<compile_context>
chip_gen: v6e
topology: v6e:2x2x1
jax: 0.10.0
libtpu: 0.0.40
codegen_flags: <defaults>
</compile_context>

<pallas_src>
import functools

import jax
import jax.numpy as jnp
from jax.experimental import pallas as pl
from jax.experimental.pallas import tpu as pltpu

RES_SCALE = 0.1     # res_scale passed to ResBlock / ResAttentionBlock
REDUCTION = 16      # CALayer squeeze reduction


def ssb_kernel(H, W, use_im2col,
               x_ref,                 # (1, H*W, C)  f32 input (NHWC-flat)
               w1_ref, b1_ref,        # (9C, C) bf16, (1, C) f32   spa conv1 (3x3)
               w2_ref, b2_ref,        # (9C, C) bf16, (1, C) f32   spa conv2 (3x3)
               w3_ref, b3_ref,        # (C, C)  bf16, (1, C) f32   spc conv1 (1x1)
               w4_ref, b4_ref,        # (C, C)  bf16, (1, C) f32   spc conv2 (1x1)
               wd_ref, bd_ref,        # (C, Cr) f32,  (1, Cr) f32  CA squeeze
               wu_ref, bu_ref,        # (Cr, C) f32,  (1, C) f32   CA excite
               o_ref,                 # (1, H*W, C)  f32
               pad_sc,                # VMEM (H+2, W+2, C) f32  zero-padded acts
               *im2col_sc):           # optional VMEM (H, W, 9C) bf16 patch scratch
    C = o_ref.shape[-1]
    HW = H * W
    x = x_ref[0]                                         # (H*W, C) f32

    # Re-zero only the 1-pixel halo; the interior is fully overwritten below.
    zrow = jnp.zeros((1, W + 2, C), jnp.float32)
    pad_sc[0:1, :, :] = zrow
    pad_sc[H + 1:H + 2, :, :] = zrow
    zcol = jnp.zeros((H + 2, 1, C), jnp.float32)
    pad_sc[:, 0:1, :] = zcol
    pad_sc[:, W + 1:W + 2, :] = zcol

    if use_im2col:
        patch_sc, = im2col_sc

        def conv3x3(w_ref, b_ref):
            # Small C: K=C under-fills MXU depth, so pack 9 taps into a bf16
            # (H, W, 9C) scratch (Ref-sliced reads, cast at write time, no
            # per-tap reshape) and do one K=9C matmul with f32 accumulation.
            for ky in range(3):
                for kx in range(3):
                    t = ky * 3 + kx
                    patch_sc[:, :, t * C:(t + 1) * C] = (
                        pad_sc[ky:ky + H, kx:kx + W, :].astype(jnp.bfloat16))
            patches = patch_sc[...].reshape(HW, 9 * C)   # layout-preserving merge
            return (jnp.dot(patches, w_ref[...],
                            preferred_element_type=jnp.float32) + b_ref[...])
    else:
        def conv3x3(w_ref, b_ref):
            # Production C (>=128): K=C already fills the MXU contraction
            # depth, so skip im2col entirely -- 9 accumulating matmuls reading
            # shifted slices of the padded scratch (no patch matrix, no extra
            # store-bound packing pass).
            acc = None
            for ky in range(3):
                for kx in range(3):
                    t = ky * 3 + kx
                    lhs = pad_sc[ky:ky + H, kx:kx + W, :].astype(
                        jnp.bfloat16).reshape(HW, C)
                    p = jnp.dot(lhs, w_ref[t * C:(t + 1) * C, :],
                                preferred_element_type=jnp.float32)
                    acc = p if acc is None else acc + p
            return acc + b_ref[...]

    # ---------------- spa: ResBlock (3x3 -> relu -> 3x3, residual) ----------
    pad_sc[1:H + 1, 1:W + 1, :] = x.reshape(H, W, C)
    r1 = jnp.maximum(conv3x3(w1_ref, b1_ref), 0.0)       # ReLU
    pad_sc[1:H + 1, 1:W + 1, :] = r1.reshape(H, W, C)
    spa = conv3x3(w2_ref, b2_ref) * RES_SCALE + x        # (H*W, C) f32

    # -------- spc: ResAttentionBlock (1x1 -> relu -> 1x1 -> CALayer) --------
    t1 = jnp.maximum(
        jnp.dot(spa.astype(jnp.bfloat16), w3_ref[...],
                preferred_element_type=jnp.float32) + b3_ref[...], 0.0)
    t2 = (jnp.dot(t1.astype(jnp.bfloat16), w4_ref[...],
                  preferred_element_type=jnp.float32) + b4_ref[...])

    # CALayer: global average pool over spatial, squeeze/excite (M=1, f32),
    # sigmoid gate (EUP).
    pooled = jnp.mean(t2, axis=0, keepdims=True)         # (1, C)
    d = jnp.maximum(
        jnp.dot(pooled, wd_ref[...], preferred_element_type=jnp.float32)
        + bd_ref[...], 0.0)                              # (1, Cr)
    gate = jax.nn.sigmoid(
        jnp.dot(d, wu_ref[...], preferred_element_type=jnp.float32)
        + bu_ref[...])                                   # (1, C)

    o_ref[0] = (t2 * gate * RES_SCALE + spa).astype(o_ref.dtype)


def _full_spec(shape):
    # Grid-constant operand: same block every step, so Pallas never re-fetches
    # it.  (On v7x one could additionally single-buffer these small blocks via
    # pipeline_mode=pl.Buffered(1) to reclaim a few MiB of VMEM.)
    return pl.BlockSpec(shape, lambda b: (0,) * len(shape))


def _vmem_limit_bytes(H, W, C, Cr, use_im2col):
    """Explicit scoped-VMEM budget: floored at 32 MiB, capped at 64 MiB so the
    same value is valid on v5e/v6e (128 MiB physical) and v7x (64 MiB)."""
    f32, bf16 = 4, 2
    hw = H * W
    io = 2 * 2 * hw * C * f32                        # x + out blocks, 2x buffered
    pad = (H + 2) * (W + 2) * C * f32                # padded-activation scratch
    patch = hw * 9 * C * bf16 if use_im2col else 0   # bf16 im2col scratch
    wts = 2 * (2 * 9 * C * C * bf16 + 2 * C * C * bf16
               + 2 * C * Cr * f32 + (6 * C + 2 * Cr) * f32)
    live = 4 * hw * C * f32                          # r1/spa/t/acc value headroom
    est = io + pad + patch + wts + live
    return int(min(max(2 * est, 32 * 2 ** 20), 64 * 2 ** 20))


def prep_params(params):
    """One-time weight prep (do this once per model, not per block call):
    fold the 3x3 taps into the contraction dim and cast matmul weights to bf16
    for the MXU (biases / CALayer stay f32)."""
    w1, b1, w2, b2, w3, b3, w4, b4, wd, bd, wu, bu = params
    C = w3.shape[0]
    return (w1.reshape(9 * C, C).astype(jnp.bfloat16), b1,
            w2.reshape(9 * C, C).astype(jnp.bfloat16), b2,
            w3.astype(jnp.bfloat16), b3,
            w4.astype(jnp.bfloat16), b4,
            wd, bd, wu, bu)


def ssb_forward_flat(x_flat, prepped, H, W):
    """Core entry point: x_flat is (B, H*W, C) f32 in flat-NHWC layout.
    Stacked SSB blocks should chain this directly (no NCHW transposes)."""
    B, HW, C = x_flat.shape
    w1r, b1, w2r, b2, w3b, b3, w4b, b4, wd, bd, wu, bu = prepped
    Cr = wd.shape[-1]
    use_im2col = C < 128   # K=C fills MXU depth at C>=128 -> direct 9-tap path

    scratch = [pltpu.VMEM((H + 2, W + 2, C), jnp.float32)]
    if use_im2col:
        scratch.append(pltpu.VMEM((H, W, 9 * C), jnp.bfloat16))

    return pl.pallas_call(
        functools.partial(ssb_kernel, H, W, use_im2col),
        out_shape=jax.ShapeDtypeStruct((B, HW, C), jnp.float32),
        grid_spec=pltpu.PrefetchScalarGridSpec(
            num_scalar_prefetch=0,
            grid=(B,),
            in_specs=[
                pl.BlockSpec((1, HW, C), lambda b: (b, 0, 0)),
                _full_spec((9 * C, C)), _full_spec((1, C)),
                _full_spec((9 * C, C)), _full_spec((1, C)),
                _full_spec((C, C)), _full_spec((1, C)),
                _full_spec((C, C)), _full_spec((1, C)),
                _full_spec((C, Cr)), _full_spec((1, Cr)),
                _full_spec((Cr, C)), _full_spec((1, C)),
            ],
            out_specs=pl.BlockSpec((1, HW, C), lambda b: (b, 0, 0)),
            scratch_shapes=scratch,
        ),
        compiler_params=pltpu.CompilerParams(
            dimension_semantics=("parallel",),   # v7x: split batch over 2 TCs
            vmem_limit_bytes=_vmem_limit_bytes(H, W, C, Cr, use_im2col)),
    )(x_flat, w1r, b1, w2r, b2, w3b, b3, w4b, b4, wd, bd, wu, bu)


@jax.jit
def ssb_forward(x_nchw, params):
    """PyTorch-interface wrapper: x_nchw (B, C, H, W) f32 -> (B, C, H, W).
    The NCHW<->NHWC transposes live only here, at the model boundary."""
    B, C, H, W = x_nchw.shape
    x = jnp.transpose(x_nchw, (0, 2, 3, 1)).reshape(B, H * W, C)
    out = ssb_forward_flat(x, prep_params(params), H, W)
    return jnp.transpose(out.reshape(B, H, W, C), (0, 3, 1, 2))


def init_params(key, C):
    """Deterministic PyTorch-default-style uniform init (bound = 1/sqrt(fan_in))."""
    Cr = max(C // REDUCTION, 1)
    ks = jax.random.split(key, 12)

    def u(k, shape, fan_in):
        bound = 1.0 / (fan_in ** 0.5)
        return jax.random.uniform(k, shape, jnp.float32, -bound, bound)

    w1 = u(ks[0], (3, 3, C, C), C * 9); b1 = u(ks[1], (1, C), C * 9)
    w2 = u(ks[2], (3, 3, C, C), C * 9); b2 = u(ks[3], (1, C), C * 9)
    w3 = u(ks[4], (C, C), C);           b3 = u(ks[5], (1, C), C)
    w4 = u(ks[6], (C, C), C);           b4 = u(ks[7], (1, C), C)
    wd = u(ks[8], (C, Cr), C);          bd = u(ks[9], (1, Cr), C)
    wu = u(ks[10], (Cr, C), Cr);        bu = u(ks[11], (1, C), Cr)
    return (w1, b1, w2, b2, w3, b3, w4, b4, wd, bd, wu, bu)


def ssb_reference(x_nchw, params):
    """Pure-JAX f32 reference with identical semantics (for correctness check)."""
    w1, b1, w2, b2, w3, b3, w4, b4, wd, bd, wu, bu = params
    x = jnp.transpose(x_nchw, (0, 2, 3, 1))

    def conv3x3(inp, w, b):
        Bn, H, W, C = inp.shape
        p = jnp.pad(inp, ((0, 0), (1, 1), (1, 1), (0, 0)))
        out = jnp.zeros((Bn, H, W, w.shape[-1]), jnp.float32)
        for ky in range(3):
            for kx in range(3):
                out = out + jnp.einsum('bhwc,cd->bhwd',
                                       p[:, ky:ky + H, kx:kx + W, :], w[ky, kx])
        return out + b[0]

    r1 = jax.nn.relu(conv3x3(x, w1, b1))
    spa = conv3x3(r1, w2, b2) * RES_SCALE + x
    t = jax.nn.relu(jnp.einsum('bhwc,cd->bhwd', spa, w3) + b3[0])
    t = jnp.einsum('bhwc,cd->bhwd', t, w4) + b4[0]
    pooled = jnp.mean(t, axis=(1, 2), keepdims=True)
    d = jax.nn.relu(jnp.einsum('bhwc,cd->bhwd', pooled, wd) + bd[0])
    gate = jax.nn.sigmoid(jnp.einsum('bhwc,cd->bhwd', d, wu) + bu[0])
    out = (t * gate) * RES_SCALE + spa
    return jnp.transpose(out, (0, 3, 1, 2))


if __name__ == "__main__":
    key = jax.random.PRNGKey(0)

    # Small config exercises the im2col (K=9C) path; the C=128 config exercises
    # the production direct 9-tap (K=C) path and lane-dense stores.
    for (B, C, H, W) in [(2, 32, 16, 16), (2, 128, 16, 16)]:
        key, kx, kp = jax.random.split(key, 3)
        x = jax.random.normal(kx, (B, C, H, W), jnp.float32)
        params = init_params(kp, C)

        out = jax.block_until_ready(ssb_forward(x, params))
        ref = ssb_reference(x, params)

        assert out.shape == (B, C, H, W)
        assert jnp.allclose(out, ref, rtol=2e-2, atol=2e-2), (
            f"mismatch at C={C}: max abs err {jnp.max(jnp.abs(out - ref))}")

    print("KERNEL_OK")
</pallas_src>

<mosaic_0001>
module attributes {stable_mosaic.version = 11 : i64} {
  func.func @ssb_kernel(%arg0: i32, %arg1: memref<1x256x32xf32, #tpu.memory_space<vmem>>, %arg2: memref<288x32xbf16, #tpu.memory_space<vmem>>, %arg3: memref<1x32xf32, #tpu.memory_space<vmem>>, %arg4: memref<288x32xbf16, #tpu.memory_space<vmem>>, %arg5: memref<1x32xf32, #tpu.memory_space<vmem>>, %arg6: memref<32x32xbf16, #tpu.memory_space<vmem>>, %arg7: memref<1x32xf32, #tpu.memory_space<vmem>>, %arg8: memref<32x32xbf16, #tpu.memory_space<vmem>>, %arg9: memref<1x32xf32, #tpu.memory_space<vmem>>, %arg10: memref<32x2xf32, #tpu.memory_space<vmem>>, %arg11: memref<1x2xf32, #tpu.memory_space<vmem>>, %arg12: memref<2x32xf32, #tpu.memory_space<vmem>>, %arg13: memref<1x32xf32, #tpu.memory_space<vmem>>, %arg14: memref<1x256x32xf32, #tpu.memory_space<vmem>>, %arg15: memref<18x18x32xf32, #tpu.memory_space<vmem>>, %arg16: memref<16x16x288xbf16, #tpu.memory_space<vmem>>) attributes {dimension_semantics = [#tpu.dimension_semantics<parallel>], iteration_bounds = array<i64: 2>, scalar_prefetch = 0 : i64, scratch_operands = 2 : i64, tpu.core_type = #tpu.core_type<tc>, window_params = [{transform_indices = @transform_0, window_bounds = array<i64: 1, 256, 32>}, {pipeline_mode = #tpu.pipeline_mode<synchronous>, transform_indices = @transform_1, window_bounds = array<i64: 288, 32>}, {pipeline_mode = #tpu.pipeline_mode<synchronous>, transform_indices = @transform_2, window_bounds = array<i64: 1, 32>}, {pipeline_mode = #tpu.pipeline_mode<synchronous>, transform_indices = @transform_3, window_bounds = array<i64: 288, 32>}, {pipeline_mode = #tpu.pipeline_mode<synchronous>, transform_indices = @transform_4, window_bounds = array<i64: 1, 32>}, {pipeline_mode = #tpu.pipeline_mode<synchronous>, transform_indices = @transform_5, window_bounds = array<i64: 32, 32>}, {pipeline_mode = #tpu.pipeline_mode<synchronous>, transform_indices = @transform_6, window_bounds = array<i64: 1, 32>}, {pipeline_mode = #tpu.pipeline_mode<synchronous>, transform_indices = @transform_7, window_bounds = array<i64: 32, 32>}, {pipeline_mode = #tpu.pipeline_mode<synchronous>, transform_indices = @transform_8, window_bounds = array<i64: 1, 32>}, {pipeline_mode = #tpu.pipeline_mode<synchronous>, transform_indices = @transform_9, window_bounds = array<i64: 32, 2>}, {pipeline_mode = #tpu.pipeline_mode<synchronous>, transform_indices = @transform_10, window_bounds = array<i64: 1, 2>}, {pipeline_mode = #tpu.pipeline_mode<synchronous>, transform_indices = @transform_11, window_bounds = array<i64: 2, 32>}, {pipeline_mode = #tpu.pipeline_mode<synchronous>, transform_indices = @transform_12, window_bounds = array<i64: 1, 32>}, {transform_indices = @transform_13, window_bounds = array<i64: 1, 256, 32>}]} {
    %c0 = arith.constant 0 : index
    %c0_0 = arith.constant 0 : index
    %c0_1 = arith.constant 0 : index
    %0 = vector.load %arg1[%c0, %c0_0, %c0_1] : memref<1x256x32xf32, #tpu.memory_space<vmem>>, vector<1x256x32xf32>
    %1 = vector.shape_cast %0 : vector<1x256x32xf32> to vector<256x32xf32>
    %cst = arith.constant 0.000000e+00 : f32
    %2 = vector.broadcast %cst : f32 to vector<1x18x32xf32>
    %c0_2 = arith.constant 0 : index
    %c0_3 = arith.constant 0 : index
    %c0_4 = arith.constant 0 : index
    %3 = vector.load %arg15[%c0_2, %c0_3, %c0_4] : memref<18x18x32xf32, #tpu.memory_space<vmem>>, vector<1x18x32xf32>
    tpu.vector_store %arg15[%c0_2, %c0_3, %c0_4], %2 {strides = array<i32>} : memref<18x18x32xf32, #tpu.memory_space<vmem>>, vector<1x18x32xf32>,
    %c17 = arith.constant 17 : index
    %c0_5 = arith.constant 0 : index
    %c0_6 = arith.constant 0 : index
    %4 = vector.load %arg15[%c17, %c0_5, %c0_6] : memref<18x18x32xf32, #tpu.memory_space<vmem>>, vector<1x18x32xf32>
    tpu.vector_store %arg15[%c17, %c0_5, %c0_6], %2 {strides = array<i32>} : memref<18x18x32xf32, #tpu.memory_space<vmem>>, vector<1x18x32xf32>,
    %cst_7 = arith.constant 0.000000e+00 : f32
    %5 = vector.broadcast %cst_7 : f32 to vector<18x1x32xf32>
    %c0_8 = arith.constant 0 : index
    %c0_9 = arith.constant 0 : index
    %c0_10 = arith.constant 0 : index
    %6 = vector.load %arg15[%c0_8, %c0_9, %c0_10] : memref<18x18x32xf32, #tpu.memory_space<vmem>>, vector<18x1x32xf32>
    tpu.vector_store %arg15[%c0_8, %c0_9, %c0_10], %5 {strides = array<i32>} : memref<18x18x32xf32, #tpu.memory_space<vmem>>, vector<18x1x32xf32>,
    %c0_11 = arith.constant 0 : index
    %c17_12 = arith.constant 17 : index
    %c0_13 = arith.constant 0 : index
    %7 = vector.load %arg15[%c0_11, %c17_12, %c0_13] : memref<18x18x32xf32, #tpu.memory_space<vmem>>, vector<18x1x32xf32>
    tpu.vector_store %arg15[%c0_11, %c17_12, %c0_13], %5 {strides = array<i32>} : memref<18x18x32xf32, #tpu.memory_space<vmem>>, vector<18x1x32xf32>,
    %8 = vector.shape_cast %1 : vector<256x32xf32> to vector<16x16x32xf32>
    %c1 = arith.constant 1 : index
    %c1_14 = arith.constant 1 : index
    %c0_15 = arith.constant 0 : index
    %9 = vector.load %arg15[%c1, %c1_14, %c0_15] : memref<18x18x32xf32, #tpu.memory_space<vmem>>, vector<16x16x32xf32>
    tpu.vector_store %arg15[%c1, %c1_14, %c0_15], %8 {strides = array<i32>} : memref<18x18x32xf32, #tpu.memory_space<vmem>>, vector<16x16x32xf32>,
    %c0_16 = arith.constant 0 : index
    %c0_17 = arith.constant 0 : index
    %c0_18 = arith.constant 0 : index
    %10 = vector.load %arg15[%c0_16, %c0_17, %c0_18] : memref<18x18x32xf32, #tpu.memory_space<vmem>>, vector<16x16x32xf32>
    %11 = arith.truncf %10 : vector<16x16x32xf32> to vector<16x16x32xbf16>
    %c0_19 = arith.constant 0 : index
    %c0_20 = arith.constant 0 : index
    %c0_21 = arith.constant 0 : index
    %12 = vector.load %arg16[%c0_19, %c0_20, %c0_21] : memref<16x16x288xbf16, #tpu.memory_space<vmem>>, vector<16x16x32xbf16>
    tpu.vector_store %arg16[%c0_19, %c0_20, %c0_21], %11 {strides = array<i32>} : memref<16x16x288xbf16, #tpu.memory_space<vmem>>, vector<16x16x32xbf16>,
    %c0_22 = arith.constant 0 : index
    %c1_23 = arith.constant 1 : index
    %c0_24 = arith.constant 0 : index
    %13 = vector.load %arg15[%c0_22, %c1_23, %c0_24] : memref<18x18x32xf32, #tpu.memory_space<vmem>>, vector<16x16x32xf32>
    %14 = arith.truncf %13 : vector<16x16x32xf32> to vector<16x16x32xbf16>
    %c0_25 = arith.constant 0 : index
    %c0_26 = arith.constant 0 : index
    %c32 = arith.constant 32 : index
    %15 = vector.load %arg16[%c0_25, %c0_26, %c32] : memref<16x16x288xbf16, #tpu.memory_space<vmem>>, vector<16x16x32xbf16>
    tpu.vector_store %arg16[%c0_25, %c0_26, %c32], %14 {strides = array<i32>} : memref<16x16x288xbf16, #tpu.memory_space<vmem>>, vector<16x16x32xbf16>,
    %c0_27 = arith.constant 0 : index
    %c2 = arith.constant 2 : index
    %c0_28 = arith.constant 0 : index
    %16 = vector.load %arg15[%c0_27, %c2, %c0_28] : memref<18x18x32xf32, #tpu.memory_space<vmem>>, vector<16x16x32xf32>
    %17 = arith.truncf %16 : vector<16x16x32xf32> to vector<16x16x32xbf16>
    %c0_29 = arith.constant 0 : index
    %c0_30 = arith.constant 0 : index
    %c64 = arith.constant 64 : index
    %18 = vector.load %arg16[%c0_29, %c0_30, %c64] : memref<16x16x288xbf16, #tpu.memory_space<vmem>>, vector<16x16x32xbf16>
    tpu.vector_store %arg16[%c0_29, %c0_30, %c64], %17 {strides = array<i32>} : memref<16x16x288xbf16, #tpu.memory_space<vmem>>, vector<16x16x32xbf16>,
    %c1_31 = arith.constant 1 : index
    %c0_32 = arith.constant 0 : index
    %c0_33 = arith.constant 0 : index
    %19 = vector.load %arg15[%c1_31, %c0_32, %c0_33] : memref<18x18x32xf32, #tpu.memory_space<vmem>>, vector<16x16x32xf32>
    %20 = arith.truncf %19 : vector<16x16x32xf32> to vector<16x16x32xbf16>
    %c0_34 = arith.constant 0 : index
    %c0_35 = arith.constant 0 : index
    %c96 = arith.constant 96 : index
    %21 = vector.load %arg16[%c0_34, %c0_35, %c96] : memref<16x16x288xbf16, #tpu.memory_space<vmem>>, vector<16x16x32xbf16>
    tpu.vector_store %arg16[%c0_34, %c0_35, %c96], %20 {strides = array<i32>} : memref<16x16x288xbf16, #tpu.memory_space<vmem>>, vector<16x16x32xbf16>,
    %c1_36 = arith.constant 1 : index
    %c1_37 = arith.constant 1 : index
    %c0_38 = arith.constant 0 : index
    %22 = vector.load %arg15[%c1_36, %c1_37, %c0_38] : memref<18x18x32xf32, #tpu.memory_space<vmem>>, vector<16x16x32xf32>
    %23 = arith.truncf %22 : vector<16x16x32xf32> to vector<16x16x32xbf16>
    %c0_39 = arith.constant 0 : index
    %c0_40 = arith.constant 0 : index
    %c128 = arith.constant 128 : index
    %24 = vector.load %arg16[%c0_39, %c0_40, %c128] : memref<16x16x288xbf16, #tpu.memory_space<vmem>>, vector<16x16x32xbf16>
    tpu.vector_store %arg16[%c0_39, %c0_40, %c128], %23 {strides = array<i32>} : memref<16x16x288xbf16, #tpu.memory_space<vmem>>, vector<16x16x32xbf16>,
    %c1_41 = arith.constant 1 : index
    %c2_42 = arith.constant 2 : index
    %c0_43 = arith.constant 0 : index
    %25 = vector.load %arg15[%c1_41, %c2_42, %c0_43] : memref<18x18x32xf32, #tpu.memory_space<vmem>>, vector<16x16x32xf32>
    %26 = arith.truncf %25 : vector<16x16x32xf32> to vector<16x16x32xbf16>
    %c0_44 = arith.constant 0 : index
    %c0_45 = arith.constant 0 : index
    %c160 = arith.constant 160 : index
    %27 = vector.load %arg16[%c0_44, %c0_45, %c160] : memref<16x16x288xbf16, #tpu.memory_space<vmem>>, vector<16x16x32xbf16>
    tpu.vector_store %arg16[%c0_44, %c0_45, %c160], %26 {strides = array<i32>} : memref<16x16x288xbf16, #tpu.memory_space<vmem>>, vector<16x16x32xbf16>,
    %c2_46 = arith.constant 2 : index
    %c0_47 = arith.constant 0 : index
    %c0_48 = arith.constant 0 : index
    %28 = vector.load %arg15[%c2_46, %c0_47, %c0_48] : memref<18x18x32xf32, #tpu.memory_space<vmem>>, vector<16x16x32xf32>
    %29 = arith.truncf %28 : vector<16x16x32xf32> to vector<16x16x32xbf16>
    %c0_49 = arith.constant 0 : index
    %c0_50 = arith.constant 0 : index
    %c192 = arith.constant 192 : index
    %30 = vector.load %arg16[%c0_49, %c0_50, %c192] : memref<16x16x288xbf16, #tpu.memory_space<vmem>>, vector<16x16x32xbf16>
    tpu.vector_store %arg16[%c0_49, %c0_50, %c192], %29 {strides = array<i32>} : memref<16x16x288xbf16, #tpu.memory_space<vmem>>, vector<16x16x32xbf16>,
    %c2_51 = arith.constant 2 : index
    %c1_52 = arith.constant 1 : index
    %c0_53 = arith.constant 0 : index
    %31 = vector.load %arg15[%c2_51, %c1_52, %c0_53] : memref<18x18x32xf32, #tpu.memory_space<vmem>>, vector<16x16x32xf32>
    %32 = arith.truncf %31 : vector<16x16x32xf32> to vector<16x16x32xbf16>
    %c0_54 = arith.constant 0 : index
    %c0_55 = arith.constant 0 : index
    %c224 = arith.constant 224 : index
    %33 = vector.load %arg16[%c0_54, %c0_55, %c224] : memref<16x16x288xbf16, #tpu.memory_space<vmem>>, vector<16x16x32xbf16>
    tpu.vector_store %arg16[%c0_54, %c0_55, %c224], %32 {strides = array<i32>} : memref<16x16x288xbf16, #tpu.memory_space<vmem>>, vector<16x16x32xbf16>,
    %c2_56 = arith.constant 2 : index
    %c2_57 = arith.constant 2 : index
    %c0_58 = arith.constant 0 : index
    %34 = vector.load %arg15[%c2_56, %c2_57, %c0_58] : memref<18x18x32xf32, #tpu.memory_space<vmem>>, vector<16x16x32xf32>
    %35 = arith.truncf %34 : vector<16x16x32xf32> to vector<16x16x32xbf16>
    %c0_59 = arith.constant 0 : index
    %c0_60 = arith.constant 0 : index
    %c256 = arith.constant 256 : index
    %36 = vector.load %arg16[%c0_59, %c0_60, %c256] : memref<16x16x288xbf16, #tpu.memory_space<vmem>>, vector<16x16x32xbf16>
    tpu.vector_store %arg16[%c0_59, %c0_60, %c256], %35 {strides = array<i32>} : memref<16x16x288xbf16, #tpu.memory_space<vmem>>, vector<16x16x32xbf16>,
    %c0_61 = arith.constant 0 : index
    %c0_62 = arith.constant 0 : index
    %c0_63 = arith.constant 0 : index
    %37 = vector.load %arg16[%c0_61, %c0_62, %c0_63] : memref<16x16x288xbf16, #tpu.memory_space<vmem>>, vector<16x16x288xbf16>
    %38 = vector.shape_cast %37 : vector<16x16x288xbf16> to vector<256x288xbf16>
    %c0_64 = arith.constant 0 : index
    %c0_65 = arith.constant 0 : index
    %39 = vector.load %arg2[%c0_64, %c0_65] : memref<288x32xbf16, #tpu.memory_space<vmem>>, vector<288x32xbf16>
    %cst_66 = arith.constant dense<0.000000e+00> : vector<256x32xf32>
    %40 = tpu.matmul %38, %39, %cst_66 {dimension_numbers = #tpu.dot_dimension_numbers<[1], [0], [0], [1], [0, 0, 1, 1], [], []>} : vector<256x288xbf16>, vector<288x32xbf16>, vector<256x32xf32> -> vector<256x32xf32>
    %c0_67 = arith.constant 0 : index
    %c0_68 = arith.constant 0 : index
    %41 = vector.load %arg3[%c0_67, %c0_68] : memref<1x32xf32, #tpu.memory_space<vmem>>, vector<1x32xf32>
    %42 = vector.broadcast %41 : vector<1x32xf32> to vector<256x32xf32>
    %43 = arith.addf %40, %42 : vector<256x32xf32>
    %cst_69 = arith.constant 0.000000e+00 : f32
    %44 = vector.broadcast %cst_69 : f32 to vector<256x32xf32>
    %45 = arith.maximumf %43, %44 : vector<256x32xf32>
    %46 = vector.shape_cast %45 : vector<256x32xf32> to vector<16x16x32xf32>
    %c1_70 = arith.constant 1 : index
    %c1_71 = arith.constant 1 : index
    %c0_72 = arith.constant 0 : index
    %47 = vector.load %arg15[%c1_70, %c1_71, %c0_72] : memref<18x18x32xf32, #tpu.memory_space<vmem>>, vector<16x16x32xf32>
    tpu.vector_store %arg15[%c1_70, %c1_71, %c0_72], %46 {strides = array<i32>} : memref<18x18x32xf32, #tpu.memory_space<vmem>>, vector<16x16x32xf32>,
    %c0_73 = arith.constant 0 : index
    %c0_74 = arith.constant 0 : index
    %c0_75 = arith.constant 0 : index
    %48 = vector.load %arg15[%c0_73, %c0_74, %c0_75] : memref<18x18x32xf32, #tpu.memory_space<vmem>>, vector<16x16x32xf32>
    %49 = arith.truncf %48 : vector<16x16x32xf32> to vector<16x16x32xbf16>
    %c0_76 = arith.constant 0 : index
    %c0_77 = arith.constant 0 : index
    %c0_78 = arith.constant 0 : index
    %50 = vector.load %arg16[%c0_76, %c0_77, %c0_78] : memref<16x16x288xbf16, #tpu.memory_space<vmem>>, vector<16x16x32xbf16>
    tpu.vector_store %arg16[%c0_76, %c0_77, %c0_78], %49 {strides = array<i32>} : memref<16x16x288xbf16, #tpu.memory_space<vmem>>, vector<16x16x32xbf16>,
    %c0_79 = arith.constant 0 : index
    %c1_80 = arith.constant 1 : index
    %c0_81 = arith.constant 0 : index
    %51 = vector.load %arg15[%c0_79, %c1_80, %c0_81] : memref<18x18x32xf32, #tpu.memory_space<vmem>>, vector<16x16x32xf32>
    %52 = arith.truncf %51 : vector<16x16x32xf32> to vector<16x16x32xbf16>
    %c0_82 = arith.constant 0 : index
    %c0_83 = arith.constant 0 : index
    %c32_84 = arith.constant 32 : index
    %53 = vector.load %arg16[%c0_82, %c0_83, %c32_84] : memref<16x16x288xbf16, #tpu.memory_space<vmem>>, vector<16x16x32xbf16>
    tpu.vector_store %arg16[%c0_82, %c0_83, %c32_84], %52 {strides = array<i32>} : memref<16x16x288xbf16, #tpu.memory_space<vmem>>, vector<16x16x32xbf16>,
    %c0_85 = arith.constant 0 : index
    %c2_86 = arith.constant 2 : index
    %c0_87 = arith.constant 0 : index
    %54 = vector.load %arg15[%c0_85, %c2_86, %c0_87] : memref<18x18x32xf32, #tpu.memory_space<vmem>>, vector<16x16x32xf32>
    %55 = arith.truncf %54 : vector<16x16x32xf32> to vector<16x16x32xbf16>
    %c0_88 = arith.constant 0 : index
    %c0_89 = arith.constant 0 : index
    %c64_90 = arith.constant 64 : index
    %56 = vector.load %arg16[%c0_88, %c0_89, %c64_90] : memref<16x16x288xbf16, #tpu.memory_space<vmem>>, vector<16x16x32xbf16>
    tpu.vector_store %arg16[%c0_88, %c0_89, %c64_90], %55 {strides = array<i32>} : memref<16x16x288xbf16, #tpu.memory_space<vmem>>, vector<16x16x32xbf16>,
    %c1_91 = arith.constant 1 : index
    %c0_92 = arith.constant 0 : index
    %c0_93 = arith.constant 0 : index
    %57 = vector.load %arg15[%c1_91, %c0_92, %c0_93] : memref<18x18x32xf32, #tpu.memory_space<vmem>>, vector<16x16x32xf32>
    %58 = arith.truncf %57 : vector<16x16x32xf32> to vector<16x16x32xbf16>
    %c0_94 = arith.constant 0 : index
    %c0_95 = arith.constant 0 : index
    %c96_96 = arith.constant 96 : index
    %59 = vector.load %arg16[%c0_94, %c0_95, %c96_96] : memref<16x16x288xbf16, #tpu.memory_space<vmem>>, vector<16x16x32xbf16>
    tpu.vector_store %arg16[%c0_94, %c0_95, %c96_96], %58 {strides = array<i32>} : memref<16x16x288xbf16, #tpu.memory_space<vmem>>, vector<16x16x32xbf16>,
    %c1_97 = arith.constant 1 : index
    %c1_98 = arith.constant 1 : index
    %c0_99 = arith.constant 0 : index
    %60 = vector.load %arg15[%c1_97, %c1_98, %c0_99] : memref<18x18x32xf32, #tpu.memory_space<vmem>>, vector<16x16x32xf32>
    %61 = arith.truncf %60 : vector<16x16x32xf32> to vector<16x16x32xbf16>
    %c0_100 = arith.constant 0 : index
    %c0_101 = arith.constant 0 : index
    %c128_102 = arith.constant 128 : index
    %62 = vector.load %arg16[%c0_100, %c0_101, %c128_102] : memref<16x16x288xbf16, #tpu.memory_space<vmem>>, vector<16x16x32xbf16>
    tpu.vector_store %arg16[%c0_100, %c0_101, %c128_102], %61 {strides = array<i32>} : memref<16x16x288xbf16, #tpu.memory_space<vmem>>, vector<16x16x32xbf16>,
    %c1_103 = arith.constant 1 : index
    %c2_104 = arith.constant 2 : index
    %c0_105 = arith.constant 0 : index
    %63 = vector.load %arg15[%c1_103, %c2_104, %c0_105] : memref<18x18x32xf32, #tpu.memory_space<vmem>>, vector<16x16x32xf32>
    %64 = arith.truncf %63 : vector<16x16x32xf32> to vector<16x16x32xbf16>
    %c0_106 = arith.constant 0 : index
    %c0_107 = arith.constant 0 : index
    %c160_108 = arith.constant 160 : index
    %65 = vector.load %arg16[%c0_106, %c0_107, %c160_108] : memref<16x16x288xbf16, #tpu.memory_space<vmem>>, vector<16x16x32xbf16>
    tpu.vector_store %arg16[%c0_106, %c0_107, %c160_108], %64 {strides = array<i32>} : memref<16x16x288xbf16, #tpu.memory_space<vmem>>, vector<16x16x32xbf16>,
    %c2_109 = arith.constant 2 : index
    %c0_110 = arith.constant 0 : index
    %c0_111 = arith.constant 0 : index
    %66 = vector.load %arg15[%c2_109, %c0_110, %c0_111] : memref<18x18x32xf32, #tpu.memory_space<vmem>>, vector<16x16x32xf32>
    %67 = arith.truncf %66 : vector<16x16x32xf32> to vector<16x16x32xbf16>
    %c0_112 = arith.constant 0 : index
    %c0_113 = arith.constant 0 : index
    %c192_114 = arith.constant 192 : index
    %68 = vector.load %arg16[%c0_112, %c0_113, %c192_114] : memref<16x16x288xbf16, #tpu.memory_space<vmem>>, vector<16x16x32xbf16>
    tpu.vector_store %arg16[%c0_112, %c0_113, %c192_114], %67 {strides = array<i32>} : memref<16x16x288xbf16, #tpu.memory_space<vmem>>, vector<16x16x32xbf16>,
    %c2_115 = arith.constant 2 : index
    %c1_116 = arith.constant 1 : index
    %c0_117 = arith.constant 0 : index
    %69 = vector.load %arg15[%c2_115, %c1_116, %c0_117] : memref<18x18x32xf32, #tpu.memory_space<vmem>>, vector<16x16x32xf32>
    %70 = arith.truncf %69 : vector<16x16x32xf32> to vector<16x16x32xbf16>
    %c0_118 = arith.constant 0 : index
    %c0_119 = arith.constant 0 : index
    %c224_120 = arith.constant 224 : index
    %71 = vector.load %arg16[%c0_118, %c0_119, %c224_120] : memref<16x16x288xbf16, #tpu.memory_space<vmem>>, vector<16x16x32xbf16>
    tpu.vector_store %arg16[%c0_118, %c0_119, %c224_120], %70 {strides = array<i32>} : memref<16x16x288xbf16, #tpu.memory_space<vmem>>, vector<16x16x32xbf16>,
    %c2_121 = arith.constant 2 : index
    %c2_122 = arith.constant 2 : index
    %c0_123 = arith.constant 0 : index
    %72 = vector.load %arg15[%c2_121, %c2_122, %c0_123] : memref<18x18x32xf32, #tpu.memory_space<vmem>>, vector<16x16x32xf32>
    %73 = arith.truncf %72 : vector<16x16x32xf32> to vector<16x16x32xbf16>
    %c0_124 = arith.constant 0 : index
    %c0_125 = arith.constant 0 : index
    %c256_126 = arith.constant 256 : index
    %74 = vector.load %arg16[%c0_124, %c0_125, %c256_126] : memref<16x16x288xbf16, #tpu.memory_space<vmem>>, vector<16x16x32xbf16>
    tpu.vector_store %arg16[%c0_124, %c0_125, %c256_126], %73 {strides = array<i32>} : memref<16x16x288xbf16, #tpu.memory_space<vmem>>, vector<16x16x32xbf16>,
    %c0_127 = arith.constant 0 : index
    %c0_128 = arith.constant 0 : index
    %c0_129 = arith.constant 0 : index
    %75 = vector.load %arg16[%c0_127, %c0_128, %c0_129] : memref<16x16x288xbf16, #tpu.memory_space<vmem>>, vector<16x16x288xbf16>
    %76 = vector.shape_cast %75 : vector<16x16x288xbf16> to vector<256x288xbf16>
    %c0_130 = arith.constant 0 : index
    %c0_131 = arith.constant 0 : index
    %77 = vector.load %arg4[%c0_130, %c0_131] : memref<288x32xbf16, #tpu.memory_space<vmem>>, vector<288x32xbf16>
    %cst_132 = arith.constant dense<0.000000e+00> : vector<256x32xf32>
    %78 = tpu.matmul %76, %77, %cst_132 {dimension_numbers = #tpu.dot_dimension_numbers<[1], [0], [0], [1], [0, 0, 1, 1], [], []>} : vector<256x288xbf16>, vector<288x32xbf16>, vector<256x32xf32> -> vector<256x32xf32>
    %c0_133 = arith.constant 0 : index
    %c0_134 = arith.constant 0 : index
    %79 = vector.load %arg5[%c0_133, %c0_134] : memref<1x32xf32, #tpu.memory_space<vmem>>, vector<1x32xf32>
    %80 = vector.broadcast %79 : vector<1x32xf32> to vector<256x32xf32>
    %81 = arith.addf %78, %80 : vector<256x32xf32>
    %cst_135 = arith.constant 1.000000e-01 : f32
    %82 = vector.broadcast %cst_135 : f32 to vector<256x32xf32>
    %83 = arith.mulf %81, %82 : vector<256x32xf32>
    %84 = arith.addf %83, %1 : vector<256x32xf32>
    %85 = arith.truncf %84 : vector<256x32xf32> to vector<256x32xbf16>
    %c0_136 = arith.constant 0 : index
    %c0_137 = arith.constant 0 : index
    %86 = vector.load %arg6[%c0_136, %c0_137] : memref<32x32xbf16, #tpu.memory_space<vmem>>, vector<32x32xbf16>
    %cst_138 = arith.constant dense<0.000000e+00> : vector<256x32xf32>
    %87 = tpu.matmul %85, %86, %cst_138 {dimension_numbers = #tpu.dot_dimension_numbers<[1], [0], [0], [1], [0, 0, 1, 1], [], []>} : vector<256x32xbf16>, vector<32x32xbf16>, vector<256x32xf32> -> vector<256x32xf32>
    %c0_139 = arith.constant 0 : index
    %c0_140 = arith.constant 0 : index
    %88 = vector.load %arg7[%c0_139, %c0_140] : memref<1x32xf32, #tpu.memory_space<vmem>>, vector<1x32xf32>
    %89 = vector.broadcast %88 : vector<1x32xf32> to vector<256x32xf32>
    %90 = arith.addf %87, %89 : vector<256x32xf32>
    %cst_141 = arith.constant 0.000000e+00 : f32
    %91 = vector.broadcast %cst_141 : f32 to vector<256x32xf32>
    %92 = arith.maximumf %90, %91 : vector<256x32xf32>
    %93 = arith.truncf %92 : vector<256x32xf32> to vector<256x32xbf16>
    %c0_142 = arith.constant 0 : index
    %c0_143 = arith.constant 0 : index
    %94 = vector.load %arg8[%c0_142, %c0_143] : memref<32x32xbf16, #tpu.memory_space<vmem>>, vector<32x32xbf16>
    %cst_144 = arith.constant dense<0.000000e+00> : vector<256x32xf32>
    %95 = tpu.matmul %93, %94, %cst_144 {dimension_numbers = #tpu.dot_dimension_numbers<[1], [0], [0], [1], [0, 0, 1, 1], [], []>} : vector<256x32xbf16>, vector<32x32xbf16>, vector<256x32xf32> -> vector<256x32xf32>
    %c0_145 = arith.constant 0 : index
    %c0_146 = arith.constant 0 : index
    %96 = vector.load %arg9[%c0_145, %c0_146] : memref<1x32xf32, #tpu.memory_space<vmem>>, vector<1x32xf32>
    %97 = vector.broadcast %96 : vector<1x32xf32> to vector<256x32xf32>
    %98 = arith.addf %95, %97 : vector<256x32xf32>
    %cst_147 = arith.constant dense<0.000000e+00> : vector<32xf32>
    %99 = vector.multi_reduction <add>, %98, %cst_147 [0] : vector<256x32xf32> to vector<32xf32>
    %100 = vector.shape_cast %99 : vector<32xf32> to vector<1x32xf32>
    %cst_148 = arith.constant 2.560000e+02 : f32
    %101 = vector.broadcast %cst_148 : f32 to vector<1x32xf32>
    %102 = arith.divf %100, %101 : vector<1x32xf32>
    %c0_149 = arith.constant 0 : index
    %c0_150 = arith.constant 0 : index
    %103 = vector.load %arg10[%c0_149, %c0_150] : memref<32x2xf32, #tpu.memory_space<vmem>>, vector<32x2xf32>
    %cst_151 = arith.constant dense<0.000000e+00> : vector<1x2xf32>
    %104 = tpu.matmul %102, %103, %cst_151 {dimension_numbers = #tpu.dot_dimension_numbers<[1], [0], [0], [1], [0, 0, 1, 1], [], []>} : vector<1x32xf32>, vector<32x2xf32>, vector<1x2xf32> -> vector<1x2xf32>
    %c0_152 = arith.constant 0 : index
    %c0_153 = arith.constant 0 : index
    %105 = vector.load %arg11[%c0_152, %c0_153] : memref<1x2xf32, #tpu.memory_space<vmem>>, vector<1x2xf32>
    %106 = arith.addf %104, %105 : vector<1x2xf32>
    %cst_154 = arith.constant 0.000000e+00 : f32
    %107 = vector.broadcast %cst_154 : f32 to vector<1x2xf32>
    %108 = arith.maximumf %106, %107 : vector<1x2xf32>
    %c0_155 = arith.constant 0 : index
    %c0_156 = arith.constant 0 : index
    %109 = vector.load %arg12[%c0_155, %c0_156] : memref<2x32xf32, #tpu.memory_space<vmem>>, vector<2x32xf32>
    %cst_157 = arith.constant dense<0.000000e+00> : vector<1x32xf32>
    %110 = tpu.matmul %108, %109, %cst_157 {dimension_numbers = #tpu.dot_dimension_numbers<[1], [0], [0], [1], [0, 0, 1, 1], [], []>} : vector<1x2xf32>, vector<2x32xf32>, vector<1x32xf32> -> vector<1x32xf32>
    %c0_158 = arith.constant 0 : index
    %c0_159 = arith.constant 0 : index
    %111 = vector.load %arg13[%c0_158, %c0_159] : memref<1x32xf32, #tpu.memory_space<vmem>>, vector<1x32xf32>
    %112 = arith.addf %110, %111 : vector<1x32xf32>
    %113 = arith.negf %112 : vector<1x32xf32>
    %114 = math.exp %113 : vector<1x32xf32>
    %cst_160 = arith.constant 1.000000e+00 : f32
    %115 = vector.broadcast %cst_160 : f32 to vector<1x32xf32>
    %116 = arith.addf %115, %114 : vector<1x32xf32>
    %117 = arith.divf %115, %116 : vector<1x32xf32>
    %118 = vector.broadcast %117 : vector<1x32xf32> to vector<256x32xf32>
    %119 = arith.mulf %98, %118 : vector<256x32xf32>
    %cst_161 = arith.constant 1.000000e-01 : f32
    %120 = vector.broadcast %cst_161 : f32 to vector<256x32xf32>
    %121 = arith.mulf %119, %120 : vector<256x32xf32>
    %122 = arith.addf %121, %84 : vector<256x32xf32>
    %c0_162 = arith.constant 0 : index
    %c0_163 = arith.constant 0 : index
    %c0_164 = arith.constant 0 : index
    %123 = vector.load %arg14[%c0_162, %c0_163, %c0_164] : memref<1x256x32xf32, #tpu.memory_space<vmem>>, vector<1x256x32xf32>
    %124 = vector.shape_cast %123 : vector<1x256x32xf32> to vector<256x32xf32>
    %125 = vector.shape_cast %122 : vector<256x32xf32> to vector<1x256x32xf32>
    tpu.vector_store %arg14[%c0_162, %c0_163, %c0_164], %125 {strides = array<i32>} : memref<1x256x32xf32, #tpu.memory_space<vmem>>, vector<1x256x32xf32>,
    return
  }
  func.func @transform_0(%arg0: i32) -> (i32, i32, i32) {
    %c0_i32 = arith.constant 0 : i32
    %c0_i32_0 = arith.constant 0 : i32
    %c0_i32_1 = arith.constant 0 : i32
    return %arg0, %c0_i32, %c0_i32_0 : i32, i32, i32
  }
  func.func @transform_1(%arg0: i32) -> (i32, i32) {
    %c0_i32 = arith.constant 0 : i32
    %c0_i32_0 = arith.constant 0 : i32
    %c0_i32_1 = arith.constant 0 : i32
    return %c0_i32, %c0_i32_0 : i32, i32
  }
  func.func @transform_2(%arg0: i32) -> (i32, i32) {
    %c0_i32 = arith.constant 0 : i32
    %c0_i32_0 = arith.constant 0 : i32
    %c0_i32_1 = arith.constant 0 : i32
    return %c0_i32, %c0_i32_0 : i32, i32
  }
  func.func @transform_3(%arg0: i32) -> (i32, i32) {
    %c0_i32 = arith.constant 0 : i32
    %c0_i32_0 = arith.constant 0 : i32
    %c0_i32_1 = arith.constant 0 : i32
    return %c0_i32, %c0_i32_0 : i32, i32
  }
  func.func @transform_4(%arg0: i32) -> (i32, i32) {
    %c0_i32 = arith.constant 0 : i32
    %c0_i32_0 = arith.constant 0 : i32
    %c0_i32_1 = arith.constant 0 : i32
    return %c0_i32, %c0_i32_0 : i32, i32
  }
  func.func @transform_5(%arg0: i32) -> (i32, i32) {
    %c0_i32 = arith.constant 0 : i32
    %c0_i32_0 = arith.constant 0 : i32
    %c0_i32_1 = arith.constant 0 : i32
    return %c0_i32, %c0_i32_0 : i32, i32
  }
  func.func @transform_6(%arg0: i32) -> (i32, i32) {
    %c0_i32 = arith.constant 0 : i32
    %c0_i32_0 = arith.constant 0 : i32
    %c0_i32_1 = arith.constant 0 : i32
    return %c0_i32, %c0_i32_0 : i32, i32
  }
  func.func @transform_7(%arg0: i32) -> (i32, i32) {
    %c0_i32 = arith.constant 0 : i32
    %c0_i32_0 = arith.constant 0 : i32
    %c0_i32_1 = arith.constant 0 : i32
    return %c0_i32, %c0_i32_0 : i32, i32
  }
  func.func @transform_8(%arg0: i32) -> (i32, i32) {
    %c0_i32 = arith.constant 0 : i32
    %c0_i32_0 = arith.constant 0 : i32
    %c0_i32_1 = arith.constant 0 : i32
    return %c0_i32, %c0_i32_0 : i32, i32
  }
  func.func @transform_9(%arg0: i32) -> (i32, i32) {
    %c0_i32 = arith.constant 0 : i32
    %c0_i32_0 = arith.constant 0 : i32
    %c0_i32_1 = arith.constant 0 : i32
    return %c0_i32, %c0_i32_0 : i32, i32
  }
  func.func @transform_10(%arg0: i32) -> (i32, i32) {
    %c0_i32 = arith.constant 0 : i32
    %c0_i32_0 = arith.constant 0 : i32
    %c0_i32_1 = arith.constant 0 : i32
    return %c0_i32, %c0_i32_0 : i32, i32
  }
  func.func @transform_11(%arg0: i32) -> (i32, i32) {
    %c0_i32 = arith.constant 0 : i32
    %c0_i32_0 = arith.constant 0 : i32
    %c0_i32_1 = arith.constant 0 : i32
    return %c0_i32, %c0_i32_0 : i32, i32
  }
  func.func @transform_12(%arg0: i32) -> (i32, i32) {
    %c0_i32 = arith.constant 0 : i32
    %c0_i32_0 = arith.constant 0 : i32
    %c0_i32_1 = arith.constant 0 : i32
    return %c0_i32, %c0_i32_0 : i32, i32
  }
  func.func @transform_13(%arg0: i32) -> (i32, i32, i32) {
    %c0_i32 = arith.constant 0 : i32
    %c0_i32_0 = arith.constant 0 : i32
    %c0_i32_1 = arith.constant 0 : i32
    return %arg0, %c0_i32, %c0_i32_0 : i32, i32, i32
  }
}

</mosaic_0001>

<bundles_post_ra>
// kernel: ssb_forward.1
= control target key start
LH: loop header
LB: loop body
LE: loop exit
PB: predicated region body
PF: predicated region fallthrough
CT: control target
= control target key end

     0   :  { %18 = vsyncpa [#allocation5], 0  ;;  %s12774_s0 = inlined_call_operand.vmem [shape: f32[2,256,32], index: 0, kind: input, shape index: {}]   ;;  %s12775_s1 = inlined_call_operand.vmem [shape: bf16[288,32], index: 1, kind: input, shape index: {}]   ;;  %s12776_s2 = inlined_call_operand.vmem [shape: f32[1,32], index: 2, kind: input, shape index: {}]   ;;  %s12777_s3 = inlined_call_operand.vmem [shape: bf16[288,32], index: 3, kind: input, shape index: {}]   ;;  %s12778_s4 = inlined_call_operand.vmem [shape: f32[1,32], index: 4, kind: input, shape index: {}]   ;;  %s12779_s5 = inlined_call_operand.vmem [shape: bf16[32,32], index: 5, kind: input, shape index: {}]   ;;  %s12780_s6 = inlined_call_operand.vmem [shape: f32[1,32], index: 6, kind: input, shape index: {}]   ;;  %s12781_s7 = inlined_call_operand.vmem [shape: bf16[32,32], index: 7, kind: input, shape index: {}]   ;;  %s12782_s8 = inlined_call_operand.vmem [shape: f32[1,32], index: 8, kind: input, shape index: {}]   ;;  %s12783_s9 = inlined_call_operand.vmem [shape: f32[32,2], index: 9, kind: input, shape index: {}]   ;;  %s12784_s10 = inlined_call_operand.vmem [shape: f32[1,2], index: 10, kind: input, shape index: {}]   ;;  %s12785_s11 = inlined_call_operand.vmem [shape: f32[2,32], index: 11, kind: input, shape index: {}]   ;;  %s12786_s12 = inlined_call_operand.vmem [shape: f32[1,32], index: 12, kind: input, shape index: {}]   ;;  %s12787_s13 = inlined_call_operand.hbm [shape: f32[2,256,32], index: 13, kind: output, shape index: {}]  }
   0x1   :  { %20 = vsyncpa [#allocation5 + $0x1], 0  ;;  %s9703_s25 = smov 0   ;;  %s9705_s26 = smov 0  }
   0x2   :  { %s9707_s27 = smov 0   ;;  %s9709_s28 = smov 0  }
   0x3 LB: > { %12826 = sst [smem:[#allocation7_spill]] %s9619_s27  ;;  %s9724_s29 = sadd.s32 4294967295, %s9623_s28   ;;  %s9623_s28 = sphi %s9709_s28, %s12898_s28   ;;  %s9619_s27 = sphi %s9707_s27, %s12900_s27   ;;  %s9615_s26 = sphi %s9705_s26, %s12902_s26   ;;  %s9611_s25 = sphi %s9703_s25, %s12901_s25  }
   0x4   : > { %s7530_s30 = sadd.s32 4294967294, %s9623_s28   ;;  %s9728_s14 = sadd.s32 1, %s9623_s28  }
   0x5   : > { %12827 = sst [smem:[#allocation8_spill]] %s9728_s14  ;;  %s311_s15 = sadd.s32 1, %s9619_s27 }
   0x6   : > { %s308_s16 = ssub.s32 %s9623_s28, %s9728_s14  ;;  %p321_p0 = scmp.ne.s32.totalorder %s9619_s27, %s9615_s26 }
   0x7   : > { %p309_p1 = scmp.eq.s32.totalorder %s308_s16, 0  ;;  %p322_p2 = scmp.eq.s32.totalorder %s9724_s29, 1 }
   0x8   : > { %p327_p3 = scmp.ne.s32.totalorder %s9615_s26, %s9611_s25  ;;  %p328_p4 = scmp.eq.s32.totalorder %s7530_s30, 1 }
   0x9   : > { %s9739_s17 = scalar_select %p309_p1, %s9619_s27, %s311_s15  }
   0xa   : > { %p9741_p5 = por %p322_p2, %p321_p0  ;;  %p9745_p6 = por %p328_p4, %p327_p3 }
   0xb   : > { %12828 = sst [smem:[#allocation9_spill]] %s9739_s17  ;;  %p7533_p7 = scmp.ge.s32.totalorder %s9623_s28, 1 }
   0xc   : > { %s12830_s19 = scalar_select %p9745_p6, 1, 0 }
   0xd   : > { %p390_p8 = scmp.lt.s32.totalorder %s9623_s28, 3 }
   0xe   : > { %12831 = sst [smem:[#allocation10_spill]] %s12830_s19 }
   0xf   : > { %p391_p9 = pnand %p7533_p7, %p390_p8 }
  0x11   : > { %394 = sbr.rel (%p391_p9) target bundleno = 2056 (0x808), region = 72 }
  0x16   : > { %vm472_vm0 = vcmask 261120   ;;  %vm475_vm1 = vcmask 254976   ;;  %vm481_vm2 = vcmask 253952   ;;  %v12792_v0 = vmov 0.0   ;;  %p434_p10 = scmp.lt.s32.totalorder %s9724_s29, 1  ;;  %v9417_v1 = vld [vmem:[%s12775_s1 + $0x78] sm:$0xff]  }
  0x17   : > { %473 = vst.msk [vmem:[#allocation2] sm:$0xff] %vm472_vm0, %v12792_v0  ;;  %474 = vst.msk [vmem:[#allocation2 + $0x8] sm:$0xff] %vm472_vm0, %v12792_v0  ;;  %v9418_v2 = vld [vmem:[%s12775_s1 + $0x38] sm:$0xff]   ;;  %8904 = vmatprep.subr.bf16.mxu0 %v9417_v1  ;;  %v9419_v3 = vld [vmem:[%s12775_s1 + $0x70] sm:$0xff]   ;;  %s9626_s27 = smov 32   ;;  %s9627_s14 = smov 64  }
  0x18   : > { %478 = vst.msk [vmem:[#allocation2 + $0x198] sm:$0xff] %vm472_vm0, %v12792_v0  ;;  %479 = vst.msk [vmem:[#allocation2 + $0x1a0] sm:$0xff] %vm472_vm0, %v12792_v0  ;;  %s435_s22 = scalar_select %p434_p10, %s9724_s29, 1  ;;  %8905 = vmatpush3.bf16.msra.mxu0 %v9418_v2  ;;  %v9420_v4 = vld [vmem:[%s12775_s1 + $0x30] sm:$0xff]   ;;  %v9421_v5 = vld [vmem:[%s12775_s1 + $0x68] sm:$0xff]   ;;  %vm711_vm3 = vcmask 257024  }
  0x19   : > { %476 = vst.msk [vmem:[#allocation2 + $0x10] sm:$0x3] %vm475_vm1, %v12792_v0  ;;  %480 = vst.msk [vmem:[#allocation2 + $0x1a8] sm:$0x3] %vm475_vm1, %v12792_v0  ;;  %8906 = vmatprep.subr.bf16.mxu0 %v9419_v3  ;;  %v9422_v29 = vld [vmem:[%s12775_s1 + $0x28] sm:$0xff]   ;;  %v9423_v30 = vld [vmem:[%s12775_s1 + $0x60] sm:$0xff]  }
  0x1a   : > { %483 = vst.msk [vmem:[#allocation2 + $0x18] sm:$0x1] %vm481_vm2, %v12792_v0  ;;  %484 = vst.msk [vmem:[#allocation2 + $0x30] sm:$0x1] %vm481_vm2, %v12792_v0  ;;  %s8326_s16 = sshll.u32 %s435_s22, 8  ;;  %s9628_s30 = smov 96  }
  0x1b   : > { %485 = vst.msk [vmem:[#allocation2 + $0x48] sm:$0x1] %vm481_vm2, %v12792_v0  ;;  %486 = vst.msk [vmem:[#allocation2 + $0x60] sm:$0x1] %vm481_vm2, %v12792_v0  ;;  %s9850_s20 = scalar_lea.vmem %s12774_s0, %s8326_s16  ;;  %vm968_vm4 = vcmask 519424   ;;  %vm1225_vm5 = vcmask 781824  }
  0x1c   : > { %487 = vst.msk [vmem:[#allocation2 + $0x78] sm:$0x1] %vm481_vm2, %v12792_v0  ;;  %488 = vst.msk [vmem:[#allocation2 + $0x90] sm:$0x1] %vm481_vm2, %v12792_v0  ;;  %v9856_v6 = vld [vmem:[%s9850_s20] sm:$0xff]  ;;  %v9859_v7 = vld [vmem:[%s9850_s20 + $0x8] sm:$0xff]  ;;  %8907 = vmatpush3.bf16.msra.mxu0 %v9420_v4 }
  0x1d   : > { %489 = vst.msk [vmem:[#allocation2 + $0xa8] sm:$0x1] %vm481_vm2, %v12792_v0  ;;  %490 = vst.msk [vmem:[#allocation2 + $0xc0] sm:$0x1] %vm481_vm2, %v12792_v0  ;;  %v9862_v8 = vld [vmem:[%s9850_s20 + $0x10] sm:$0xff]  ;;  %v9871_v13 = vld [vmem:[%s9850_s20 + $0x18] sm:$0xff]  ;;  %8908 = vmatprep.subr.bf16.mxu0 %v9421_v5 }
  0x1e   : > { %491 = vst.msk [vmem:[#allocation2 + $0xd8] sm:$0x1] %vm481_vm2, %v12792_v0  ;;  %492 = vst.msk [vmem:[#allocation2 + $0xf0] sm:$0x1] %vm481_vm2, %v12792_v0  ;;  %v744_v9 = vld [vmem:[#allocation2 + $0x1] sm:$0xff]  ;;  %v9884_v18 = vld [vmem:[%s9850_s20 + $0x30] sm:$0xff] }
  0x1f   : > { %493 = vst.msk [vmem:[#allocation2 + $0x108] sm:$0x1] %vm481_vm2, %v12792_v0  ;;  %494 = vst.msk [vmem:[#allocation2 + $0x120] sm:$0x1] %vm481_vm2, %v12792_v0  ;;  %v8359_v11 = vpack.c.bf16 %v744_v9, %v744_v9  ;;  %v9874_v14 = vld [vmem:[%s9850_s20 + $0x20] sm:$0xff]  ;;  %v9881_v17 = vld [vmem:[%s9850_s20 + $0x28] sm:$0xff] }
  0x20   : > { %495 = vst.msk [vmem:[#allocation2 + $0x138] sm:$0x1] %vm481_vm2, %v12792_v0  ;;  %496 = vst.msk [vmem:[#allocation2 + $0x150] sm:$0x1] %vm481_vm2, %v12792_v0  ;;  %v745_v10 = vld [vmem:[#allocation2 + $0x9] sm:$0xff]  ;;  %v9887_v19 = vld [vmem:[%s9850_s20 + $0x38] sm:$0xff]  ;;  %8909 = vmatpush3.bf16.msra.mxu0 %v9422_v29 }
  0x21   : > { %497 = vst.msk [vmem:[#allocation2 + $0x168] sm:$0x1] %vm481_vm2, %v12792_v0  ;;  %498 = vst.msk [vmem:[#allocation2 + $0x180] sm:$0x1] %vm481_vm2, %v12792_v0  ;;  %v1001_v16 = vld [vmem:[#allocation2 + $0x2] sm:$0xff]  ;;  %872 = vrot.lane.b32.xlu0 %v8359_v11, %s9626_s27  ;;  %v8360_v20 = vpack.c.bf16 %v745_v10, %v745_v10  ;;  %v9903_v23 = vld [vmem:[%s9850_s20 + $0x50] sm:$0xff]  ;;  %8910 = vmatprep.subr.bf16.mxu0 %v9423_v30 }
  0x22   : > { %501 = vst.msk [vmem:[#allocation2 + $0x29] sm:$0x1] %vm481_vm2, %v12792_v0  ;;  %502 = vst.msk [vmem:[#allocation2 + $0x41] sm:$0x1] %vm481_vm2, %v12792_v0  ;;  %v9897_v21 = vld [vmem:[%s9850_s20 + $0x40] sm:$0xff]  ;;  %v9900_v22 = vld [vmem:[%s9850_s20 + $0x48] sm:$0xff]  ;;  %v8391_v32 = vpack.c.bf16 %v1001_v16, %v1001_v16 }
  0x23   : > { %503 = vst.msk [vmem:[#allocation2 + $0x59] sm:$0x1] %vm481_vm2, %v12792_v0  ;;  %504 = vst.msk [vmem:[#allocation2 + $0x71] sm:$0x1] %vm481_vm2, %v12792_v0  ;;  %v9913_v24 = vld [vmem:[%s9850_s20 + $0x58] sm:$0xff]  ;;  %v552_v26 = vld [vmem:[#allocation2 + $0x8] sm:$0xff] }
  0x24   : > { %505 = vst.msk [vmem:[#allocation2 + $0x89] sm:$0x1] %vm481_vm2, %v12792_v0  ;;  %506 = vst.msk [vmem:[#allocation2 + $0xa1] sm:$0x1] %vm481_vm2, %v12792_v0  ;;  %v8328_v28 = vpack.c.bf16 %v552_v26, %v552_v26  ;;  %vm1482_vm6 = vcmask 1044224   ;;  %vm9629_vm7 = vmmov 0  }
  0x25   : > { %507 = vst.msk [vmem:[#allocation2 + $0xb9] sm:$0x1] %vm481_vm2, %v12792_v0  ;;  %508 = vst.msk [vmem:[#allocation2 + $0xd1] sm:$0x1] %vm481_vm2, %v12792_v0  ;;  %874 = vrot.lane.b32.xlu0 %v8360_v20, %s9626_s27  ;;  %vm7242_vm8 = vcmask 1041408   ;;  %vm7238_vm9 = vcmask 15360  }
  0x26   : > { %509 = vst.msk [vmem:[#allocation2 + $0xe9] sm:$0x1] %vm481_vm2, %v12792_v0  ;;  %510 = vst.msk [vmem:[#allocation2 + $0x101] sm:$0x1] %vm481_vm2, %v12792_v0  ;;  %s431_s24 = sand.u32 1, %s9615_s26   ;;  %s8903_s21 = sshll.u32 %s9724_s29, 12 }
  0x27   : > { %511 = vst.msk [vmem:[#allocation2 + $0x119] sm:$0x1] %vm481_vm2, %v12792_v0  ;;  %512 = vst.msk [vmem:[#allocation2 + $0x131] sm:$0x1] %vm481_vm2, %v12792_v0  ;;  %s12604_s15 = sshll.u32 %s431_s24, 8  ;;  %s12706_s19 = scalar_lea.hbm %s12787_s13, %s8903_s21 }
  0x28   : > { %513 = vst.msk [vmem:[#allocation2 + $0x149] sm:$0x1] %vm481_vm2, %v12792_v0  ;;  %514 = vst.msk [vmem:[#allocation2 + $0x161] sm:$0x1] %vm481_vm2, %v12792_v0  ;;  %s12628_s16 = scalar_lea.vmem [#allocation4], %s12604_s15 }
  0x29   : > { %515 = vst.msk [vmem:[#allocation2 + $0x179] sm:$0x1] %vm481_vm2, %v12792_v0  ;;  %516 = vst.msk [vmem:[#allocation2 + $0x191] sm:$0x1] %vm481_vm2, %v12792_v0  ;;  %1129 = vrot.lane.b32.xlu0 %v8391_v32, %s9627_s14  ;;  %s7468_s23 = sshll.u32 %s12628_s16, 4  ;;  %s12708_s23 = int_to_ptr.vmem [resolvable:$true] %s7468_s23 }
  0x2a   : > { %500 = vst.msk [vmem:[#allocation2 + $0x11] sm:$0x1] %vm481_vm2, %v12792_v0  ;;  %517 = vst.msk [vmem:[#allocation2 + $0x1a9] sm:$0x1] %vm481_vm2, %v12792_v0 }
  0x2b   : > { %482 = vst.msk [vmem:[#allocation2] sm:$0x1] %vm481_vm2, %v12792_v0  ;;  %499 = vst.msk [vmem:[#allocation2 + $0x198] sm:$0x1] %vm481_vm2, %v12792_v0 }
  0x2c   : > { %519 = vst.msk [vmem:[#allocation2 + $0x19] sm:$0xff] %vm472_vm0, %v9856_v6  ;;  %520 = vst.msk [vmem:[#allocation2 + $0x21] sm:$0xff] %vm472_vm0, %v9859_v7 }
  0x2d   : > { %521 = vst.msk [vmem:[#allocation2 + $0x31] sm:$0xff] %vm472_vm0, %v9862_v8  ;;  %522 = vst.msk [vmem:[#allocation2 + $0x39] sm:$0xff] %vm472_vm0, %v9871_v13 }
  0x2e   : > { %523 = vst.msk [vmem:[#allocation2 + $0x49] sm:$0xff] %vm472_vm0, %v9874_v14  ;;  %524 = vst.msk [vmem:[#allocation2 + $0x51] sm:$0xff] %vm472_vm0, %v9881_v17 }
  0x2f   : > { %525 = vst.msk [vmem:[#allocation2 + $0x61] sm:$0xff] %vm472_vm0, %v9884_v18  ;;  %526 = vst.msk [vmem:[#allocation2 + $0x69] sm:$0xff] %vm472_vm0, %v9887_v19 }
  0x30   : > { %527 = vst.msk [vmem:[#allocation2 + $0x79] sm:$0xff] %vm472_vm0, %v9897_v21  ;;  %528 = vst.msk [vmem:[#allocation2 + $0x81] sm:$0xff] %vm472_vm0, %v9900_v22 }
  0x31   : > { %v1002_v12 = vld [vmem:[#allocation2 + $0xa] sm:$0xff]  ;;  %529 = vst.msk [vmem:[#allocation2 + $0x91] sm:$0xff] %vm472_vm0, %v9903_v23  ;;  %530 = vst.msk [vmem:[#allocation2 + $0x99] sm:$0xff] %vm472_vm0, %v9913_v24 }
  0x32   : > { %v8392_v15 = vpack.c.bf16 %v1002_v12, %v1002_v12  ;;  %v551_v25 = vld [vmem:[#allocation2] sm:$0xff]  ;;  %713 = vst.msk [vmem:[#allocation3 + $0xc] sm:$0xf] %vm711_vm3, %v8328_v28 }
  0x33   : > { %v8327_v27 = vpack.c.bf16 %v551_v25, %v551_v25  ;;  %v1707_v31 = vld [vmem:[#allocation2 + $0x1a] sm:$0xff]  ;;  %v1708_v33 = vld [vmem:[#allocation2 + $0x22] sm:$0xff] }
  0x34   : > { %1131 = vrot.lane.b32.xlu1 %v8392_v15, %s9627_s14  ;;  %v1964_v34 = vld [vmem:[#allocation2 + $0x30] sm:$0xff]  ;;  %v9926_v35 = vpack.c.bf16 %v1707_v31, %v1707_v31  ;;  %v1258_v37 = vld [vmem:[#allocation2 + $0x18] sm:$0xff]  ;;  %v1259_v38 = vld [vmem:[#allocation2 + $0x20] sm:$0xff]  ;;  %v9938_v46 = vpack.c.bf16 %v1708_v33, %v1708_v33 }
  0x35   : > { %712 = vst.msk [vmem:[#allocation3] sm:$0xf] %vm711_vm3, %v8327_v27  ;;  %v9928_v36 = vpack.c.bf16 %v1964_v34, %v1964_v34  ;;  %v2220_v39 = vld [vmem:[#allocation2 + $0x31] sm:$0xff]  ;;  %v9930_v41 = vpack.c.bf16 %v1258_v37, %v1258_v37  ;;  %v9932_v42 = vpack.c.bf16 %v1259_v38, %v1259_v38  ;;  %v2221_v44 = vld [vmem:[#allocation2 + $0x39] sm:$0xff]  ;;  %v747_v50 = vld [vmem:[#allocation2 + $0x21] sm:$0xff] }
  0x36   : > { %v1965_v40 = vld [vmem:[#allocation2 + $0x38] sm:$0xff]  ;;  %v9934_v43 = vpack.c.bf16 %v2220_v39, %v2220_v39  ;;  %v9942_v48 = vpack.c.bf16 %v2221_v44, %v2221_v44  ;;  %v9949_v53 = vpack.c.bf16 %v747_v50, %v747_v50  ;;  %v1966_v56 = vld [vmem:[#allocation2 + $0x48] sm:$0xff]  ;;  %v1967_v57 = vld [vmem:[#allocation2 + $0x50] sm:$0xff] }
  0x37   : > { %v746_v45 = vld [vmem:[#allocation2 + $0x19] sm:$0xff]  ;;  %v9940_v47 = vpack.c.bf16 %v1965_v40, %v1965_v40  ;;  %716 = vst.msk [vmem:[#allocation3 + $0x30] sm:$0xf] %vm711_vm3, %v9928_v36  ;;  %v2222_v58 = vld [vmem:[#allocation2 + $0x49] sm:$0xff]  ;;  %714 = vst.msk [vmem:[#allocation3 + $0x18] sm:$0xf] %vm711_vm3, %v9930_v41  ;;  %v9961_v59 = vpack.c.bf16 %v1966_v56, %v1966_v56  ;;  %v9963_v60 = vpack.c.bf16 %v1967_v57, %v1967_v57  ;;  %2092 = vrot.lane.b32.xlu0 %v9928_v36, %s9627_s14 }
  0x38   : > { %1835 = vrot.lane.b32.xlu1 %v9926_v35, %s9626_s27  ;;  %v9944_v49 = vpack.c.bf16 %v746_v45, %v746_v45  ;;  %v1709_v51 = vld [vmem:[#allocation2 + $0x32] sm:$0xff]  ;;  %v1710_v52 = vld [vmem:[#allocation2 + $0x3a] sm:$0xff]  ;;  %715 = vst.msk [vmem:[#allocation3 + $0x24] sm:$0xf] %vm711_vm3, %v9932_v42  ;;  %1677 = vst.msk [vmem:[#allocation3 + $0x1c] sm:$0xf] %vm711_vm3, %v9934_v43  ;;  %v9965_v61 = vpack.c.bf16 %v2222_v58, %v2222_v58 }
  0x39   : > { %v9951_v54 = vpack.c.bf16 %v1709_v51, %v1709_v51  ;;  %v9953_v55 = vpack.c.bf16 %v1710_v52, %v1710_v52  ;;  %v2223_v62 = vld [vmem:[#allocation2 + $0x51] sm:$0xff]  ;;  %1678 = vst.msk [vmem:[#allocation3 + $0x28] sm:$0xf] %vm711_vm3, %v9942_v48  ;;  %717 = vst.msk [vmem:[#allocation3 + $0x3c] sm:$0xf] %vm711_vm3, %v9940_v47  ;;  %v2224_v5 = vld [vmem:[#allocation2 + $0x61] sm:$0xff] }
  0x3a   : > { %v1711_v63 = vld [vmem:[#allocation2 + $0x4a] sm:$0xff]  ;;  %v1712_v1 = vld [vmem:[#allocation2 + $0x52] sm:$0xff]  ;;  %1675 = vst.msk [vmem:[#allocation3 + $0x4] sm:$0xf] %vm711_vm3, %v9944_v49  ;;  %v9973_v2 = vpack.c.bf16 %v2223_v62, %v2223_v62  ;;  %1676 = vst.msk [vmem:[#allocation3 + $0x10] sm:$0xf] %vm711_vm3, %v9949_v53  ;;  %v9987_v9 = vpack.c.bf16 %v2224_v5, %v2224_v5 }
  0x3b   : > { %v9975_v3 = vpack.c.bf16 %v1711_v63, %v1711_v63  ;;  %v9977_v4 = vpack.c.bf16 %v1712_v1, %v1712_v1  ;;  %2636 = vst.msk [vmem:[#allocation3 + $0x8] sm:$0xf] %vm711_vm3, %v9951_v54  ;;  %2637 = vst.msk [vmem:[#allocation3 + $0x14] sm:$0xf] %vm711_vm3, %v9953_v55  ;;  %v2225_v10 = vld [vmem:[#allocation2 + $0x69] sm:$0xff]  ;;  %v2226_v25 = vld [vmem:[#allocation2 + $0x79] sm:$0xff]  ;;  %1386 = vrot.lane.b32.xlu0 %v9930_v41, %s9628_s30 }
  0x3c   : > { %1837 = vrot.lane.b32.xlu1 %v9938_v46, %s9626_s27  ;;  %v1713_v11 = vld [vmem:[#allocation2 + $0x62] sm:$0xff]  ;;  %v1714_v12 = vld [vmem:[#allocation2 + $0x6a] sm:$0xff]  ;;  %1679 = vst.msk [vmem:[#allocation3 + $0x34] sm:$0xf] %vm711_vm3, %v9965_v61  ;;  %718 = vst.msk [vmem:[#allocation3 + $0x48] sm:$0xf] %vm711_vm3, %v9961_v59  ;;  %v9997_v15 = vpack.c.bf16 %v2225_v10, %v2225_v10  ;;  %v10009_v26 = vpack.c.bf16 %v2226_v25, %v2226_v25 }
  0x3d   : > { %719 = vst.msk [vmem:[#allocation3 + $0x54] sm:$0xf] %vm711_vm3, %v9963_v60  ;;  %v9999_v16 = vpack.c.bf16 %v1713_v11, %v1713_v11  ;;  %v10001_v20 = vpack.c.bf16 %v1714_v12, %v1714_v12  ;;  %2638 = vst.msk [vmem:[#allocation3 + $0x20] sm:$0xf] %vm711_vm3, %v9975_v3  ;;  %v2227_v27 = vld [vmem:[#allocation2 + $0x81] sm:$0xff]  ;;  %v9425_v38 = vld [vmem:[%s12775_s1 + $0x58] sm:$0xff]  }
  0x3e   : > { %2639 = vst.msk [vmem:[#allocation3 + $0x2c] sm:$0xf] %vm711_vm3, %v9977_v4  ;;  %1680 = vst.msk [vmem:[#allocation3 + $0x40] sm:$0xf] %vm711_vm3, %v9973_v2  ;;  %v1715_v28 = vld [vmem:[#allocation2 + $0x7a] sm:$0xff]  ;;  %v1716_v29 = vld [vmem:[#allocation2 + $0x82] sm:$0xff]  ;;  %v10013_v30 = vpack.c.bf16 %v2227_v27, %v2227_v27 }
  0x3f   : > { %1681 = vst.msk [vmem:[#allocation3 + $0x4c] sm:$0xf] %vm711_vm3, %v9987_v9  ;;  %v10015_v31 = vpack.c.bf16 %v1715_v28, %v1715_v28  ;;  %v10017_v32 = vpack.c.bf16 %v1716_v29, %v1716_v29  ;;  %1682 = vst.msk [vmem:[#allocation3 + $0x58] sm:$0xf] %vm711_vm3, %v9997_v15  ;;  %v1718_v33 = vld [vmem:[#allocation2 + $0x9a] sm:$0xff]  ;;  %v10058_v41 = vld [vmem:[%s9850_s20 + $0x68] sm:$0xff]  ;;  %2348 = vrot.lane.b32.xlu0 %v9934_v43, %s9628_s30 }
  0x40   : > { %2640 = vst.msk [vmem:[#allocation3 + $0x38] sm:$0xf] %vm711_vm3, %v9999_v16  ;;  %2641 = vst.msk [vmem:[#allocation3 + $0x44] sm:$0xf] %vm711_vm3, %v10001_v20  ;;  %2094 = vrot.lane.b32.xlu1 %v9940_v47, %s9627_s14  ;;  %v10031_v34 = vpack.c.bf16 %v1718_v33, %v1718_v33  ;;  %v9424_v37 = vld [vmem:[%s12775_s1 + $0x20] sm:$0xff]   ;;  %v9426_v40 = vld [vmem:[%s12775_s1 + $0x18] sm:$0xff]  }
  0x41   : > { %1683 = vst.msk [vmem:[#allocation3 + $0x64] sm:$0xf] %vm711_vm3, %v10009_v26  ;;  %2642 = vst.msk [vmem:[#allocation3 + $0x50] sm:$0xf] %vm711_vm3, %v10015_v31  ;;  %v10046_v39 = vld [vmem:[%s9850_s20 + $0x60] sm:$0xff]  ;;  %8911 = vmatpush3.bf16.msra.mxu0 %v9424_v37  ;;  %v9427_v44 = vld [vmem:[%s12775_s1 + $0x50] sm:$0xff]  }
  0x42   : > { %2643 = vst.msk [vmem:[#allocation3 + $0x5c] sm:$0xf] %vm711_vm3, %v10017_v32  ;;  %1684 = vst.msk [vmem:[#allocation3 + $0x70] sm:$0xf] %vm711_vm3, %v10013_v30  ;;  %8912 = vmatprep.subr.bf16.mxu0 %v9425_v38  ;;  %v9428_v45 = vld [vmem:[%s12775_s1 + $0x10] sm:$0xff]   ;;  %v9432_v51 = vld [vmem:[%s12775_s1 + $0x88] sm:$0xff]  }
  0x43   : > { %531 = vst.msk [vmem:[#allocation2 + $0xa9] sm:$0xff] %vm472_vm0, %v10046_v39  ;;  %532 = vst.msk [vmem:[#allocation2 + $0xb1] sm:$0xff] %vm472_vm0, %v10058_v41  ;;  %876 = vrot.lane.b32.xlu0 %v9944_v49, %s9626_s27  ;;  %v9430_v56 = vld [vmem:[%s12775_s1 + $0x8] sm:$0xff]   ;;  %v9431_v49 = vld [vmem:[%s12775_s1 + $0x40] sm:$0xff]   ;;  %9207 = vmatprep.subr.bf16.mxu1 %v9432_v51 }
  0x44   : > { %2645 = vst.msk [vmem:[#allocation3 + $0x74] sm:$0xf] %vm711_vm3, %v10031_v34  ;;  %1388 = vrot.lane.b32.xlu1 %v9932_v42, %s9628_s30  ;;  %v9429_v42 = vld [vmem:[%s12775_s1 + $0x48] sm:$0xff]   ;;  %v9433_v62 = vld [vmem:[%s12775_s1] sm:$0xff]   ;;  %9208 = vmatpush3.bf16.msra.mxu1 %v9432_v51  ;;  %v10111_v25 = vld [vmem:[%s9850_s20 + $0x70] sm:$0xff] }
  0x45   : > { %8913 = vmatpush3.bf16.msra.mxu0 %v9426_v40  ;;  %v9437_v11 = vld [vmem:[#allocation3 + $0x8] ss:$12 sps:$4 sm:$0xff]   ;;  %v9438_v12 = vld [vmem:[#allocation3 + $0x20] ss:$12 sps:$4 sm:$0xff]   ;;  %533 = vst.msk [vmem:[#allocation2 + $0xc1] sm:$0xff] %vm472_vm0, %v10111_v25  ;;  %v10156_v40 = vld [vmem:[%s9850_s20 + $0x88] sm:$0xff] }
  0x46   : > { %8914 = vmatprep.subr.bf16.mxu0 %v9427_v44  ;;  %v10114_v27 = vld [vmem:[%s9850_s20 + $0x78] sm:$0xff]  ;;  %9211 = vmatprep.mubr.msk.bf16.mxu1 %vm472_vm0, %v9437_v11  ;;  %12832 = vst [vmem:[#allocation11_spill] sm:$0xff] %v10156_v40  ;;  %536 = vst.msk [vmem:[#allocation2 + $0xe1] sm:$0xff] %vm472_vm0, %v10156_v40  ;;  %v1971_v11 = vld [vmem:[#allocation2 + $0x80] sm:$0xff] }
  0x47   : > { %1839 = vrot.lane.b32.xlu0 %v9951_v54, %s9626_s27  ;;  %534 = vst.msk [vmem:[#allocation2 + $0xc9] sm:$0xff] %vm472_vm0, %v10114_v27 }
  0x48   : > { %2350 = vrot.lane.b32.xlu1 %v9942_v48, %s9628_s30 }
  0x49   : > { %8915 = vmatpush3.bf16.msra.mxu0 %v9428_v45 }
  0x4a   : > { %v2230_v50 = vld [vmem:[#allocation2 + $0xa9] sm:$0xff]  ;;  %8916 = vmatprep.subr.bf16.mxu0 %v9429_v42  ;;  %v2231_v57 = vld [vmem:[#allocation2 + $0xb1] sm:$0xff] }
  0x4b   : > { %v10080_v52 = vpack.c.bf16 %v2230_v50, %v2230_v50  ;;  %v10092_v58 = vpack.c.bf16 %v2231_v57, %v2231_v57  ;;  %v1719_v63 = vld [vmem:[#allocation2 + $0xaa] sm:$0xff]  ;;  %v1720_v5 = vld [vmem:[#allocation2 + $0xb2] sm:$0xff]  ;;  %1133 = vrot.lane.b32.xlu0 %v9926_v35, %s9627_s14 }
  0x4c   : > { %878 = vrot.lane.b32.xlu1 %v9949_v53, %s9626_s27  ;;  %v9436_v53 = vld [vmem:[%s12775_s1 + $0x80] sm:$0xff]   ;;  %v10102_v1 = vpack.c.bf16 %v1719_v63, %v1719_v63  ;;  %v10104_v10 = vpack.c.bf16 %v1720_v5, %v1720_v5  ;;  %v1969_v42 = vld [vmem:[#allocation2 + $0x68] sm:$0xff]  ;;  %v1970_v63 = vld [vmem:[#allocation2 + $0x78] sm:$0xff] }
  0x4d   : > { %1687 = vst.msk [vmem:[#allocation3 + $0x94] sm:$0xf] %vm711_vm3, %v10080_v52  ;;  %8917 = vmatpush3.bf16.msra.mxu0 %v9430_v56  ;;  %9209 = vmatprep.subr.bf16.mxu1 %v9436_v53  ;;  %1688 = vst.msk [vmem:[#allocation3 + $0xa0] sm:$0xf] %vm711_vm3, %v10092_v58  ;;  %v2232_v35 = vld [vmem:[#allocation2 + $0xc1] sm:$0xff]  ;;  %v10228_v5 = vpack.c.bf16 %v1970_v63, %v1970_v63 }
  0x4e   : > { %8918 = vmatprep.subr.bf16.mxu0 %v9431_v49  ;;  %2646 = vst.msk [vmem:[#allocation3 + $0x80] sm:$0xf] %vm711_vm3, %v10102_v1  ;;  %2647 = vst.msk [vmem:[#allocation3 + $0x8c] sm:$0xf] %vm711_vm3, %v10104_v10  ;;  %9210 = vmatpush3.bf16.msra.mxu1 %v9436_v53  ;;  %v10136_v28 = vpack.c.bf16 %v2232_v35, %v2232_v35  ;;  %v2233_v29 = vld [vmem:[#allocation2 + $0xc9] sm:$0xff]  ;;  %v2235_v51 = vld [vmem:[#allocation2 + $0xe1] sm:$0xff] }
  0x4f   : > { %2096 = vrot.lane.b32.xlu0 %v9961_v59, %s9627_s14  ;;  %v10138_v33 = vpack.c.bf16 %v2233_v29, %v2233_v29  ;;  %v1721_v37 = vld [vmem:[#allocation2 + $0xc2] sm:$0xff]  ;;  %v10183_v56 = vpack.c.bf16 %v2235_v51, %v2235_v51 }
  0x50   : > { %1841 = vrot.lane.b32.xlu1 %v9953_v55, %s9626_s27  ;;  %1689 = vst.msk [vmem:[#allocation3 + $0xac] sm:$0xf] %vm711_vm3, %v10136_v28  ;;  %v10147_v38 = vpack.c.bf16 %v1721_v37, %v1721_v37  ;;  %v1724_v49 = vld [vmem:[#allocation2 + $0xe2] sm:$0xff] }
  0x51   : > { %8919 = vmatpush3.bf16.msra.mxu0 %v9433_v62  ;;  %9212 = vmatmul.mubr.msk.bf16.vlgmr.msra.gmra.mxu1 %vm472_vm0, %v9438_v12  ;;  %1690 = vst.msk [vmem:[#allocation3 + $0xb8] sm:$0xf] %vm711_vm3, %v10138_v33  ;;  %1692 = vst.msk [vmem:[#allocation3 + $0xd0] sm:$0xf] %vm711_vm3, %v10183_v56  ;;  %v10204_v62 = vld [vmem:[%s9850_s20 + $0x98] sm:$0xff]  ;;  %v10206_v53 = vpack.c.bf16 %v1724_v49, %v1724_v49  ;;  %v559_v12 = vld [vmem:[#allocation2 + $0x60] sm:$0xff] }
  0x52   : > { %2648 = vst.msk [vmem:[#allocation3 + $0x98] sm:$0xf] %vm711_vm3, %v10147_v38  ;;  %12834 = vst [vmem:[#allocation13_spill] sm:$0xff] %v10204_v62  ;;  %v8335_v29 = vpack.c.bf16 %v559_v12, %v559_v12  ;;  %v562_v63 = vld [vmem:[#allocation2 + $0x80] sm:$0xff] }
  0x53   : > { %1390 = vrot.lane.b32.xlu0 %v9928_v36, %s9628_s30  ;;  %v1722_v36 = vld [vmem:[#allocation2 + $0xca] sm:$0xff]  ;;  %538 = vst.msk [vmem:[#allocation2 + $0xf9] sm:$0xff] %vm472_vm0, %v10204_v62  ;;  %v8338_v12 = vpack.c.bf16 %v562_v63, %v562_v63 }
  0x54   : > { %1135 = vrot.lane.b32.xlu1 %v9938_v46, %s9627_s14  ;;  %v10141_v46 = vld [vmem:[%s9850_s20 + $0x80] sm:$0xff]  ;;  %v10158_v44 = vpack.c.bf16 %v1722_v36, %v1722_v36  ;;  %2651 = vst.msk [vmem:[#allocation3 + $0xbc] sm:$0xf] %vm711_vm3, %v10206_v53  ;;  %720 = vst.msk [vmem:[#allocation3 + $0x60] sm:$0xf] %vm711_vm3, %v8335_v29 }
  0x55   : > { %535 = vst.msk [vmem:[#allocation2 + $0xd9] sm:$0xff] %vm472_vm0, %v10141_v46 }
  0x56   : > { %2649 = vst.msk [vmem:[#allocation3 + $0xa4] sm:$0xf] %vm711_vm3, %v10158_v44  ;;  %723 = vst.msk [vmem:[#allocation3 + $0x84] sm:$0xf] %vm711_vm3, %v8338_v12 }
  0x57   : > { %2352 = vrot.lane.b32.xlu0 %v9965_v61, %s9628_s30 }
  0x58   : > { %2098 = vrot.lane.b32.xlu1 %v9963_v60, %s9627_s14 }
  0x5a   : > { %v1726_v51 = vld [vmem:[#allocation2 + $0xfa] sm:$0xff] }
  0x5b   : > { %880 = vrot.lane.b32.xlu0 %v9934_v43, %s9626_s27  ;;  %v8524_v43 = vpack.c.bf16 %v1969_v42, %v1969_v42  ;;  %v10250_v42 = vld [vmem:[%s9850_s20 + $0xa0] sm:$0xff]  ;;  %v10262_v49 = vpack.c.bf16 %v1726_v51, %v1726_v51 }
  0x5c   : > { %1392 = vrot.lane.b32.xlu1 %v9940_v47, %s9628_s30  ;;  %v1968_v47 = vld [vmem:[#allocation2 + $0x60] sm:$0xff]  ;;  %12835 = vst [vmem:[#allocation14_spill] sm:$0xff] %v10250_v42  ;;  %539 = vst.msk [vmem:[#allocation2 + $0x109] sm:$0xff] %vm472_vm0, %v10250_v42 }
  0x5d   : > { %v8523_v45 = vpack.c.bf16 %v1968_v47, %v1968_v47  ;;  %v2234_v50 = vld [vmem:[#allocation2 + $0xd9] sm:$0xff]  ;;  %2653 = vst.msk [vmem:[#allocation3 + $0xd4] sm:$0xf] %vm711_vm3, %v10262_v49 }
  0x5f   : > { %1843 = vrot.lane.b32.xlu0 %v9975_v3, %s9626_s27 }
  0x60   : > { %2354 = vrot.lane.b32.xlu1 %v9973_v2, %s9628_s30 }
  0x63   : > { %1137 = vrot.lane.b32.xlu0 %v9951_v54, %s9627_s14  ;;  %v1723_v54 = vld [vmem:[#allocation2 + $0xda] sm:$0xff] }
  0x64   : > { %882 = vrot.lane.b32.xlu1 %v9942_v48, %s9626_s27  ;;  %v10180_v48 = vpack.c.bf16 %v2234_v50, %v2234_v50  ;;  %v10197_v57 = vpack.c.bf16 %v1723_v54, %v1723_v54  ;;  %v10260_v54 = vld [vmem:[%s9850_s20 + $0xa8] sm:$0xff] }
  0x65   : > { %12836 = vst [vmem:[#allocation15_spill] sm:$0xff] %v10260_v54  ;;  %540 = vst.msk [vmem:[#allocation2 + $0x111] sm:$0xff] %vm472_vm0, %v10260_v54 }
  0x66   : > { %1691 = vst.msk [vmem:[#allocation3 + $0xc4] sm:$0xf] %vm711_vm3, %v10180_v48  ;;  %2650 = vst.msk [vmem:[#allocation3 + $0xb0] sm:$0xf] %vm711_vm3, %v10197_v57 }
  0x67   : > { %2100 = vrot.lane.b32.xlu0 %v8523_v45, %s9627_s14 }
  0x68   : > { %1845 = vrot.lane.b32.xlu1 %v9977_v4, %s9626_s27 }
  0x6b   : > { %1394 = vrot.lane.b32.xlu0 %v9961_v59, %s9628_s30  ;;  %v9443_v59 = vld [vmem:[#allocation3 + $0x38] ss:$12 sps:$4 sm:$0xff]  }
  0x6c   : > { %1139 = vrot.lane.b32.xlu1 %v9953_v55, %s9627_s14  ;;  %v10193_v55 = vld [vmem:[%s9850_s20 + $0x90] sm:$0xff]  ;;  %9215 = vmatprep.mubr.msk.bf16.mxu1 %vm472_vm0, %v9443_v59  ;;  %v1973_v59 = vld [vmem:[#allocation2 + $0x98] sm:$0xff] }
  0x6d   : > { %12833 = vst [vmem:[#allocation12_spill] sm:$0xff] %v10193_v55  ;;  %537 = vst.msk [vmem:[#allocation2 + $0xf1] sm:$0xff] %vm472_vm0, %v10193_v55 }
  0x6f   : > { %2356 = vrot.lane.b32.xlu0 %v9987_v9, %s9628_s30 }
  0x70   : > { %2102 = vrot.lane.b32.xlu1 %v8524_v43, %s9627_s14 }
  0x73   : > { %884 = vrot.lane.b32.xlu0 %v9965_v61, %s9626_s27  ;;  %v560_v61 = vld [vmem:[#allocation2 + $0x68] sm:$0xff] }
  0x74   : > { %1396 = vrot.lane.b32.xlu1 %v9963_v60, %s9628_s30  ;;  %v9444_v60 = vld [vmem:[#allocation3 + $0x50] ss:$12 sps:$4 sm:$0xff]   ;;  %v2236_v35 = vld [vmem:[#allocation2 + $0xf1] sm:$0xff]  ;;  %v8336_v37 = vpack.c.bf16 %v560_v61, %v560_v61 }
  0x75   : > { %9216 = vmatmul.mubr.msk.bf16.gmra.mxu1 %vm472_vm0, %v9444_v60  ;;  %v10234_v36 = vpack.c.bf16 %v2236_v35, %v2236_v35  ;;  %v561_v60 = vld [vmem:[#allocation2 + $0x78] sm:$0xff] }
  0x76   : > { %721 = vst.msk [vmem:[#allocation3 + $0x6c] sm:$0xf] %vm711_vm3, %v8336_v37  ;;  %v2484_v35 = vld [vmem:[#allocation2 + $0x92] sm:$0xff] }
  0x77   : > { %1847 = vrot.lane.b32.xlu0 %v9999_v16, %s9626_s27  ;;  %1693 = vst.msk [vmem:[#allocation3 + $0xdc] sm:$0xf] %vm711_vm3, %v10234_v36  ;;  %v8591_v29 = vpack.c.bf16 %v2484_v35, %v2484_v35  ;;  %v2228_v37 = vld [vmem:[#allocation2 + $0x91] sm:$0xff] }
  0x78   : > { %2358 = vrot.lane.b32.xlu1 %v9997_v15, %s9628_s30 }
  0x79   : > { %2644 = vst.msk [vmem:[#allocation3 + $0x68] sm:$0xf] %vm711_vm3, %v8591_v29  ;;  %v10324_v29 = vld [vmem:[%s9850_s20 + $0xb8] sm:$0xff] }
  0x7a   : > { %12838 = vst [vmem:[#allocation17_spill] sm:$0xff] %v10324_v29  ;;  %542 = vst.msk [vmem:[#allocation2 + $0x129] sm:$0xff] %vm472_vm0, %v10324_v29 }
  0x7b   : > { %1141 = vrot.lane.b32.xlu0 %v9975_v3, %s9627_s14  ;;  %v2237_v3 = vld [vmem:[#allocation2 + $0xf9] sm:$0xff] }
  0x7c   : > { %886 = vrot.lane.b32.xlu1 %v9973_v2, %s9626_s27  ;;  %v10232_v2 = vpack.c.bf16 %v1971_v11, %v1971_v11  ;;  %v10240_v47 = vpack.c.bf16 %v2237_v3, %v2237_v3  ;;  %v2238_v11 = vld [vmem:[#allocation2 + $0x109] sm:$0xff] }
  0x7d   : > { %v10288_v61 = vpack.c.bf16 %v2238_v11, %v2238_v11  ;;  %v1727_v11 = vld [vmem:[#allocation2 + $0x10a] sm:$0xff] }
  0x7e   : > { %1694 = vst.msk [vmem:[#allocation3 + $0xe8] sm:$0xf] %vm711_vm3, %v10240_v47  ;;  %v10317_v35 = vpack.c.bf16 %v1727_v11, %v1727_v11 }
  0x7f   : > { %2104 = vrot.lane.b32.xlu0 %v10228_v5, %s9627_s14  ;;  %1695 = vst.msk [vmem:[#allocation3 + $0xf4] sm:$0xf] %vm711_vm3, %v10288_v61 }
  0x80   : > { %1849 = vrot.lane.b32.xlu1 %v10001_v20, %s9626_s27  ;;  %2654 = vst.msk [vmem:[#allocation3 + $0xe0] sm:$0xf] %vm711_vm3, %v10317_v35 }
  0x83   : > { %1398 = vrot.lane.b32.xlu0 %v8523_v45, %s9628_s30  ;;  %v1972_v45 = vld [vmem:[#allocation2 + $0x90] sm:$0xff] }
  0x84   : > { %1143 = vrot.lane.b32.xlu1 %v9977_v4, %s9627_s14  ;;  %v1725_v4 = vld [vmem:[#allocation2 + $0xf2] sm:$0xff] }
  0x85   : > { %v10253_v50 = vpack.c.bf16 %v1725_v4, %v1725_v4  ;;  %v1526_v4 = vld [vmem:[#allocation2 + $0x99] sm:$0xff] }
  0x87   : > { %2360 = vrot.lane.b32.xlu0 %v10009_v26, %s9628_s30  ;;  %2652 = vst.msk [vmem:[#allocation3 + $0xc8] sm:$0xf] %vm711_vm3, %v10253_v50 }
  0x88   : > { %2106 = vrot.lane.b32.xlu1 %v10232_v2, %s9627_s14 }
  0x8b   : > { %888 = vrot.lane.b32.xlu0 %v9987_v9, %s9626_s27  ;;  %v10286_v9 = vpack.c.bf16 %v1973_v59, %v1973_v59  ;;  %v10305_v59 = vpack.c.bf16 %v2228_v37, %v2228_v37  ;;  %v1717_v37 = vld [vmem:[#allocation2 + $0x92] sm:$0xff] }
  0x8c   : > { %1400 = vrot.lane.b32.xlu1 %v8524_v43, %s9628_s30  ;;  %v10282_v43 = vpack.c.bf16 %v1972_v45, %v1972_v45  ;;  %v8466_v45 = vpack.c.bf16 %v1526_v4, %v1526_v4  ;;  %v9449_v4 = vld [vmem:[#allocation3 + $0x68] ss:$12 sps:$4 sm:$0xff]  }
  0x8d   : > { %9219 = vmatprep.mubr.msk.bf16.mxu1 %vm472_vm0, %v9449_v4 }
  0x8e   : > { %1686 = vst.msk [vmem:[#allocation3 + $0x88] sm:$0xf] %vm711_vm3, %v8466_v45  ;;  %v10341_v45 = vpack.c.bf16 %v1717_v37, %v1717_v37 }
  0x8f   : > { %1851 = vrot.lane.b32.xlu0 %v10015_v31, %s9626_s27 }
  0x90   : > { %2362 = vrot.lane.b32.xlu1 %v10013_v30, %s9628_s30 }
  0x93   : > { %1145 = vrot.lane.b32.xlu0 %v9999_v16, %s9627_s14  ;;  %v2239_v16 = vld [vmem:[#allocation2 + $0x111] sm:$0xff]  ;;  %v873_v63 = vpop.permute.xlu0 %872 }
  0x94   : > { %890 = vrot.lane.b32.xlu1 %v9997_v15, %s9626_s27  ;;  %v8337_v15 = vpack.c.bf16 %v561_v60, %v561_v60  ;;  %v10294_v3 = vpack.c.bf16 %v2239_v16, %v2239_v16  ;;  %v2229_v60 = vld [vmem:[#allocation2 + $0x99] sm:$0xff]  ;;  %969 = vst.msk [vmem:[#allocation3] sm:$0xf] %vm968_vm4, %v873_v63 }
  0x95   : > { %v1728_v16 = vld [vmem:[#allocation2 + $0x112] sm:$0xff] }
  0x96   : > { %722 = vst.msk [vmem:[#allocation3 + $0x78] sm:$0xf] %vm711_vm3, %v8337_v15  ;;  %1696 = vst.msk [vmem:[#allocation3 + $0x100] sm:$0xf] %vm711_vm3, %v10294_v3  ;;  %v10310_v15 = vld [vmem:[%s9850_s20 + $0xb0] sm:$0xff] }
  0x97   : > { %2108 = vrot.lane.b32.xlu0 %v10282_v43, %s9627_s14  ;;  %12837 = vst [vmem:[#allocation16_spill] sm:$0xff] %v10310_v15  ;;  %541 = vst.msk [vmem:[#allocation2 + $0x121] sm:$0xff] %vm472_vm0, %v10310_v15 }
  0x98   : > { %1853 = vrot.lane.b32.xlu1 %v10017_v32, %s9626_s27 }
  0x9b   : > { %1402 = vrot.lane.b32.xlu0 %v10228_v5, %s9628_s30  ;;  %v10315_v5 = vpack.c.bf16 %v2229_v60, %v2229_v60 }
  0x9c   : > { %1147 = vrot.lane.b32.xlu1 %v10001_v20, %s9627_s14  ;;  %v1525_v20 = vld [vmem:[#allocation2 + $0x91] sm:$0xff] }
  0x9d   : > { %v8465_v51 = vpack.c.bf16 %v1525_v20, %v1525_v20  ;;  %v10326_v20 = vpack.c.bf16 %v1728_v16, %v1728_v16 }
  0x9f   : > { %1685 = vst.msk [vmem:[#allocation3 + $0x7c] sm:$0xf] %vm711_vm3, %v8465_v51  ;;  %2364 = vrot.lane.b32.xlu0 %v10305_v59, %s9628_s30  ;;  %v9450_v51 = vld [vmem:[#allocation3 + $0x80] ss:$12 sps:$4 sm:$0xff]   ;;  %2655 = vst.msk [vmem:[#allocation3 + $0xec] sm:$0xf] %vm711_vm3, %v10326_v20 }
  0xa0   : > { %2110 = vrot.lane.b32.xlu1 %v10286_v9, %s9627_s14  ;;  %9220 = vmatmul.mubr.msk.bf16.gmra.mxu1 %vm472_vm0, %v9450_v51  ;;  %v564_v51 = vld [vmem:[#allocation2 + $0x98] sm:$0xff] }
  0xa3   : > { %892 = vrot.lane.b32.xlu0 %v10009_v26, %s9626_s27  ;;  %v1974_v26 = vld [vmem:[#allocation2 + $0xa8] sm:$0xff] }
  0xa4   : > { %1404 = vrot.lane.b32.xlu1 %v10232_v2, %s9628_s30  ;;  %v875_v2 = vpop.permute.xlu0 %874  ;;  %v10356_v16 = vpack.c.bf16 %v1974_v26, %v1974_v26  ;;  %v2241_v26 = vld [vmem:[#allocation2 + $0x129] sm:$0xff] }
  0xa5   : > { %970 = vst.msk [vmem:[#allocation3 + $0xc] sm:$0xf] %vm968_vm4, %v875_v2  ;;  %v563_v2 = vld [vmem:[#allocation2 + $0x90] sm:$0xff]  ;;  %v10370_v0 = vpack.c.bf16 %v2241_v26, %v2241_v26 }
  0xa6   : > { %v1132_v12 = vpop.permute.xlu1 %1131 }
  0xa7   : > { %1227 = vst.msk [vmem:[#allocation3 + $0xc] sm:$0xf] %vm1225_vm5, %v1132_v12  ;;  %1855 = vrot.lane.b32.xlu0 %v10341_v45, %s9626_s27 }
  0xa8   : > { %2366 = vrot.lane.b32.xlu1 %v10315_v5, %s9628_s30  ;;  %v1130_v63 = vpop.permute.xlu0 %1129  ;;  %1698 = vst.msk [vmem:[#allocation3 + $0x118] sm:$0xf] %vm711_vm3, %v10370_v0 }
  0xa9   : > { %1226 = vst.msk [vmem:[#allocation3] sm:$0xf] %vm1225_vm5, %v1130_v63 }
  0xaa   : > { %v1836_v60 = vpop.permute.xlu1 %1835 }
  0xab   : > { %1931 = vst.msk [vmem:[#allocation3 + $0x4] sm:$0xf] %vm968_vm4, %v1836_v60  ;;  %1149 = vrot.lane.b32.xlu0 %v10015_v31, %s9627_s14  ;;  %v2240_v60 = vld [vmem:[#allocation2 + $0x121] sm:$0xff]  ;;  %v8340_v31 = vpack.c.bf16 %v564_v51, %v564_v51 }
  0xac   : > { %894 = vrot.lane.b32.xlu1 %v10013_v30, %s9626_s27  ;;  %v2093_v12 = vpop.permute.xlu0 %2092  ;;  %v1975_v30 = vld [vmem:[#allocation2 + $0xb0] sm:$0xff]  ;;  %v10384_v51 = vld [vmem:[%s9850_s20 + $0xc0] sm:$0xff] }
  0xad   : > { %2188 = vst.msk [vmem:[#allocation3 + $0x4] sm:$0xf] %vm1225_vm5, %v2093_v12  ;;  %v10362_v63 = vpack.c.bf16 %v1975_v30, %v1975_v30  ;;  %v10364_v12 = vpack.c.bf16 %v2240_v60, %v2240_v60  ;;  %12839 = vst [vmem:[#allocation18_spill] sm:$0xff] %v10384_v51 }
  0xae   : > { %v1838_v11 = vpop.permute.xlu1 %1837  ;;  %725 = vst.msk [vmem:[#allocation3 + $0x9c] sm:$0xf] %vm711_vm3, %v8340_v31 }
  0xaf   : > { %1932 = vst.msk [vmem:[#allocation3 + $0x10] sm:$0xf] %vm968_vm4, %v1838_v11  ;;  %v8339_v11 = vpack.c.bf16 %v563_v2, %v563_v2  ;;  %2112 = vrot.lane.b32.xlu0 %v10356_v16, %s9627_s14  ;;  %v1729_v2 = vld [vmem:[#allocation2 + $0x122] sm:$0xff] }
  0xb0   : > { %1857 = vrot.lane.b32.xlu1 %v10031_v34, %s9626_s27  ;;  %v1387_v4 = vpop.permute.xlu0 %1386  ;;  %1697 = vst.msk [vmem:[#allocation3 + $0x10c] sm:$0xf] %vm711_vm3, %v10364_v12  ;;  %v10389_v60 = vpack.c.bf16 %v1729_v2, %v1729_v2 }
  0xb1   : > { %1483 = vst.msk [vmem:[#allocation3] sm:$0xf] %vm1482_vm6, %v1387_v4 }
  0xb2   : > { %v2095_v37 = vpop.permute.xlu1 %2094  ;;  %724 = vst.msk [vmem:[#allocation3 + $0x90] sm:$0xf] %vm711_vm3, %v8339_v11  ;;  %v10396_v11 = vld [vmem:[%s9850_s20 + $0xc8] sm:$0xff]  ;;  %2656 = vst.msk [vmem:[#allocation3 + $0xf8] sm:$0xf] %vm711_vm3, %v10389_v60 }
  0xb3   : > { %2189 = vst.msk [vmem:[#allocation3 + $0x10] sm:$0xf] %vm1225_vm5, %v2095_v37  ;;  %1406 = vrot.lane.b32.xlu0 %v10282_v43, %s9628_s30  ;;  %v1730_v43 = vld [vmem:[#allocation2 + $0x12a] sm:$0xff]  ;;  %12840 = vst [vmem:[#allocation19_spill] sm:$0xff] %v10396_v11 }
  0xb4   : > { %1151 = vrot.lane.b32.xlu1 %v10017_v32, %s9627_s14  ;;  %v2349_v32 = vpop.permute.xlu0 %2348  ;;  %543 = vst.msk [vmem:[#allocation2 + $0x139] sm:$0xff] %vm472_vm0, %v10384_v51  ;;  %v10398_v26 = vpack.c.bf16 %v1730_v43, %v1730_v43  ;;  %544 = vst.msk [vmem:[#allocation2 + $0x141] sm:$0xff] %vm472_vm0, %v10396_v11 }
  0xb5   : > { %2444 = vst.msk [vmem:[#allocation3 + $0x4] sm:$0xf] %vm1482_vm6, %v2349_v32 }
  0xb6   : > { %v1389_v37 = vpop.permute.xlu1 %1388  ;;  %2657 = vst.msk [vmem:[#allocation3 + $0x104] sm:$0xf] %vm711_vm3, %v10398_v26 }
  0xb7   : > { %1484 = vst.msk [vmem:[#allocation3 + $0xc] sm:$0xf] %vm1482_vm6, %v1389_v37  ;;  %2368 = vrot.lane.b32.xlu0 %v10080_v52, %s9628_s30 }
  0xb8   : > { %2114 = vrot.lane.b32.xlu1 %v10362_v63, %s9627_s14  ;;  %v877_v4 = vpop.permute.xlu0 %876 }
  0xb9   : > { %971 = vst.msk [vmem:[#allocation3 + $0x18] sm:$0xf] %vm968_vm4, %v877_v4 }
  0xba   : > { %v2351_v30 = vpop.permute.xlu1 %2350 }
  0xbb   : > { %2445 = vst.msk [vmem:[#allocation3 + $0x10] sm:$0xf] %vm1482_vm6, %v2351_v30  ;;  %896 = vrot.lane.b32.xlu0 %v10305_v59, %s9626_s27  ;;  %v1976_v59 = vld [vmem:[#allocation2 + $0xc0] sm:$0xff] }
  0xbc   : > { %1408 = vrot.lane.b32.xlu1 %v10286_v9, %s9628_s30  ;;  %v1840_v9 = vpop.permute.xlu0 %1839  ;;  %v2668_v32 = vld [vmem:[#allocation3] sm:$0xff] }
  0xbd   : > { %1933 = vst.msk [vmem:[#allocation3 + $0x1c] sm:$0xf] %vm968_vm4, %v1840_v9 }
  0xbe   : > { %v879_v31 = vpop.permute.xlu1 %878 }
  0xbf   : > { %972 = vst.msk [vmem:[#allocation3 + $0x24] sm:$0xf] %vm968_vm4, %v879_v31  ;;  %1859 = vrot.lane.b32.xlu0 %v10102_v1, %s9626_s27 }
  0xc0   : > { %2370 = vrot.lane.b32.xlu1 %v10092_v58, %s9628_s30  ;;  %v1134_v2 = vpop.permute.xlu0 %1133 }
  0xc1   : > { %1228 = vst.msk [vmem:[#allocation3 + $0x18] sm:$0xf] %vm1225_vm5, %v1134_v2  ;;  %v566_v2 = vld [vmem:[#allocation2 + $0xb0] sm:$0xff] }
  0xc2   : > { %v1842_v37 = vpop.permute.xlu1 %1841  ;;  %v2670_v30 = vld [vmem:[#allocation3 + $0xc] sm:$0xff] }
  0xc3   : > { %v9434_v4 = vld [vmem:[#allocation3 + $0x4] ss:$12 sps:$4 sm:$0xff]   ;;  %1934 = vst.msk [vmem:[#allocation3 + $0x28] sm:$0xf] %vm968_vm4, %v1842_v37  ;;  %v7826_v43 = vcombine.low %v2668_v32, %v2670_v30  ;;  %1153 = vrot.lane.b32.xlu0 %v10341_v45, %s9627_s14  ;;  %v1977_v37 = vld [vmem:[#allocation2 + $0xc8] sm:$0xff] }
  0xc4   : > { %898 = vrot.lane.b32.xlu1 %v10315_v5, %s9626_s27  ;;  %3203 = vmatprep.mubr.bf16.mxu0 %v9434_v4  ;;  %v2097_v9 = vpop.permute.xlu0 %2096  ;;  %v10424_v5 = vpack.c.bf16 %v1976_v59, %v1976_v59  ;;  %v565_v4 = vld [vmem:[#allocation2 + $0xa8] sm:$0xff] }
  0xc5   : > { %3204 = vmatmul.mubr.bf16.vlgmr.msra.gmra.mxu0 %v7826_v43  ;;  %2190 = vst.msk [vmem:[#allocation3 + $0x1c] sm:$0xf] %vm1225_vm5, %v2097_v9  ;;  %v10430_v43 = vpack.c.bf16 %v1977_v37, %v1977_v37  ;;  %v8342_v9 = vpack.c.bf16 %v566_v2, %v566_v2  ;;  %v10456_v2 = vld [vmem:[%s9850_s20 + $0xd8] sm:$0xff] }
  0xc6   : > { %v1136_v31 = vpop.permute.xlu1 %1135  ;;  %12842 = vst [vmem:[#allocation21_spill] sm:$0xff] %v10456_v2  ;;  %546 = vst.msk [vmem:[#allocation2 + $0x159] sm:$0xff] %vm472_vm0, %v10456_v2 }
  0xc7   : > { %1229 = vst.msk [vmem:[#allocation3 + $0x24] sm:$0xf] %vm1225_vm5, %v1136_v31  ;;  %v8341_v31 = vpack.c.bf16 %v565_v4, %v565_v4  ;;  %2116 = vrot.lane.b32.xlu0 %v10424_v5, %s9627_s14 }
  0xc8   : > { %1861 = vrot.lane.b32.xlu1 %v10104_v10, %s9626_s27  ;;  %v1391_v30 = vpop.permute.xlu0 %1390  ;;  %727 = vst.msk [vmem:[#allocation3 + $0xb4] sm:$0xf] %vm711_vm3, %v8342_v9 }
  0xc9   : > { %1485 = vst.msk [vmem:[#allocation3 + $0x18] sm:$0xf] %vm1482_vm6, %v1391_v30  ;;  %v10444_v30 = vld [vmem:[%s9850_s20 + $0xd0] sm:$0xff] }
  0xca   : > { %v2099_v32 = vpop.permute.xlu1 %2098  ;;  %726 = vst.msk [vmem:[#allocation3 + $0xa8] sm:$0xf] %vm711_vm3, %v8341_v31  ;;  %12841 = vst [vmem:[#allocation20_spill] sm:$0xff] %v10444_v30 }
  0xcb   : > { %2191 = vst.msk [vmem:[#allocation3 + $0x28] sm:$0xf] %vm1225_vm5, %v2099_v32  ;;  %1410 = vrot.lane.b32.xlu0 %v10356_v16, %s9628_s30  ;;  %v1731_v32 = vld [vmem:[#allocation2 + $0x13a] sm:$0xff]  ;;  %v1732_v16 = vld [vmem:[#allocation2 + $0x142] sm:$0xff] }
  0xcc   : > { %1155 = vrot.lane.b32.xlu1 %v10031_v34, %s9627_s14  ;;  %v2353_v59 = vpop.permute.xlu0 %2352  ;;  %v10449_v4 = vpack.c.bf16 %v1731_v32, %v1731_v32  ;;  %545 = vst.msk [vmem:[#allocation2 + $0x151] sm:$0xff] %vm472_vm0, %v10444_v30  ;;  %v10458_v9 = vpack.c.bf16 %v1732_v16, %v1732_v16 }
  0xcd   : > { %2446 = vst.msk [vmem:[#allocation3 + $0x1c] sm:$0xf] %vm1482_vm6, %v2353_v59  ;;  %v9456_v59 = vld [vmem:[#allocation3 + $0xb0] ss:$12 sps:$4 sm:$0xff]  }
  0xce   : > { %v1393_v45 = vpop.permute.xlu1 %1392  ;;  %2658 = vst.msk [vmem:[#allocation3 + $0x110] sm:$0xf] %vm711_vm3, %v10449_v4  ;;  %2659 = vst.msk [vmem:[#allocation3 + $0x11c] sm:$0xf] %vm711_vm3, %v10458_v9 }
  0xcf   : > { %1486 = vst.msk [vmem:[#allocation3 + $0x24] sm:$0xf] %vm1482_vm6, %v1393_v45  ;;  %2372 = vrot.lane.b32.xlu0 %v10136_v28, %s9628_s30  ;;  %v9455_v45 = vld [vmem:[#allocation3 + $0x98] ss:$12 sps:$4 sm:$0xff]  }
  0xd0   : > { %2118 = vrot.lane.b32.xlu1 %v10430_v43, %s9627_s14  ;;  %v881_v37 = vpop.permute.xlu0 %880  ;;  %9223 = vmatprep.mubr.msk.bf16.mxu1 %vm472_vm0, %v9455_v45  ;;  %v1978_v45 = vld [vmem:[#allocation2 + $0xd8] sm:$0xff] }
  0xd1   : > { %973 = vst.msk [vmem:[#allocation3 + $0x30] sm:$0xf] %vm968_vm4, %v881_v37  ;;  %9224 = vmatmul.mubr.msk.bf16.gmra.mxu1 %vm472_vm0, %v9456_v59  ;;  %v1979_v59 = vld [vmem:[#allocation2 + $0xe0] sm:$0xff] }
  0xd2   : > { %v2355_v34 = vpop.permute.xlu1 %2354 }
  0xd3   : > { %2447 = vst.msk [vmem:[#allocation3 + $0x28] sm:$0xf] %vm1482_vm6, %v2355_v34  ;;  %900 = vrot.lane.b32.xlu0 %v10080_v52, %s9626_s27 }
  0xd4   : > { %1412 = vrot.lane.b32.xlu1 %v10362_v63, %s9628_s30  ;;  %v1844_v63 = vpop.permute.xlu0 %1843  ;;  %v2672_v37 = vld [vmem:[#allocation3 + $0x18] sm:$0xff] }
  0xd5   : > { %1935 = vst.msk [vmem:[#allocation3 + $0x34] sm:$0xf] %vm968_vm4, %v1844_v63 }
  0xd6   : > { %v883_v31 = vpop.permute.xlu1 %882 }
  0xd7   : > { %974 = vst.msk [vmem:[#allocation3 + $0x3c] sm:$0xf] %vm968_vm4, %v883_v31  ;;  %1863 = vrot.lane.b32.xlu0 %v10147_v38, %s9626_s27 }
  0xd8   : > { %2374 = vrot.lane.b32.xlu1 %v10138_v33, %s9628_s30  ;;  %v1138_v31 = vpop.permute.xlu0 %1137 }
  0xd9   : > { %1230 = vst.msk [vmem:[#allocation3 + $0x30] sm:$0xf] %vm1225_vm5, %v1138_v31  ;;  %v10492_v31 = vpack.c.bf16 %v1979_v59, %v1979_v59 }
  0xda   : > { %v1846_v34 = vpop.permute.xlu1 %1845  ;;  %v2674_v32 = vld [vmem:[#allocation3 + $0x24] sm:$0xff] }
  0xdb   : > { %v9439_v16 = vld [vmem:[#allocation3 + $0x1c] ss:$12 sps:$4 sm:$0xff]   ;;  %1936 = vst.msk [vmem:[#allocation3 + $0x40] sm:$0xf] %vm968_vm4, %v1846_v34  ;;  %v7829_v2 = vcombine.low %v2672_v37, %v2674_v32  ;;  %1157 = vrot.lane.b32.xlu0 %v10102_v1, %s9627_s14  ;;  %v567_v37 = vld [vmem:[#allocation2 + $0xc0] sm:$0xff] }
  0xdc   : > { %902 = vrot.lane.b32.xlu1 %v10092_v58, %s9626_s27  ;;  %3211 = vmatprep.mubr.bf16.mxu0 %v9439_v16  ;;  %v2101_v63 = vpop.permute.xlu0 %2100  ;;  %v10486_v58 = vpack.c.bf16 %v1978_v45, %v1978_v45  ;;  %v568_v32 = vld [vmem:[#allocation2 + $0xc8] sm:$0xff]  ;;  %v2244_v16 = vld [vmem:[#allocation2 + $0x151] sm:$0xff]  ;;  %v2245_v45 = vld [vmem:[#allocation2 + $0x159] sm:$0xff] }
  0xdd   : > { %3212 = vmatmul.mubr.bf16.gmra.mxu0 %v7829_v2  ;;  %2192 = vst.msk [vmem:[#allocation3 + $0x34] sm:$0xf] %vm1225_vm5, %v2101_v63  ;;  %v8344_v63 = vpack.c.bf16 %v568_v32, %v568_v32  ;;  %v10494_v1 = vpack.c.bf16 %v2244_v16, %v2244_v16  ;;  %v10500_v30 = vpack.c.bf16 %v2245_v45, %v2245_v45  ;;  %v10524_v32 = vld [vmem:[%s9850_s20 + $0xe8] sm:$0xff] }
  0xde   : > { %v1140_v52 = vpop.permute.xlu1 %1139  ;;  %12844 = vst [vmem:[#allocation23_spill] sm:$0xff] %v10524_v32  ;;  %548 = vst.msk [vmem:[#allocation2 + $0x171] sm:$0xff] %vm472_vm0, %v10524_v32 }
  0xdf   : > { %1231 = vst.msk [vmem:[#allocation3 + $0x3c] sm:$0xf] %vm1225_vm5, %v1140_v52  ;;  %v8343_v52 = vpack.c.bf16 %v567_v37, %v567_v37  ;;  %2120 = vrot.lane.b32.xlu0 %v10486_v58, %s9627_s14  ;;  %v10514_v37 = vld [vmem:[%s9850_s20 + $0xe0] sm:$0xff] }
  0xe0   : > { %1865 = vrot.lane.b32.xlu1 %v10158_v44, %s9626_s27  ;;  %v1395_v2 = vpop.permute.xlu0 %1394  ;;  %729 = vst.msk [vmem:[#allocation3 + $0xcc] sm:$0xf] %vm711_vm3, %v8344_v63  ;;  %1701 = vst.msk [vmem:[#allocation3 + $0x13c] sm:$0xf] %vm711_vm3, %v10494_v1 }
  0xe1   : > { %1487 = vst.msk [vmem:[#allocation3 + $0x30] sm:$0xf] %vm1482_vm6, %v1395_v2  ;;  %12843 = vst [vmem:[#allocation22_spill] sm:$0xff] %v10514_v37 }
  0xe2   : > { %v2103_v34 = vpop.permute.xlu1 %2102  ;;  %728 = vst.msk [vmem:[#allocation3 + $0xc0] sm:$0xf] %vm711_vm3, %v8343_v52  ;;  %1702 = vst.msk [vmem:[#allocation3 + $0x148] sm:$0xf] %vm711_vm3, %v10500_v30 }
  0xe3   : > { %2193 = vst.msk [vmem:[#allocation3 + $0x40] sm:$0xf] %vm1225_vm5, %v2103_v34  ;;  %1414 = vrot.lane.b32.xlu0 %v10424_v5, %s9628_s30 }
  0xe4   : > { %1159 = vrot.lane.b32.xlu1 %v10104_v10, %s9627_s14  ;;  %v2357_v10 = vpop.permute.xlu0 %2356  ;;  %547 = vst.msk [vmem:[#allocation2 + $0x169] sm:$0xff] %vm472_vm0, %v10514_v37 }
  0xe5   : > { %2448 = vst.msk [vmem:[#allocation3 + $0x34] sm:$0xf] %vm1482_vm6, %v2357_v10 }
  0xe6   : > { %v1397_v34 = vpop.permute.xlu1 %1396 }
  0xe7   : > { %1488 = vst.msk [vmem:[#allocation3 + $0x3c] sm:$0xf] %vm1482_vm6, %v1397_v34  ;;  %2376 = vrot.lane.b32.xlu0 %v10180_v48, %s9628_s30 }
  0xe8   : > { %2122 = vrot.lane.b32.xlu1 %v10492_v31, %s9627_s14  ;;  %v885_v2 = vpop.permute.xlu0 %884 }
  0xe9   : > { %975 = vst.msk [vmem:[#allocation3 + $0x48] sm:$0xf] %vm968_vm4, %v885_v2 }
  0xea   : > { %v2359_v59 = vpop.permute.xlu1 %2358 }
  0xeb   : > { %2449 = vst.msk [vmem:[#allocation3 + $0x40] sm:$0xf] %vm1482_vm6, %v2359_v59  ;;  %904 = vrot.lane.b32.xlu0 %v10136_v28, %s9626_s27  ;;  %v1980_v28 = vld [vmem:[#allocation2 + $0xf0] sm:$0xff] }
  0xec   : > { %1416 = vrot.lane.b32.xlu1 %v10430_v43, %s9628_s30  ;;  %v1848_v16 = vpop.permute.xlu0 %1847  ;;  %v2676_v52 = vld [vmem:[#allocation3 + $0x30] sm:$0xff] }
  0xed   : > { %1937 = vst.msk [vmem:[#allocation3 + $0x4c] sm:$0xf] %vm968_vm4, %v1848_v16 }
  0xee   : > { %v887_v5 = vpop.permute.xlu1 %886 }
  0xef   : > { %976 = vst.msk [vmem:[#allocation3 + $0x54] sm:$0xf] %vm968_vm4, %v887_v5  ;;  %1867 = vrot.lane.b32.xlu0 %v10197_v57, %s9626_s27  ;;  %v1981_v5 = vld [vmem:[#allocation2 + $0xf8] sm:$0xff] }
  0xf0   : > { %2378 = vrot.lane.b32.xlu1 %v10183_v56, %s9628_s30  ;;  %v1142_v34 = vpop.permute.xlu0 %1141 }
  0xf1   : > { %1232 = vst.msk [vmem:[#allocation3 + $0x48] sm:$0xf] %vm1225_vm5, %v1142_v34 }
  0xf2   : > { %v1850_v43 = vpop.permute.xlu1 %1849  ;;  %v2678_v63 = vld [vmem:[#allocation3 + $0x3c] sm:$0xff] }
  0xf3   : > { %v9441_v45 = vld [vmem:[#allocation3 + $0x34] ss:$12 sps:$4 sm:$0xff]   ;;  %1938 = vst.msk [vmem:[#allocation3 + $0x58] sm:$0xf] %vm968_vm4, %v1850_v43  ;;  %v7832_v10 = vcombine.low %v2676_v52, %v2678_v63  ;;  %1161 = vrot.lane.b32.xlu0 %v10147_v38, %s9627_s14  ;;  %v569_v52 = vld [vmem:[#allocation2 + $0xd8] sm:$0xff] }
  0xf4   : > { %906 = vrot.lane.b32.xlu1 %v10138_v33, %s9626_s27  ;;  %3219 = vmatprep.mubr.bf16.mxu0 %v9441_v45  ;;  %v2105_v2 = vpop.permute.xlu0 %2104  ;;  %v10546_v33 = vpack.c.bf16 %v1980_v28, %v1980_v28  ;;  %v570_v63 = vld [vmem:[#allocation2 + $0xe0] sm:$0xff]  ;;  %v10552_v45 = vpack.c.bf16 %v1981_v5, %v1981_v5  ;;  %v8345_v34 = vpack.c.bf16 %v569_v52, %v569_v52  ;;  %v10566_v5 = vld [vmem:[%s9850_s20 + $0xf0] sm:$0xff] }
  0xf5   : > { %3220 = vmatmul.mubr.bf16.gmra.mxu0 %v7832_v10  ;;  %2194 = vst.msk [vmem:[#allocation3 + $0x4c] sm:$0xf] %vm1225_vm5, %v2105_v2  ;;  %v8346_v10 = vpack.c.bf16 %v570_v63, %v570_v63  ;;  %v1735_v2 = vld [vmem:[#allocation2 + $0x16a] sm:$0xff]  ;;  %12845 = vst [vmem:[#allocation24_spill] sm:$0xff] %v10566_v5 }
  0xf6   : > { %v1144_v59 = vpop.permute.xlu1 %1143  ;;  %730 = vst.msk [vmem:[#allocation3 + $0xd8] sm:$0xf] %vm711_vm3, %v8345_v34  ;;  %v9461_v34 = vld [vmem:[#allocation3 + $0xc8] ss:$12 sps:$4 sm:$0xff]  }
  0xf7   : > { %1233 = vst.msk [vmem:[#allocation3 + $0x54] sm:$0xf] %vm1225_vm5, %v1144_v59  ;;  %2124 = vrot.lane.b32.xlu0 %v10546_v33, %s9627_s14  ;;  %9227 = vmatprep.mubr.msk.bf16.mxu1 %vm472_vm0, %v9461_v34 }
  0xf8   : > { %1869 = vrot.lane.b32.xlu1 %v10206_v53, %s9626_s27  ;;  %v1399_v43 = vpop.permute.xlu0 %1398  ;;  %731 = vst.msk [vmem:[#allocation3 + $0xe4] sm:$0xf] %vm711_vm3, %v8346_v10  ;;  %v9462_v10 = vld [vmem:[#allocation3 + $0xe0] ss:$12 sps:$4 sm:$0xff]  }
  0xf9   : > { %1489 = vst.msk [vmem:[#allocation3 + $0x48] sm:$0xf] %vm1482_vm6, %v1399_v43  ;;  %v10578_v43 = vld [vmem:[%s9850_s20 + $0xf8] sm:$0xff]  ;;  %9228 = vmatmul.mubr.msk.bf16.gmra.mxu1 %vm472_vm0, %v9462_v10  ;;  %s12734_s20 = scalar_lea.sflag [#allocation5], %s431_s24 }
  0xfa   : > { %v2107_v16 = vpop.permute.xlu1 %2106  ;;  %549 = vst.msk [vmem:[#allocation2 + $0x181] sm:$0xff] %vm472_vm0, %v10566_v5  ;;  %12846 = vst [vmem:[#allocation25_spill] sm:$0xff] %v10578_v43 }
  0xfb   : > { %2195 = vst.msk [vmem:[#allocation3 + $0x58] sm:$0xf] %vm1225_vm5, %v2107_v16  ;;  %1418 = vrot.lane.b32.xlu0 %v10486_v58, %s9628_s30  ;;  %v10571_v16 = vpack.c.bf16 %v1735_v2, %v1735_v2  ;;  %v1736_v58 = vld [vmem:[#allocation2 + $0x172] sm:$0xff] }
  0xfc   : > { %1163 = vrot.lane.b32.xlu1 %v10158_v44, %s9627_s14  ;;  %v2361_v59 = vpop.permute.xlu0 %2360  ;;  %v10580_v63 = vpack.c.bf16 %v1736_v58, %v1736_v58  ;;  %550 = vst.msk [vmem:[#allocation2 + $0x189] sm:$0xff] %vm472_vm0, %v10578_v43 }
  0xfd   : > { %2450 = vst.msk [vmem:[#allocation3 + $0x4c] sm:$0xf] %vm1482_vm6, %v2361_v59 }
  0xfe   : > { %v1401_v38 = vpop.permute.xlu1 %1400  ;;  %2662 = vst.msk [vmem:[#allocation3 + $0x140] sm:$0xf] %vm711_vm3, %v10571_v16  ;;  %2663 = vst.msk [vmem:[#allocation3 + $0x14c] sm:$0xf] %vm711_vm3, %v10580_v63 }
  0xff   : > { %1490 = vst.msk [vmem:[#allocation3 + $0x54] sm:$0xf] %vm1482_vm6, %v1401_v38  ;;  %2380 = vrot.lane.b32.xlu0 %v10234_v36, %s9628_s30 }
 0x100   : > { %2126 = vrot.lane.b32.xlu1 %v10552_v45, %s9627_s14  ;;  %v889_v28 = vpop.permute.xlu0 %888 }
 0x101   : > { %977 = vst.msk [vmem:[#allocation3 + $0x60] sm:$0xf] %vm968_vm4, %v889_v28 }
 0x102   : > { %v2363_v44 = vpop.permute.xlu1 %2362 }
 0x103   : > { %2451 = vst.msk [vmem:[#allocation3 + $0x58] sm:$0xf] %vm1482_vm6, %v2363_v44  ;;  %908 = vrot.lane.b32.xlu0 %v10180_v48, %s9626_s27 }
 0x104   : > { %1420 = vrot.lane.b32.xlu1 %v10492_v31, %s9628_s30  ;;  %v1852_v31 = vpop.permute.xlu0 %1851  ;;  %v2680_v59 = vld [vmem:[#allocation3 + $0x48] sm:$0xff] }
 0x105   : > { %1939 = vst.msk [vmem:[#allocation3 + $0x64] sm:$0xf] %vm968_vm4, %v1852_v31  ;;  %v1983_v31 = vld [vmem:[#allocation2 + $0x110] sm:$0xff] }
 0x106   : > { %v891_v52 = vpop.permute.xlu1 %890 }
 0x107   : > { %978 = vst.msk [vmem:[#allocation3 + $0x6c] sm:$0xf] %vm968_vm4, %v891_v52  ;;  %1871 = vrot.lane.b32.xlu0 %v10253_v50, %s9626_s27  ;;  %v1982_v52 = vld [vmem:[#allocation2 + $0x108] sm:$0xff] }
 0x108   : > { %2382 = vrot.lane.b32.xlu1 %v10240_v47, %s9628_s30  ;;  %v1146_v2 = vpop.permute.xlu0 %1145 }
 0x109   : > { %1234 = vst.msk [vmem:[#allocation3 + $0x60] sm:$0xf] %vm1225_vm5, %v1146_v2  ;;  %v10614_v2 = vpack.c.bf16 %v1983_v31, %v1983_v31 }
 0x10a   : > { %v1854_v38 = vpop.permute.xlu1 %1853  ;;  %v2682_v44 = vld [vmem:[#allocation3 + $0x54] sm:$0xff] }
 0x10b   : > { %v9445_v28 = vld [vmem:[#allocation3 + $0x4c] ss:$12 sps:$4 sm:$0xff]   ;;  %1940 = vst.msk [vmem:[#allocation3 + $0x70] sm:$0xf] %vm968_vm4, %v1854_v38  ;;  %v7835_v58 = vcombine.low %v2680_v59, %v2682_v44  ;;  %1165 = vrot.lane.b32.xlu0 %v10197_v57, %s9627_s14  ;;  %v571_v59 = vld [vmem:[#allocation2 + $0xf0] sm:$0xff] }
 0x10c   : > { %910 = vrot.lane.b32.xlu1 %v10183_v56, %s9626_s27  ;;  %3227 = vmatprep.mubr.bf16.mxu0 %v9445_v28  ;;  %v2109_v34 = vpop.permute.xlu0 %2108  ;;  %v10608_v56 = vpack.c.bf16 %v1982_v52, %v1982_v52  ;;  %v572_v44 = vld [vmem:[#allocation2 + $0xf8] sm:$0xff]  ;;  %v2248_v28 = vld [vmem:[#allocation2 + $0x181] sm:$0xff] }
 0x10d   : > { %3228 = vmatmul.mubr.bf16.gmra.mxu0 %v7835_v58  ;;  %2196 = vst.msk [vmem:[#allocation3 + $0x64] sm:$0xf] %vm1225_vm5, %v2109_v34  ;;  %v8347_v58 = vpack.c.bf16 %v571_v59, %v571_v59  ;;  %v10616_v57 = vpack.c.bf16 %v2248_v28, %v2248_v28 }
 0x10e   : > { %v1148_v48 = vpop.permute.xlu1 %1147 }
 0x10f   : > { %1235 = vst.msk [vmem:[#allocation3 + $0x6c] sm:$0xf] %vm1225_vm5, %v1148_v48  ;;  %v8348_v48 = vpack.c.bf16 %v572_v44, %v572_v44  ;;  %2128 = vrot.lane.b32.xlu0 %v10608_v56, %s9627_s14 }
 0x110   : > { %1873 = vrot.lane.b32.xlu1 %v10262_v49, %s9626_s27  ;;  %v1403_v38 = vpop.permute.xlu0 %1402  ;;  %732 = vst.msk [vmem:[#allocation3 + $0xf0] sm:$0xf] %vm711_vm3, %v8347_v58  ;;  %1705 = vst.msk [vmem:[#allocation3 + $0x16c] sm:$0xf] %vm711_vm3, %v10616_v57 }
 0x111   : > { %1491 = vst.msk [vmem:[#allocation3 + $0x60] sm:$0xf] %vm1482_vm6, %v1403_v38 }
 0x112   : > { %v2111_v10 = vpop.permute.xlu1 %2110  ;;  %733 = vst.msk [vmem:[#allocation3 + $0xfc] sm:$0xf] %vm711_vm3, %v8348_v48 }
 0x113   : > { %2197 = vst.msk [vmem:[#allocation3 + $0x70] sm:$0xf] %vm1225_vm5, %v2111_v10  ;;  %1422 = vrot.lane.b32.xlu0 %v10546_v33, %s9628_s30 }
 0x114   : > { %1167 = vrot.lane.b32.xlu1 %v10206_v53, %s9627_s14  ;;  %v2365_v53 = vpop.permute.xlu0 %2364 }
 0x115   : > { %2452 = vst.msk [vmem:[#allocation3 + $0x64] sm:$0xf] %vm1482_vm6, %v2365_v53  ;;  %v1985_v53 = vld [vmem:[#allocation2 + $0x128] sm:$0xff] }
 0x116   : > { %v1405_v52 = vpop.permute.xlu1 %1404 }
 0x117   : > { %1492 = vst.msk [vmem:[#allocation3 + $0x6c] sm:$0xf] %vm1482_vm6, %v1405_v52  ;;  %2384 = vrot.lane.b32.xlu0 %v10288_v61, %s9628_s30 }
 0x118   : > { %2130 = vrot.lane.b32.xlu1 %v10614_v2, %s9627_s14  ;;  %v893_v31 = vpop.permute.xlu0 %892 }
 0x119   : > { %979 = vst.msk [vmem:[#allocation3 + $0x78] sm:$0xf] %vm968_vm4, %v893_v31 }
 0x11a   : > { %v2367_v34 = vpop.permute.xlu1 %2366 }
 0x11b   : > { %2453 = vst.msk [vmem:[#allocation3 + $0x70] sm:$0xf] %vm1482_vm6, %v2367_v34  ;;  %912 = vrot.lane.b32.xlu0 %v10234_v36, %s9626_s27  ;;  %v1984_v36 = vld [vmem:[#allocation2 + $0x120] sm:$0xff] }
 0x11c   : > { %1424 = vrot.lane.b32.xlu1 %v10552_v45, %s9628_s30  ;;  %v1856_v38 = vpop.permute.xlu0 %1855  ;;  %v2684_v59 = vld [vmem:[#allocation3 + $0x60] sm:$0xff] }
 0x11d   : > { %1941 = vst.msk [vmem:[#allocation3 + $0x7c] sm:$0xf] %vm968_vm4, %v1856_v38  ;;  %v574_v38 = vld [vmem:[#allocation2 + $0x110] sm:$0xff] }
 0x11e   : > { %v895_v10 = vpop.permute.xlu1 %894 }
 0x11f   : > { %980 = vst.msk [vmem:[#allocation3 + $0x84] sm:$0xf] %vm968_vm4, %v895_v10  ;;  %1875 = vrot.lane.b32.xlu0 %v10317_v35, %s9626_s27  ;;  %v573_v10 = vld [vmem:[#allocation2 + $0x108] sm:$0xff] }
 0x120   : > { %2386 = vrot.lane.b32.xlu1 %v10294_v3, %s9628_s30  ;;  %v1150_v28 = vpop.permute.xlu0 %1149 }
 0x121   : > { %1236 = vst.msk [vmem:[#allocation3 + $0x78] sm:$0xf] %vm1225_vm5, %v1150_v28 }
 0x122   : > { %v1858_v33 = vpop.permute.xlu1 %1857  ;;  %v2686_v45 = vld [vmem:[#allocation3 + $0x6c] sm:$0xff] }
 0x123   : > { %v9447_v44 = vld [vmem:[#allocation3 + $0x64] ss:$12 sps:$4 sm:$0xff]   ;;  %1942 = vst.msk [vmem:[#allocation3 + $0x88] sm:$0xf] %vm968_vm4, %v1858_v33  ;;  %v7838_v58 = vcombine.low %v2684_v59, %v2686_v45  ;;  %1169 = vrot.lane.b32.xlu0 %v10253_v50, %s9627_s14  ;;  %v10660_v33 = vpack.c.bf16 %v1985_v53, %v1985_v53  ;;  %v8349_v59 = vpack.c.bf16 %v573_v10, %v573_v10 }
 0x124   : > { %914 = vrot.lane.b32.xlu1 %v10240_v47, %s9626_s27  ;;  %3235 = vmatprep.mubr.bf16.mxu0 %v9447_v44  ;;  %v2113_v52 = vpop.permute.xlu0 %2112  ;;  %v10654_v47 = vpack.c.bf16 %v1984_v36, %v1984_v36  ;;  %v8350_v45 = vpack.c.bf16 %v574_v38, %v574_v38  ;;  %v1986_v38 = vld [vmem:[#allocation2 + $0x138] sm:$0xff] }
 0x125   : > { %3236 = vmatmul.mubr.bf16.gmra.mxu0 %v7838_v58  ;;  %2198 = vst.msk [vmem:[#allocation3 + $0x7c] sm:$0xf] %vm1225_vm5, %v2113_v52  ;;  %v9468_v52 = vld [vmem:[#allocation3 + $0x110] ss:$12 sps:$4 sm:$0xff]  }
 0x126   : > { %v1152_v48 = vpop.permute.xlu1 %1151  ;;  %734 = vst.msk [vmem:[#allocation3 + $0x108] sm:$0xf] %vm711_vm3, %v8349_v59  ;;  %735 = vst.msk [vmem:[#allocation3 + $0x114] sm:$0xf] %vm711_vm3, %v8350_v45  ;;  %v1987_v45 = vld [vmem:[#allocation2 + $0x140] sm:$0xff] }
 0x127   : > { %1237 = vst.msk [vmem:[#allocation3 + $0x84] sm:$0xf] %vm1225_vm5, %v1152_v48  ;;  %2132 = vrot.lane.b32.xlu0 %v10654_v47, %s9627_s14  ;;  %v9467_v48 = vld [vmem:[#allocation3 + $0xf8] ss:$12 sps:$4 sm:$0xff]  }
 0x128   : > { %1877 = vrot.lane.b32.xlu1 %v10326_v20, %s9626_s27  ;;  %v1407_v31 = vpop.permute.xlu0 %1406  ;;  %9231 = vmatprep.mubr.msk.bf16.mxu1 %vm472_vm0, %v9467_v48 }
 0x129   : > { %1493 = vst.msk [vmem:[#allocation3 + $0x78] sm:$0xf] %vm1482_vm6, %v1407_v31  ;;  %9232 = vmatmul.mubr.msk.bf16.gmra.mxu1 %vm472_vm0, %v9468_v52  ;;  %v2242_v52 = vld [vmem:[#allocation2 + $0x139] sm:$0xff] }
 0x12a   : > { %v2115_v34 = vpop.permute.xlu1 %2114 }
 0x12b   : > { %2199 = vst.msk [vmem:[#allocation3 + $0x88] sm:$0xf] %vm1225_vm5, %v2115_v34  ;;  %1426 = vrot.lane.b32.xlu0 %v10608_v56, %s9628_s30 }
 0x12c   : > { %1171 = vrot.lane.b32.xlu1 %v10262_v49, %s9627_s14  ;;  %v2369_v44 = vpop.permute.xlu0 %2368 }
 0x12d   : > { %2454 = vst.msk [vmem:[#allocation3 + $0x7c] sm:$0xf] %vm1482_vm6, %v2369_v44 }
 0x12e   : > { %v1409_v50 = vpop.permute.xlu1 %1408 }
 0x12f   : > { %1494 = vst.msk [vmem:[#allocation3 + $0x84] sm:$0xf] %vm1482_vm6, %v1409_v50  ;;  %2388 = vrot.lane.b32.xlu0 %v10364_v12, %s9628_s30 }
 0x130   : > { %2134 = vrot.lane.b32.xlu1 %v10660_v33, %s9627_s14  ;;  %v897_v28 = vpop.permute.xlu0 %896 }
 0x131   : > { %981 = vst.msk [vmem:[#allocation3 + $0x90] sm:$0xf] %vm968_vm4, %v897_v28  ;;  %v576_v28 = vld [vmem:[#allocation2 + $0x128] sm:$0xff] }
 0x132   : > { %v2371_v49 = vpop.permute.xlu1 %2370 }
 0x133   : > { %2455 = vst.msk [vmem:[#allocation3 + $0x88] sm:$0xf] %vm1482_vm6, %v2371_v49  ;;  %916 = vrot.lane.b32.xlu0 %v10288_v61, %s9626_s27  ;;  %v575_v49 = vld [vmem:[#allocation2 + $0x120] sm:$0xff] }
 0x134   : > { %1428 = vrot.lane.b32.xlu1 %v10614_v2, %s9628_s30  ;;  %v1860_v36 = vpop.permute.xlu0 %1859  ;;  %v2688_v2 = vld [vmem:[#allocation3 + $0x78] sm:$0xff]  ;;  %v8351_v48 = vpack.c.bf16 %v575_v49, %v575_v49 }
 0x135   : > { %1943 = vst.msk [vmem:[#allocation3 + $0x94] sm:$0xf] %vm968_vm4, %v1860_v36  ;;  %v8352_v36 = vpack.c.bf16 %v576_v28, %v576_v28 }
 0x136   : > { %v899_v58 = vpop.permute.xlu1 %898  ;;  %736 = vst.msk [vmem:[#allocation3 + $0x120] sm:$0xf] %vm711_vm3, %v8351_v48 }
 0x137   : > { %982 = vst.msk [vmem:[#allocation3 + $0x9c] sm:$0xf] %vm968_vm4, %v899_v58  ;;  %1879 = vrot.lane.b32.xlu0 %v10389_v60, %s9626_s27  ;;  %v10704_v58 = vpack.c.bf16 %v1987_v45, %v1987_v45 }
 0x138   : > { %2390 = vrot.lane.b32.xlu1 %v10370_v0, %s9628_s30  ;;  %v1154_v31 = vpop.permute.xlu0 %1153  ;;  %737 = vst.msk [vmem:[#allocation3 + $0x12c] sm:$0xf] %vm711_vm3, %v8352_v36 }
 0x139   : > { %1238 = vst.msk [vmem:[#allocation3 + $0x90] sm:$0xf] %vm1225_vm5, %v1154_v31  ;;  %v10716_v31 = vpack.c.bf16 %v2242_v52, %v2242_v52  ;;  %v1989_v52 = vld [vmem:[#allocation2 + $0x158] sm:$0xff] }
 0x13a   : > { %v1862_v56 = vpop.permute.xlu1 %1861  ;;  %v2690_v53 = vld [vmem:[#allocation3 + $0x84] sm:$0xff] }
 0x13b   : > { %v9451_v34 = vld [vmem:[#allocation3 + $0x7c] ss:$12 sps:$4 sm:$0xff]   ;;  %1944 = vst.msk [vmem:[#allocation3 + $0xa0] sm:$0xf] %vm968_vm4, %v1862_v56  ;;  %v7841_v10 = vcombine.low %v2688_v2, %v2690_v53  ;;  %1173 = vrot.lane.b32.xlu0 %v10317_v35, %s9627_s14 }
 0x13c   : > { %918 = vrot.lane.b32.xlu1 %v10294_v3, %s9626_s27  ;;  %3243 = vmatprep.mubr.bf16.mxu0 %v9451_v34  ;;  %v2117_v59 = vpop.permute.xlu0 %2116  ;;  %v10698_v3 = vpack.c.bf16 %v1986_v38, %v1986_v38  ;;  %v1539_v2 = vld [vmem:[#allocation2 + $0x139] sm:$0xff] }
 0x13d   : > { %3244 = vmatmul.mubr.bf16.gmra.mxu0 %v7841_v10  ;;  %2200 = vst.msk [vmem:[#allocation3 + $0x94] sm:$0xf] %vm1225_vm5, %v2117_v59  ;;  %v8479_v53 = vpack.c.bf16 %v1539_v2, %v1539_v2  ;;  %v2243_v10 = vld [vmem:[#allocation2 + $0x141] sm:$0xff] }
 0x13e   : > { %v1156_v61 = vpop.permute.xlu1 %1155  ;;  %v10724_v59 = vpack.c.bf16 %v2243_v10, %v2243_v10 }
 0x13f   : > { %1239 = vst.msk [vmem:[#allocation3 + $0x9c] sm:$0xf] %vm1225_vm5, %v1156_v61  ;;  %2136 = vrot.lane.b32.xlu0 %v10698_v3, %s9627_s14 }
 0x140   : > { %1881 = vrot.lane.b32.xlu1 %v10398_v26, %s9626_s27  ;;  %v1411_v44 = vpop.permute.xlu0 %1410  ;;  %1699 = vst.msk [vmem:[#allocation3 + $0x124] sm:$0xf] %vm711_vm3, %v8479_v53  ;;  %v577_v53 = vld [vmem:[#allocation2 + $0x138] sm:$0xff] }
 0x141   : > { %1495 = vst.msk [vmem:[#allocation3 + $0x90] sm:$0xf] %vm1482_vm6, %v1411_v44  ;;  %v8353_v10 = vpack.c.bf16 %v577_v53, %v577_v53 }
 0x142   : > { %v2119_v50 = vpop.permute.xlu1 %2118 }
 0x143   : > { %2201 = vst.msk [vmem:[#allocation3 + $0xa0] sm:$0xf] %vm1225_vm5, %v2119_v50  ;;  %1430 = vrot.lane.b32.xlu0 %v10654_v47, %s9628_s30 }
 0x144   : > { %1175 = vrot.lane.b32.xlu1 %v10326_v20, %s9627_s14  ;;  %v2373_v56 = vpop.permute.xlu0 %2372  ;;  %v1540_v20 = vld [vmem:[#allocation2 + $0x141] sm:$0xff]  ;;  %738 = vst.msk [vmem:[#allocation3 + $0x138] sm:$0xf] %vm711_vm3, %v8353_v10  ;;  %v1991_v10 = vld [vmem:[#allocation2 + $0x170] sm:$0xff] }
 0x145   : > { %2456 = vst.msk [vmem:[#allocation3 + $0x94] sm:$0xf] %vm1482_vm6, %v2373_v56  ;;  %v8480_v34 = vpack.c.bf16 %v1540_v20, %v1540_v20  ;;  %v10752_v20 = vpack.c.bf16 %v1989_v52, %v1989_v52 }
 0x146   : > { %v1413_v35 = vpop.permute.xlu1 %1412 }
 0x147   : > { %1496 = vst.msk [vmem:[#allocation3 + $0x9c] sm:$0xf] %vm1482_vm6, %v1413_v35  ;;  %2392 = vrot.lane.b32.xlu0 %v10716_v31, %s9628_s30 }
 0x148   : > { %2138 = vrot.lane.b32.xlu1 %v10704_v58, %s9627_s14  ;;  %1700 = vst.msk [vmem:[#allocation3 + $0x130] sm:$0xf] %vm711_vm3, %v8480_v34  ;;  %v901_v38 = vpop.permute.xlu0 %900  ;;  %v578_v34 = vld [vmem:[#allocation2 + $0x140] sm:$0xff] }
 0x149   : > { %983 = vst.msk [vmem:[#allocation3 + $0xa8] sm:$0xf] %vm968_vm4, %v901_v38  ;;  %v2500_v38 = vld [vmem:[#allocation2 + $0x152] sm:$0xff] }
 0x14a   : > { %v2375_v61 = vpop.permute.xlu1 %2374 }
 0x14b   : > { %2457 = vst.msk [vmem:[#allocation3 + $0xa0] sm:$0xf] %vm1482_vm6, %v2375_v61  ;;  %920 = vrot.lane.b32.xlu0 %v10364_v12, %s9626_s27  ;;  %v1988_v12 = vld [vmem:[#allocation2 + $0x150] sm:$0xff]  ;;  %v8354_v61 = vpack.c.bf16 %v578_v34, %v578_v34  ;;  %v1990_v34 = vld [vmem:[#allocation2 + $0x168] sm:$0xff] }
 0x14c   : > { %1432 = vrot.lane.b32.xlu1 %v10660_v33, %s9628_s30  ;;  %v1864_v45 = vpop.permute.xlu0 %1863  ;;  %v2692_v50 = vld [vmem:[#allocation3 + $0x90] sm:$0xff] }
 0x14d   : > { %1945 = vst.msk [vmem:[#allocation3 + $0xac] sm:$0xf] %vm968_vm4, %v1864_v45  ;;  %v8607_v45 = vpack.c.bf16 %v2500_v38, %v2500_v38 }
 0x14e   : > { %v903_v47 = vpop.permute.xlu1 %902  ;;  %739 = vst.msk [vmem:[#allocation3 + $0x144] sm:$0xf] %vm711_vm3, %v8354_v61 }
 0x14f   : > { %984 = vst.msk [vmem:[#allocation3 + $0xb4] sm:$0xf] %vm968_vm4, %v903_v47  ;;  %1883 = vrot.lane.b32.xlu0 %v10449_v4, %s9626_s27 }
 0x150   : > { %2394 = vrot.lane.b32.xlu1 %v10724_v59, %s9628_s30  ;;  %v1158_v28 = vpop.permute.xlu0 %1157  ;;  %2660 = vst.msk [vmem:[#allocation3 + $0x128] sm:$0xf] %vm711_vm3, %v8607_v45  ;;  %v579_v45 = vld [vmem:[#allocation2 + $0x150] sm:$0xff] }
 0x151   : > { %1240 = vst.msk [vmem:[#allocation3 + $0xa8] sm:$0xf] %vm1225_vm5, %v1158_v28  ;;  %v1733_v28 = vld [vmem:[#allocation2 + $0x152] sm:$0xff] }
 0x152   : > { %v1866_v33 = vpop.permute.xlu1 %1865  ;;  %v2694_v44 = vld [vmem:[#allocation3 + $0x9c] sm:$0xff] }
 0x153   : > { %v9453_v49 = vld [vmem:[#allocation3 + $0x94] ss:$12 sps:$4 sm:$0xff]   ;;  %1946 = vst.msk [vmem:[#allocation3 + $0xb8] sm:$0xf] %vm968_vm4, %v1866_v33  ;;  %v7844_v48 = vcombine.low %v2692_v50, %v2694_v44  ;;  %1177 = vrot.lane.b32.xlu0 %v10389_v60, %s9627_s14  ;;  %v1734_v60 = vld [vmem:[#allocation2 + $0x15a] sm:$0xff] }
 0x154   : > { %922 = vrot.lane.b32.xlu1 %v10370_v0, %s9626_s27  ;;  %3251 = vmatprep.mubr.bf16.mxu0 %v9453_v49  ;;  %v2121_v35 = vpop.permute.xlu0 %2120  ;;  %v10746_v0 = vpack.c.bf16 %v1988_v12, %v1988_v12  ;;  %v10756_v33 = vpack.c.bf16 %v1734_v60, %v1734_v60 }
 0x155   : > { %3252 = vmatmul.mubr.bf16.gmra.mxu0 %v7844_v48  ;;  %2202 = vst.msk [vmem:[#allocation3 + $0xac] sm:$0xf] %vm1225_vm5, %v2121_v35 }
 0x156   : > { %v1160_v36 = vpop.permute.xlu1 %1159  ;;  %2661 = vst.msk [vmem:[#allocation3 + $0x134] sm:$0xf] %vm711_vm3, %v10756_v33 }
 0x157   : > { %1241 = vst.msk [vmem:[#allocation3 + $0xb4] sm:$0xf] %vm1225_vm5, %v1160_v36  ;;  %2140 = vrot.lane.b32.xlu0 %v10746_v0, %s9627_s14  ;;  %v9474_v36 = vld [vmem:[#allocation3 + $0x140] ss:$12 sps:$4 sm:$0xff]  }
 0x158   : > { %1885 = vrot.lane.b32.xlu1 %v10458_v9, %s9626_s27  ;;  %v1415_v2 = vpop.permute.xlu0 %1414 }
 0x159   : > { %1497 = vst.msk [vmem:[#allocation3 + $0xa8] sm:$0xf] %vm1482_vm6, %v1415_v2 }
 0x15a   : > { %v2123_v56 = vpop.permute.xlu1 %2122 }
 0x15b   : > { %2203 = vst.msk [vmem:[#allocation3 + $0xb8] sm:$0xf] %vm1225_vm5, %v2123_v56  ;;  %1434 = vrot.lane.b32.xlu0 %v10698_v3, %s9628_s30 }
 0x15c   : > { %1179 = vrot.lane.b32.xlu1 %v10398_v26, %s9627_s14  ;;  %v2377_v26 = vpop.permute.xlu0 %2376 }
 0x15d   : > { %2458 = vst.msk [vmem:[#allocation3 + $0xac] sm:$0xf] %vm1482_vm6, %v2377_v26  ;;  %v9473_v3 = vld [vmem:[#allocation3 + $0x128] ss:$12 sps:$4 sm:$0xff]  }
 0x15e   : > { %v1417_v47 = vpop.permute.xlu1 %1416  ;;  %9235 = vmatprep.mubr.msk.bf16.mxu1 %vm472_vm0, %v9473_v3  ;;  %v580_v26 = vld [vmem:[#allocation2 + $0x158] sm:$0xff] }
 0x15f   : > { %1498 = vst.msk [vmem:[#allocation3 + $0xb4] sm:$0xf] %vm1482_vm6, %v1417_v47  ;;  %2396 = vrot.lane.b32.xlu0 %v10494_v1, %s9628_s30  ;;  %9236 = vmatmul.mubr.msk.bf16.gmra.mxu1 %vm472_vm0, %v9474_v36  ;;  %v10803_v47 = vpack.c.bf16 %v1991_v10, %v1991_v10  ;;  %v1544_v3 = vld [vmem:[#allocation2 + $0x171] sm:$0xff] }
 0x160   : > { %2142 = vrot.lane.b32.xlu1 %v10752_v20, %s9627_s14  ;;  %v905_v44 = vpop.permute.xlu0 %904 }
 0x161   : > { %985 = vst.msk [vmem:[#allocation3 + $0xc0] sm:$0xf] %vm968_vm4, %v905_v44 }
 0x162   : > { %v2379_v50 = vpop.permute.xlu1 %2378 }
 0x163   : > { %2459 = vst.msk [vmem:[#allocation3 + $0xb8] sm:$0xf] %vm1482_vm6, %v2379_v50  ;;  %924 = vrot.lane.b32.xlu0 %v10716_v31, %s9626_s27  ;;  %v8356_v50 = vpack.c.bf16 %v580_v26, %v580_v26 }
 0x164   : > { %1436 = vrot.lane.b32.xlu1 %v10704_v58, %s9628_s30  ;;  %v1868_v48 = vpop.permute.xlu0 %1867  ;;  %v10781_v58 = vpack.c.bf16 %v1733_v28, %v1733_v28  ;;  %v2696_v35 = vld [vmem:[#allocation3 + $0xa8] sm:$0xff] }
 0x165   : > { %1947 = vst.msk [vmem:[#allocation3 + $0xc4] sm:$0xf] %vm968_vm4, %v1868_v48 }
 0x166   : > { %v907_v49 = vpop.permute.xlu1 %906  ;;  %741 = vst.msk [vmem:[#allocation3 + $0x15c] sm:$0xf] %vm711_vm3, %v8356_v50 }
 0x167   : > { %986 = vst.msk [vmem:[#allocation3 + $0xcc] sm:$0xf] %vm968_vm4, %v907_v49  ;;  %1887 = vrot.lane.b32.xlu0 %v10781_v58, %s9626_s27  ;;  %v2246_v49 = vld [vmem:[#allocation2 + $0x169] sm:$0xff] }
 0x168   : > { %2398 = vrot.lane.b32.xlu1 %v10500_v30, %s9628_s30  ;;  %v1162_v2 = vpop.permute.xlu0 %1161  ;;  %v10815_v36 = vpack.c.bf16 %v2246_v49, %v2246_v49  ;;  %v10845_v49 = vld [vmem:[%s12776_s2] ss:$0 sm:$0xff] }
 0x169   : > { %1242 = vst.msk [vmem:[#allocation3 + $0xc0] sm:$0xf] %vm1225_vm5, %v1162_v2 }
 0x16a   : > { %v1870_v12 = vpop.permute.xlu1 %1869  ;;  %v2698_v52 = vld [vmem:[#allocation3 + $0xb4] sm:$0xff] }
 0x16b   : > { %v9457_v56 = vld [vmem:[#allocation3 + $0xac] ss:$12 sps:$4 sm:$0xff]   ;;  %1948 = vst.msk [vmem:[#allocation3 + $0xd0] sm:$0xf] %vm968_vm4, %v1870_v12  ;;  %v7847_v53 = vcombine.low %v2696_v35, %v2698_v52  ;;  %1181 = vrot.lane.b32.xlu0 %v10449_v4, %s9627_s14  ;;  %v8355_v4 = vpack.c.bf16 %v579_v45, %v579_v45  ;;  %v2247_v12 = vld [vmem:[#allocation2 + $0x171] sm:$0xff]  ;;  %v8484_v35 = vpack.c.bf16 %v1544_v3, %v1544_v3 }
 0x16c   : > { %926 = vrot.lane.b32.xlu1 %v10724_v59, %s9626_s27  ;;  %3259 = vmatprep.mubr.bf16.mxu0 %v9457_v56  ;;  %v2125_v60 = vpop.permute.xlu0 %2124  ;;  %v10797_v59 = vpack.c.bf16 %v1990_v34, %v1990_v34  ;;  %v10823_v2 = vpack.c.bf16 %v2247_v12, %v2247_v12  ;;  %v1993_v3 = vld [vmem:[#allocation2 + $0x188] sm:$0xff] }
 0x16d   : > { %3260 = vmatmul.mubr.bf16.gmra.mxu0 %v7847_v53  ;;  %2204 = vst.msk [vmem:[#allocation3 + $0xc4] sm:$0xf] %vm1225_vm5, %v2125_v60 }
 0x16e   : > { %v1164_v31 = vpop.permute.xlu1 %1163  ;;  %740 = vst.msk [vmem:[#allocation3 + $0x150] sm:$0xf] %vm711_vm3, %v8355_v4  ;;  %1704 = vst.msk [vmem:[#allocation3 + $0x160] sm:$0xf] %vm711_vm3, %v8484_v35  ;;  %v1992_v4 = vld [vmem:[#allocation2 + $0x180] sm:$0xff] }
 0x16f   : > { %1243 = vst.msk [vmem:[#allocation3 + $0xcc] sm:$0xf] %vm1225_vm5, %v1164_v31  ;;  %2144 = vrot.lane.b32.xlu0 %v10797_v59, %s9627_s14 }
 0x170   : > { %1889 = vrot.lane.b32.xlu1 %v10756_v33, %s9626_s27  ;;  %v1419_v38 = vpop.permute.xlu0 %1418 }
 0x171   : > { %1499 = vst.msk [vmem:[#allocation3 + $0xc0] sm:$0xf] %vm1482_vm6, %v1419_v38 }
 0x172   : > { %v2127_v61 = vpop.permute.xlu1 %2126 }
 0x173   : > { %2205 = vst.msk [vmem:[#allocation3 + $0xd0] sm:$0xf] %vm1225_vm5, %v2127_v61  ;;  %1438 = vrot.lane.b32.xlu0 %v10746_v0, %s9628_s30 }
 0x174   : > { %1183 = vrot.lane.b32.xlu1 %v10458_v9, %s9627_s14  ;;  %v2381_v28 = vpop.permute.xlu0 %2380  ;;  %v1543_v9 = vld [vmem:[#allocation2 + $0x169] sm:$0xff] }
 0x175   : > { %2460 = vst.msk [vmem:[#allocation3 + $0xc4] sm:$0xf] %vm1482_vm6, %v2381_v28  ;;  %v8483_v48 = vpack.c.bf16 %v1543_v9, %v1543_v9 }
 0x176   : > { %v1421_v44 = vpop.permute.xlu1 %1420 }
 0x177   : > { %1500 = vst.msk [vmem:[#allocation3 + $0xcc] sm:$0xf] %vm1482_vm6, %v1421_v44  ;;  %2400 = vrot.lane.b32.xlu0 %v10815_v36, %s9628_s30 }
 0x178   : > { %2146 = vrot.lane.b32.xlu1 %v10803_v47, %s9627_s14  ;;  %1703 = vst.msk [vmem:[#allocation3 + $0x154] sm:$0xf] %vm711_vm3, %v8483_v48  ;;  %v909_v56 = vpop.permute.xlu0 %908  ;;  %v10854_v48 = vpack.c.bf16 %v1992_v4, %v1992_v4 }
 0x179   : > { %987 = vst.msk [vmem:[#allocation3 + $0xd8] sm:$0xf] %vm968_vm4, %v909_v56 }
 0x17a   : > { %v2383_v52 = vpop.permute.xlu1 %2382 }
 0x17b   : > { %2461 = vst.msk [vmem:[#allocation3 + $0xd0] sm:$0xf] %vm1482_vm6, %v2383_v52  ;;  %928 = vrot.lane.b32.xlu0 %v10494_v1, %s9626_s27 }
 0x17c   : > { %1440 = vrot.lane.b32.xlu1 %v10752_v20, %s9628_s30  ;;  %v1872_v53 = vpop.permute.xlu0 %1871  ;;  %v10833_v20 = vpop.f32.mrf.mxu1  ;;  %v2700_v34 = vld [vmem:[#allocation3 + $0xc0] sm:$0xff] }
 0x17d   : > { %1949 = vst.msk [vmem:[#allocation3 + $0xdc] sm:$0xf] %vm968_vm4, %v1872_v53 }
 0x17e   : > { %v911_v0 = vpop.permute.xlu1 %910  ;;  %v3366_v1 = vpop.f32.mrf.mxu1 }
 0x17f   : > { %988 = vst.msk [vmem:[#allocation3 + $0xe4] sm:$0xf] %vm968_vm4, %v911_v0  ;;  %1891 = vrot.lane.b32.xlu0 %v10571_v16, %s9626_s27 }
 0x180   : > { %2402 = vrot.lane.b32.xlu1 %v10823_v2, %s9628_s30  ;;  %v1166_v61 = vpop.permute.xlu0 %1165  ;;  %v10852_v9 = vpop.f32.mrf.mxu1 }
 0x181   : > { %1244 = vst.msk [vmem:[#allocation3 + $0xd8] sm:$0xf] %vm1225_vm5, %v1166_v61 }
 0x182   : > { %v1874_v31 = vpop.permute.xlu1 %1873  ;;  %v2702_v60 = vld [vmem:[#allocation3 + $0xcc] sm:$0xff] }
 0x183   : > { %v9459_v10 = vld [vmem:[#allocation3 + $0xc4] ss:$12 sps:$4 sm:$0xff]   ;;  %1950 = vst.msk [vmem:[#allocation3 + $0xe8] sm:$0xf] %vm968_vm4, %v1874_v31  ;;  %v7850_v38 = vcombine.low %v2700_v34, %v2702_v60  ;;  %1185 = vrot.lane.b32.xlu0 %v10781_v58, %s9627_s14  ;;  %v10861_v58 = vpack.c.bf16 %v1993_v3, %v1993_v3  ;;  %v581_v31 = vld [vmem:[#allocation2 + $0x168] sm:$0xff]  ;;  %v3369_v60 = vpop.f32.mrf.mxu1 }
 0x184   : > { %930 = vrot.lane.b32.xlu1 %v10500_v30, %s9626_s27  ;;  %3267 = vmatprep.mubr.bf16.mxu0 %v9459_v10  ;;  %v2129_v44 = vpop.permute.xlu0 %2128  ;;  %v582_v34 = vld [vmem:[#allocation2 + $0x170] sm:$0xff]  ;;  %v8357_v10 = vpack.c.bf16 %v581_v31, %v581_v31 }
 0x185   : > { %v8920_v45 = vpop.f32.mrf.mxu0  ;;  %3268 = vmatmul.mubr.bf16.gmra.mxu0 %v7850_v38  ;;  %2206 = vst.msk [vmem:[#allocation3 + $0xdc] sm:$0xf] %vm1225_vm5, %v2129_v44  ;;  %v8358_v61 = vpack.c.bf16 %v582_v34, %v582_v34  ;;  %v2504_v38 = vld [vmem:[#allocation2 + $0x182] sm:$0xff]  ;;  %v2506_v44 = vld [vmem:[#allocation2 + $0x19a] sm:$0xff] }
 0x186   : > { %v1168_v26 = vpop.permute.xlu1 %1167  ;;  %742 = vst.msk [vmem:[#allocation3 + $0x168] sm:$0xf] %vm711_vm3, %v8357_v10  ;;  %v8613_v3 = vpack.c.bf16 %v2506_v44, %v2506_v44  ;;  %v1737_v10 = vld [vmem:[#allocation2 + $0x182] sm:$0xff] }
 0x187   : > { %1245 = vst.msk [vmem:[#allocation3 + $0xe4] sm:$0xf] %vm1225_vm5, %v1168_v26  ;;  %v8921_v50 = vpop.f32.mrf.mxu0  ;;  %2148 = vrot.lane.b32.xlu0 %v10854_v48, %s9627_s14 }
 0x188   : > { %1893 = vrot.lane.b32.xlu1 %v10580_v63, %s9626_s27  ;;  %v8922_v30 = vadd.f32 %v8921_v50, %v8920_v45  ;;  %v1423_v56 = vpop.permute.xlu0 %1422  ;;  %v2505_v45 = vld [vmem:[#allocation2 + $0x18a] sm:$0xff]  ;;  %743 = vst.msk [vmem:[#allocation3 + $0x174] sm:$0xf] %vm711_vm3, %v8358_v61  ;;  %2666 = vst.msk [vmem:[#allocation3 + $0x170] sm:$0xf] %vm711_vm3, %v8613_v3 }
 0x189   : > { %v8923_v28 = vpop.f32.mrf.mxu0  ;;  %1501 = vst.msk [vmem:[#allocation3 + $0xd8] sm:$0xf] %vm1482_vm6, %v1423_v56  ;;  %v8612_v50 = vpack.c.bf16 %v2505_v45, %v2505_v45  ;;  %v2249_v56 = vld [vmem:[#allocation2 + $0x189] sm:$0xff] }
 0x18a   : > { %v2131_v12 = vpop.permute.xlu1 %2130  ;;  %v3206_v35 = vadd.f32 %v8922_v30, %v10845_v49  ;;  %v2507_v30 = vld [vmem:[#allocation2 + $0x1a2] sm:$0xff] }
 0x18b   : > { %2207 = vst.msk [vmem:[#allocation3 + $0xe8] sm:$0xf] %vm1225_vm5, %v2131_v12  ;;  %v8924_v52 = vpop.f32.mrf.mxu0  ;;  %v8614_v12 = vpack.c.bf16 %v2507_v30, %v2507_v30  ;;  %1442 = vrot.lane.b32.xlu0 %v10797_v59, %s9628_s30  ;;  %v8580_v59 = vpack.c.bf16 %v2249_v56, %v2249_v56 }
 0x18c   : > { %v3367_v0 = vadd.f32 %v3366_v1, %v3206_v35  ;;  %1187 = vrot.lane.b32.xlu1 %v10756_v33, %s9627_s14  ;;  %v8925_v53 = vadd.f32 %v8924_v52, %v8923_v28  ;;  %v8611_v33 = vpack.c.bf16 %v2504_v38, %v2504_v38  ;;  %v2385_v28 = vpop.permute.xlu0 %2384  ;;  %v1546_v52 = vld [vmem:[#allocation2 + $0x189] sm:$0xff]  ;;  %2665 = vst.msk [vmem:[#allocation3 + $0x164] sm:$0xf] %vm711_vm3, %v8612_v50 }
 0x18d   : > { %2462 = vst.msk [vmem:[#allocation3 + $0xdc] sm:$0xf] %vm1482_vm6, %v2385_v28  ;;  %v1738_v38 = vld [vmem:[#allocation2 + $0x18a] sm:$0xff] }
 0x18e   : > { %v3493_v26 = vmax.f32 %v3367_v0, 0.0  ;;  %v1425_v1 = vpop.permute.xlu1 %1424  ;;  %v3209_v4 = vadd.f32 %v8925_v53, %v10845_v49  ;;  %2664 = vst.msk [vmem:[#allocation3 + $0x158] sm:$0xf] %vm711_vm3, %v8611_v33  ;;  %v8486_v0 = vpack.c.bf16 %v1546_v52, %v1546_v52  ;;  %2667 = vst.msk [vmem:[#allocation3 + $0x17c] sm:$0xf] %vm711_vm3, %v8614_v12 }
 0x18f   : > { %1502 = vst.msk [vmem:[#allocation3 + $0xe4] sm:$0xf] %vm1482_vm6, %v1425_v1  ;;  %2404 = vrot.lane.b32.xlu0 %v10616_v57, %s9628_s30 }
 0x190   : > { %3525 = vst.msk [vmem:[#allocation2 + $0x19] sm:$0xff] %vm472_vm0, %v3493_v26  ;;  %v3370_v35 = vadd.f32 %v3369_v60, %v3209_v4  ;;  %2150 = vrot.lane.b32.xlu1 %v10861_v58, %s9627_s14  ;;  %v913_v34 = vpop.permute.xlu0 %912  ;;  %v8517_v4 = vpack.c.bf16 %v1737_v10, %v1737_v10 }
 0x191   : > { %1706 = vst.msk [vmem:[#allocation3 + $0x178] sm:$0xf] %vm711_vm3, %v8486_v0 }
 0x192   : > { %v3494_v53 = vmax.f32 %v3370_v35, 0.0  ;;  %v2387_v31 = vpop.permute.xlu1 %2386  ;;  %989 = vst.msk [vmem:[#allocation3 + $0xf0] sm:$0xf] %vm968_vm4, %v913_v34  ;;  %v1994_v34 = vld [vmem:[#allocation2 + $0x198] sm:$0xff] }
 0x193   : > { %2463 = vst.msk [vmem:[#allocation3 + $0xe8] sm:$0xf] %vm1482_vm6, %v2387_v31  ;;  %932 = vrot.lane.b32.xlu0 %v10815_v36, %s9626_s27 }
 0x194   : > { %3526 = vst.msk [vmem:[#allocation2 + $0x21] sm:$0xff] %vm472_vm0, %v3494_v53  ;;  %1444 = vrot.lane.b32.xlu1 %v10803_v47, %s9628_s30  ;;  %v1876_v61 = vpop.permute.xlu0 %1875  ;;  %v2704_v26 = vld [vmem:[#allocation3 + $0xd8] sm:$0xff] }
 0x195   : > { %1951 = vst.msk [vmem:[#allocation3 + $0xf4] sm:$0xf] %vm968_vm4, %v1876_v61  ;;  %v9479_v47 = vld [vmem:[#allocation3 + $0x158] ss:$12 sps:$4 sm:$0xff]   ;;  %v9480_v57 = vld [vmem:[#allocation3 + $0x170] ss:$12 sps:$4 sm:$0xff]   ;;  %v8549_v61 = vpack.c.bf16 %v1994_v34, %v1994_v34 }
 0x196   : > { %v915_v60 = vpop.permute.xlu1 %914  ;;  %9239 = vmatprep.mubr.msk.bf16.mxu1 %vm472_vm0, %v9479_v47  ;;  %5667 = vst.msk [vmem:[#allocation3 + $0x170] sm:$0xf] %vm711_vm3, %v8613_v3  ;;  %5668 = vst.msk [vmem:[#allocation3 + $0x17c] sm:$0xf] %vm711_vm3, %v8614_v12  ;;  %v8518_v3 = vpack.c.bf16 %v1738_v38, %v1738_v38  ;;  %v1995_v38 = vld [vmem:[#allocation2 + $0x1a0] sm:$0xff] }
 0x197   : > { %990 = vst.msk [vmem:[#allocation3 + $0xfc] sm:$0xf] %vm968_vm4, %v915_v60  ;;  %v3751_v45 = vld [vmem:[#allocation2 + $0x19] sm:$0xff]  ;;  %9240 = vmatmul.mubr.msk.bf16.gmra.mxu1 %vm472_vm0, %v9480_v57  ;;  %1895 = vrot.lane.b32.xlu0 %v8517_v4, %s9626_s27  ;;  %v2251_v34 = vld [vmem:[#allocation2 + $0x1a1] sm:$0xff] }
 0x198   : > { %2406 = vrot.lane.b32.xlu1 %v8580_v59, %s9628_s30  ;;  %v10890_v1 = vpack.c.bf16 %v3751_v45, %v3751_v45  ;;  %v3559_v30 = vld [vmem:[#allocation2 + $0x18] sm:$0xff]  ;;  %v1170_v28 = vpop.permute.xlu0 %1169 }
 0x199   : > { %v8617_v36 = vpack.c.bf16 %v3559_v30, %v3559_v30  ;;  %1246 = vst.msk [vmem:[#allocation3 + $0xf0] sm:$0xf] %vm1225_vm5, %v1170_v28  ;;  %v3558_v30 = vld [vmem:[#allocation2 + $0x8] sm:$0xff] }
 0x19a   : > { %v1878_v33 = vpop.permute.xlu1 %1877  ;;  %v2706_v50 = vld [vmem:[#allocation3 + $0xe4] sm:$0xff]  ;;  %4677 = vst.msk [vmem:[#allocation3 + $0x4] sm:$0xf] %vm711_vm3, %v10890_v1 }
 0x19b   : > { %v9463_v44 = vld [vmem:[#allocation3 + $0xdc] ss:$12 sps:$4 sm:$0xff]   ;;  %1952 = vst.msk [vmem:[#allocation3 + $0x100] sm:$0xf] %vm968_vm4, %v1878_v33  ;;  %v7853_v35 = vcombine.low %v2704_v26, %v2706_v50  ;;  %v3752_v52 = vld [vmem:[#allocation2 + $0x21] sm:$0xff]  ;;  %1189 = vrot.lane.b32.xlu0 %v10571_v16, %s9627_s14  ;;  %v8550_v50 = vpack.c.bf16 %v1995_v38, %v1995_v38 }
 0x19c   : > { %934 = vrot.lane.b32.xlu1 %v10823_v2, %s9626_s27  ;;  %3275 = vmatprep.mubr.bf16.mxu0 %v9463_v44  ;;  %v3560_v12 = vld [vmem:[#allocation2 + $0x20] sm:$0xff]  ;;  %v10905_v0 = vpack.c.bf16 %v3752_v52, %v3752_v52  ;;  %3719 = vst.msk [vmem:[#allocation3 + $0x18] sm:$0xf] %vm711_vm3, %v8617_v36  ;;  %v2133_v2 = vpop.permute.xlu0 %2132  ;;  %v9481_v44 = vld [vmem:[%s12777_s3 + $0x78] sm:$0xff]   ;;  %v10956_v38 = vld [vmem:[%s12777_s3 + $0x88] sm:$0xff]  }
 0x19d   : > { %v8926_v56 = vpop.f32.mrf.mxu0  ;;  %3276 = vmatmul.mubr.bf16.gmra.mxu0 %v7853_v35  ;;  %v8618_v53 = vpack.c.bf16 %v3560_v12, %v3560_v12  ;;  %2208 = vst.msk [vmem:[#allocation3 + $0xf4] sm:$0xf] %vm1225_vm5, %v2133_v2  ;;  %v3557_v16 = vld [vmem:[#allocation2] sm:$0xff]  ;;  %v8616_v35 = vpack.c.bf16 %v3558_v30, %v3558_v30  ;;  %9034 = vmatprep.subr.bf16.mxu1 %v9481_v44  ;;  %v9484_v2 = vld [vmem:[%s12777_s3 + $0x30] sm:$0xff]   ;;  %v10974_v30 = vpop.f32.mrf.mxu1 }
 0x19e   : > { %v1172_v31 = vpop.permute.xlu1 %1171  ;;  %4678 = vst.msk [vmem:[#allocation3 + $0x10] sm:$0xf] %vm711_vm3, %v10905_v0  ;;  %v8615_v28 = vpack.c.bf16 %v3557_v16, %v3557_v16  ;;  %v2250_v52 = vld [vmem:[#allocation2 + $0x199] sm:$0xff]  ;;  %9243 = vmatprep.subr.bf16.mxu0 %v10956_v38 }
 0x19f   : > { %1247 = vst.msk [vmem:[#allocation3 + $0xfc] sm:$0xf] %vm1225_vm5, %v1172_v31  ;;  %v8927_v59 = vpop.f32.mrf.mxu0  ;;  %2152 = vrot.lane.b32.xlu0 %v8549_v61, %s9627_s14  ;;  %v8581_v31 = vpack.c.bf16 %v2250_v52, %v2250_v52  ;;  %v9487_v61 = vld [vmem:[%s12777_s3 + $0x68] sm:$0xff]   ;;  %9244 = vmatpush3.bf16.msra.mxu0 %v10956_v38  ;;  %v9492_v16 = vld [vmem:[%s12777_s3 + $0x80] sm:$0xff]  }
 0x1a0   : > { %3720 = vst.msk [vmem:[#allocation3 + $0x24] sm:$0xf] %vm711_vm3, %v8618_v53  ;;  %1897 = vrot.lane.b32.xlu1 %v8518_v3, %s9626_s27  ;;  %v8928_v60 = vadd.f32 %v8927_v59, %v8926_v56  ;;  %v1427_v47 = vpop.permute.xlu0 %1426  ;;  %3717 = vst.msk [vmem:[#allocation3] sm:$0xf] %vm711_vm3, %v8615_v28  ;;  %v9483_v53 = vld [vmem:[%s12777_s3 + $0x70] sm:$0xff]   ;;  %v4005_v28 = vld [vmem:[#allocation2 + $0x2] sm:$0xff]  ;;  %9245 = vmatprep.subr.bf16.mxu0 %v9492_v16 }
 0x1a1   : > { %v8929_v10 = vpop.f32.mrf.mxu0  ;;  %1503 = vst.msk [vmem:[#allocation3 + $0xf0] sm:$0xf] %vm1482_vm6, %v1427_v47 }
 0x1a2   : > { %v3214_v45 = vadd.f32 %v8928_v60, %v10845_v49  ;;  %v2135_v26 = vpop.permute.xlu1 %2134  ;;  %3718 = vst.msk [vmem:[#allocation3 + $0xc] sm:$0xf] %vm711_vm3, %v8616_v35  ;;  %v9493_v35 = vld [vmem:[%s12777_s3 + $0x20] sm:$0xff]  }
 0x1a3   : > { %2209 = vst.msk [vmem:[#allocation3 + $0x100] sm:$0xf] %vm1225_vm5, %v2135_v26  ;;  %v8930_v4 = vpop.f32.mrf.mxu0  ;;  %1446 = vrot.lane.b32.xlu0 %v10854_v48, %s9628_s30  ;;  %v8582_v48 = vpack.c.bf16 %v2251_v34, %v2251_v34  ;;  %v3750_v26 = vld [vmem:[#allocation2 + $0x9] sm:$0xff]  ;;  %9246 = vmatpush3.bf16.msra.mxu0 %v9492_v16 }
 0x1a4   : > { %v3375_v57 = vadd.f32 %v10833_v20, %v3214_v45  ;;  %1191 = vrot.lane.b32.xlu1 %v10580_v63, %s9627_s14  ;;  %v8931_v33 = vadd.f32 %v8930_v4, %v8929_v10  ;;  %v9482_v20 = vld [vmem:[%s12777_s3 + $0x38] sm:$0xff]   ;;  %v2389_v12 = vpop.permute.xlu0 %2388 }
 0x1a5   : > { %9035 = vmatpush3.bf16.msra.mxu1 %v9482_v20  ;;  %2464 = vst.msk [vmem:[#allocation3 + $0xf4] sm:$0xf] %vm1482_vm6, %v2389_v12 }
 0x1a6   : > { %v3495_v36 = vmax.f32 %v3375_v57, 0.0  ;;  %v3217_v63 = vadd.f32 %v8931_v33, %v10845_v49  ;;  %v1429_v3 = vpop.permute.xlu1 %1428  ;;  %9036 = vmatprep.subr.bf16.mxu1 %v9483_v53  ;;  %v4709_v57 = vld [vmem:[#allocation2 + $0x1a] sm:$0xff]  ;;  %v8648_v33 = vpack.c.bf16 %v3750_v26, %v3750_v26  ;;  %v3382_v26 = vpop.f32.mrf.mxu1 }
 0x1a7   : > { %1504 = vst.msk [vmem:[#allocation3 + $0xfc] sm:$0xf] %vm1482_vm6, %v1429_v3  ;;  %2408 = vrot.lane.b32.xlu0 %v8581_v31, %s9628_s30  ;;  %v10980_v31 = vpack.c.bf16 %v4709_v57, %v4709_v57 }
 0x1a8   : > { %3527 = vst.msk [vmem:[#allocation2 + $0x31] sm:$0xff] %vm472_vm0, %v3495_v36  ;;  %v3378_v56 = vadd.f32 %v10852_v9, %v3217_v63  ;;  %2154 = vrot.lane.b32.xlu1 %v8550_v50, %s9627_s14  ;;  %v3749_v9 = vld [vmem:[#allocation2 + $0x1] sm:$0xff]  ;;  %v917_v10 = vpop.permute.xlu0 %916 }
 0x1a9   : > { %9037 = vmatpush3.bf16.msra.mxu1 %v9484_v2  ;;  %991 = vst.msk [vmem:[#allocation3 + $0x108] sm:$0xf] %vm968_vm4, %v917_v10  ;;  %v8647_v45 = vpack.c.bf16 %v3749_v9, %v3749_v9  ;;  %v9491_v50 = vld [vmem:[%s12777_s3 + $0x60] sm:$0xff]   ;;  %v9494_v10 = vld [vmem:[%s12777_s3 + $0x58] sm:$0xff]  }
 0x1aa   : > { %v3496_v59 = vmax.f32 %v3378_v56, 0.0  ;;  %v2391_v60 = vpop.permute.xlu1 %2390  ;;  %9038 = vmatprep.subr.bf16.mxu1 %v9487_v61  ;;  %v4710_v2 = vld [vmem:[#allocation2 + $0x22] sm:$0xff] }
 0x1ab   : > { %2465 = vst.msk [vmem:[#allocation3 + $0x100] sm:$0xf] %vm1482_vm6, %v2391_v60  ;;  %3877 = vrot.lane.b32.xlu0 %v8647_v45, %s9626_s27  ;;  %v8679_v45 = vpack.c.bf16 %v4005_v28, %v4005_v28  ;;  %v10998_v16 = vpack.c.bf16 %v4710_v2, %v4710_v2 }
 0x1ac   : > { %3528 = vst.msk [vmem:[#allocation2 + $0x39] sm:$0xff] %vm472_vm0, %v3496_v59  ;;  %1448 = vrot.lane.b32.xlu1 %v10861_v58, %s9628_s30  ;;  %v9489_v58 = vld [vmem:[%s12777_s3 + $0x28] sm:$0xff]   ;;  %v1880_v4 = vpop.permute.xlu0 %1879  ;;  %v2708_v3 = vld [vmem:[#allocation3 + $0xf0] sm:$0xff] }
 0x1ad   : > { %9039 = vmatpush3.bf16.msra.mxu1 %v9489_v58  ;;  %1953 = vst.msk [vmem:[#allocation3 + $0x10c] sm:$0xf] %vm968_vm4, %v1880_v4  ;;  %v4006_v58 = vld [vmem:[#allocation2 + $0xa] sm:$0xff]  ;;  %v9496_v4 = vld [vmem:[%s12777_s3 + $0x18] sm:$0xff]  }
 0x1ae   : > { %v919_v47 = vpop.permute.xlu1 %918  ;;  %9040 = vmatprep.subr.bf16.mxu1 %v9491_v50 }
 0x1af   : > { %992 = vst.msk [vmem:[#allocation3 + $0x114] sm:$0xf] %vm968_vm4, %v919_v47  ;;  %v4519_v44 = vld [vmem:[#allocation2 + $0x31] sm:$0xff]  ;;  %4837 = vrot.lane.b32.xlu0 %v10980_v31, %s9626_s27 }
 0x1b0   : > { %2410 = vrot.lane.b32.xlu1 %v8582_v48, %s9628_s30  ;;  %v8745_v20 = vpack.c.bf16 %v4519_v44, %v4519_v44  ;;  %v3561_v36 = vld [vmem:[#allocation2 + $0x30] sm:$0xff]  ;;  %v1174_v53 = vpop.permute.xlu0 %1173 }
 0x1b1   : > { %v8619_v56 = vpack.c.bf16 %v3561_v36, %v3561_v36  ;;  %9041 = vmatpush3.bf16.msra.mxu1 %v9493_v35  ;;  %1248 = vst.msk [vmem:[#allocation3 + $0x108] sm:$0xf] %vm1225_vm5, %v1174_v53  ;;  %v8680_v36 = vpack.c.bf16 %v4006_v58, %v4006_v58  ;;  %v9500_v58 = vld [vmem:[%s12777_s3 + $0x48] sm:$0xff]  }
 0x1b2   : > { %v1882_v63 = vpop.permute.xlu1 %1881  ;;  %v2710_v52 = vld [vmem:[#allocation3 + $0xfc] sm:$0xff]  ;;  %4679 = vst.msk [vmem:[#allocation3 + $0x1c] sm:$0xf] %vm711_vm3, %v8745_v20  ;;  %9042 = vmatprep.subr.bf16.mxu1 %v9494_v10 }
 0x1b3   : > { %v9465_v12 = vld [vmem:[#allocation3 + $0xf4] ss:$12 sps:$4 sm:$0xff]   ;;  %1954 = vst.msk [vmem:[#allocation3 + $0x118] sm:$0xf] %vm968_vm4, %v1882_v63  ;;  %v7856_v34 = vcombine.low %v2708_v3, %v2710_v52  ;;  %v4712_v9 = vld [vmem:[#allocation2 + $0x3a] sm:$0xff]  ;;  %4133 = vrot.lane.b32.xlu0 %v8679_v45, %s9627_s14 }
 0x1b4   : > { %v4711_v59 = vld [vmem:[#allocation2 + $0x32] sm:$0xff]  ;;  %3879 = vrot.lane.b32.xlu1 %v8648_v33, %s9626_s27  ;;  %3283 = vmatprep.mubr.bf16.mxu0 %v9465_v12  ;;  %3721 = vst.msk [vmem:[#allocation3 + $0x30] sm:$0xf] %vm711_vm3, %v8619_v56  ;;  %v10993_v47 = vpack.c.bf16 %v4712_v9, %v4712_v9  ;;  %v2137_v28 = vpop.permute.xlu0 %2136  ;;  %v11014_v12 = vpop.f32.mrf.mxu1 }
 0x1b5   : > { %v10985_v60 = vpack.c.bf16 %v4711_v59, %v4711_v59  ;;  %v4520_v48 = vld [vmem:[#allocation2 + $0x39] sm:$0xff]  ;;  %v8932_v61 = vpop.f32.mrf.mxu0  ;;  %3284 = vmatmul.mubr.bf16.gmra.mxu0 %v7856_v34  ;;  %9043 = vmatpush3.bf16.msra.mxu1 %v9496_v4  ;;  %2210 = vst.msk [vmem:[#allocation3 + $0x10c] sm:$0xf] %vm1225_vm5, %v2137_v28  ;;  %v4965_v63 = vld [vmem:[#allocation2 + $0x30] sm:$0xff] }
 0x1b6   : > { %v8746_v57 = vpack.c.bf16 %v4520_v48, %v4520_v48  ;;  %v3562_v33 = vld [vmem:[#allocation2 + $0x38] sm:$0xff]  ;;  %v1176_v50 = vpop.permute.xlu1 %1175  ;;  %5638 = vst.msk [vmem:[#allocation3 + $0x14] sm:$0xf] %vm711_vm3, %v10993_v47  ;;  %v9498_v3 = vld [vmem:[%s12777_s3 + $0x50] sm:$0xff]   ;;  %v11021_v9 = vpack.c.bf16 %v4965_v63, %v4965_v63  ;;  %v3385_v4 = vpop.f32.mrf.mxu1 }
 0x1b7   : > { %5637 = vst.msk [vmem:[#allocation3 + $0x8] sm:$0xf] %vm711_vm3, %v10985_v60  ;;  %v8620_v44 = vpack.c.bf16 %v3562_v33, %v3562_v33  ;;  %v8933_v35 = vpop.f32.mrf.mxu0  ;;  %v9499_v56 = vld [vmem:[%s12777_s3 + $0x10] sm:$0xff]   ;;  %9044 = vmatprep.subr.bf16.mxu1 %v9498_v3  ;;  %v4966_v10 = vld [vmem:[#allocation2 + $0x38] sm:$0xff]  ;;  %v9504_v3 = vld [vmem:[%s12777_s3 + $0x40] sm:$0xff]  }
 0x1b8   : > { %1249 = vst.msk [vmem:[#allocation3 + $0x114] sm:$0xf] %vm1225_vm5, %v1176_v50  ;;  %4839 = vrot.lane.b32.xlu1 %v10998_v16, %s9626_s27  ;;  %v8934_v20 = vadd.f32 %v8933_v35, %v8932_v61  ;;  %v1431_v2 = vpop.permute.xlu0 %1430  ;;  %v4261_v45 = vld [vmem:[#allocation2 + $0x18] sm:$0xff]  ;;  %5093 = vrot.lane.b32.xlu0 %v11021_v9, %s9627_s14  ;;  %v4262_v35 = vld [vmem:[#allocation2 + $0x20] sm:$0xff] }
 0x1b9   : > { %4680 = vst.msk [vmem:[#allocation3 + $0x28] sm:$0xf] %vm711_vm3, %v8746_v57  ;;  %3722 = vst.msk [vmem:[#allocation3 + $0x3c] sm:$0xf] %vm711_vm3, %v8620_v44  ;;  %v8935_v52 = vpop.f32.mrf.mxu0  ;;  %9045 = vmatpush3.bf16.msra.mxu1 %v9499_v56  ;;  %v11031_v44 = vpack.c.bf16 %v4966_v10, %v4966_v10  ;;  %v8711_v28 = vpack.c.bf16 %v4261_v45, %v4261_v45  ;;  %v5221_v63 = vld [vmem:[#allocation2 + $0x31] sm:$0xff]  ;;  %v9505_v10 = vld [vmem:[%s12777_s3] sm:$0xff]  }
 0x1ba   : > { %v2139_v53 = vpop.permute.xlu1 %2138  ;;  %v3222_v34 = vadd.f32 %v8934_v20, %v10845_v49  ;;  %1505 = vst.msk [vmem:[#allocation3 + $0x108] sm:$0xf] %vm1482_vm6, %v1431_v2  ;;  %9046 = vmatprep.subr.bf16.mxu1 %v9500_v58  ;;  %v9502_v20 = vld [vmem:[%s12777_s3 + $0x8] sm:$0xff]   ;;  %v11046_v2 = vpack.c.bf16 %v5221_v63, %v5221_v63 }
 0x1bb   : > { %2211 = vst.msk [vmem:[#allocation3 + $0x118] sm:$0xf] %vm1225_vm5, %v2139_v53  ;;  %v8936_v59 = vpop.f32.mrf.mxu0  ;;  %v8712_v53 = vpack.c.bf16 %v4262_v35, %v4262_v35 }
 0x1bc   : > { %v3383_v48 = vadd.f32 %v3382_v26, %v3222_v34  ;;  %4135 = vrot.lane.b32.xlu1 %v8680_v36, %s9627_s14  ;;  %v8937_v61 = vadd.f32 %v8936_v59, %v8935_v52  ;;  %v2393_v26 = vpop.permute.xlu0 %2392  ;;  %4389 = vrot.lane.b32.xlu0 %v8711_v28, %s9628_s30  ;;  %v5222_v59 = vld [vmem:[#allocation2 + $0x39] sm:$0xff] }
 0x1bd   : > { %2466 = vst.msk [vmem:[#allocation3 + $0x10c] sm:$0xf] %vm1482_vm6, %v2393_v26  ;;  %9047 = vmatpush3.bf16.msra.mxu1 %v9502_v20 }
 0x1be   : > { %v3497_v57 = vmax.f32 %v3383_v48, 0.0  ;;  %v1433_v33 = vpop.permute.xlu1 %1432  ;;  %v3225_v50 = vadd.f32 %v8937_v61, %v10845_v49  ;;  %9048 = vmatprep.subr.bf16.mxu1 %v9504_v3  ;;  %v11056_v61 = vpack.c.bf16 %v5222_v59, %v5222_v59 }
 0x1bf   : > { %1506 = vst.msk [vmem:[#allocation3 + $0x114] sm:$0xf] %vm1482_vm6, %v1433_v33 }
 0x1c0   : > { %3529 = vst.msk [vmem:[#allocation2 + $0x49] sm:$0xff] %vm472_vm0, %v3497_v57  ;;  %v3386_v36 = vadd.f32 %v3385_v4, %v3225_v50  ;;  %5095 = vrot.lane.b32.xlu1 %v11031_v44, %s9627_s14  ;;  %v921_v34 = vpop.permute.xlu0 %920  ;;  %5349 = vrot.lane.b32.xlu0 %v11046_v2, %s9628_s30 }
 0x1c1   : > { %993 = vst.msk [vmem:[#allocation3 + $0x120] sm:$0xf] %vm968_vm4, %v921_v34  ;;  %9049 = vmatpush3.bf16.msra.mxu1 %v9505_v10 }
 0x1c2   : > { %v3498_v52 = vmax.f32 %v3386_v36, 0.0  ;;  %v2395_v56 = vpop.permute.xlu1 %2394  ;;  %9367 = vmatprep.subr.bf16.mxu1 %v10956_v38 }
 0x1c3   : > { %2467 = vst.msk [vmem:[#allocation3 + $0x118] sm:$0xf] %vm1482_vm6, %v2395_v56 }
 0x1c4   : > { %3530 = vst.msk [vmem:[#allocation2 + $0x51] sm:$0xff] %vm472_vm0, %v3498_v52  ;;  %4391 = vrot.lane.b32.xlu1 %v8712_v53, %s9628_s30  ;;  %v1884_v45 = vpop.permute.xlu0 %1883  ;;  %3881 = vrot.lane.b32.xlu0 %v10890_v1, %s9626_s27  ;;  %v2712_v26 = vld [vmem:[#allocation3 + $0x108] sm:$0xff] }
 0x1c5   : > { %1955 = vst.msk [vmem:[#allocation3 + $0x124] sm:$0xf] %vm968_vm4, %v1884_v45 }
 0x1c6   : > { %v923_v48 = vpop.permute.xlu1 %922 }
 0x1c7   : > { %994 = vst.msk [vmem:[#allocation3 + $0x12c] sm:$0xf] %vm968_vm4, %v923_v48  ;;  %v4521_v58 = vld [vmem:[#allocation2 + $0x49] sm:$0xff] }
 0x1c8   : > { %5351 = vrot.lane.b32.xlu1 %v11056_v61, %s9628_s30  ;;  %v3563_v4 = vld [vmem:[#allocation2 + $0x48] sm:$0xff]  ;;  %v8747_v57 = vpack.c.bf16 %v4521_v58, %v4521_v58  ;;  %v1178_v38 = vpop.permute.xlu0 %1177  ;;  %4841 = vrot.lane.b32.xlu0 %v10985_v60, %s9626_s27 }
 0x1c9   : > { %v8621_v33 = vpack.c.bf16 %v3563_v4, %v3563_v4  ;;  %1250 = vst.msk [vmem:[#allocation3 + $0x120] sm:$0xf] %vm1225_vm5, %v1178_v38  ;;  %v4967_v58 = vld [vmem:[#allocation2 + $0x48] sm:$0xff] }
 0x1ca   : > { %v1886_v50 = vpop.permute.xlu1 %1885  ;;  %v2714_v28 = vld [vmem:[#allocation3 + $0x114] sm:$0xff]  ;;  %4681 = vst.msk [vmem:[#allocation3 + $0x34] sm:$0xf] %vm711_vm3, %v8747_v57 }
 0x1cb   : > { %v9469_v35 = vld [vmem:[#allocation3 + $0x10c] ss:$12 sps:$4 sm:$0xff]   ;;  %1956 = vst.msk [vmem:[#allocation3 + $0x130] sm:$0xf] %vm968_vm4, %v1886_v50  ;;  %v7859_v20 = vcombine.low %v2712_v26, %v2714_v28  ;;  %v4714_v63 = vld [vmem:[#allocation2 + $0x52] sm:$0xff]  ;;  %v11091_v28 = vpack.c.bf16 %v4967_v58, %v4967_v58 }
 0x1cc   : > { %v4713_v36 = vld [vmem:[#allocation2 + $0x4a] sm:$0xff]  ;;  %3723 = vst.msk [vmem:[#allocation3 + $0x48] sm:$0xf] %vm711_vm3, %v8621_v33  ;;  %3883 = vrot.lane.b32.xlu1 %v10905_v0, %s9626_s27  ;;  %3291 = vmatprep.mubr.bf16.mxu0 %v9469_v35  ;;  %v11075_v53 = vpack.c.bf16 %v4714_v63, %v4714_v63  ;;  %v2141_v0 = vpop.permute.xlu0 %2140 }
 0x1cd   : > { %v11071_v1 = vpack.c.bf16 %v4713_v36, %v4713_v36  ;;  %v4522_v3 = vld [vmem:[#allocation2 + $0x51] sm:$0xff]  ;;  %v8938_v56 = vpop.f32.mrf.mxu0  ;;  %3292 = vmatmul.mubr.bf16.gmra.mxu0 %v7859_v20  ;;  %2212 = vst.msk [vmem:[#allocation3 + $0x124] sm:$0xf] %vm1225_vm5, %v2141_v0  ;;  %4137 = vrot.lane.b32.xlu0 %v10980_v31, %s9627_s14 }
 0x1ce   : > { %v3564_v52 = vld [vmem:[#allocation2 + $0x50] sm:$0xff]  ;;  %v8748_v34 = vpack.c.bf16 %v4522_v3, %v4522_v3  ;;  %v1180_v10 = vpop.permute.xlu1 %1179  ;;  %5640 = vst.msk [vmem:[#allocation3 + $0x2c] sm:$0xf] %vm711_vm3, %v11075_v53 }
 0x1cf   : > { %v8622_v59 = vpack.c.bf16 %v3564_v52, %v3564_v52  ;;  %5639 = vst.msk [vmem:[#allocation3 + $0x20] sm:$0xf] %vm711_vm3, %v11071_v1  ;;  %v8939_v48 = vpop.f32.mrf.mxu0  ;;  %v4968_v35 = vld [vmem:[#allocation2 + $0x50] sm:$0xff] }
 0x1d0   : > { %1251 = vst.msk [vmem:[#allocation3 + $0x12c] sm:$0xf] %vm1225_vm5, %v1180_v10  ;;  %v8940_v45 = vadd.f32 %v8939_v48, %v8938_v56  ;;  %4843 = vrot.lane.b32.xlu1 %v10993_v47, %s9626_s27  ;;  %v1435_v50 = vpop.permute.xlu0 %1434  ;;  %v11100_v3 = vpack.c.bf16 %v4968_v35, %v4968_v35  ;;  %v5224_v0 = vld [vmem:[#allocation2 + $0x51] sm:$0xff] }
 0x1d1   : > { %4682 = vst.msk [vmem:[#allocation3 + $0x40] sm:$0xf] %vm711_vm3, %v8748_v34  ;;  %3724 = vst.msk [vmem:[#allocation3 + $0x54] sm:$0xf] %vm711_vm3, %v8622_v59  ;;  %v8941_v4 = vpop.f32.mrf.mxu0  ;;  %5097 = vrot.lane.b32.xlu0 %v11091_v28, %s9627_s14 }
 0x1d2   : > { %v3230_v57 = vadd.f32 %v8940_v45, %v10845_v49  ;;  %v2143_v33 = vpop.permute.xlu1 %2142  ;;  %1507 = vst.msk [vmem:[#allocation3 + $0x120] sm:$0xf] %vm1482_vm6, %v1435_v50 }
 0x1d3   : > { %2213 = vst.msk [vmem:[#allocation3 + $0x130] sm:$0xf] %vm1225_vm5, %v2143_v33  ;;  %v8942_v26 = vpop.f32.mrf.mxu0 }
 0x1d4   : > { %v3391_v38 = vadd.f32 %v10974_v30, %v3230_v57  ;;  %v8943_v20 = vadd.f32 %v8942_v26, %v8941_v4  ;;  %4139 = vrot.lane.b32.xlu1 %v10998_v16, %s9627_s14  ;;  %v2397_v52 = vpop.permute.xlu0 %2396  ;;  %v5223_v16 = vld [vmem:[#allocation2 + $0x49] sm:$0xff] }
 0x1d5   : > { %2468 = vst.msk [vmem:[#allocation3 + $0x124] sm:$0xf] %vm1482_vm6, %v2397_v52  ;;  %4393 = vrot.lane.b32.xlu0 %v11021_v9, %s9628_s30  ;;  %v11111_v10 = vpack.c.bf16 %v5223_v16, %v5223_v16  ;;  %v11119_v9 = vpack.c.bf16 %v5224_v0, %v5224_v0 }
 0x1d6   : > { %v3499_v31 = vmax.f32 %v3391_v38, 0.0  ;;  %v3233_v36 = vadd.f32 %v8943_v20, %v10845_v49  ;;  %v1437_v63 = vpop.permute.xlu1 %1436 }
 0x1d7   : > { %1508 = vst.msk [vmem:[#allocation3 + $0x12c] sm:$0xf] %vm1482_vm6, %v1437_v63 }
 0x1d8   : > { %3531 = vst.msk [vmem:[#allocation2 + $0x61] sm:$0xff] %vm472_vm0, %v3499_v31  ;;  %v3394_v30 = vadd.f32 %v11014_v12, %v3233_v36  ;;  %5099 = vrot.lane.b32.xlu1 %v11100_v3, %s9627_s14  ;;  %v925_v59 = vpop.permute.xlu0 %924 }
 0x1d9   : > { %995 = vst.msk [vmem:[#allocation3 + $0x138] sm:$0xf] %vm968_vm4, %v925_v59  ;;  %5353 = vrot.lane.b32.xlu0 %v11111_v10, %s9628_s30 }
 0x1da   : > { %v3500_v56 = vmax.f32 %v3394_v30, 0.0  ;;  %v2399_v34 = vpop.permute.xlu1 %2398 }
 0x1db   : > { %2469 = vst.msk [vmem:[#allocation3 + $0x130] sm:$0xf] %vm1482_vm6, %v2399_v34 }
 0x1dc   : > { %3532 = vst.msk [vmem:[#allocation2 + $0x69] sm:$0xff] %vm472_vm0, %v3500_v56  ;;  %4395 = vrot.lane.b32.xlu1 %v11031_v44, %s9628_s30  ;;  %v1888_v48 = vpop.permute.xlu0 %1887  ;;  %v11127_v44 = vpop.f32.mrf.mxu1  ;;  %v2716_v50 = vld [vmem:[#allocation3 + $0x120] sm:$0xff] }
 0x1dd   : > { %1957 = vst.msk [vmem:[#allocation3 + $0x13c] sm:$0xf] %vm968_vm4, %v1888_v48  ;;  %3885 = vrot.lane.b32.xlu0 %v11046_v2, %s9626_s27 }
 0x1de   : > { %v927_v12 = vpop.permute.xlu1 %926  ;;  %v3398_v16 = vpop.f32.mrf.mxu1 }
 0x1df   : > { %996 = vst.msk [vmem:[#allocation3 + $0x144] sm:$0xf] %vm968_vm4, %v927_v12  ;;  %v4523_v45 = vld [vmem:[#allocation2 + $0x61] sm:$0xff] }
 0x1e0   : > { %5355 = vrot.lane.b32.xlu1 %v11119_v9, %s9628_s30  ;;  %v3565_v58 = vld [vmem:[#allocation2 + $0x60] sm:$0xff]  ;;  %v8749_v4 = vpack.c.bf16 %v4523_v45, %v4523_v45  ;;  %v1182_v38 = vpop.permute.xlu0 %1181 }
 0x1e1   : > { %v8623_v57 = vpack.c.bf16 %v3565_v58, %v3565_v58  ;;  %1252 = vst.msk [vmem:[#allocation3 + $0x138] sm:$0xf] %vm1225_vm5, %v1182_v38  ;;  %4845 = vrot.lane.b32.xlu0 %v11071_v1, %s9626_s27  ;;  %v4969_v45 = vld [vmem:[#allocation2 + $0x60] sm:$0xff] }
 0x1e2   : > { %v1890_v33 = vpop.permute.xlu1 %1889  ;;  %v2718_v26 = vld [vmem:[#allocation3 + $0x12c] sm:$0xff]  ;;  %4683 = vst.msk [vmem:[#allocation3 + $0x4c] sm:$0xf] %vm711_vm3, %v8749_v4  ;;  %v11153_v4 = vpop.f32.mrf.mxu1 }
 0x1e3   : > { %v9471_v35 = vld [vmem:[#allocation3 + $0x124] ss:$12 sps:$4 sm:$0xff]   ;;  %1958 = vst.msk [vmem:[#allocation3 + $0x148] sm:$0xf] %vm968_vm4, %v1890_v33  ;;  %v7862_v20 = vcombine.low %v2716_v50, %v2718_v26  ;;  %v4716_v36 = vld [vmem:[#allocation2 + $0x6a] sm:$0xff] }
 0x1e4   : > { %v4715_v31 = vld [vmem:[#allocation2 + $0x62] sm:$0xff]  ;;  %3725 = vst.msk [vmem:[#allocation3 + $0x60] sm:$0xf] %vm711_vm3, %v8623_v57  ;;  %3887 = vrot.lane.b32.xlu1 %v11056_v61, %s9626_s27  ;;  %3299 = vmatprep.mubr.bf16.mxu0 %v9471_v35  ;;  %v11139_v56 = vpack.c.bf16 %v4716_v36, %v4716_v36  ;;  %v2145_v61 = vpop.permute.xlu0 %2144  ;;  %v11157_v35 = vpack.c.bf16 %v4969_v45, %v4969_v45 }
 0x1e5   : > { %v11135_v2 = vpack.c.bf16 %v4715_v31, %v4715_v31  ;;  %v4524_v63 = vld [vmem:[#allocation2 + $0x69] sm:$0xff]  ;;  %v8944_v30 = vpop.f32.mrf.mxu0  ;;  %3300 = vmatmul.mubr.bf16.gmra.mxu0 %v7862_v20  ;;  %2214 = vst.msk [vmem:[#allocation3 + $0x13c] sm:$0xf] %vm1225_vm5, %v2145_v61  ;;  %4141 = vrot.lane.b32.xlu0 %v10985_v60, %s9627_s14  ;;  %v3401_v60 = vpop.f32.mrf.mxu1 }
 0x1e6   : > { %v3566_v52 = vld [vmem:[#allocation2 + $0x68] sm:$0xff]  ;;  %v8750_v34 = vpack.c.bf16 %v4524_v63, %v4524_v63  ;;  %v1184_v0 = vpop.permute.xlu1 %1183  ;;  %5642 = vst.msk [vmem:[#allocation3 + $0x44] sm:$0xf] %vm711_vm3, %v11139_v56 }
 0x1e7   : > { %v8624_v59 = vpack.c.bf16 %v3566_v52, %v3566_v52  ;;  %5641 = vst.msk [vmem:[#allocation3 + $0x38] sm:$0xf] %vm711_vm3, %v11135_v2  ;;  %v8945_v12 = vpop.f32.mrf.mxu0  ;;  %v4970_v38 = vld [vmem:[#allocation2 + $0x68] sm:$0xff] }
 0x1e8   : > { %1253 = vst.msk [vmem:[#allocation3 + $0x144] sm:$0xf] %vm1225_vm5, %v1184_v0  ;;  %v8946_v48 = vadd.f32 %v8945_v12, %v8944_v30  ;;  %4847 = vrot.lane.b32.xlu1 %v11075_v53, %s9626_s27  ;;  %v1439_v50 = vpop.permute.xlu0 %1438  ;;  %v11165_v30 = vpack.c.bf16 %v4970_v38, %v4970_v38  ;;  %v5226_v12 = vld [vmem:[#allocation2 + $0x69] sm:$0xff] }
 0x1e9   : > { %4684 = vst.msk [vmem:[#allocation3 + $0x58] sm:$0xf] %vm711_vm3, %v8750_v34  ;;  %3726 = vst.msk [vmem:[#allocation3 + $0x6c] sm:$0xf] %vm711_vm3, %v8624_v59  ;;  %v8947_v58 = vpop.f32.mrf.mxu0  ;;  %5101 = vrot.lane.b32.xlu0 %v11157_v35, %s9627_s14 }
 0x1ea   : > { %v2147_v57 = vpop.permute.xlu1 %2146  ;;  %v3238_v33 = vadd.f32 %v8946_v48, %v10845_v49  ;;  %1509 = vst.msk [vmem:[#allocation3 + $0x138] sm:$0xf] %vm1482_vm6, %v1439_v50 }
 0x1eb   : > { %2215 = vst.msk [vmem:[#allocation3 + $0x148] sm:$0xf] %vm1225_vm5, %v2147_v57  ;;  %v8948_v26 = vpop.f32.mrf.mxu0 }
 0x1ec   : > { %v3399_v20 = vadd.f32 %v3398_v16, %v3238_v33  ;;  %v8949_v31 = vadd.f32 %v8948_v26, %v8947_v58  ;;  %4143 = vrot.lane.b32.xlu1 %v10993_v47, %s9627_s14  ;;  %v2401_v34 = vpop.permute.xlu0 %2400  ;;  %v5225_v47 = vld [vmem:[#allocation2 + $0x61] sm:$0xff] }
 0x1ed   : > { %2470 = vst.msk [vmem:[#allocation3 + $0x13c] sm:$0xf] %vm1482_vm6, %v2401_v34  ;;  %4397 = vrot.lane.b32.xlu0 %v11091_v28, %s9628_s30  ;;  %v11175_v61 = vpack.c.bf16 %v5225_v47, %v5225_v47  ;;  %v11183_v28 = vpack.c.bf16 %v5226_v12, %v5226_v12 }
 0x1ee   : > { %v3501_v36 = vmax.f32 %v3399_v20, 0.0  ;;  %v3241_v63 = vadd.f32 %v8949_v31, %v10845_v49  ;;  %v1441_v52 = vpop.permute.xlu1 %1440 }
 0x1ef   : > { %1510 = vst.msk [vmem:[#allocation3 + $0x144] sm:$0xf] %vm1482_vm6, %v1441_v52 }
 0x1f0   : > { %3533 = vst.msk [vmem:[#allocation2 + $0x79] sm:$0xff] %vm472_vm0, %v3501_v36  ;;  %v3402_v16 = vadd.f32 %v3401_v60, %v3241_v63  ;;  %5103 = vrot.lane.b32.xlu1 %v11165_v30, %s9627_s14  ;;  %v929_v0 = vpop.permute.xlu0 %928 }
 0x1f1   : > { %997 = vst.msk [vmem:[#allocation3 + $0x150] sm:$0xf] %vm968_vm4, %v929_v0  ;;  %5357 = vrot.lane.b32.xlu0 %v11175_v61, %s9628_s30 }
 0x1f2   : > { %v3502_v59 = vmax.f32 %v3402_v16, 0.0  ;;  %v2403_v49 = vpop.permute.xlu1 %2402 }
 0x1f3   : > { %2471 = vst.msk [vmem:[#allocation3 + $0x148] sm:$0xf] %vm1482_vm6, %v2403_v49 }
 0x1f4   : > { %3534 = vst.msk [vmem:[#allocation2 + $0x81] sm:$0xff] %vm472_vm0, %v3502_v59  ;;  %4399 = vrot.lane.b32.xlu1 %v11100_v3, %s9628_s30  ;;  %v1892_v45 = vpop.permute.xlu0 %1891  ;;  %v2720_v26 = vld [vmem:[#allocation3 + $0x138] sm:$0xff] }
 0x1f5   : > { %1959 = vst.msk [vmem:[#allocation3 + $0x154] sm:$0xf] %vm968_vm4, %v1892_v45  ;;  %3889 = vrot.lane.b32.xlu0 %v11111_v10, %s9626_s27 }
 0x1f6   : > { %v931_v48 = vpop.permute.xlu1 %930 }
 0x1f7   : > { %998 = vst.msk [vmem:[#allocation3 + $0x15c] sm:$0xf] %vm968_vm4, %v931_v48  ;;  %v4525_v58 = vld [vmem:[#allocation2 + $0x79] sm:$0xff] }
 0x1f8   : > { %5359 = vrot.lane.b32.xlu1 %v11183_v28, %s9628_s30  ;;  %v3567_v57 = vld [vmem:[#allocation2 + $0x78] sm:$0xff]  ;;  %v8751_v3 = vpack.c.bf16 %v4525_v58, %v4525_v58  ;;  %v1186_v31 = vpop.permute.xlu0 %1185 }
 0x1f9   : > { %v8625_v33 = vpack.c.bf16 %v3567_v57, %v3567_v57  ;;  %1254 = vst.msk [vmem:[#allocation3 + $0x150] sm:$0xf] %vm1225_vm5, %v1186_v31  ;;  %4849 = vrot.lane.b32.xlu0 %v11135_v2, %s9626_s27  ;;  %v4971_v45 = vld [vmem:[#allocation2 + $0x78] sm:$0xff]  ;;  %v11218_v57 = vld [vmem:[%s12776_s2] ss:$0 sm:$0xff] }
 0x1fa   : > { %v1894_v50 = vpop.permute.xlu1 %1893  ;;  %v2722_v38 = vld [vmem:[#allocation3 + $0x144] sm:$0xff]  ;;  %4685 = vst.msk [vmem:[#allocation3 + $0x64] sm:$0xf] %vm711_vm3, %v8751_v3 }
 0x1fb   : > { %v9475_v20 = vld [vmem:[#allocation3 + $0x13c] ss:$12 sps:$4 sm:$0xff]   ;;  %1960 = vst.msk [vmem:[#allocation3 + $0x160] sm:$0xf] %vm968_vm4, %v1894_v50  ;;  %v7865_v60 = vcombine.low %v2720_v26, %v2722_v38  ;;  %v4718_v63 = vld [vmem:[#allocation2 + $0x82] sm:$0xff]  ;;  %v11222_v38 = vpack.c.bf16 %v4971_v45, %v4971_v45 }
 0x1fc   : > { %v4717_v36 = vld [vmem:[#allocation2 + $0x7a] sm:$0xff]  ;;  %3727 = vst.msk [vmem:[#allocation3 + $0x78] sm:$0xf] %vm711_vm3, %v8625_v33  ;;  %3891 = vrot.lane.b32.xlu1 %v11119_v9, %s9626_s27  ;;  %3307 = vmatprep.mubr.bf16.mxu0 %v9475_v20  ;;  %v11201_v47 = vpack.c.bf16 %v4718_v63, %v4718_v63  ;;  %v2149_v9 = vpop.permute.xlu0 %2148 }
 0x1fd   : > { %v11197_v10 = vpack.c.bf16 %v4717_v36, %v4717_v36  ;;  %v4526_v52 = vld [vmem:[#allocation2 + $0x81] sm:$0xff]  ;;  %v8950_v16 = vpop.f32.mrf.mxu0  ;;  %3308 = vmatmul.mubr.bf16.gmra.mxu0 %v7865_v60  ;;  %2216 = vst.msk [vmem:[#allocation3 + $0x154] sm:$0xf] %vm1225_vm5, %v2149_v9  ;;  %4145 = vrot.lane.b32.xlu0 %v11071_v1, %s9627_s14 }
 0x1fe   : > { %v3568_v34 = vld [vmem:[#allocation2 + $0x80] sm:$0xff]  ;;  %v8752_v59 = vpack.c.bf16 %v4526_v52, %v4526_v52  ;;  %v1188_v0 = vpop.permute.xlu1 %1187  ;;  %5644 = vst.msk [vmem:[#allocation3 + $0x5c] sm:$0xf] %vm711_vm3, %v11201_v47 }
 0x1ff   : > { %v8626_v49 = vpack.c.bf16 %v3568_v34, %v3568_v34  ;;  %5643 = vst.msk [vmem:[#allocation3 + $0x50] sm:$0xf] %vm711_vm3, %v11197_v10  ;;  %v8951_v12 = vpop.f32.mrf.mxu0  ;;  %v4972_v20 = vld [vmem:[#allocation2 + $0x80] sm:$0xff] }
 0x200   : > { %1255 = vst.msk [vmem:[#allocation3 + $0x15c] sm:$0xf] %vm1225_vm5, %v1188_v0  ;;  %v8952_v48 = vadd.f32 %v8951_v12, %v8950_v16  ;;  %4851 = vrot.lane.b32.xlu1 %v11139_v56, %s9626_s27  ;;  %v1443_v50 = vpop.permute.xlu0 %1442  ;;  %v11231_v52 = vpack.c.bf16 %v4972_v20, %v4972_v20  ;;  %v5228_v9 = vld [vmem:[#allocation2 + $0x81] sm:$0xff] }
 0x201   : > { %4686 = vst.msk [vmem:[#allocation3 + $0x70] sm:$0xf] %vm711_vm3, %v8752_v59  ;;  %3728 = vst.msk [vmem:[#allocation3 + $0x84] sm:$0xf] %vm711_vm3, %v8626_v49  ;;  %v8953_v58 = vpop.f32.mrf.mxu0  ;;  %5105 = vrot.lane.b32.xlu0 %v11222_v38, %s9627_s14 }
 0x202   : > { %v3246_v3 = vadd.f32 %v11218_v57, %v8952_v48  ;;  %v2151_v33 = vpop.permute.xlu1 %2150  ;;  %1511 = vst.msk [vmem:[#allocation3 + $0x150] sm:$0xf] %vm1482_vm6, %v1443_v50 }
 0x203   : > { %2217 = vst.msk [vmem:[#allocation3 + $0x160] sm:$0xf] %vm1225_vm5, %v2151_v33  ;;  %v8954_v26 = vpop.f32.mrf.mxu0 }
 0x204   : > { %v3407_v31 = vadd.f32 %v11127_v44, %v3246_v3  ;;  %v8955_v1 = vadd.f32 %v8954_v26, %v8953_v58  ;;  %4147 = vrot.lane.b32.xlu1 %v11075_v53, %s9627_s14  ;;  %v2405_v34 = vpop.permute.xlu0 %2404  ;;  %v5227_v53 = vld [vmem:[#allocation2 + $0x79] sm:$0xff] }
 0x205   : > { %2472 = vst.msk [vmem:[#allocation3 + $0x154] sm:$0xf] %vm1482_vm6, %v2405_v34  ;;  %4401 = vrot.lane.b32.xlu0 %v11157_v35, %s9628_s30  ;;  %v11242_v0 = vpack.c.bf16 %v5227_v53, %v5227_v53  ;;  %v11250_v35 = vpack.c.bf16 %v5228_v9, %v5228_v9 }
 0x206   : > { %v3503_v60 = vmax.f32 %v3407_v31, 0.0  ;;  %v3249_v36 = vadd.f32 %v11218_v57, %v8955_v1  ;;  %v1445_v63 = vpop.permute.xlu1 %1444 }
 0x207   : > { %1512 = vst.msk [vmem:[#allocation3 + $0x15c] sm:$0xf] %vm1482_vm6, %v1445_v63 }
 0x208   : > { %3535 = vst.msk [vmem:[#allocation2 + $0x91] sm:$0xff] %vm472_vm0, %v3503_v60  ;;  %v3410_v44 = vadd.f32 %v11153_v4, %v3249_v36  ;;  %5107 = vrot.lane.b32.xlu1 %v11231_v52, %s9627_s14  ;;  %v933_v49 = vpop.permute.xlu0 %932 }
 0x209   : > { %999 = vst.msk [vmem:[#allocation3 + $0x168] sm:$0xf] %vm968_vm4, %v933_v49  ;;  %5361 = vrot.lane.b32.xlu0 %v11242_v0, %s9628_s30 }
 0x20a   : > { %v3504_v16 = vmax.f32 %v3410_v44, 0.0  ;;  %v2407_v59 = vpop.permute.xlu1 %2406 }
 0x20b   : > { %2473 = vst.msk [vmem:[#allocation3 + $0x160] sm:$0xf] %vm1482_vm6, %v2407_v59 }
 0x20c   : > { %3536 = vst.msk [vmem:[#allocation2 + $0x99] sm:$0xff] %vm472_vm0, %v3504_v16  ;;  %4403 = vrot.lane.b32.xlu1 %v11165_v30, %s9628_s30  ;;  %v1896_v12 = vpop.permute.xlu0 %1895  ;;  %v11258_v30 = vpop.f32.mrf.mxu1  ;;  %v2724_v50 = vld [vmem:[#allocation3 + $0x150] sm:$0xff] }
 0x20d   : > { %1961 = vst.msk [vmem:[#allocation3 + $0x16c] sm:$0xf] %vm968_vm4, %v1896_v12  ;;  %3893 = vrot.lane.b32.xlu0 %v11175_v61, %s9626_s27 }
 0x20e   : > { %v935_v4 = vpop.permute.xlu1 %934  ;;  %v3414_v53 = vpop.f32.mrf.mxu1 }
 0x20f   : > { %1000 = vst.msk [vmem:[#allocation3 + $0x174] sm:$0xf] %vm968_vm4, %v935_v4  ;;  %v4527_v48 = vld [vmem:[#allocation2 + $0x91] sm:$0xff] }
 0x210   : > { %5363 = vrot.lane.b32.xlu1 %v11250_v35, %s9628_s30  ;;  %v3569_v45 = vld [vmem:[#allocation2 + $0x90] sm:$0xff]  ;;  %v8753_v58 = vpack.c.bf16 %v4527_v48, %v4527_v48  ;;  %v1190_v31 = vpop.permute.xlu0 %1189 }
 0x211   : > { %v8627_v3 = vpack.c.bf16 %v3569_v45, %v3569_v45  ;;  %1256 = vst.msk [vmem:[#allocation3 + $0x168] sm:$0xf] %vm1225_vm5, %v1190_v31  ;;  %4853 = vrot.lane.b32.xlu0 %v11197_v10, %s9626_s27  ;;  %v4973_v48 = vld [vmem:[#allocation2 + $0x90] sm:$0xff] }
 0x212   : > { %v1898_v33 = vpop.permute.xlu1 %1897  ;;  %v2726_v26 = vld [vmem:[#allocation3 + $0x15c] sm:$0xff]  ;;  %4687 = vst.msk [vmem:[#allocation3 + $0x7c] sm:$0xf] %vm711_vm3, %v8753_v58  ;;  %v11284_v58 = vpop.f32.mrf.mxu1 }
 0x213   : > { %v9477_v20 = vld [vmem:[#allocation3 + $0x154] ss:$12 sps:$4 sm:$0xff]   ;;  %1962 = vst.msk [vmem:[#allocation3 + $0x178] sm:$0xf] %vm968_vm4, %v1898_v33  ;;  %v7868_v1 = vcombine.low %v2724_v50, %v2726_v26  ;;  %v4720_v36 = vld [vmem:[#allocation2 + $0x9a] sm:$0xff] }
 0x214   : > { %v4719_v60 = vld [vmem:[#allocation2 + $0x92] sm:$0xff]  ;;  %3729 = vst.msk [vmem:[#allocation3 + $0x90] sm:$0xf] %vm711_vm3, %v8627_v3  ;;  %3895 = vrot.lane.b32.xlu1 %v11183_v28, %s9626_s27  ;;  %3315 = vmatprep.mubr.bf16.mxu0 %v9477_v20  ;;  %v11270_v16 = vpack.c.bf16 %v4720_v36, %v4720_v36  ;;  %v2153_v28 = vpop.permute.xlu0 %2152  ;;  %v11288_v20 = vpack.c.bf16 %v4973_v48, %v4973_v48 }
 0x215   : > { %v11266_v61 = vpack.c.bf16 %v4719_v60, %v4719_v60  ;;  %v4528_v63 = vld [vmem:[#allocation2 + $0x99] sm:$0xff]  ;;  %v8956_v44 = vpop.f32.mrf.mxu0  ;;  %3316 = vmatmul.mubr.bf16.gmra.mxu0 %v7868_v1  ;;  %2218 = vst.msk [vmem:[#allocation3 + $0x16c] sm:$0xf] %vm1225_vm5, %v2153_v28  ;;  %4149 = vrot.lane.b32.xlu0 %v11135_v2, %s9627_s14  ;;  %v3417_v2 = vpop.f32.mrf.mxu1 }
 0x216   : > { %v3570_v34 = vld [vmem:[#allocation2 + $0x98] sm:$0xff]  ;;  %v8754_v59 = vpack.c.bf16 %v4528_v63, %v4528_v63  ;;  %v1192_v9 = vpop.permute.xlu1 %1191  ;;  %5646 = vst.msk [vmem:[#allocation3 + $0x74] sm:$0xf] %vm711_vm3, %v11270_v16 }
 0x217   : > { %v8628_v49 = vpack.c.bf16 %v3570_v34, %v3570_v34  ;;  %5645 = vst.msk [vmem:[#allocation3 + $0x68] sm:$0xf] %vm711_vm3, %v11266_v61  ;;  %v8957_v4 = vpop.f32.mrf.mxu0  ;;  %v4974_v31 = vld [vmem:[#allocation2 + $0x98] sm:$0xff] }
 0x218   : > { %1257 = vst.msk [vmem:[#allocation3 + $0x174] sm:$0xf] %vm1225_vm5, %v1192_v9  ;;  %v8958_v12 = vadd.f32 %v8957_v4, %v8956_v44  ;;  %4855 = vrot.lane.b32.xlu1 %v11201_v47, %s9626_s27  ;;  %v1447_v50 = vpop.permute.xlu0 %1446  ;;  %v11296_v44 = vpack.c.bf16 %v4974_v31, %v4974_v31 }
 0x219   : > { %4688 = vst.msk [vmem:[#allocation3 + $0x88] sm:$0xf] %vm711_vm3, %v8754_v59  ;;  %3730 = vst.msk [vmem:[#allocation3 + $0x9c] sm:$0xf] %vm711_vm3, %v8628_v49  ;;  %v8959_v45 = vpop.f32.mrf.mxu0  ;;  %5109 = vrot.lane.b32.xlu0 %v11288_v20, %s9627_s14 }
 0x21a   : > { %v2155_v3 = vpop.permute.xlu1 %2154  ;;  %v3254_v33 = vadd.f32 %v11218_v57, %v8958_v12  ;;  %1513 = vst.msk [vmem:[#allocation3 + $0x168] sm:$0xf] %vm1482_vm6, %v1447_v50  ;;  %v5230_v12 = vld [vmem:[#allocation2 + $0x99] sm:$0xff] }
 0x21b   : > { %2219 = vst.msk [vmem:[#allocation3 + $0x178] sm:$0xf] %vm1225_vm5, %v2155_v3  ;;  %v8960_v26 = vpop.f32.mrf.mxu0 }
 0x21c   : > { %v3415_v1 = vadd.f32 %v3414_v53, %v3254_v33  ;;  %v8961_v60 = vadd.f32 %v8960_v26, %v8959_v45  ;;  %4151 = vrot.lane.b32.xlu1 %v11139_v56, %s9627_s14  ;;  %v2409_v59 = vpop.permute.xlu0 %2408  ;;  %v5229_v56 = vld [vmem:[#allocation2 + $0x91] sm:$0xff] }
 0x21d   : > { %2474 = vst.msk [vmem:[#allocation3 + $0x16c] sm:$0xf] %vm1482_vm6, %v2409_v59  ;;  %4405 = vrot.lane.b32.xlu0 %v11222_v38, %s9628_s30  ;;  %v11306_v4 = vpack.c.bf16 %v5229_v56, %v5229_v56  ;;  %v11314_v38 = vpack.c.bf16 %v5230_v12, %v5230_v12 }
 0x21e   : > { %v3505_v36 = vmax.f32 %v3415_v1, 0.0  ;;  %v3257_v63 = vadd.f32 %v11218_v57, %v8961_v60  ;;  %v1449_v34 = vpop.permute.xlu1 %1448 }
 0x21f   : > { %1514 = vst.msk [vmem:[#allocation3 + $0x174] sm:$0xf] %vm1482_vm6, %v1449_v34 }
 0x220   : > { %3537 = vst.msk [vmem:[#allocation2 + $0xa9] sm:$0xff] %vm472_vm0, %v3505_v36  ;;  %v3418_v53 = vadd.f32 %v3417_v2, %v3257_v63  ;;  %5111 = vrot.lane.b32.xlu1 %v11296_v44, %s9627_s14  ;;  %v3878_v28 = vpop.permute.xlu0 %3877  ;;  %v9490_v63 = vld [vmem:[#allocation3 + $0x8] ss:$12 sps:$4 sm:$0xff]  }
 0x221   : > { %3973 = vst.msk [vmem:[#allocation3] sm:$0xf] %vm968_vm4, %v3878_v28  ;;  %5365 = vrot.lane.b32.xlu0 %v11306_v4, %s9628_s30 }
 0x222   : > { %v3506_v49 = vmax.f32 %v3418_v53, 0.0  ;;  %v2411_v9 = vpop.permute.xlu1 %2410 }
 0x223   : > { %2475 = vst.msk [vmem:[#allocation3 + $0x178] sm:$0xf] %vm1482_vm6, %v2411_v9 }
 0x224   : > { %3538 = vst.msk [vmem:[#allocation2 + $0xb1] sm:$0xff] %vm472_vm0, %v3506_v49  ;;  %4407 = vrot.lane.b32.xlu1 %v11231_v52, %s9628_s30  ;;  %v4838_v45 = vpop.permute.xlu0 %4837  ;;  %v2728_v31 = vld [vmem:[#allocation3 + $0x168] sm:$0xff] }
 0x225   : > { %4933 = vst.msk [vmem:[#allocation3 + $0x4] sm:$0xf] %vm968_vm4, %v4838_v45  ;;  %3897 = vrot.lane.b32.xlu0 %v11242_v0, %s9626_s27 }
 0x226   : > { %v3880_v48 = vpop.permute.xlu1 %3879 }
 0x227   : > { %3974 = vst.msk [vmem:[#allocation3 + $0xc] sm:$0xf] %vm968_vm4, %v3880_v48  ;;  %v4529_v3 = vld [vmem:[#allocation2 + $0xa9] sm:$0xff] }
 0x228   : > { %5367 = vrot.lane.b32.xlu1 %v11314_v38, %s9628_s30  ;;  %v3571_v33 = vld [vmem:[#allocation2 + $0xa8] sm:$0xff]  ;;  %v8755_v52 = vpack.c.bf16 %v4529_v3, %v4529_v3  ;;  %v4134_v2 = vpop.permute.xlu0 %4133 }
 0x229   : > { %v8629_v50 = vpack.c.bf16 %v3571_v33, %v3571_v33  ;;  %4229 = vst.msk [vmem:[#allocation3] sm:$0xf] %vm1225_vm5, %v4134_v2  ;;  %4857 = vrot.lane.b32.xlu0 %v11266_v61, %s9626_s27  ;;  %v4975_v33 = vld [vmem:[#allocation2 + $0xa8] sm:$0xff] }
 0x22a   : > { %v4840_v26 = vpop.permute.xlu1 %4839  ;;  %v2730_v1 = vld [vmem:[#allocation3 + $0x174] sm:$0xff]  ;;  %4689 = vst.msk [vmem:[#allocation3 + $0x94] sm:$0xf] %vm711_vm3, %v8755_v52  ;;  %v11349_v2 = vpack.c.bf16 %v4975_v33, %v4975_v33 }
 0x22b   : > { %v9485_v60 = vld [vmem:[#allocation3 + $0x16c] ss:$12 sps:$4 sm:$0xff]   ;;  %4934 = vst.msk [vmem:[#allocation3 + $0x10] sm:$0xf] %vm968_vm4, %v4840_v26  ;;  %v7871_v36 = vcombine.low %v2728_v31, %v2730_v1  ;;  %v5488_v0 = vld [vmem:[#allocation2 + $0xb2] sm:$0xff] }
 0x22c   : > { %v5487_v34 = vld [vmem:[#allocation2 + $0xaa] sm:$0xff]  ;;  %3731 = vst.msk [vmem:[#allocation3 + $0xa8] sm:$0xf] %vm711_vm3, %v8629_v50  ;;  %3899 = vrot.lane.b32.xlu1 %v11250_v35, %s9626_s27  ;;  %3323 = vmatprep.mubr.bf16.mxu0 %v9485_v60  ;;  %v11332_v9 = vpack.c.bf16 %v5488_v0, %v5488_v0  ;;  %v5094_v45 = vpop.permute.xlu0 %5093 }
 0x22d   : > { %v11328_v59 = vpack.c.bf16 %v5487_v34, %v5487_v34  ;;  %v4530_v53 = vld [vmem:[#allocation2 + $0xb1] sm:$0xff]  ;;  %v8962_v49 = vpop.f32.mrf.mxu0  ;;  %3324 = vmatmul.mubr.bf16.gmra.mxu0 %v7871_v36  ;;  %5189 = vst.msk [vmem:[#allocation3 + $0x4] sm:$0xf] %vm1225_vm5, %v5094_v45  ;;  %4153 = vrot.lane.b32.xlu0 %v11197_v10, %s9627_s14  ;;  %v9501_v45 = vld [vmem:[#allocation3 + $0x50] ss:$12 sps:$4 sm:$0xff]  }
 0x22e   : > { %v3572_v56 = vld [vmem:[#allocation2 + $0xb0] sm:$0xff]  ;;  %v8756_v28 = vpack.c.bf16 %v4530_v53, %v4530_v53  ;;  %v4136_v48 = vpop.permute.xlu1 %4135  ;;  %9247 = vmatprep.mubr.msk.bf16.mxu0 %vm472_vm0, %v9490_v63  ;;  %5648 = vst.msk [vmem:[#allocation3 + $0x8c] sm:$0xf] %vm711_vm3, %v11332_v9 }
 0x22f   : > { %v8630_v12 = vpack.c.bf16 %v3572_v56, %v3572_v56  ;;  %5647 = vst.msk [vmem:[#allocation3 + $0x80] sm:$0xf] %vm711_vm3, %v11328_v59  ;;  %v8963_v35 = vpop.f32.mrf.mxu0  ;;  %v9495_v60 = vld [vmem:[#allocation3 + $0x20] ss:$12 sps:$4 sm:$0xff]   ;;  %v9497_v10 = vld [vmem:[#allocation3 + $0x38] ss:$12 sps:$4 sm:$0xff]  }
 0x230   : > { %4230 = vst.msk [vmem:[#allocation3 + $0xc] sm:$0xf] %vm1225_vm5, %v4136_v48  ;;  %v8964_v3 = vadd.f32 %v8963_v35, %v8962_v49  ;;  %4859 = vrot.lane.b32.xlu1 %v11270_v16, %s9626_s27  ;;  %v4390_v1 = vpop.permute.xlu0 %4389  ;;  %v4976_v36 = vld [vmem:[#allocation2 + $0xb0] sm:$0xff] }
 0x231   : > { %4690 = vst.msk [vmem:[#allocation3 + $0xa0] sm:$0xf] %vm711_vm3, %v8756_v28  ;;  %3732 = vst.msk [vmem:[#allocation3 + $0xb4] sm:$0xf] %vm711_vm3, %v8630_v12  ;;  %v8965_v52 = vpop.f32.mrf.mxu0  ;;  %5113 = vrot.lane.b32.xlu0 %v11349_v2, %s9627_s14  ;;  %v11360_v49 = vpack.c.bf16 %v4976_v36, %v4976_v36  ;;  %v5231_v28 = vld [vmem:[#allocation2 + $0xa9] sm:$0xff]  ;;  %v5232_v33 = vld [vmem:[#allocation2 + $0xb1] sm:$0xff] }
 0x232   : > { %v3262_v50 = vadd.f32 %v11218_v57, %v8964_v3  ;;  %v5096_v26 = vpop.permute.xlu1 %5095  ;;  %4485 = vst.msk [vmem:[#allocation3] sm:$0xf] %vm1482_vm6, %v4390_v1  ;;  %v11371_v3 = vpack.c.bf16 %v5231_v28, %v5231_v28 }
 0x233   : > { %5190 = vst.msk [vmem:[#allocation3 + $0x10] sm:$0xf] %vm1225_vm5, %v5096_v26  ;;  %v8966_v31 = vpop.f32.mrf.mxu0 }
 0x234   : > { %v3423_v63 = vadd.f32 %v11258_v30, %v3262_v50  ;;  %v8967_v34 = vadd.f32 %v8966_v31, %v8965_v52  ;;  %4155 = vrot.lane.b32.xlu1 %v11201_v47, %s9627_s14  ;;  %v5350_v30 = vpop.permute.xlu0 %5349  ;;  %v11381_v52 = vpack.c.bf16 %v5232_v33, %v5232_v33  ;;  %v11389_v31 = vpop.f32.mrf.mxu1 }
 0x235   : > { %9248 = vmatmul.mubr.msk.bf16.vlgmr.msra.gmra.mxu0 %vm472_vm0, %v9495_v60  ;;  %5445 = vst.msk [vmem:[#allocation3 + $0x4] sm:$0xf] %vm1482_vm6, %v5350_v30  ;;  %4409 = vrot.lane.b32.xlu0 %v11288_v20, %s9628_s30 }
 0x236   : > { %v3507_v0 = vmax.f32 %v3423_v63, 0.0  ;;  %v3265_v53 = vadd.f32 %v11218_v57, %v8967_v34  ;;  %v4392_v56 = vpop.permute.xlu1 %4391  ;;  %9251 = vmatprep.mubr.msk.bf16.mxu0 %vm472_vm0, %v9497_v10 }
 0x237   : > { %4486 = vst.msk [vmem:[#allocation3 + $0xc] sm:$0xf] %vm1482_vm6, %v4392_v56 }
 0x238   : > { %3539 = vst.msk [vmem:[#allocation2 + $0xc1] sm:$0xff] %vm472_vm0, %v3507_v0  ;;  %v3426_v47 = vadd.f32 %v11284_v58, %v3265_v53  ;;  %5115 = vrot.lane.b32.xlu1 %v11360_v49, %s9627_s14  ;;  %v3882_v35 = vpop.permute.xlu0 %3881  ;;  %v9503_v58 = vld [vmem:[#allocation3 + $0x68] ss:$12 sps:$4 sm:$0xff]   ;;  %v9509_v0 = vld [vmem:[#allocation3 + $0x80] ss:$12 sps:$4 sm:$0xff]  }
 0x239   : > { %3975 = vst.msk [vmem:[#allocation3 + $0x18] sm:$0xf] %vm968_vm4, %v3882_v35  ;;  %5369 = vrot.lane.b32.xlu0 %v11371_v3, %s9628_s30 }
 0x23a   : > { %v3508_v12 = vmax.f32 %v3426_v47, 0.0  ;;  %v5352_v48 = vpop.permute.xlu1 %5351 }
 0x23b   : > { %5446 = vst.msk [vmem:[#allocation3 + $0x10] sm:$0xf] %vm1482_vm6, %v5352_v48  ;;  %v3430_v48 = vpop.f32.mrf.mxu1 }
 0x23c   : > { %3540 = vst.msk [vmem:[#allocation2 + $0xc9] sm:$0xff] %vm472_vm0, %v3508_v12  ;;  %4411 = vrot.lane.b32.xlu1 %v11296_v44, %s9628_s30  ;;  %v4842_v50 = vpop.permute.xlu0 %4841 }
 0x23d   : > { %9252 = vmatmul.mubr.msk.bf16.gmra.mxu0 %vm472_vm0, %v9501_v45  ;;  %4935 = vst.msk [vmem:[#allocation3 + $0x1c] sm:$0xf] %vm968_vm4, %v4842_v50  ;;  %3901 = vrot.lane.b32.xlu0 %v11306_v4, %s9626_s27  ;;  %v9561_v50 = vld [vmem:[%s12777_s3 + $0x80] sm:$0xff]  }
 0x23e   : > { %v3884_v20 = vpop.permute.xlu1 %3883  ;;  %9255 = vmatprep.mubr.msk.bf16.mxu0 %vm472_vm0, %v9503_v58  ;;  %v9506_v63 = vld [vmem:[#allocation3] ss:$12 sps:$4 sm:$0xff]  }
 0x23f   : > { %3976 = vst.msk [vmem:[#allocation3 + $0x24] sm:$0xf] %vm968_vm4, %v3884_v20  ;;  %v4531_v44 = vld [vmem:[#allocation2 + $0xc1] sm:$0xff] }
 0x240   : > { %5371 = vrot.lane.b32.xlu1 %v11381_v52, %s9628_s30  ;;  %v3573_v26 = vld [vmem:[#allocation2 + $0xc0] sm:$0xff]  ;;  %v8757_v1 = vpack.c.bf16 %v4531_v44, %v4531_v44  ;;  %v4138_v10 = vpop.permute.xlu0 %4137 }
 0x241   : > { %v8631_v60 = vpack.c.bf16 %v3573_v26, %v3573_v26  ;;  %4231 = vst.msk [vmem:[#allocation3 + $0x18] sm:$0xf] %vm1225_vm5, %v4138_v10  ;;  %4861 = vrot.lane.b32.xlu0 %v11328_v59, %s9626_s27 }
 0x242   : > { %v4844_v36 = vpop.permute.xlu1 %4843  ;;  %v9508_v34 = vld [vmem:[#allocation3 + $0x4] ss:$12 sps:$4 sm:$0xff]   ;;  %4691 = vst.msk [vmem:[#allocation3 + $0xac] sm:$0xf] %vm711_vm3, %v8757_v1  ;;  %v11420_v1 = vpop.f32.mrf.mxu1 }
 0x243   : > { %4936 = vst.msk [vmem:[#allocation3 + $0x28] sm:$0xf] %vm968_vm4, %v4844_v36  ;;  %v5489_v53 = vld [vmem:[#allocation2 + $0xc2] sm:$0xff]  ;;  %v5490_v56 = vld [vmem:[#allocation2 + $0xca] sm:$0xff]  ;;  %6204 = vmatprep.mubr.bf16.mxu1 %v9508_v34 }
 0x244   : > { %3733 = vst.msk [vmem:[#allocation3 + $0xc0] sm:$0xf] %vm711_vm3, %v8631_v60  ;;  %3903 = vrot.lane.b32.xlu1 %v11314_v38, %s9626_s27  ;;  %v11397_v4 = vpack.c.bf16 %v5489_v53, %v5489_v53  ;;  %v11399_v30 = vpack.c.bf16 %v5490_v56, %v5490_v56  ;;  %v4532_v47 = vld [vmem:[#allocation2 + $0xc9] sm:$0xff]  ;;  %6205 = vmatmul.mubr.bf16.vlgmr.msra.gmra.mxu1 %v9506_v63  ;;  %v5098_v20 = vpop.permute.xlu0 %5097  ;;  %v4977_v60 = vld [vmem:[#allocation2 + $0xc0] sm:$0xff] }
 0x245   : > { %v3574_v28 = vld [vmem:[#allocation2 + $0xc8] sm:$0xff]  ;;  %v8968_v12 = vpop.f32.mrf.mxu0  ;;  %9256 = vmatmul.mubr.msk.bf16.gmra.mxu0 %vm472_vm0, %v9509_v0  ;;  %v8758_v35 = vpack.c.bf16 %v4532_v47, %v4532_v47  ;;  %5191 = vst.msk [vmem:[#allocation3 + $0x1c] sm:$0xf] %vm1225_vm5, %v5098_v20  ;;  %4157 = vrot.lane.b32.xlu0 %v11266_v61, %s9627_s14  ;;  %v11429_v47 = vpack.c.bf16 %v4977_v60, %v4977_v60 }
 0x246   : > { %v8632_v45 = vpack.c.bf16 %v3574_v28, %v3574_v28  ;;  %v4140_v33 = vpop.permute.xlu1 %4139  ;;  %5649 = vst.msk [vmem:[#allocation3 + $0x98] sm:$0xf] %vm711_vm3, %v11397_v4  ;;  %5650 = vst.msk [vmem:[#allocation3 + $0xa4] sm:$0xf] %vm711_vm3, %v11399_v30  ;;  %v9560_v38 = vld [vmem:[%s12777_s3 + $0x88] sm:$0xff]   ;;  %v3433_v28 = vpop.f32.mrf.mxu1 }
 0x247   : > { %9369 = vmatpush3.bf16.msra.mxu1 %v9560_v38  ;;  %4232 = vst.msk [vmem:[#allocation3 + $0x24] sm:$0xf] %vm1225_vm5, %v4140_v33  ;;  %v8969_v58 = vpop.f32.mrf.mxu0  ;;  %v4978_v0 = vld [vmem:[#allocation2 + $0xc8] sm:$0xff] }
 0x248   : > { %4692 = vst.msk [vmem:[#allocation3 + $0xb8] sm:$0xf] %vm711_vm3, %v8758_v35  ;;  %3734 = vst.msk [vmem:[#allocation3 + $0xcc] sm:$0xf] %vm711_vm3, %v8632_v45  ;;  %9368 = vmatprep.subr.bf16.mxu1 %v9561_v50  ;;  %v8970_v44 = vadd.f32 %v8969_v58, %v8968_v12  ;;  %4863 = vrot.lane.b32.xlu1 %v11332_v9, %s9626_s27  ;;  %v4394_v10 = vpop.permute.xlu0 %4393  ;;  %v11434_v33 = vpack.c.bf16 %v4978_v0, %v4978_v0  ;;  %v5233_v38 = vld [vmem:[#allocation2 + $0xc1] sm:$0xff] }
 0x249   : > { %v8971_v26 = vpop.f32.mrf.mxu0  ;;  %4487 = vst.msk [vmem:[#allocation3 + $0x18] sm:$0xf] %vm1482_vm6, %v4394_v10  ;;  %5117 = vrot.lane.b32.xlu0 %v11429_v47, %s9627_s14 }
 0x24a   : > { %v5100_v36 = vpop.permute.xlu1 %5099  ;;  %v3270_v63 = vadd.f32 %v11218_v57, %v8970_v44  ;;  %v5234_v44 = vld [vmem:[#allocation2 + $0xc9] sm:$0xff] }
 0x24b   : > { %9370 = vmatpush3.bf16.msra.mxu1 %v9561_v50  ;;  %5192 = vst.msk [vmem:[#allocation3 + $0x28] sm:$0xf] %vm1225_vm5, %v5100_v36  ;;  %v8972_v34 = vpop.f32.mrf.mxu0  ;;  %v11453_v36 = vpack.c.bf16 %v5234_v44, %v5234_v44 }
 0x24c   : > { %v8973_v53 = vadd.f32 %v8972_v34, %v8971_v26  ;;  %v3431_v56 = vadd.f32 %v3430_v48, %v3270_v63  ;;  %4159 = vrot.lane.b32.xlu1 %v11270_v16, %s9627_s14  ;;  %v5354_v48 = vpop.permute.xlu0 %5353  ;;  %v11449_v26 = vpack.c.bf16 %v5233_v38, %v5233_v38 }
 0x24d   : > { %v9510_v12 = vld [vmem:[#allocation3 + $0x98] ss:$12 sps:$4 sm:$0xff]   ;;  %5447 = vst.msk [vmem:[#allocation3 + $0x1c] sm:$0xf] %vm1482_vm6, %v5354_v48  ;;  %4413 = vrot.lane.b32.xlu0 %v11349_v2, %s9628_s30 }
 0x24e   : > { %v3273_v61 = vadd.f32 %v11218_v57, %v8973_v53  ;;  %v3509_v35 = vmax.f32 %v3431_v56, 0.0  ;;  %v4396_v45 = vpop.permute.xlu1 %4395  ;;  %9259 = vmatprep.mubr.msk.bf16.mxu0 %vm472_vm0, %v9510_v12 }
 0x24f   : > { %4488 = vst.msk [vmem:[#allocation3 + $0x24] sm:$0xf] %vm1482_vm6, %v4396_v45 }
 0x250   : > { %3541 = vst.msk [vmem:[#allocation2 + $0xd9] sm:$0xff] %vm472_vm0, %v3509_v35  ;;  %v3434_v16 = vadd.f32 %v3433_v28, %v3273_v61  ;;  %5119 = vrot.lane.b32.xlu1 %v11434_v33, %s9627_s14  ;;  %v3886_v50 = vpop.permute.xlu0 %3885 }
 0x251   : > { %3977 = vst.msk [vmem:[#allocation3 + $0x30] sm:$0xf] %vm968_vm4, %v3886_v50  ;;  %5373 = vrot.lane.b32.xlu0 %v11449_v26, %s9628_s30 }
 0x252   : > { %v3510_v58 = vmax.f32 %v3434_v16, 0.0  ;;  %v5356_v20 = vpop.permute.xlu1 %5355 }
 0x253   : > { %5448 = vst.msk [vmem:[#allocation3 + $0x28] sm:$0xf] %vm1482_vm6, %v5356_v20 }
 0x254   : > { %3542 = vst.msk [vmem:[#allocation2 + $0xe1] sm:$0xff] %vm472_vm0, %v3510_v58  ;;  %4415 = vrot.lane.b32.xlu1 %v11360_v49, %s9628_s30  ;;  %v4846_v2 = vpop.permute.xlu0 %4845  ;;  %v5673_v53 = vld [vmem:[#allocation3 + $0x18] sm:$0xff] }
 0x255   : > { %4937 = vst.msk [vmem:[#allocation3 + $0x34] sm:$0xf] %vm968_vm4, %v4846_v2  ;;  %3905 = vrot.lane.b32.xlu0 %v11371_v3, %s9626_s27 }
 0x256   : > { %v3888_v60 = vpop.permute.xlu1 %3887 }
 0x257   : > { %3978 = vst.msk [vmem:[#allocation3 + $0x3c] sm:$0xf] %vm968_vm4, %v3888_v60  ;;  %v4533_v63 = vld [vmem:[#allocation2 + $0xd9] sm:$0xff] }
 0x258   : > { %5375 = vrot.lane.b32.xlu1 %v11453_v36, %s9628_s30  ;;  %v3575_v49 = vld [vmem:[#allocation2 + $0xd8] sm:$0xff]  ;;  %v8759_v34 = vpack.c.bf16 %v4533_v63, %v4533_v63  ;;  %v4142_v12 = vpop.permute.xlu0 %4141 }
 0x259   : > { %v8633_v10 = vpack.c.bf16 %v3575_v49, %v3575_v49  ;;  %4233 = vst.msk [vmem:[#allocation3 + $0x30] sm:$0xf] %vm1225_vm5, %v4142_v12  ;;  %4865 = vrot.lane.b32.xlu0 %v11397_v4, %s9626_s27  ;;  %v4979_v49 = vld [vmem:[#allocation2 + $0xd8] sm:$0xff] }
 0x25a   : > { %v4848_v0 = vpop.permute.xlu1 %4847  ;;  %v5675_v56 = vld [vmem:[#allocation3 + $0x24] sm:$0xff]  ;;  %4693 = vst.msk [vmem:[#allocation3 + $0xc4] sm:$0xf] %vm711_vm3, %v8759_v34 }
 0x25b   : > { %v9511_v28 = vld [vmem:[#allocation3 + $0x1c] ss:$12 sps:$4 sm:$0xff]   ;;  %4938 = vst.msk [vmem:[#allocation3 + $0x40] sm:$0xf] %vm968_vm4, %v4848_v0  ;;  %v8200_v61 = vcombine.low %v5673_v53, %v5675_v56  ;;  %v5492_v45 = vld [vmem:[#allocation2 + $0xe2] sm:$0xff] }
 0x25c   : > { %v5491_v35 = vld [vmem:[#allocation2 + $0xda] sm:$0xff]  ;;  %3735 = vst.msk [vmem:[#allocation3 + $0xd8] sm:$0xf] %vm711_vm3, %v8633_v10  ;;  %3907 = vrot.lane.b32.xlu1 %v11381_v52, %s9626_s27  ;;  %6212 = vmatprep.mubr.bf16.mxu1 %v9511_v28  ;;  %v11469_v48 = vpack.c.bf16 %v5492_v45, %v5492_v45  ;;  %v5102_v60 = vpop.permute.xlu0 %5101 }
 0x25d   : > { %v11467_v3 = vpack.c.bf16 %v5491_v35, %v5491_v35  ;;  %v4534_v16 = vld [vmem:[#allocation2 + $0xe1] sm:$0xff]  ;;  %v8974_v58 = vpop.f32.mrf.mxu0  ;;  %6213 = vmatmul.mubr.bf16.gmra.mxu1 %v8200_v61  ;;  %5193 = vst.msk [vmem:[#allocation3 + $0x34] sm:$0xf] %vm1225_vm5, %v5102_v60  ;;  %4161 = vrot.lane.b32.xlu0 %v11328_v59, %s9627_s14  ;;  %v11491_v61 = vpack.c.bf16 %v4979_v49, %v4979_v49  ;;  %v11522_v49 = vpop.f32.mrf.mxu1 }
 0x25e   : > { %v3576_v38 = vld [vmem:[#allocation2 + $0xe0] sm:$0xff]  ;;  %v8760_v20 = vpack.c.bf16 %v4534_v16, %v4534_v16  ;;  %v4144_v44 = vpop.permute.xlu1 %4143  ;;  %5652 = vst.msk [vmem:[#allocation3 + $0xbc] sm:$0xf] %vm711_vm3, %v11469_v48 }
 0x25f   : > { %v8634_v50 = vpack.c.bf16 %v3576_v38, %v3576_v38  ;;  %5651 = vst.msk [vmem:[#allocation3 + $0xb0] sm:$0xf] %vm711_vm3, %v11467_v3  ;;  %v8975_v52 = vpop.f32.mrf.mxu0  ;;  %v4980_v56 = vld [vmem:[#allocation2 + $0xe0] sm:$0xff] }
 0x260   : > { %4234 = vst.msk [vmem:[#allocation3 + $0x3c] sm:$0xf] %vm1225_vm5, %v4144_v44  ;;  %v8976_v2 = vadd.f32 %v8975_v52, %v8974_v58  ;;  %4867 = vrot.lane.b32.xlu1 %v11399_v30, %s9626_s27  ;;  %v4398_v53 = vpop.permute.xlu0 %4397  ;;  %v11496_v38 = vpack.c.bf16 %v4980_v56, %v4980_v56  ;;  %v5235_v58 = vld [vmem:[#allocation2 + $0xd9] sm:$0xff]  ;;  %v5236_v52 = vld [vmem:[#allocation2 + $0xe1] sm:$0xff] }
 0x261   : > { %4694 = vst.msk [vmem:[#allocation3 + $0xd0] sm:$0xf] %vm711_vm3, %v8760_v20  ;;  %3736 = vst.msk [vmem:[#allocation3 + $0xe4] sm:$0xf] %vm711_vm3, %v8634_v50  ;;  %v8977_v63 = vpop.f32.mrf.mxu0  ;;  %5121 = vrot.lane.b32.xlu0 %v11491_v61, %s9627_s14 }
 0x262   : > { %v3278_v34 = vadd.f32 %v11218_v57, %v8976_v2  ;;  %v5104_v10 = vpop.permute.xlu1 %5103  ;;  %4489 = vst.msk [vmem:[#allocation3 + $0x30] sm:$0xf] %vm1482_vm6, %v4398_v53  ;;  %v11516_v2 = vpack.c.bf16 %v5236_v52, %v5236_v52 }
 0x263   : > { %5194 = vst.msk [vmem:[#allocation3 + $0x40] sm:$0xf] %vm1225_vm5, %v5104_v10  ;;  %v8978_v0 = vpop.f32.mrf.mxu0 }
 0x264   : > { %v3439_v28 = vadd.f32 %v11389_v31, %v3278_v34  ;;  %v8979_v12 = vadd.f32 %v8978_v0, %v8977_v63  ;;  %4163 = vrot.lane.b32.xlu1 %v11332_v9, %s9627_s14  ;;  %v5358_v31 = vpop.permute.xlu0 %5357 }
 0x265   : > { %5449 = vst.msk [vmem:[#allocation3 + $0x34] sm:$0xf] %vm1482_vm6, %v5358_v31  ;;  %4417 = vrot.lane.b32.xlu0 %v11429_v47, %s9628_s30 }
 0x266   : > { %v9513_v35 = vld [vmem:[#allocation3 + $0xb0] ss:$12 sps:$4 sm:$0xff]   ;;  %v3511_v45 = vmax.f32 %v3439_v28, 0.0  ;;  %v3281_v16 = vadd.f32 %v11218_v57, %v8979_v12  ;;  %v4400_v59 = vpop.permute.xlu1 %4399 }
 0x267   : > { %4490 = vst.msk [vmem:[#allocation3 + $0x3c] sm:$0xf] %vm1482_vm6, %v4400_v59  ;;  %9260 = vmatmul.mubr.msk.bf16.gmra.mxu0 %vm472_vm0, %v9513_v35 }
 0x268   : > { %3543 = vst.msk [vmem:[#allocation2 + $0xf1] sm:$0xff] %vm472_vm0, %v3511_v45  ;;  %v3442_v9 = vadd.f32 %v11420_v1, %v3281_v16  ;;  %5123 = vrot.lane.b32.xlu1 %v11496_v38, %s9627_s14  ;;  %v3890_v44 = vpop.permute.xlu0 %3889  ;;  %v11512_v1 = vpack.c.bf16 %v5235_v58, %v5235_v58 }
 0x269   : > { %3979 = vst.msk [vmem:[#allocation3 + $0x48] sm:$0xf] %vm968_vm4, %v3890_v44 }
 0x26a   : > { %v3512_v20 = vmax.f32 %v3442_v9, 0.0  ;;  %v5360_v50 = vpop.permute.xlu1 %5359  ;;  %5377 = vrot.lane.b32.xlu0 %v11512_v1, %s9628_s30 }
 0x26b   : > { %5450 = vst.msk [vmem:[#allocation3 + $0x40] sm:$0xf] %vm1482_vm6, %v5360_v50 }
 0x26c   : > { %3544 = vst.msk [vmem:[#allocation2 + $0xf9] sm:$0xff] %vm472_vm0, %v3512_v20  ;;  %4419 = vrot.lane.b32.xlu1 %v11434_v33, %s9628_s30  ;;  %v4850_v47 = vpop.permute.xlu0 %4849  ;;  %v5677_v53 = vld [vmem:[#allocation3 + $0x30] sm:$0xff]  ;;  %v3446_v20 = vpop.f32.mrf.mxu1 }
 0x26d   : > { %4939 = vst.msk [vmem:[#allocation3 + $0x4c] sm:$0xf] %vm968_vm4, %v4850_v47 }
 0x26e   : > { %v3892_v60 = vpop.permute.xlu1 %3891  ;;  %3909 = vrot.lane.b32.xlu0 %v11449_v26, %s9626_s27 }
 0x26f   : > { %3980 = vst.msk [vmem:[#allocation3 + $0x54] sm:$0xf] %vm968_vm4, %v3892_v60  ;;  %v4535_v63 = vld [vmem:[#allocation2 + $0xf1] sm:$0xff] }
 0x270   : > { %5379 = vrot.lane.b32.xlu1 %v11516_v2, %s9628_s30  ;;  %v3577_v33 = vld [vmem:[#allocation2 + $0xf0] sm:$0xff]  ;;  %v8761_v34 = vpack.c.bf16 %v4535_v63, %v4535_v63  ;;  %v4146_v12 = vpop.permute.xlu0 %4145 }
 0x271   : > { %v8635_v10 = vpack.c.bf16 %v3577_v33, %v3577_v33  ;;  %4235 = vst.msk [vmem:[#allocation3 + $0x48] sm:$0xf] %vm1225_vm5, %v4146_v12  ;;  %v11548_v33 = vpop.f32.mrf.mxu1 }
 0x272   : > { %v4852_v0 = vpop.permute.xlu1 %4851  ;;  %v5679_v56 = vld [vmem:[#allocation3 + $0x3c] sm:$0xff]  ;;  %4695 = vst.msk [vmem:[#allocation3 + $0xdc] sm:$0xf] %vm711_vm3, %v8761_v34  ;;  %4869 = vrot.lane.b32.xlu0 %v11467_v3, %s9626_s27 }
 0x273   : > { %v9514_v28 = vld [vmem:[#allocation3 + $0x34] ss:$12 sps:$4 sm:$0xff]   ;;  %4940 = vst.msk [vmem:[#allocation3 + $0x58] sm:$0xf] %vm968_vm4, %v4852_v0  ;;  %v8203_v35 = vcombine.low %v5677_v53, %v5679_v56  ;;  %v5494_v16 = vld [vmem:[#allocation2 + $0xfa] sm:$0xff] }
 0x274   : > { %v5493_v45 = vld [vmem:[#allocation2 + $0xf2] sm:$0xff]  ;;  %3737 = vst.msk [vmem:[#allocation3 + $0xf0] sm:$0xf] %vm711_vm3, %v8635_v10  ;;  %3911 = vrot.lane.b32.xlu1 %v11453_v36, %s9626_s27  ;;  %6220 = vmatprep.mubr.bf16.mxu1 %v9514_v28  ;;  %v11534_v59 = vpack.c.bf16 %v5494_v16, %v5494_v16  ;;  %v5106_v60 = vpop.permute.xlu0 %5105  ;;  %v3449_v16 = vpop.f32.mrf.mxu1 }
 0x275   : > { %v11532_v26 = vpack.c.bf16 %v5493_v45, %v5493_v45  ;;  %v4536_v31 = vld [vmem:[#allocation2 + $0xf9] sm:$0xff]  ;;  %v8980_v58 = vpop.f32.mrf.mxu0  ;;  %6221 = vmatmul.mubr.bf16.gmra.mxu1 %v8203_v35  ;;  %5195 = vst.msk [vmem:[#allocation3 + $0x4c] sm:$0xf] %vm1225_vm5, %v5106_v60  ;;  %v4981_v34 = vld [vmem:[#allocation2 + $0xf0] sm:$0xff] }
 0x276   : > { %v3578_v9 = vld [vmem:[#allocation2 + $0xf8] sm:$0xff]  ;;  %v8762_v50 = vpack.c.bf16 %v4536_v31, %v4536_v31  ;;  %v4148_v52 = vpop.permute.xlu1 %4147  ;;  %5654 = vst.msk [vmem:[#allocation3 + $0xd4] sm:$0xf] %vm711_vm3, %v11534_v59  ;;  %4165 = vrot.lane.b32.xlu0 %v11397_v4, %s9627_s14  ;;  %v11557_v45 = vpack.c.bf16 %v4981_v34, %v4981_v34 }
 0x277   : > { %v8636_v44 = vpack.c.bf16 %v3578_v9, %v3578_v9  ;;  %5653 = vst.msk [vmem:[#allocation3 + $0xc8] sm:$0xf] %vm711_vm3, %v11532_v26  ;;  %v8981_v36 = vpop.f32.mrf.mxu0  ;;  %v4982_v28 = vld [vmem:[#allocation2 + $0xf8] sm:$0xff] }
 0x278   : > { %4236 = vst.msk [vmem:[#allocation3 + $0x54] sm:$0xf] %vm1225_vm5, %v4148_v52  ;;  %v8982_v47 = vadd.f32 %v8981_v36, %v8980_v58  ;;  %4871 = vrot.lane.b32.xlu1 %v11469_v48, %s9626_s27  ;;  %v4402_v56 = vpop.permute.xlu0 %4401  ;;  %v5238_v60 = vld [vmem:[#allocation2 + $0xf9] sm:$0xff] }
 0x279   : > { %4696 = vst.msk [vmem:[#allocation3 + $0xe8] sm:$0xf] %vm711_vm3, %v8762_v50  ;;  %3738 = vst.msk [vmem:[#allocation3 + $0xfc] sm:$0xf] %vm711_vm3, %v8636_v44  ;;  %v8983_v63 = vpop.f32.mrf.mxu0  ;;  %v11562_v50 = vpack.c.bf16 %v4982_v28, %v4982_v28  ;;  %v11581_v34 = vpack.c.bf16 %v5238_v60, %v5238_v60 }
 0x27a   : > { %v3286_v10 = vadd.f32 %v11218_v57, %v8982_v47  ;;  %v5108_v0 = vpop.permute.xlu1 %5107  ;;  %4491 = vst.msk [vmem:[#allocation3 + $0x48] sm:$0xf] %vm1482_vm6, %v4402_v56  ;;  %5125 = vrot.lane.b32.xlu0 %v11557_v45, %s9627_s14 }
 0x27b   : > { %5196 = vst.msk [vmem:[#allocation3 + $0x58] sm:$0xf] %vm1225_vm5, %v5108_v0  ;;  %v8984_v53 = vpop.f32.mrf.mxu0 }
 0x27c   : > { %v8985_v12 = vadd.f32 %v8984_v53, %v8983_v63  ;;  %v3447_v35 = vadd.f32 %v3446_v20, %v3286_v10  ;;  %4167 = vrot.lane.b32.xlu1 %v11399_v30, %s9627_s14  ;;  %v5362_v20 = vpop.permute.xlu0 %5361 }
 0x27d   : > { %5451 = vst.msk [vmem:[#allocation3 + $0x4c] sm:$0xf] %vm1482_vm6, %v5362_v20 }
 0x27e   : > { %v9516_v31 = vld [vmem:[#allocation3 + $0xc8] ss:$12 sps:$4 sm:$0xff]   ;;  %v3289_v9 = vadd.f32 %v11218_v57, %v8985_v12  ;;  %v3513_v58 = vmax.f32 %v3447_v35, 0.0  ;;  %v4404_v4 = vpop.permute.xlu1 %4403  ;;  %4421 = vrot.lane.b32.xlu0 %v11491_v61, %s9628_s30 }
 0x27f   : > { %4492 = vst.msk [vmem:[#allocation3 + $0x54] sm:$0xf] %vm1482_vm6, %v4404_v4  ;;  %9263 = vmatprep.mubr.msk.bf16.mxu0 %vm472_vm0, %v9516_v31  ;;  %v5237_v57 = vld [vmem:[#allocation2 + $0xf1] sm:$0xff] }
 0x280   : > { %3545 = vst.msk [vmem:[#allocation2 + $0x109] sm:$0xff] %vm472_vm0, %v3513_v58  ;;  %v3450_v30 = vadd.f32 %v3449_v16, %v3289_v9  ;;  %5127 = vrot.lane.b32.xlu1 %v11562_v50, %s9627_s14  ;;  %v3894_v36 = vpop.permute.xlu0 %3893  ;;  %v11577_v47 = vpack.c.bf16 %v5237_v57, %v5237_v57 }
 0x281   : > { %3981 = vst.msk [vmem:[#allocation3 + $0x60] sm:$0xf] %vm968_vm4, %v3894_v36 }
 0x282   : > { %v3514_v44 = vmax.f32 %v3450_v30, 0.0  ;;  %v5364_v52 = vpop.permute.xlu1 %5363  ;;  %5381 = vrot.lane.b32.xlu0 %v11577_v47, %s9628_s30 }
 0x283   : > { %5452 = vst.msk [vmem:[#allocation3 + $0x58] sm:$0xf] %vm1482_vm6, %v5364_v52 }
 0x284   : > { %3546 = vst.msk [vmem:[#allocation2 + $0x111] sm:$0xff] %vm472_vm0, %v3514_v44  ;;  %4423 = vrot.lane.b32.xlu1 %v11496_v38, %s9628_s30  ;;  %v4854_v61 = vpop.permute.xlu0 %4853  ;;  %v5681_v28 = vld [vmem:[#allocation3 + $0x48] sm:$0xff] }
 0x285   : > { %4941 = vst.msk [vmem:[#allocation3 + $0x64] sm:$0xf] %vm968_vm4, %v4854_v61 }
 0x286   : > { %v3896_v63 = vpop.permute.xlu1 %3895  ;;  %3913 = vrot.lane.b32.xlu0 %v11512_v1, %s9626_s27 }
 0x287   : > { %3982 = vst.msk [vmem:[#allocation3 + $0x6c] sm:$0xf] %vm968_vm4, %v3896_v63  ;;  %v4537_v10 = vld [vmem:[#allocation2 + $0x109] sm:$0xff] }
 0x288   : > { %5383 = vrot.lane.b32.xlu1 %v11581_v34, %s9628_s30  ;;  %v3579_v38 = vld [vmem:[#allocation2 + $0x108] sm:$0xff]  ;;  %v8763_v0 = vpack.c.bf16 %v4537_v10, %v4537_v10  ;;  %v4150_v16 = vpop.permute.xlu0 %4149 }
 0x289   : > { %v8637_v53 = vpack.c.bf16 %v3579_v38, %v3579_v38  ;;  %4237 = vst.msk [vmem:[#allocation3 + $0x60] sm:$0xf] %vm1225_vm5, %v4150_v16  ;;  %v4983_v10 = vld [vmem:[#allocation2 + $0x108] sm:$0xff]  ;;  %v11614_v38 = vld [vmem:[%s12776_s2] ss:$0 sm:$0xff] }
 0x28a   : > { %v4856_v56 = vpop.permute.xlu1 %4855  ;;  %v5683_v12 = vld [vmem:[#allocation3 + $0x54] sm:$0xff]  ;;  %4697 = vst.msk [vmem:[#allocation3 + $0xf4] sm:$0xf] %vm711_vm3, %v8763_v0  ;;  %4873 = vrot.lane.b32.xlu0 %v11532_v26, %s9626_s27 }
 0x28b   : > { %v9517_v35 = vld [vmem:[#allocation3 + $0x4c] ss:$12 sps:$4 sm:$0xff]   ;;  %4942 = vst.msk [vmem:[#allocation3 + $0x70] sm:$0xf] %vm968_vm4, %v4856_v56  ;;  %v8206_v31 = vcombine.low %v5681_v28, %v5683_v12  ;;  %v5496_v58 = vld [vmem:[#allocation2 + $0x112] sm:$0xff] }
 0x28c   : > { %v5495_v9 = vld [vmem:[#allocation2 + $0x10a] sm:$0xff]  ;;  %3739 = vst.msk [vmem:[#allocation3 + $0x108] sm:$0xf] %vm711_vm3, %v8637_v53  ;;  %3915 = vrot.lane.b32.xlu1 %v11516_v2, %s9626_s27  ;;  %6228 = vmatprep.mubr.bf16.mxu1 %v9517_v35  ;;  %v11597_v4 = vpack.c.bf16 %v5496_v58, %v5496_v58  ;;  %v5110_v60 = vpop.permute.xlu0 %5109 }
 0x28d   : > { %v11595_v1 = vpack.c.bf16 %v5495_v9, %v5495_v9  ;;  %v4538_v20 = vld [vmem:[#allocation2 + $0x111] sm:$0xff]  ;;  %v8986_v57 = vpop.f32.mrf.mxu0  ;;  %6229 = vmatmul.mubr.bf16.gmra.mxu1 %v8206_v31  ;;  %5197 = vst.msk [vmem:[#allocation3 + $0x64] sm:$0xf] %vm1225_vm5, %v5110_v60  ;;  %v11624_v31 = vpack.c.bf16 %v4983_v10, %v4983_v10  ;;  %v11655_v10 = vpop.f32.mrf.mxu1 }
 0x28e   : > { %v3580_v30 = vld [vmem:[#allocation2 + $0x110] sm:$0xff]  ;;  %v8764_v44 = vpack.c.bf16 %v4538_v20, %v4538_v20  ;;  %v4152_v36 = vpop.permute.xlu1 %4151  ;;  %5656 = vst.msk [vmem:[#allocation3 + $0xec] sm:$0xf] %vm711_vm3, %v11597_v4  ;;  %4169 = vrot.lane.b32.xlu0 %v11467_v3, %s9627_s14 }
 0x28f   : > { %v8638_v52 = vpack.c.bf16 %v3580_v30, %v3580_v30  ;;  %5655 = vst.msk [vmem:[#allocation3 + $0xe0] sm:$0xf] %vm711_vm3, %v11595_v1  ;;  %v8987_v2 = vpop.f32.mrf.mxu0  ;;  %v4984_v12 = vld [vmem:[#allocation2 + $0x110] sm:$0xff] }
 0x290   : > { %4238 = vst.msk [vmem:[#allocation3 + $0x6c] sm:$0xf] %vm1225_vm5, %v4152_v36  ;;  %v8988_v63 = vadd.f32 %v8987_v2, %v8986_v57  ;;  %4875 = vrot.lane.b32.xlu1 %v11534_v59, %s9626_s27  ;;  %v4406_v28 = vpop.permute.xlu0 %4405  ;;  %v11629_v30 = vpack.c.bf16 %v4984_v12, %v4984_v12  ;;  %v5239_v57 = vld [vmem:[#allocation2 + $0x109] sm:$0xff]  ;;  %v5240_v2 = vld [vmem:[#allocation2 + $0x111] sm:$0xff] }
 0x291   : > { %4698 = vst.msk [vmem:[#allocation3 + $0x100] sm:$0xf] %vm711_vm3, %v8764_v44  ;;  %3740 = vst.msk [vmem:[#allocation3 + $0x114] sm:$0xf] %vm711_vm3, %v8638_v52  ;;  %v8989_v61 = vpop.f32.mrf.mxu0 }
 0x292   : > { %v3294_v0 = vadd.f32 %v11614_v38, %v8988_v63  ;;  %v5112_v53 = vpop.permute.xlu1 %5111  ;;  %4493 = vst.msk [vmem:[#allocation3 + $0x60] sm:$0xf] %vm1482_vm6, %v4406_v28  ;;  %5129 = vrot.lane.b32.xlu0 %v11624_v31, %s9627_s14  ;;  %v11649_v63 = vpack.c.bf16 %v5240_v2, %v5240_v2 }
 0x293   : > { %5198 = vst.msk [vmem:[#allocation3 + $0x70] sm:$0xf] %vm1225_vm5, %v5112_v53  ;;  %v8990_v56 = vpop.f32.mrf.mxu0 }
 0x294   : > { %v3455_v35 = vadd.f32 %v11522_v49, %v3294_v0  ;;  %v8991_v16 = vadd.f32 %v8990_v56, %v8989_v61  ;;  %4171 = vrot.lane.b32.xlu1 %v11469_v48, %s9627_s14  ;;  %v5366_v49 = vpop.permute.xlu0 %5365 }
 0x295   : > { %5453 = vst.msk [vmem:[#allocation3 + $0x64] sm:$0xf] %vm1482_vm6, %v5366_v49 }
 0x296   : > { %v9519_v9 = vld [vmem:[#allocation3 + $0xe0] ss:$12 sps:$4 sm:$0xff]   ;;  %v3515_v58 = vmax.f32 %v3455_v35, 0.0  ;;  %v3297_v20 = vadd.f32 %v11614_v38, %v8991_v16  ;;  %v4408_v3 = vpop.permute.xlu1 %4407  ;;  %4425 = vrot.lane.b32.xlu0 %v11557_v45, %s9628_s30 }
 0x297   : > { %4494 = vst.msk [vmem:[#allocation3 + $0x6c] sm:$0xf] %vm1482_vm6, %v4408_v3  ;;  %9264 = vmatmul.mubr.msk.bf16.gmra.mxu0 %vm472_vm0, %v9519_v9 }
 0x298   : > { %3547 = vst.msk [vmem:[#allocation2 + $0x121] sm:$0xff] %vm472_vm0, %v3515_v58  ;;  %v3458_v48 = vadd.f32 %v11548_v33, %v3297_v20  ;;  %5131 = vrot.lane.b32.xlu1 %v11629_v30, %s9627_s14  ;;  %v3898_v36 = vpop.permute.xlu0 %3897  ;;  %v11645_v33 = vpack.c.bf16 %v5239_v57, %v5239_v57 }
 0x299   : > { %3983 = vst.msk [vmem:[#allocation3 + $0x78] sm:$0xf] %vm968_vm4, %v3898_v36 }
 0x29a   : > { %v3516_v44 = vmax.f32 %v3458_v48, 0.0  ;;  %v5368_v52 = vpop.permute.xlu1 %5367  ;;  %5385 = vrot.lane.b32.xlu0 %v11645_v33, %s9628_s30 }
 0x29b   : > { %5454 = vst.msk [vmem:[#allocation3 + $0x70] sm:$0xf] %vm1482_vm6, %v5368_v52 }
 0x29c   : > { %3548 = vst.msk [vmem:[#allocation2 + $0x129] sm:$0xff] %vm472_vm0, %v3516_v44  ;;  %4427 = vrot.lane.b32.xlu1 %v11562_v50, %s9628_s30  ;;  %v4858_v45 = vpop.permute.xlu0 %4857  ;;  %v5685_v28 = vld [vmem:[#allocation3 + $0x60] sm:$0xff]  ;;  %v3462_v44 = vpop.f32.mrf.mxu1 }
 0x29d   : > { %4943 = vst.msk [vmem:[#allocation3 + $0x7c] sm:$0xf] %vm968_vm4, %v4858_v45 }
 0x29e   : > { %v3900_v60 = vpop.permute.xlu1 %3899  ;;  %3917 = vrot.lane.b32.xlu0 %v11577_v47, %s9626_s27 }
 0x29f   : > { %3984 = vst.msk [vmem:[#allocation3 + $0x84] sm:$0xf] %vm968_vm4, %v3900_v60  ;;  %v4539_v61 = vld [vmem:[#allocation2 + $0x121] sm:$0xff] }
 0x2a0   : > { %5387 = vrot.lane.b32.xlu1 %v11649_v63, %s9628_s30  ;;  %v3581_v50 = vld [vmem:[#allocation2 + $0x120] sm:$0xff]  ;;  %v8765_v0 = vpack.c.bf16 %v4539_v61, %v4539_v61  ;;  %v4154_v16 = vpop.permute.xlu0 %4153 }
 0x2a1   : > { %v8639_v53 = vpack.c.bf16 %v3581_v50, %v3581_v50  ;;  %4239 = vst.msk [vmem:[#allocation3 + $0x78] sm:$0xf] %vm1225_vm5, %v4154_v16  ;;  %v11681_v50 = vpop.f32.mrf.mxu1 }
 0x2a2   : > { %v4860_v56 = vpop.permute.xlu1 %4859  ;;  %v5687_v12 = vld [vmem:[#allocation3 + $0x6c] sm:$0xff]  ;;  %4699 = vst.msk [vmem:[#allocation3 + $0x10c] sm:$0xf] %vm711_vm3, %v8765_v0  ;;  %4877 = vrot.lane.b32.xlu0 %v11595_v1, %s9626_s27 }
 0x2a3   : > { %v9520_v35 = vld [vmem:[#allocation3 + $0x64] ss:$12 sps:$4 sm:$0xff]   ;;  %4944 = vst.msk [vmem:[#allocation3 + $0x88] sm:$0xf] %vm968_vm4, %v4860_v56  ;;  %v8209_v9 = vcombine.low %v5685_v28, %v5687_v12  ;;  %v5498_v20 = vld [vmem:[#allocation2 + $0x12a] sm:$0xff] }
 0x2a4   : > { %v5497_v58 = vld [vmem:[#allocation2 + $0x122] sm:$0xff]  ;;  %3741 = vst.msk [vmem:[#allocation3 + $0x120] sm:$0xf] %vm711_vm3, %v8639_v53  ;;  %3919 = vrot.lane.b32.xlu1 %v11581_v34, %s9626_s27  ;;  %6236 = vmatprep.mubr.bf16.mxu1 %v9520_v35  ;;  %v11667_v3 = vpack.c.bf16 %v5498_v20, %v5498_v20  ;;  %v5114_v60 = vpop.permute.xlu0 %5113  ;;  %v3465_v20 = vpop.f32.mrf.mxu1 }
 0x2a5   : > { %v11665_v47 = vpack.c.bf16 %v5497_v58, %v5497_v58  ;;  %v4540_v49 = vld [vmem:[#allocation2 + $0x129] sm:$0xff]  ;;  %v8992_v57 = vpop.f32.mrf.mxu0  ;;  %6237 = vmatmul.mubr.bf16.gmra.mxu1 %v8209_v9  ;;  %5199 = vst.msk [vmem:[#allocation3 + $0x7c] sm:$0xf] %vm1225_vm5, %v5114_v60  ;;  %v4985_v0 = vld [vmem:[#allocation2 + $0x120] sm:$0xff] }
 0x2a6   : > { %v3582_v48 = vld [vmem:[#allocation2 + $0x128] sm:$0xff]  ;;  %v8766_v52 = vpack.c.bf16 %v4540_v49, %v4540_v49  ;;  %v4156_v2 = vpop.permute.xlu1 %4155  ;;  %5658 = vst.msk [vmem:[#allocation3 + $0x104] sm:$0xf] %vm711_vm3, %v11667_v3  ;;  %4173 = vrot.lane.b32.xlu0 %v11532_v26, %s9627_s14  ;;  %v11690_v58 = vpack.c.bf16 %v4985_v0, %v4985_v0 }
 0x2a7   : > { %v8640_v36 = vpack.c.bf16 %v3582_v48, %v3582_v48  ;;  %5657 = vst.msk [vmem:[#allocation3 + $0xf8] sm:$0xf] %vm711_vm3, %v11665_v47  ;;  %v8993_v34 = vpop.f32.mrf.mxu0  ;;  %v4986_v35 = vld [vmem:[#allocation2 + $0x128] sm:$0xff] }
 0x2a8   : > { %4240 = vst.msk [vmem:[#allocation3 + $0x84] sm:$0xf] %vm1225_vm5, %v4156_v2  ;;  %v8994_v45 = vadd.f32 %v8993_v34, %v8992_v57  ;;  %4879 = vrot.lane.b32.xlu1 %v11597_v4, %s9626_s27  ;;  %v4410_v12 = vpop.permute.xlu0 %4409 }
 0x2a9   : > { %4700 = vst.msk [vmem:[#allocation3 + $0x118] sm:$0xf] %vm711_vm3, %v8766_v52  ;;  %3742 = vst.msk [vmem:[#allocation3 + $0x12c] sm:$0xf] %vm711_vm3, %v8640_v36  ;;  %v8995_v61 = vpop.f32.mrf.mxu0  ;;  %v11695_v52 = vpack.c.bf16 %v4986_v35, %v4986_v35  ;;  %v5241_v36 = vld [vmem:[#allocation2 + $0x121] sm:$0xff] }
 0x2aa   : > { %v5116_v53 = vpop.permute.xlu1 %5115  ;;  %v3302_v56 = vadd.f32 %v11614_v38, %v8994_v45  ;;  %4495 = vst.msk [vmem:[#allocation3 + $0x78] sm:$0xf] %vm1482_vm6, %v4410_v12  ;;  %5133 = vrot.lane.b32.xlu0 %v11690_v58, %s9627_s14  ;;  %v5242_v45 = vld [vmem:[#allocation2 + $0x129] sm:$0xff] }
 0x2ab   : > { %5200 = vst.msk [vmem:[#allocation3 + $0x88] sm:$0xf] %vm1225_vm5, %v5116_v53  ;;  %v8996_v28 = vpop.f32.mrf.mxu0  ;;  %v11714_v53 = vpack.c.bf16 %v5242_v45, %v5242_v45 }
 0x2ac   : > { %v8997_v16 = vadd.f32 %v8996_v28, %v8995_v61  ;;  %v3463_v9 = vadd.f32 %v3462_v44, %v3302_v56  ;;  %4175 = vrot.lane.b32.xlu1 %v11534_v59, %s9627_s14  ;;  %v5370_v44 = vpop.permute.xlu0 %5369  ;;  %v11710_v61 = vpack.c.bf16 %v5241_v36, %v5241_v36 }
 0x2ad   : > { %5455 = vst.msk [vmem:[#allocation3 + $0x7c] sm:$0xf] %vm1482_vm6, %v5370_v44 }
 0x2ae   : > { %v9522_v49 = vld [vmem:[#allocation3 + $0xf8] ss:$12 sps:$4 sm:$0xff]   ;;  %v3517_v48 = vmax.f32 %v3463_v9, 0.0  ;;  %v4412_v26 = vpop.permute.xlu1 %4411  ;;  %v3305_v57 = vadd.f32 %v11614_v38, %v8997_v16  ;;  %4429 = vrot.lane.b32.xlu0 %v11624_v31, %s9628_s30 }
 0x2af   : > { %4496 = vst.msk [vmem:[#allocation3 + $0x84] sm:$0xf] %vm1482_vm6, %v4412_v26  ;;  %9267 = vmatprep.mubr.msk.bf16.mxu0 %vm472_vm0, %v9522_v49 }
 0x2b0   : > { %3549 = vst.msk [vmem:[#allocation2 + $0x139] sm:$0xff] %vm472_vm0, %v3517_v48  ;;  %v3466_v59 = vadd.f32 %v3465_v20, %v3305_v57  ;;  %5135 = vrot.lane.b32.xlu1 %v11695_v52, %s9627_s14  ;;  %v3902_v60 = vpop.permute.xlu0 %3901 }
 0x2b1   : > { %3985 = vst.msk [vmem:[#allocation3 + $0x90] sm:$0xf] %vm968_vm4, %v3902_v60 }
 0x2b2   : > { %v3518_v2 = vmax.f32 %v3466_v59, 0.0  ;;  %v5372_v34 = vpop.permute.xlu1 %5371  ;;  %5389 = vrot.lane.b32.xlu0 %v11710_v61, %s9628_s30 }
 0x2b3   : > { %5456 = vst.msk [vmem:[#allocation3 + $0x88] sm:$0xf] %vm1482_vm6, %v5372_v34 }
 0x2b4   : > { %3550 = vst.msk [vmem:[#allocation2 + $0x141] sm:$0xff] %vm472_vm0, %v3518_v2  ;;  %4431 = vrot.lane.b32.xlu1 %v11629_v30, %s9628_s30  ;;  %v4862_v56 = vpop.permute.xlu0 %4861  ;;  %v5689_v16 = vld [vmem:[#allocation3 + $0x78] sm:$0xff] }
 0x2b5   : > { %4945 = vst.msk [vmem:[#allocation3 + $0x94] sm:$0xf] %vm968_vm4, %v4862_v56 }
 0x2b6   : > { %v3904_v0 = vpop.permute.xlu1 %3903  ;;  %3921 = vrot.lane.b32.xlu0 %v11645_v33, %s9626_s27 }
 0x2b7   : > { %3986 = vst.msk [vmem:[#allocation3 + $0x9c] sm:$0xf] %vm968_vm4, %v3904_v0  ;;  %v5243_v31 = vld [vmem:[#allocation2 + $0x139] sm:$0xff] }
 0x2b8   : > { %5391 = vrot.lane.b32.xlu1 %v11714_v53, %s9628_s30  ;;  %v11719_v28 = vpack.c.bf16 %v5243_v31, %v5243_v31  ;;  %v3583_v30 = vld [vmem:[#allocation2 + $0x138] sm:$0xff]  ;;  %v4158_v57 = vpop.permute.xlu0 %4157 }
 0x2b9   : > { %v8641_v12 = vpack.c.bf16 %v3583_v30, %v3583_v30  ;;  %4241 = vst.msk [vmem:[#allocation3 + $0x90] sm:$0xf] %vm1225_vm5, %v4158_v57  ;;  %v4987_v30 = vld [vmem:[#allocation2 + $0x138] sm:$0xff] }
 0x2ba   : > { %v4864_v35 = vpop.permute.xlu1 %4863  ;;  %v5691_v9 = vld [vmem:[#allocation3 + $0x84] sm:$0xff]  ;;  %4701 = vst.msk [vmem:[#allocation3 + $0x124] sm:$0xf] %vm711_vm3, %v11719_v28  ;;  %4881 = vrot.lane.b32.xlu0 %v11665_v47, %s9626_s27 }
 0x2bb   : > { %v9523_v20 = vld [vmem:[#allocation3 + $0x7c] ss:$12 sps:$4 sm:$0xff]   ;;  %4946 = vst.msk [vmem:[#allocation3 + $0xa0] sm:$0xf] %vm968_vm4, %v4864_v35  ;;  %v8212_v49 = vcombine.low %v5689_v16, %v5691_v9  ;;  %v5500_v26 = vld [vmem:[#allocation2 + $0x142] sm:$0xff] }
 0x2bc   : > { %v5499_v48 = vld [vmem:[#allocation2 + $0x13a] sm:$0xff]  ;;  %3743 = vst.msk [vmem:[#allocation3 + $0x138] sm:$0xf] %vm711_vm3, %v8641_v12  ;;  %3923 = vrot.lane.b32.xlu1 %v11649_v63, %s9626_s27  ;;  %6244 = vmatprep.mubr.bf16.mxu1 %v9523_v20  ;;  %v11732_v33 = vpack.c.bf16 %v5500_v26, %v5500_v26  ;;  %v5118_v31 = vpop.permute.xlu0 %5117  ;;  %v11757_v26 = vpack.c.bf16 %v4987_v30, %v4987_v30 }
 0x2bd   : > { %v11730_v44 = vpack.c.bf16 %v5499_v48, %v5499_v48  ;;  %v5244_v59 = vld [vmem:[#allocation2 + $0x141] sm:$0xff]  ;;  %v8998_v2 = vpop.f32.mrf.mxu0  ;;  %6245 = vmatmul.mubr.bf16.gmra.mxu1 %v8212_v49  ;;  %5201 = vst.msk [vmem:[#allocation3 + $0x94] sm:$0xf] %vm1225_vm5, %v5118_v31 }
 0x2be   : > { %v3584_v36 = vld [vmem:[#allocation2 + $0x140] sm:$0xff]  ;;  %v11735_v34 = vpack.c.bf16 %v5244_v59, %v5244_v59  ;;  %v4160_v45 = vpop.permute.xlu1 %4159  ;;  %5660 = vst.msk [vmem:[#allocation3 + $0x11c] sm:$0xf] %vm711_vm3, %v11732_v33  ;;  %4177 = vrot.lane.b32.xlu0 %v11595_v1, %s9627_s14 }
 0x2bf   : > { %v8642_v60 = vpack.c.bf16 %v3584_v36, %v3584_v36  ;;  %5659 = vst.msk [vmem:[#allocation3 + $0x110] sm:$0xf] %vm711_vm3, %v11730_v44  ;;  %v8999_v63 = vpop.f32.mrf.mxu0  ;;  %v4988_v9 = vld [vmem:[#allocation2 + $0x140] sm:$0xff] }
 0x2c0   : > { %4242 = vst.msk [vmem:[#allocation3 + $0x9c] sm:$0xf] %vm1225_vm5, %v4160_v45  ;;  %v9000_v0 = vadd.f32 %v8999_v63, %v8998_v2  ;;  %4883 = vrot.lane.b32.xlu1 %v11667_v3, %s9626_s27  ;;  %v4414_v48 = vpop.permute.xlu0 %4413  ;;  %v11763_v2 = vpack.c.bf16 %v4988_v9, %v4988_v9 }
 0x2c1   : > { %4702 = vst.msk [vmem:[#allocation3 + $0x130] sm:$0xf] %vm711_vm3, %v11735_v34  ;;  %3744 = vst.msk [vmem:[#allocation3 + $0x144] sm:$0xf] %vm711_vm3, %v8642_v60  ;;  %v9001_v56 = vpop.f32.mrf.mxu0 }
 0x2c2   : > { %v3310_v12 = vadd.f32 %v11614_v38, %v9000_v0  ;;  %v5120_v35 = vpop.permute.xlu1 %5119  ;;  %4497 = vst.msk [vmem:[#allocation3 + $0x90] sm:$0xf] %vm1482_vm6, %v4414_v48  ;;  %5137 = vrot.lane.b32.xlu0 %v11757_v26, %s9627_s14 }
 0x2c3   : > { %5202 = vst.msk [vmem:[#allocation3 + $0xa0] sm:$0xf] %vm1225_vm5, %v5120_v35  ;;  %v9002_v16 = vpop.f32.mrf.mxu0 }
 0x2c4   : > { %v3471_v20 = vadd.f32 %v11655_v10, %v3310_v12  ;;  %v9003_v49 = vadd.f32 %v9002_v16, %v9001_v56  ;;  %4179 = vrot.lane.b32.xlu1 %v11597_v4, %s9627_s14  ;;  %v5374_v10 = vpop.permute.xlu0 %5373 }
 0x2c5   : > { %5457 = vst.msk [vmem:[#allocation3 + $0x94] sm:$0xf] %vm1482_vm6, %v5374_v10 }
 0x2c6   : > { %v9525_v57 = vld [vmem:[#allocation3 + $0x110] ss:$12 sps:$4 sm:$0xff]   ;;  %v3519_v59 = vmax.f32 %v3471_v20, 0.0  ;;  %v3313_v36 = vadd.f32 %v11614_v38, %v9003_v49  ;;  %v4416_v1 = vpop.permute.xlu1 %4415  ;;  %4433 = vrot.lane.b32.xlu0 %v11690_v58, %s9628_s30 }
 0x2c7   : > { %4498 = vst.msk [vmem:[#allocation3 + $0x9c] sm:$0xf] %vm1482_vm6, %v4416_v1  ;;  %9268 = vmatmul.mubr.msk.bf16.gmra.mxu0 %vm472_vm0, %v9525_v57 }
 0x2c8   : > { %3551 = vst.msk [vmem:[#allocation2 + $0x151] sm:$0xff] %vm472_vm0, %v3519_v59  ;;  %v3474_v4 = vadd.f32 %v11681_v50, %v3313_v36  ;;  %5139 = vrot.lane.b32.xlu1 %v11763_v2, %s9627_s14  ;;  %v3906_v63 = vpop.permute.xlu0 %3905 }
 0x2c9   : > { %3987 = vst.msk [vmem:[#allocation3 + $0xa8] sm:$0xf] %vm968_vm4, %v3906_v63 }
 0x2ca   : > { %v3520_v60 = vmax.f32 %v3474_v4, 0.0  ;;  %v5376_v45 = vpop.permute.xlu1 %5375  ;;  %5393 = vrot.lane.b32.xlu0 %v11719_v28, %s9628_s30 }
 0x2cb   : > { %5458 = vst.msk [vmem:[#allocation3 + $0xa0] sm:$0xf] %vm1482_vm6, %v5376_v45 }
 0x2cc   : > { %3552 = vst.msk [vmem:[#allocation2 + $0x159] sm:$0xff] %vm472_vm0, %v3520_v60  ;;  %4435 = vrot.lane.b32.xlu1 %v11695_v52, %s9628_s30  ;;  %v4866_v58 = vpop.permute.xlu0 %4865  ;;  %v11787_v52 = vpop.f32.mrf.mxu1  ;;  %v5693_v35 = vld [vmem:[#allocation3 + $0x90] sm:$0xff] }
 0x2cd   : > { %4947 = vst.msk [vmem:[#allocation3 + $0xac] sm:$0xf] %vm968_vm4, %v4866_v58 }
 0x2ce   : > { %v3908_v50 = vpop.permute.xlu1 %3907  ;;  %3925 = vrot.lane.b32.xlu0 %v11710_v61, %s9626_s27  ;;  %v3478_v10 = vpop.f32.mrf.mxu1 }
 0x2cf   : > { %3988 = vst.msk [vmem:[#allocation3 + $0xb4] sm:$0xf] %vm968_vm4, %v3908_v50  ;;  %v5245_v0 = vld [vmem:[#allocation2 + $0x151] sm:$0xff] }
 0x2d0   : > { %v3585_v31 = vld [vmem:[#allocation2 + $0x150] sm:$0xff]  ;;  %5395 = vrot.lane.b32.xlu1 %v11735_v34, %s9628_s30  ;;  %v11784_v56 = vpack.c.bf16 %v5245_v0, %v5245_v0  ;;  %v4162_v57 = vpop.permute.xlu0 %4161  ;;  %v11817_v58 = vpop.f32.mrf.mxu1 }
 0x2d1   : > { %v8643_v30 = vpack.c.bf16 %v3585_v31, %v3585_v31  ;;  %4243 = vst.msk [vmem:[#allocation3 + $0xa8] sm:$0xf] %vm1225_vm5, %v4162_v57 }
 0x2d2   : > { %v4868_v12 = vpop.permute.xlu1 %4867  ;;  %v5695_v16 = vld [vmem:[#allocation3 + $0x9c] sm:$0xff]  ;;  %4703 = vst.msk [vmem:[#allocation3 + $0x13c] sm:$0xf] %vm711_vm3, %v11784_v56  ;;  %4885 = vrot.lane.b32.xlu0 %v11730_v44, %s9626_s27 }
 0x2d3   : > { %v9526_v9 = vld [vmem:[#allocation3 + $0x94] ss:$12 sps:$4 sm:$0xff]   ;;  %3745 = vst.msk [vmem:[#allocation3 + $0x150] sm:$0xf] %vm711_vm3, %v8643_v30  ;;  %v8215_v20 = vcombine.low %v5693_v35, %v5695_v16  ;;  %v5502_v48 = vld [vmem:[#allocation2 + $0x15a] sm:$0xff] }
 0x2d4   : > { %4948 = vst.msk [vmem:[#allocation3 + $0xb8] sm:$0xf] %vm968_vm4, %v4868_v12  ;;  %v5501_v49 = vld [vmem:[#allocation2 + $0x152] sm:$0xff]  ;;  %3927 = vrot.lane.b32.xlu1 %v11714_v53, %s9626_s27  ;;  %6252 = vmatprep.mubr.bf16.mxu1 %v9526_v9  ;;  %v11799_v61 = vpack.c.bf16 %v5502_v48, %v5502_v48  ;;  %v5122_v0 = vpop.permute.xlu0 %5121 }
 0x2d5   : > { %v11797_v59 = vpack.c.bf16 %v5501_v49, %v5501_v49  ;;  %v5246_v36 = vld [vmem:[#allocation2 + $0x159] sm:$0xff]  ;;  %v9004_v4 = vpop.f32.mrf.mxu0  ;;  %6253 = vmatmul.mubr.bf16.gmra.mxu1 %v8215_v20  ;;  %5203 = vst.msk [vmem:[#allocation3 + $0xac] sm:$0xf] %vm1225_vm5, %v5122_v0  ;;  %v4989_v30 = vld [vmem:[#allocation2 + $0x150] sm:$0xff] }
 0x2d6   : > { %v3586_v1 = vld [vmem:[#allocation2 + $0x158] sm:$0xff]  ;;  %v11802_v60 = vpack.c.bf16 %v5246_v36, %v5246_v36  ;;  %v4164_v63 = vpop.permute.xlu1 %4163  ;;  %5662 = vst.msk [vmem:[#allocation3 + $0x134] sm:$0xf] %vm711_vm3, %v11799_v61  ;;  %4181 = vrot.lane.b32.xlu0 %v11665_v47, %s9627_s14  ;;  %v11825_v57 = vpack.c.bf16 %v4989_v30, %v4989_v30  ;;  %v3481_v36 = vpop.f32.mrf.mxu1 }
 0x2d7   : > { %v8644_v45 = vpack.c.bf16 %v3586_v1, %v3586_v1  ;;  %5661 = vst.msk [vmem:[#allocation3 + $0x128] sm:$0xf] %vm711_vm3, %v11797_v59  ;;  %v9005_v53 = vpop.f32.mrf.mxu0  ;;  %v4990_v9 = vld [vmem:[#allocation2 + $0x158] sm:$0xff] }
 0x2d8   : > { %4244 = vst.msk [vmem:[#allocation3 + $0xb4] sm:$0xf] %vm1225_vm5, %v4164_v63  ;;  %v9006_v50 = vadd.f32 %v9005_v53, %v9004_v4  ;;  %4887 = vrot.lane.b32.xlu1 %v11732_v33, %s9626_s27  ;;  %v4418_v48 = vpop.permute.xlu0 %4417  ;;  %v11831_v63 = vpack.c.bf16 %v4990_v9, %v4990_v9 }
 0x2d9   : > { %4704 = vst.msk [vmem:[#allocation3 + $0x148] sm:$0xf] %vm711_vm3, %v11802_v60  ;;  %3746 = vst.msk [vmem:[#allocation3 + $0x15c] sm:$0xf] %vm711_vm3, %v8644_v45  ;;  %v9007_v31 = vpop.f32.mrf.mxu0 }
 0x2da   : > { %v5124_v12 = vpop.permute.xlu1 %5123  ;;  %v3318_v35 = vadd.f32 %v11614_v38, %v9006_v50  ;;  %4499 = vst.msk [vmem:[#allocation3 + $0xa8] sm:$0xf] %vm1482_vm6, %v4418_v48  ;;  %5141 = vrot.lane.b32.xlu0 %v11825_v57, %s9627_s14 }
 0x2db   : > { %5204 = vst.msk [vmem:[#allocation3 + $0xb8] sm:$0xf] %vm1225_vm5, %v5124_v12  ;;  %v9008_v16 = vpop.f32.mrf.mxu0 }
 0x2dc   : > { %v9009_v20 = vadd.f32 %v9008_v16, %v9007_v31  ;;  %v3479_v49 = vadd.f32 %v3478_v10, %v3318_v35  ;;  %4183 = vrot.lane.b32.xlu1 %v11667_v3, %s9627_s14  ;;  %v5378_v10 = vpop.permute.xlu0 %5377 }
 0x2dd   : > { %5459 = vst.msk [vmem:[#allocation3 + $0xac] sm:$0xf] %vm1482_vm6, %v5378_v10 }
 0x2de   : > { %v9528_v1 = vld [vmem:[#allocation3 + $0x128] ss:$12 sps:$4 sm:$0xff]   ;;  %v3521_v4 = vmax.f32 %v3479_v49, 0.0  ;;  %v4420_v47 = vpop.permute.xlu1 %4419  ;;  %v3321_v45 = vadd.f32 %v11614_v38, %v9009_v20  ;;  %4437 = vrot.lane.b32.xlu0 %v11757_v26, %s9628_s30 }
 0x2df   : > { %4500 = vst.msk [vmem:[#allocation3 + $0xb4] sm:$0xf] %vm1482_vm6, %v4420_v47  ;;  %9271 = vmatprep.mubr.msk.bf16.mxu0 %vm472_vm0, %v9528_v1 }
 0x2e0   : > { %3553 = vst.msk [vmem:[#allocation2 + $0x169] sm:$0xff] %vm472_vm0, %v3521_v4  ;;  %v3482_v3 = vadd.f32 %v3481_v36, %v3321_v45  ;;  %5143 = vrot.lane.b32.xlu1 %v11831_v63, %s9627_s14  ;;  %v3910_v0 = vpop.permute.xlu0 %3909 }
 0x2e1   : > { %3989 = vst.msk [vmem:[#allocation3 + $0xc0] sm:$0xf] %vm968_vm4, %v3910_v0 }
 0x2e2   : > { %v3522_v53 = vmax.f32 %v3482_v3, 0.0  ;;  %v5380_v50 = vpop.permute.xlu1 %5379  ;;  %5397 = vrot.lane.b32.xlu0 %v11784_v56, %s9628_s30 }
 0x2e3   : > { %5460 = vst.msk [vmem:[#allocation3 + $0xb8] sm:$0xf] %vm1482_vm6, %v5380_v50 }
 0x2e4   : > { %3554 = vst.msk [vmem:[#allocation2 + $0x171] sm:$0xff] %vm472_vm0, %v3522_v53  ;;  %4439 = vrot.lane.b32.xlu1 %v11763_v2, %s9628_s30  ;;  %v4870_v26 = vpop.permute.xlu0 %4869  ;;  %v5697_v9 = vld [vmem:[#allocation3 + $0xa8] sm:$0xff] }
 0x2e5   : > { %4949 = vst.msk [vmem:[#allocation3 + $0xc4] sm:$0xf] %vm968_vm4, %v4870_v26 }
 0x2e6   : > { %v3912_v31 = vpop.permute.xlu1 %3911  ;;  %3929 = vrot.lane.b32.xlu0 %v11719_v28, %s9626_s27 }
 0x2e7   : > { %3990 = vst.msk [vmem:[#allocation3 + $0xcc] sm:$0xf] %vm968_vm4, %v3912_v31  ;;  %v4991_v30 = vld [vmem:[#allocation2 + $0x168] sm:$0xff] }
 0x2e8   : > { %v5247_v12 = vld [vmem:[#allocation2 + $0x169] sm:$0xff]  ;;  %5399 = vrot.lane.b32.xlu1 %v11802_v60, %s9628_s30  ;;  %v11851_v35 = vpack.c.bf16 %v4991_v30, %v4991_v30  ;;  %v4166_v47 = vpop.permute.xlu0 %4165 }
 0x2e9   : > { %v11853_v16 = vpack.c.bf16 %v5247_v12, %v5247_v12  ;;  %4245 = vst.msk [vmem:[#allocation3 + $0xc0] sm:$0xf] %vm1225_vm5, %v4166_v47 }
 0x2ea   : > { %v4872_v2 = vpop.permute.xlu1 %4871  ;;  %v5699_v20 = vld [vmem:[#allocation3 + $0xb4] sm:$0xff]  ;;  %3747 = vst.msk [vmem:[#allocation3 + $0x168] sm:$0xf] %vm711_vm3, %v11851_v35  ;;  %4889 = vrot.lane.b32.xlu0 %v11797_v59, %s9626_s27 }
 0x2eb   : > { %v9529_v49 = vld [vmem:[#allocation3 + $0xac] ss:$12 sps:$4 sm:$0xff]   ;;  %4705 = vst.msk [vmem:[#allocation3 + $0x154] sm:$0xf] %vm711_vm3, %v11853_v16  ;;  %v8218_v48 = vcombine.low %v5697_v9, %v5699_v20  ;;  %v4992_v36 = vld [vmem:[#allocation2 + $0x170] sm:$0xff] }
 0x2ec   : > { %4950 = vst.msk [vmem:[#allocation3 + $0xd0] sm:$0xf] %vm968_vm4, %v4872_v2  ;;  %v5503_v1 = vld [vmem:[#allocation2 + $0x16a] sm:$0xff]  ;;  %v5504_v4 = vld [vmem:[#allocation2 + $0x172] sm:$0xff]  ;;  %3931 = vrot.lane.b32.xlu1 %v11735_v34, %s9626_s27  ;;  %6260 = vmatprep.mubr.bf16.mxu1 %v9529_v49  ;;  %v11865_v28 = vpack.c.bf16 %v4992_v36, %v4992_v36  ;;  %v5126_v30 = vpop.permute.xlu0 %5125 }
 0x2ed   : > { %v11867_v45 = vpack.c.bf16 %v5503_v1, %v5503_v1  ;;  %v11869_v3 = vpack.c.bf16 %v5504_v4, %v5504_v4  ;;  %v5248_v10 = vld [vmem:[#allocation2 + $0x171] sm:$0xff]  ;;  %v9010_v53 = vpop.f32.mrf.mxu0  ;;  %6261 = vmatmul.mubr.bf16.gmra.mxu1 %v8218_v48  ;;  %5205 = vst.msk [vmem:[#allocation3 + $0xc4] sm:$0xf] %vm1225_vm5, %v5126_v30 }
 0x2ee   : > { %v11872_v50 = vpack.c.bf16 %v5248_v10, %v5248_v10  ;;  %v4168_v0 = vpop.permute.xlu1 %4167  ;;  %3748 = vst.msk [vmem:[#allocation3 + $0x174] sm:$0xf] %vm711_vm3, %v11865_v28  ;;  %4185 = vrot.lane.b32.xlu0 %v11730_v44, %s9627_s14 }
 0x2ef   : > { %5663 = vst.msk [vmem:[#allocation3 + $0x140] sm:$0xf] %vm711_vm3, %v11867_v45  ;;  %5664 = vst.msk [vmem:[#allocation3 + $0x14c] sm:$0xf] %vm711_vm3, %v11869_v3  ;;  %v9011_v34 = vpop.f32.mrf.mxu0 }
 0x2f0   : > { %4246 = vst.msk [vmem:[#allocation3 + $0xcc] sm:$0xf] %vm1225_vm5, %v4168_v0  ;;  %v9012_v31 = vadd.f32 %v9011_v34, %v9010_v53  ;;  %4891 = vrot.lane.b32.xlu1 %v11799_v61, %s9626_s27  ;;  %v4422_v48 = vpop.permute.xlu0 %4421 }
 0x2f1   : > { %4706 = vst.msk [vmem:[#allocation3 + $0x160] sm:$0xf] %vm711_vm3, %v11872_v50  ;;  %v9013_v12 = vpop.f32.mrf.mxu0 }
 0x2f2   : > { %v3326_v26 = vadd.f32 %v11614_v38, %v9012_v31  ;;  %v5128_v2 = vpop.permute.xlu1 %5127  ;;  %4501 = vst.msk [vmem:[#allocation3 + $0xc0] sm:$0xf] %vm1482_vm6, %v4422_v48  ;;  %5145 = vrot.lane.b32.xlu0 %v11851_v35, %s9627_s14 }
 0x2f3   : > { %5206 = vst.msk [vmem:[#allocation3 + $0xd0] sm:$0xf] %vm1225_vm5, %v5128_v2  ;;  %v9014_v9 = vpop.f32.mrf.mxu0 }
 0x2f4   : > { %v3487_v20 = vadd.f32 %v11787_v52, %v3326_v26  ;;  %v9015_v49 = vadd.f32 %v9014_v9, %v9013_v12  ;;  %4187 = vrot.lane.b32.xlu1 %v11732_v33, %s9627_s14  ;;  %v5382_v33 = vpop.permute.xlu0 %5381 }
 0x2f5   : > { %5461 = vst.msk [vmem:[#allocation3 + $0xc4] sm:$0xf] %vm1482_vm6, %v5382_v33 }
 0x2f6   : > { %v9531_v36 = vld [vmem:[#allocation3 + $0x140] ss:$12 sps:$4 sm:$0xff]   ;;  %v3523_v1 = vmax.f32 %v3487_v20, 0.0  ;;  %v3329_v4 = vadd.f32 %v11614_v38, %v9015_v49  ;;  %v4424_v47 = vpop.permute.xlu1 %4423  ;;  %4441 = vrot.lane.b32.xlu0 %v11825_v57, %s9628_s30 }
 0x2f7   : > { %4502 = vst.msk [vmem:[#allocation3 + $0xcc] sm:$0xf] %vm1482_vm6, %v4424_v47  ;;  %9272 = vmatmul.mubr.msk.bf16.gmra.mxu0 %vm472_vm0, %v9531_v36 }
 0x2f8   : > { %3555 = vst.msk [vmem:[#allocation2 + $0x181] sm:$0xff] %vm472_vm0, %v3523_v1  ;;  %v3490_v44 = vadd.f32 %v11817_v58, %v3329_v4  ;;  %5147 = vrot.lane.b32.xlu1 %v11865_v28, %s9627_s14  ;;  %v3914_v10 = vpop.permute.xlu0 %3913 }
 0x2f9   : > { %3991 = vst.msk [vmem:[#allocation3 + $0xd8] sm:$0xf] %vm968_vm4, %v3914_v10 }
 0x2fa   : > { %v3524_v52 = vmax.f32 %v3490_v44, 0.0  ;;  %v5384_v38 = vpop.permute.xlu1 %5383  ;;  %5401 = vrot.lane.b32.xlu0 %v11853_v16, %s9628_s30 }
 0x2fb   : > { %5462 = vst.msk [vmem:[#allocation3 + $0xd0] sm:$0xf] %vm1482_vm6, %v5384_v38 }
 0x2fc   : > { %3556 = vst.msk [vmem:[#allocation2 + $0x189] sm:$0xff] %vm472_vm0, %v3524_v52  ;;  %4443 = vrot.lane.b32.xlu1 %v11831_v63, %s9628_s30  ;;  %v4874_v57 = vpop.permute.xlu0 %4873  ;;  %v5701_v63 = vld [vmem:[#allocation3 + $0xc0] sm:$0xff] }
 0x2fd   : > { %4951 = vst.msk [vmem:[#allocation3 + $0xdc] sm:$0xf] %vm968_vm4, %v4874_v57 }
 0x2fe   : > { %v3916_v58 = vpop.permute.xlu1 %3915  ;;  %3933 = vrot.lane.b32.xlu0 %v11784_v56, %s9626_s27 }
 0x2ff   : > { %3992 = vst.msk [vmem:[#allocation3 + $0xe4] sm:$0xf] %vm968_vm4, %v3916_v58  ;;  %v5249_v53 = vld [vmem:[#allocation2 + $0x181] sm:$0xff] }
 0x300   : > { %5403 = vrot.lane.b32.xlu1 %v11872_v50, %s9628_s30  ;;  %v8867_v0 = vpack.c.bf16 %v5249_v53, %v5249_v53  ;;  %v4170_v9 = vpop.permute.xlu0 %4169  ;;  %v4993_v1 = vld [vmem:[#allocation2 + $0x180] sm:$0xff] }
 0x301   : > { %4247 = vst.msk [vmem:[#allocation3 + $0xd8] sm:$0xf] %vm1225_vm5, %v4170_v9  ;;  %v8835_v33 = vpack.c.bf16 %v4993_v1, %v4993_v1 }
 0x302   : > { %v4876_v34 = vpop.permute.xlu1 %4875  ;;  %v5703_v31 = vld [vmem:[#allocation3 + $0xcc] sm:$0xff]  ;;  %4707 = vst.msk [vmem:[#allocation3 + $0x16c] sm:$0xf] %vm711_vm3, %v8867_v0  ;;  %4893 = vrot.lane.b32.xlu0 %v11867_v45, %s9626_s27 }
 0x303   : > { %v9532_v30 = vld [vmem:[#allocation3 + $0xc4] ss:$12 sps:$4 sm:$0xff]   ;;  %4952 = vst.msk [vmem:[#allocation3 + $0xe8] sm:$0xf] %vm968_vm4, %v4876_v34  ;;  %v8221_v12 = vcombine.low %v5701_v63, %v5703_v31  ;;  %v5250_v26 = vld [vmem:[#allocation2 + $0x189] sm:$0xff] }
 0x304   : > { %v4739_v2 = vld [vmem:[#allocation2 + $0x182] sm:$0xff]  ;;  %3935 = vrot.lane.b32.xlu1 %v11802_v60, %s9626_s27  ;;  %6268 = vmatprep.mubr.bf16.mxu1 %v9532_v30  ;;  %v8868_v20 = vpack.c.bf16 %v5250_v26, %v5250_v26  ;;  %v4740_v48 = vld [vmem:[#allocation2 + $0x18a] sm:$0xff]  ;;  %v5130_v60 = vpop.permute.xlu0 %5129 }
 0x305   : > { %v8805_v49 = vpack.c.bf16 %v4739_v2, %v4739_v2  ;;  %6269 = vmatmul.mubr.bf16.gmra.mxu1 %v8221_v12  ;;  %v8806_v56 = vpack.c.bf16 %v4740_v48, %v4740_v48  ;;  %5207 = vst.msk [vmem:[#allocation3 + $0xdc] sm:$0xf] %vm1225_vm5, %v5130_v60  ;;  %v4994_v47 = vld [vmem:[#allocation2 + $0x188] sm:$0xff]  ;;  %v4996_v12 = vld [vmem:[#allocation2 + $0x1a0] sm:$0xff] }
 0x306   : > { %v4172_v36 = vpop.permute.xlu1 %4171  ;;  %4708 = vst.msk [vmem:[#allocation3 + $0x178] sm:$0xf] %vm711_vm3, %v8868_v20  ;;  %4189 = vrot.lane.b32.xlu0 %v11797_v59, %s9627_s14  ;;  %v8836_v38 = vpack.c.bf16 %v4994_v47, %v4994_v47  ;;  %v8838_v9 = vpack.c.bf16 %v4996_v12, %v4996_v12 }
 0x307   : > { %5665 = vst.msk [vmem:[#allocation3 + $0x158] sm:$0xf] %vm711_vm3, %v8805_v49  ;;  %5666 = vst.msk [vmem:[#allocation3 + $0x164] sm:$0xf] %vm711_vm3, %v8806_v56 }
 0x308   : > { %4248 = vst.msk [vmem:[#allocation3 + $0xe4] sm:$0xf] %vm1225_vm5, %v4172_v36  ;;  %4895 = vrot.lane.b32.xlu1 %v11869_v3, %s9626_s27  ;;  %v4426_v44 = vpop.permute.xlu0 %4425 }
 0x309   : > { %4503 = vst.msk [vmem:[#allocation3 + $0xd8] sm:$0xf] %vm1482_vm6, %v4426_v44 }
 0x30a   : > { %v5132_v4 = vpop.permute.xlu1 %5131  ;;  %5149 = vrot.lane.b32.xlu0 %v8835_v33, %s9627_s14 }
 0x30b   : > { %5208 = vst.msk [vmem:[#allocation3 + $0xe8] sm:$0xf] %vm1225_vm5, %v5132_v4 }
 0x30c   : > { %4191 = vrot.lane.b32.xlu1 %v11799_v61, %s9627_s14  ;;  %v5386_v10 = vpop.permute.xlu0 %5385 }
 0x30d   : > { %5463 = vst.msk [vmem:[#allocation3 + $0xdc] sm:$0xf] %vm1482_vm6, %v5386_v10 }
 0x30e   : > { %v4428_v52 = vpop.permute.xlu1 %4427  ;;  %4445 = vrot.lane.b32.xlu0 %v11851_v35, %s9628_s30 }
 0x30f   : > { %4504 = vst.msk [vmem:[#allocation3 + $0xe4] sm:$0xf] %vm1482_vm6, %v4428_v52 }
 0x310   : > { %5151 = vrot.lane.b32.xlu1 %v8836_v38, %s9627_s14  ;;  %v3918_v61 = vpop.permute.xlu0 %3917 }
 0x311   : > { %3993 = vst.msk [vmem:[#allocation3 + $0xf0] sm:$0xf] %vm968_vm4, %v3918_v61  ;;  %v11988_v61 = vld [vmem:[%s12779_s5 + $0x8] sm:$0xff]  }
 0x312   : > { %v5388_v59 = vpop.permute.xlu1 %5387  ;;  %5405 = vrot.lane.b32.xlu0 %v8867_v0, %s9628_s30  ;;  %9279 = vmatprep.subr.bf16.mxu1 %v11988_v61 }
 0x313   : > { %5464 = vst.msk [vmem:[#allocation3 + $0xe8] sm:$0xf] %vm1482_vm6, %v5388_v59 }
 0x314   : > { %4447 = vrot.lane.b32.xlu1 %v11865_v28, %s9628_s30  ;;  %v4878_v53 = vpop.permute.xlu0 %4877  ;;  %v5705_v35 = vld [vmem:[#allocation3 + $0xd8] sm:$0xff] }
 0x315   : > { %4953 = vst.msk [vmem:[#allocation3 + $0xf4] sm:$0xf] %vm968_vm4, %v4878_v53 }
 0x316   : > { %v3920_v58 = vpop.permute.xlu1 %3919  ;;  %3937 = vrot.lane.b32.xlu0 %v11853_v16, %s9626_s27  ;;  %v4995_v16 = vld [vmem:[#allocation2 + $0x198] sm:$0xff] }
 0x317   : > { %3994 = vst.msk [vmem:[#allocation3 + $0xfc] sm:$0xf] %vm968_vm4, %v3920_v58 }
 0x318   : > { %5407 = vrot.lane.b32.xlu1 %v8868_v20, %s9628_s30  ;;  %v4174_v0 = vpop.permute.xlu0 %4173 }
 0x319   : > { %4249 = vst.msk [vmem:[#allocation3 + $0xf0] sm:$0xf] %vm1225_vm5, %v4174_v0 }
 0x31a   : > { %v4880_v57 = vpop.permute.xlu1 %4879  ;;  %v5707_v34 = vld [vmem:[#allocation3 + $0xe4] sm:$0xff]  ;;  %4897 = vrot.lane.b32.xlu0 %v8805_v49, %s9626_s27 }
 0x31b   : > { %v9534_v28 = vld [vmem:[#allocation3 + $0xdc] ss:$12 sps:$4 sm:$0xff]   ;;  %4954 = vst.msk [vmem:[#allocation3 + $0x100] sm:$0xf] %vm968_vm4, %v4880_v57  ;;  %v8224_v63 = vcombine.low %v5705_v35, %v5707_v34 }
 0x31c   : > { %3939 = vrot.lane.b32.xlu1 %v11872_v50, %s9626_s27  ;;  %6276 = vmatprep.mubr.bf16.mxu1 %v9534_v28  ;;  %v5134_v30 = vpop.permute.xlu0 %5133  ;;  %v8837_v50 = vpack.c.bf16 %v4995_v16, %v4995_v16  ;;  %v5251_v49 = vld [vmem:[#allocation2 + $0x199] sm:$0xff] }
 0x31d   : > { %6277 = vmatmul.mubr.bf16.gmra.mxu1 %v8224_v63  ;;  %5209 = vst.msk [vmem:[#allocation3 + $0xf4] sm:$0xf] %vm1225_vm5, %v5134_v30 }
 0x31e   : > { %v4176_v31 = vpop.permute.xlu1 %4175  ;;  %4193 = vrot.lane.b32.xlu0 %v11867_v45, %s9627_s14  ;;  %v5252_v45 = vld [vmem:[#allocation2 + $0x1a1] sm:$0xff] }
 0x31f   : > { %4250 = vst.msk [vmem:[#allocation3 + $0xfc] sm:$0xf] %vm1225_vm5, %v4176_v31  ;;  %v8870_v60 = vpack.c.bf16 %v5252_v45, %v5252_v45 }
 0x320   : > { %4899 = vrot.lane.b32.xlu1 %v8806_v56, %s9626_s27  ;;  %v4430_v2 = vpop.permute.xlu0 %4429  ;;  %s9563_s27 = scalar_lea.vmem %s12708_s23, 4096 }
 0x321   : > { %4505 = vst.msk [vmem:[#allocation3 + $0xf0] sm:$0xf] %vm1482_vm6, %v4430_v2  ;;  %p9564_p11 = scmp.ne.s32.totalorder %s12708_s23, %s9563_s27 }
 0x322   : > { %v5136_v26 = vpop.permute.xlu1 %5135  ;;  %5153 = vrot.lane.b32.xlu0 %v8837_v50, %s9627_s14 }
 0x323   : > { %5210 = vst.msk [vmem:[#allocation3 + $0x100] sm:$0xf] %vm1225_vm5, %v5136_v26  ;;  %p9565_p12 = pnand %p9564_p11, %p9741_p5 }
 0x324   : > { %4195 = vrot.lane.b32.xlu1 %v11869_v3, %s9627_s14  ;;  %v5390_v48 = vpop.permute.xlu0 %5389  ;;  %v8869_v3 = vpack.c.bf16 %v5251_v49, %v5251_v49 }
 0x325   : > { %5465 = vst.msk [vmem:[#allocation3 + $0xf4] sm:$0xf] %vm1482_vm6, %v5390_v48  ;;  %p9566_p13 = pneg %p9565_p12 }
 0x326   : > { %v4432_v20 = vpop.permute.xlu1 %4431  ;;  %4449 = vrot.lane.b32.xlu0 %v8835_v33, %s9628_s30 }
 0x327   : > { %4506 = vst.msk [vmem:[#allocation3 + $0xfc] sm:$0xf] %vm1482_vm6, %v4432_v20 }
 0x328   : > { %5155 = vrot.lane.b32.xlu1 %v8838_v9, %s9627_s14  ;;  %v3922_v36 = vpop.permute.xlu0 %3921  ;;  %v12003_v9 = vpop.f32.mrf.mxu1  ;;  %s9630_s14 = smov [#allocation4]  }
 0x329   : > { %3995 = vst.msk [vmem:[#allocation3 + $0x108] sm:$0xf] %vm968_vm4, %v3922_v36 }
 0x32a   : > { %v5392_v56 = vpop.permute.xlu1 %5391  ;;  %5409 = vrot.lane.b32.xlu0 %v8869_v3, %s9628_s30  ;;  %v12007_v48 = vpop.f32.mrf.mxu1 }
 0x32b   : > { %5466 = vst.msk [vmem:[#allocation3 + $0x100] sm:$0xf] %vm1482_vm6, %v5392_v56 }
 0x32c   : > { %4451 = vrot.lane.b32.xlu1 %v8836_v38, %s9628_s30  ;;  %v4882_v4 = vpop.permute.xlu0 %4881  ;;  %v5709_v44 = vld [vmem:[#allocation3 + $0xf0] sm:$0xff]  ;;  %v12011_v3 = vpop.f32.mrf.mxu1 }
 0x32d   : > { %4955 = vst.msk [vmem:[#allocation3 + $0x10c] sm:$0xf] %vm968_vm4, %v4882_v4 }
 0x32e   : > { %v3924_v1 = vpop.permute.xlu1 %3923 }
 0x32f   : > { %3996 = vst.msk [vmem:[#allocation3 + $0x114] sm:$0xf] %vm968_vm4, %v3924_v1  ;;  %v12015_v1 = vpop.f32.mrf.mxu1 }
 0x330   : > { %5411 = vrot.lane.b32.xlu1 %v8870_v60, %s9628_s30  ;;  %v4178_v10 = vpop.permute.xlu0 %4177  ;;  %s9567_s30 = sshll.u32 %s9630_s14, 4  ;;  %s9568_s30 = int_to_ptr.vmem [resolvable:$false] %s9567_s30 }
 0x331   : > { %4251 = vst.msk [vmem:[#allocation3 + $0x108] sm:$0xf] %vm1225_vm5, %v4178_v10  ;;  %s9569_s22 = scalar_lea.vmem %s9568_s30, 8192  ;;  %p9570_p0 = scmp.lt.s32.totalorder %s12708_s23, %s9568_s30 }
 0x332   : > { %v4884_v47 = vpop.permute.xlu1 %4883  ;;  %v5711_v33 = vld [vmem:[#allocation3 + $0xfc] sm:$0xff]  ;;  %p9571_p1 = scmp.lt.s32.totalorder %s9569_s22, %s9563_s27 }
 0x333   : > { %v9536_v52 = vld [vmem:[#allocation3 + $0xf4] ss:$12 sps:$4 sm:$0xff]   ;;  %4956 = vst.msk [vmem:[#allocation3 + $0x118] sm:$0xf] %vm968_vm4, %v4884_v47  ;;  %v8227_v38 = vcombine.low %v5709_v44, %v5711_v33  ;;  %v12018_v47 = vpop.f32.mrf.mxu1 }
 0x334   : > { %6284 = vmatprep.mubr.bf16.mxu1 %v9536_v52  ;;  %v5138_v58 = vpop.permute.xlu0 %5137  ;;  %p9572_p2 = por %p9571_p1, %p9570_p0 }
 0x335   : > { %6285 = vmatmul.mubr.bf16.gmra.mxu1 %v8227_v38  ;;  %5211 = vst.msk [vmem:[#allocation3 + $0x10c] sm:$0xf] %vm1225_vm5, %v5138_v58  ;;  %v12022_v52 = vpop.f32.mrf.mxu1 }
 0x336   : > { %v4180_v59 = vpop.permute.xlu1 %4179  ;;  %v9058_v54 = vadd.f32 %v12022_v52, %v12018_v47  ;;  %p9573_p3 = pnand %p9572_p2, %p9566_p13 }
 0x337   : > { %4252 = vst.msk [vmem:[#allocation3 + $0x114] sm:$0xf] %vm1225_vm5, %v4180_v59 }
 0x338   : > { %v4434_v57 = vpop.permute.xlu0 %4433 }
 0x339   : > { %4507 = vst.msk [vmem:[#allocation3 + $0x108] sm:$0xf] %vm1482_vm6, %v4434_v57 }
 0x33a   : > { %v5140_v53 = vpop.permute.xlu1 %5139 }
 0x33b   : > { %5212 = vst.msk [vmem:[#allocation3 + $0x118] sm:$0xf] %vm1225_vm5, %v5140_v53 }
 0x33c   : > { %v5394_v34 = vpop.permute.xlu0 %5393 }
 0x33d   : > { %5467 = vst.msk [vmem:[#allocation3 + $0x10c] sm:$0xf] %vm1482_vm6, %v5394_v34 }
 0x33e   : > { %v4436_v35 = vpop.permute.xlu1 %4435 }
 0x33f   : > { %4508 = vst.msk [vmem:[#allocation3 + $0x114] sm:$0xf] %vm1482_vm6, %v4436_v35  ;;  %v12026_v35 = vpop.f32.mrf.mxu1 }
 0x340   : > { %v3926_v63 = vpop.permute.xlu0 %3925 }
 0x341   : > { %3997 = vst.msk [vmem:[#allocation3 + $0x120] sm:$0xf] %vm968_vm4, %v3926_v63  ;;  %v12030_v63 = vpop.f32.mrf.mxu1 }
 0x342   : > { %v5396_v28 = vpop.permute.xlu1 %5395 }
 0x343   : > { %5468 = vst.msk [vmem:[#allocation3 + $0x118] sm:$0xf] %vm1482_vm6, %v5396_v28 }
 0x344   : > { %v4886_v31 = vpop.permute.xlu0 %4885  ;;  %v5713_v30 = vld [vmem:[#allocation3 + $0x108] sm:$0xff] }
 0x345   : > { %4957 = vst.msk [vmem:[#allocation3 + $0x124] sm:$0xf] %vm968_vm4, %v4886_v31  ;;  %v12033_v31 = vpop.f32.mrf.mxu1 }
 0x346   : > { %v3928_v0 = vpop.permute.xlu1 %3927 }
 0x347   : > { %3998 = vst.msk [vmem:[#allocation3 + $0x12c] sm:$0xf] %vm968_vm4, %v3928_v0 }
 0x348   : > { %v4182_v2 = vpop.permute.xlu0 %4181 }
 0x349   : > { %4253 = vst.msk [vmem:[#allocation3 + $0x120] sm:$0xf] %vm1225_vm5, %v4182_v2 }
 0x34a   : > { %v4888_v16 = vpop.permute.xlu1 %4887  ;;  %v5715_v12 = vld [vmem:[#allocation3 + $0x114] sm:$0xff] }
 0x34b   : > { %v9538_v26 = vld [vmem:[#allocation3 + $0x10c] ss:$12 sps:$4 sm:$0xff]   ;;  %4958 = vst.msk [vmem:[#allocation3 + $0x130] sm:$0xf] %vm968_vm4, %v4888_v16  ;;  %v8230_v50 = vcombine.low %v5713_v30, %v5715_v12  ;;  %v12037_v12 = vpop.f32.mrf.mxu1 }
 0x34c   : > { %6292 = vmatprep.mubr.bf16.mxu1 %v9538_v26  ;;  %v5142_v49 = vpop.permute.xlu0 %5141 }
 0x34d   : > { %6293 = vmatmul.mubr.bf16.gmra.mxu1 %v8230_v50  ;;  %5213 = vst.msk [vmem:[#allocation3 + $0x124] sm:$0xf] %vm1225_vm5, %v5142_v49  ;;  %v12041_v2 = vpop.f32.mrf.mxu1 }
 0x34e   : > { %v4184_v20 = vpop.permute.xlu1 %4183 }
 0x34f   : > { %4254 = vst.msk [vmem:[#allocation3 + $0x12c] sm:$0xf] %vm1225_vm5, %v4184_v20 }
 0x350   : > { %v4438_v56 = vpop.permute.xlu0 %4437 }
 0x351   : > { %4509 = vst.msk [vmem:[#allocation3 + $0x120] sm:$0xf] %vm1482_vm6, %v4438_v56 }
 0x352   : > { %v5144_v45 = vpop.permute.xlu1 %5143 }
 0x353   : > { %5214 = vst.msk [vmem:[#allocation3 + $0x130] sm:$0xf] %vm1225_vm5, %v5144_v45  ;;  %v12045_v45 = vpop.f32.mrf.mxu1 }
 0x354   : > { %v5398_v60 = vpop.permute.xlu0 %5397  ;;  %v9067_v29 = vadd.f32 %v12045_v45, %v12041_v2 }
 0x355   : > { %5469 = vst.msk [vmem:[#allocation3 + $0x124] sm:$0xf] %vm1482_vm6, %v5398_v60 }
 0x356   : > { %v4440_v36 = vpop.permute.xlu1 %4439 }
 0x357   : > { %4510 = vst.msk [vmem:[#allocation3 + $0x12c] sm:$0xf] %vm1482_vm6, %v4440_v36  ;;  %v12048_v36 = vpop.f32.mrf.mxu1 }
 0x358   : > { %v3930_v44 = vpop.permute.xlu0 %3929 }
 0x359   : > { %3999 = vst.msk [vmem:[#allocation3 + $0x138] sm:$0xf] %vm968_vm4, %v3930_v44 }
 0x35a   : > { %v5400_v4 = vpop.permute.xlu1 %5399 }
 0x35b   : > { %5470 = vst.msk [vmem:[#allocation3 + $0x130] sm:$0xf] %vm1482_vm6, %v5400_v4 }
 0x35c   : > { %v4890_v38 = vpop.permute.xlu0 %4889  ;;  %v5717_v59 = vld [vmem:[#allocation3 + $0x120] sm:$0xff] }
 0x35d   : > { %4959 = vst.msk [vmem:[#allocation3 + $0x13c] sm:$0xf] %vm968_vm4, %v4890_v38 }
 0x35e   : > { %v3932_v33 = vpop.permute.xlu1 %3931 }
 0x35f   : > { %4000 = vst.msk [vmem:[#allocation3 + $0x144] sm:$0xf] %vm968_vm4, %v3932_v33 }
 0x360   : > { %v4186_v34 = vpop.permute.xlu0 %4185 }
 0x361   : > { %4255 = vst.msk [vmem:[#allocation3 + $0x138] sm:$0xf] %vm1225_vm5, %v4186_v34 }
 0x362   : > { %v4892_v10 = vpop.permute.xlu1 %4891  ;;  %v5719_v58 = vld [vmem:[#allocation3 + $0x12c] sm:$0xff] }
 0x363   : > { %v9540_v53 = vld [vmem:[#allocation3 + $0x124] ss:$12 sps:$4 sm:$0xff]   ;;  %4960 = vst.msk [vmem:[#allocation3 + $0x148] sm:$0xf] %vm968_vm4, %v4892_v10  ;;  %v8233_v57 = vcombine.low %v5717_v59, %v5719_v58  ;;  %v12052_v59 = vpop.f32.mrf.mxu1 }
 0x364   : > { %6300 = vmatprep.mubr.bf16.mxu1 %v9540_v53  ;;  %v5146_v0 = vpop.permute.xlu0 %5145 }
 0x365   : > { %6301 = vmatmul.mubr.bf16.gmra.mxu1 %v8233_v57  ;;  %5215 = vst.msk [vmem:[#allocation3 + $0x13c] sm:$0xf] %vm1225_vm5, %v5146_v0  ;;  %v12056_v57 = vpop.f32.mrf.mxu1 }
 0x366   : > { %v4188_v28 = vpop.permute.xlu1 %4187 }
 0x367   : > { %4256 = vst.msk [vmem:[#allocation3 + $0x144] sm:$0xf] %vm1225_vm5, %v4188_v28  ;;  %v12060_v0 = vpop.f32.mrf.mxu1 }
 0x368   : > { %v4442_v30 = vpop.permute.xlu0 %4441 }
 0x369   : > { %4511 = vst.msk [vmem:[#allocation3 + $0x138] sm:$0xf] %vm1482_vm6, %v4442_v30  ;;  %v12062_v30 = vpop.f32.mrf.mxu0 }
 0x36a   : > { %v5148_v16 = vpop.permute.xlu1 %5147 }
 0x36b   : > { %5216 = vst.msk [vmem:[#allocation3 + $0x148] sm:$0xf] %vm1225_vm5, %v5148_v16 }
 0x36c   : > { %v5402_v50 = vpop.permute.xlu0 %5401 }
 0x36d   : > { %5471 = vst.msk [vmem:[#allocation3 + $0x13c] sm:$0xf] %vm1482_vm6, %v5402_v50 }
 0x36e   : > { %v4444_v26 = vpop.permute.xlu1 %4443 }
 0x36f   : > { %4512 = vst.msk [vmem:[#allocation3 + $0x144] sm:$0xf] %vm1482_vm6, %v4444_v26  ;;  %v12065_v26 = vpop.f32.mrf.mxu1 }
 0x370   : > { %v3934_v49 = vpop.permute.xlu0 %3933 }
 0x371   : > { %4001 = vst.msk [vmem:[#allocation3 + $0x150] sm:$0xf] %vm968_vm4, %v3934_v49  ;;  %v6367_v49 = vpop.f32.mrf.mxu0 }
 0x372   : > { %v5404_v20 = vpop.permute.xlu1 %5403 }
 0x373   : > { %5472 = vst.msk [vmem:[#allocation3 + $0x148] sm:$0xf] %vm1482_vm6, %v5404_v20 }
 0x374   : > { %v4894_v60 = vpop.permute.xlu0 %4893  ;;  %v5721_v44 = vld [vmem:[#allocation3 + $0x138] sm:$0xff] }
 0x375   : > { %4961 = vst.msk [vmem:[#allocation3 + $0x154] sm:$0xf] %vm968_vm4, %v4894_v60 }
 0x376   : > { %v3936_v56 = vpop.permute.xlu1 %3935 }
 0x377   : > { %4002 = vst.msk [vmem:[#allocation3 + $0x15c] sm:$0xf] %vm968_vm4, %v3936_v56  ;;  %v12069_v56 = vpop.f32.mrf.mxu1 }
 0x378   : > { %v4190_v58 = vpop.permute.xlu0 %4189 }
 0x379   : > { %4257 = vst.msk [vmem:[#allocation3 + $0x150] sm:$0xf] %vm1225_vm5, %v4190_v58 }
 0x37a   : > { %v4896_v4 = vpop.permute.xlu1 %4895  ;;  %v5723_v33 = vld [vmem:[#allocation3 + $0x144] sm:$0xff] }
 0x37b   : > { %v9542_v38 = vld [vmem:[#allocation3 + $0x13c] ss:$12 sps:$4 sm:$0xff]   ;;  %4962 = vst.msk [vmem:[#allocation3 + $0x160] sm:$0xf] %vm968_vm4, %v4896_v4  ;;  %v8236_v10 = vcombine.low %v5721_v44, %v5723_v33  ;;  %v12072_v44 = vpop.f32.mrf.mxu0  ;;  %v12075_v33 = vpop.f32.mrf.mxu1 }
 0x37c   : > { %6308 = vmatprep.mubr.bf16.mxu1 %v9542_v38  ;;  %v5150_v34 = vpop.permute.xlu0 %5149 }
 0x37d   : > { %6309 = vmatmul.mubr.bf16.gmra.mxu1 %v8236_v10  ;;  %5217 = vst.msk [vmem:[#allocation3 + $0x154] sm:$0xf] %vm1225_vm5, %v5150_v34  ;;  %v6370_v58 = vpop.f32.mrf.mxu0 }
 0x37e   : > { %v4192_v53 = vpop.permute.xlu1 %4191 }
 0x37f   : > { %4258 = vst.msk [vmem:[#allocation3 + $0x15c] sm:$0xf] %vm1225_vm5, %v4192_v53  ;;  %v12079_v53 = vpop.f32.mrf.mxu1  ;;  %v12084_v5 = vpop.f32.mrf.mxu0 }
 0x380   : > { %v4446_v16 = vpop.permute.xlu0 %4445 }
 0x381   : > { %4513 = vst.msk [vmem:[#allocation3 + $0x150] sm:$0xf] %vm1482_vm6, %v4446_v16  ;;  %v6383_v37 = vpop.f32.mrf.mxu0 }
 0x382   : > { %v5152_v28 = vpop.permute.xlu1 %5151 }
 0x383   : > { %5218 = vst.msk [vmem:[#allocation3 + $0x160] sm:$0xf] %vm1225_vm5, %v5152_v28 }
 0x384   : > { %v5406_v20 = vpop.permute.xlu0 %5405 }
 0x385   : > { %5473 = vst.msk [vmem:[#allocation3 + $0x154] sm:$0xf] %vm1482_vm6, %v5406_v20 }
 0x386   : > { %v4448_v50 = vpop.permute.xlu1 %4447 }
 0x387   : > { %4514 = vst.msk [vmem:[#allocation3 + $0x15c] sm:$0xf] %vm1482_vm6, %v4448_v50 }
 0x388   : > { %v3938_v4 = vpop.permute.xlu0 %3937 }
 0x389   : > { %4003 = vst.msk [vmem:[#allocation3 + $0x168] sm:$0xf] %vm968_vm4, %v3938_v4 }
 0x38a   : > { %v5408_v60 = vpop.permute.xlu1 %5407 }
 0x38b   : > { %5474 = vst.msk [vmem:[#allocation3 + $0x160] sm:$0xf] %vm1482_vm6, %v5408_v60  ;;  %v12082_v60 = vpop.f32.mrf.mxu1 }
 0x38c   : > { %v4898_v10 = vpop.permute.xlu0 %4897  ;;  %v5725_v28 = vld [vmem:[#allocation3 + $0x150] sm:$0xff] }
 0x38d   : > { %4963 = vst.msk [vmem:[#allocation3 + $0x16c] sm:$0xf] %vm968_vm4, %v4898_v10  ;;  %v12088_v10 = vpop.f32.mrf.mxu1 }
 0x38e   : > { %v3940_v38 = vpop.permute.xlu1 %3939 }
 0x38f   : > { %4004 = vst.msk [vmem:[#allocation3 + $0x174] sm:$0xf] %vm968_vm4, %v3940_v38 }
 0x390   : > { %v4194_v4 = vpop.permute.xlu0 %4193 }
 0x391   : > { %4259 = vst.msk [vmem:[#allocation3 + $0x168] sm:$0xf] %vm1225_vm5, %v4194_v4  ;;  %v9055_v4 = vadd.f32 %v12015_v1, %v12011_v3 }
 0x392   : > { %v4900_v34 = vpop.permute.xlu1 %4899  ;;  %v5727_v16 = vld [vmem:[#allocation3 + $0x15c] sm:$0xff] }
 0x393   : > { %v9544_v50 = vld [vmem:[#allocation3 + $0x154] ss:$12 sps:$4 sm:$0xff]   ;;  %4964 = vst.msk [vmem:[#allocation3 + $0x178] sm:$0xf] %vm968_vm4, %v4900_v34  ;;  %v8239_v20 = vcombine.low %v5725_v28, %v5727_v16  ;;  %v12092_v28 = vpop.f32.mrf.mxu1 }
 0x394   : > { %6316 = vmatprep.mubr.bf16.mxu1 %v9544_v50  ;;  %v5154_v32 = vpop.permute.xlu0 %5153  ;;  %v12094_v50 = vpop.f32.mrf.mxu0 }
 0x395   : > { %6317 = vmatmul.mubr.bf16.gmra.mxu1 %v8239_v20  ;;  %5219 = vst.msk [vmem:[#allocation3 + $0x16c] sm:$0xf] %vm1225_vm5, %v5154_v32 }
 0x396   : > { %v4196_v38 = vpop.permute.xlu1 %4195  ;;  %v6386_v32 = vpop.f32.mrf.mxu0 }
 0x397   : > { %4260 = vst.msk [vmem:[#allocation3 + $0x174] sm:$0xf] %vm1225_vm5, %v4196_v38  ;;  %v12100_v38 = vpop.f32.mrf.mxu1 }
 0x398   : > { %v4450_v16 = vpop.permute.xlu0 %4449  ;;  %v12114_v1 = vpop.f32.mrf.mxu0 }
 0x399   : > { %4515 = vst.msk [vmem:[#allocation3 + $0x168] sm:$0xf] %vm1482_vm6, %v4450_v16  ;;  %v12105_v11 = vpop.f32.mrf.mxu1  ;;  %v12110_v16 = vld [vmem:[%s12778_s4] ss:$0 sm:$0xff] }
 0x39a   : > { %v5156_v34 = vpop.permute.xlu1 %5155  ;;  %v6210_v3 = vadd.f32 %v9055_v4, %v12110_v16  ;;  %v6399_v15 = vpop.f32.mrf.mxu0  ;;  %v9064_v4 = vadd.f32 %v12037_v12, %v12033_v31  ;;  %v6215_v2 = vadd.f32 %v9058_v54, %v12110_v16  ;;  %v9073_v12 = vadd.f32 %v12060_v0, %v12056_v57 }
 0x39b   : > { %5220 = vst.msk [vmem:[#allocation3 + $0x178] sm:$0xf] %vm1225_vm5, %v5156_v34  ;;  %v9052_v34 = vadd.f32 %v12007_v48, %v12003_v9  ;;  %v9061_v9 = vadd.f32 %v12030_v63, %v12026_v35  ;;  %v6226_v35 = vadd.f32 %v9067_v29, %v12110_v16  ;;  %v9549_v63 = vld [vmem:[#allocation3 + $0x158] ss:$12 sps:$4 sm:$0xff]  }
 0x39c   : > { %v5410_v43 = vpop.permute.xlu0 %5409  ;;  %v6371_v48 = vadd.f32 %v6370_v58, %v6210_v3  ;;  %v12129_v58 = vpop.f32.mrf.mxu0  ;;  %v6223_v52 = vadd.f32 %v9064_v4, %v12110_v16  ;;  %v6234_v0 = vadd.f32 %v9073_v12, %v12110_v16 }
 0x39d   : > { %5475 = vst.msk [vmem:[#allocation3 + $0x16c] sm:$0xf] %vm1482_vm6, %v5410_v43  ;;  %v12117_v43 = vpop.f32.mrf.mxu1  ;;  %v6218_v55 = vadd.f32 %v9061_v9, %v12110_v16  ;;  %v9070_v9 = vadd.f32 %v12052_v59, %v12048_v36 }
 0x39e   : > { %v4452_v20 = vpop.permute.xlu1 %4451  ;;  %v6495_v40 = vmul.f32 0.1, %v6371_v48  ;;  %v6402_v3 = vpop.f32.mrf.mxu0  ;;  %v9550_v48 = vld [vmem:[#allocation3 + $0x170] ss:$12 sps:$4 sm:$0xff]   ;;  %v6395_v4 = vadd.f32 %v12094_v50, %v6234_v0 }
 0x39f   : > { %4516 = vst.msk [vmem:[#allocation3 + $0x174] sm:$0xf] %vm1482_vm6, %v4452_v20  ;;  %v6207_v20 = vadd.f32 %v9052_v34, %v12110_v16  ;;  %v9089_v42 = vpop.f32.mrf.mxu1  ;;  %v6379_v31 = vadd.f32 %v12072_v44, %v6218_v55  ;;  %v6384_v44 = vadd.f32 %v6383_v37, %v6223_v52 }
 0x3a0   : > { %v12138_v29 = vadd.f32 %v6495_v40, %v9859_v7  ;;  %v9076_v7 = vadd.f32 %v12069_v56, %v12065_v26  ;;  %v12150_v57 = vpop.f32.mrf.mxu0 }
 0x3a1   : > { %v9090_v45 = vpop.f32.mrf.mxu1  ;;  %v6497_v40 = vmul.f32 0.1, %v6379_v31  ;;  %v6498_v26 = vmul.f32 0.1, %v6384_v44 }
 0x3a2   : > { %v5412_v51 = vpop.permute.xlu1 %5411  ;;  %v6239_v56 = vadd.f32 %v9076_v7, %v12110_v16 }
 0x3a3   : > { %5476 = vst.msk [vmem:[#allocation3 + $0x178] sm:$0xf] %vm1482_vm6, %v5412_v51  ;;  %v6368_v51 = vadd.f32 %v6367_v49, %v6207_v20  ;;  %v9079_v49 = vadd.f32 %v12079_v53, %v12075_v33  ;;  %v6376_v20 = vadd.f32 %v12062_v30, %v6215_v2  ;;  %v9552_v30 = vld [vmem:[%s12779_s5] sm:$0xff]   ;;  %v6231_v53 = vadd.f32 %v9070_v9, %v12110_v16 }
 0x3a4   : > { %v9091_v2 = vadd.f32 %v9090_v45, %v9089_v42  ;;  %v12180_v50 = vadd.f32 %v6498_v26, %v9874_v14  ;;  %v6400_v31 = vadd.f32 %v6399_v15, %v6239_v56  ;;  %v12847_v45 = vmov 0.0  }
 0x3a5   : > { %v6494_v47 = vmul.f32 0.1, %v6368_v51  ;;  %v6242_v36 = vadd.f32 %v9079_v49, %v12110_v16  ;;  %v6496_v37 = vmul.f32 0.1, %v6376_v20  ;;  %v6415_v51 = vpop.f32.mrf.mxu0  ;;  %v6392_v52 = vadd.f32 %v12084_v5, %v6231_v53 }
 0x3a6   : > { %v9548_v34 = vld [vmem:[#allocation3 + $0x168] ss:$12 sps:$4 sm:$0xff]  }
 0x3a7   : > { %v12146_v55 = vadd.f32 %v6494_v47, %v9856_v6  ;;  %v9262_v42 = vpop.f32.mrf.mxu0  ;;  %v6500_v15 = vmul.f32 0.1, %v6392_v52 }
 0x3a9   : > { %v6558_v6 = vpack.c.bf16 %v12138_v29, %v12146_v55  ;;  %v12203_v44 = vadd.f32 %v6500_v15, %v9884_v18  ;;  %v12850_v15 = vld [vmem:[#allocation11_spill] sm:$0xff] }
 0x3aa   : > { %v9546_v62 = vld [vmem:[#allocation3 + $0x16c] ss:$12 sps:$4 sm:$0xff]  }
 0x3ab   : > { %6324 = vmatprep.mubr.bf16.mxu1 %v9546_v62  ;;  %v6387_v62 = vadd.f32 %v6386_v32, %v6226_v35  ;;  %v12165_v32 = vadd.f32 %v6497_v40, %v9871_v13  ;;  %v9082_v13 = vadd.f32 %v12088_v10, %v12082_v60  ;;  %v6258_v60 = vadd.f32 %v9091_v2, %v12110_v16 }
 0x3ac   : > { %6325 = vmatmul.mubr.bf16.gmra.mxu1 %v9548_v34  ;;  %v9085_v34 = vadd.f32 %v12100_v38, %v12092_v28  ;;  %v9088_v28 = vadd.f32 %v12117_v43, %v12105_v11  ;;  %v6501_v38 = vmul.f32 0.1, %v6395_v4  ;;  %v6502_v43 = vmul.f32 0.1, %v6400_v31 }
 0x3ad   : > { %9275 = vmatprep.mubr.msk.bf16.mxu1 %vm472_vm0, %v9549_v63  ;;  %v9092_v54 = vpop.f32.mrf.mxu1  ;;  %v6499_v33 = vmul.f32 0.1, %v6387_v62  ;;  %v6403_v63 = vadd.f32 %v6402_v3, %v6242_v36  ;;  %v6247_v11 = vadd.f32 %v9082_v13, %v12110_v16  ;;  %v6418_v62 = vpop.f32.mrf.mxu0 }
 0x3ae   : > { %v6255_v12 = vadd.f32 %v9088_v28, %v12110_v16  ;;  %v12196_v49 = vadd.f32 %v6501_v38, %v9887_v19  ;;  %v12207_v0 = vadd.f32 %v6502_v43, %v9897_v21 }
 0x3af   : > { %v9093_v59 = vpop.f32.mrf.mxu1  ;;  %v12171_v35 = vadd.f32 %v6499_v33, %v9881_v17  ;;  %v6503_v5 = vmul.f32 0.1, %v6403_v63  ;;  %v6408_v7 = vadd.f32 %v12114_v1, %v6247_v11  ;;  %v9265_v33 = vpop.f32.mrf.mxu0 }
 0x3b0   : > { %v9094_v40 = vadd.f32 %v9093_v59, %v9092_v54 }
 0x3b1   : > { %v9095_v47 = vpop.f32.mrf.mxu1  ;;  %v6560_v14 = vpack.c.bf16 %v12171_v35, %v12180_v50  ;;  %v12200_v9 = vadd.f32 %v6503_v5, %v9900_v22  ;;  %v6504_v18 = vmul.f32 0.1, %v6408_v7  ;;  %v6431_v54 = vpop.f32.mrf.mxu0 }
 0x3b3   : > { %v9096_v10 = vpop.f32.mrf.mxu1  ;;  %v12224_v4 = vadd.f32 %v6504_v18, %v9903_v23  ;;  %v9266_v52 = vpop.f32.mrf.mxu0 }
 0x3b4   : > { %9276 = vmatmul.mubr.msk.bf16.vlgmr.msra.gmra.mxu1 %vm472_vm0, %v9550_v48  ;;  %v9097_v20 = vadd.f32 %v9096_v10, %v9095_v47  ;;  %v6419_v48 = vadd.f32 %v6418_v62, %v6258_v60 }
 0x3b5   : > { %9280 = vmatpush3.bf16.msra.mxu1 %v11988_v61  ;;  %9283 = vmatprep.mubr.msk.bf16.mxu1 %vm472_vm0, %v6558_v6  ;;  %v12174_v61 = vadd.f32 %v6496_v37, %v9862_v8  ;;  %v6250_v8 = vadd.f32 %v9085_v34, %v12110_v16  ;;  %v6562_v6 = vpack.c.bf16 %v12200_v9, %v12207_v0 }
 0x3b6   : > { %9281 = vmatprep.subr.bf16.mxu1 %v9552_v30  ;;  %v6266_v36 = vadd.f32 %v9097_v20, %v12110_v16  ;;  %v6507_v22 = vmul.f32 0.1, %v6419_v48  ;;  %v6263_v37 = vadd.f32 %v9094_v40, %v12110_v16 }
 0x3b7   : > { %v6559_v17 = vpack.c.bf16 %v12165_v32, %v12174_v61  ;;  %v6411_v3 = vadd.f32 %v12129_v58, %v6250_v8  ;;  %v6561_v58 = vpack.c.bf16 %v12196_v49, %v12203_v44 }
 0x3b8   : > { %v6427_v53 = vadd.f32 %v9262_v42, %v6266_v36  ;;  %v12221_v56 = vadd.f32 %v6507_v22, %v10058_v41  ;;  %v6424_v34 = vadd.f32 %v12150_v57, %v6263_v37  ;;  %v12852_v36 = vld [vmem:[#allocation12_spill] sm:$0xff]  ;;  %v12854_v22 = vld [vmem:[#allocation13_spill] sm:$0xff] }
 0x3b9   : > { %9282 = vmatpush3.bf16.msra.mxu1 %v9552_v30  ;;  %v6416_v30 = vadd.f32 %v6415_v51, %v6255_v12  ;;  %v6505_v19 = vmul.f32 0.1, %v6411_v3 }
 0x3ba   : > { %9351 = vmatprep.subr.mxu1 %v12847_v45 }
 0x3bb   : > { %v6506_v21 = vmul.f32 0.1, %v6416_v30  ;;  %v12218_v59 = vadd.f32 %v6505_v19, %v9913_v24  ;;  %v6509_v24 = vmul.f32 0.1, %v6427_v53 }
 0x3bc   : > { %9284 = vmatmul.mubr.msk.bf16.vlgmr.msra.gmra.mxu1 %vm472_vm0, %v6559_v17  ;;  %v6508_v17 = vmul.f32 0.1, %v6424_v34 }
 0x3bd   : > { %9287 = vmatprep.mubr.msk.bf16.mxu1 %vm472_vm0, %v6560_v14  ;;  %v12228_v2 = vadd.f32 %v6506_v21, %v10046_v39  ;;  %v6563_v31 = vpack.c.bf16 %v12218_v59, %v12224_v4  ;;  %v6434_v39 = vpop.f32.mrf.mxu0  ;;  %v12239_v42 = vadd.f32 %v6509_v24, %v10114_v27 }
 0x3be   : > { %v12242_v5 = vadd.f32 %v6508_v17, %v10111_v25  ;;  %v12858_v17 = vld [vmem:[#allocation15_spill] sm:$0xff] }
 0x3bf   : > { %v6564_v23 = vpack.c.bf16 %v12221_v56, %v12228_v2  ;;  %12848 = vst [vmem:[#allocation26_spill] sm:$0xff] %v12239_v42  ;;  %v9269_v37 = vpop.f32.mrf.mxu0 }
 0x3c0   : > { %v6565_v10 = vpack.c.bf16 %v12239_v42, %v12242_v5 }
 0x3c4   : > { %9288 = vmatmul.mubr.msk.bf16.gmra.mxu1 %vm472_vm0, %v6561_v58 }
 0x3c5   : > { %v9098_v1 = vpop.f32.mrf.mxu1  ;;  %9291 = vmatprep.mubr.msk.bf16.mxu1 %vm472_vm0, %v6562_v6 }
 0x3c7   : > { %v9099_v26 = vpop.f32.mrf.mxu1 }
 0x3c8   : > { %v9100_v51 = vadd.f32 %v9099_v26, %v9098_v1 }
 0x3c9   : > { %v9101_v63 = vpop.f32.mrf.mxu1 }
 0x3ca   : > { %v6271_v47 = vadd.f32 %v9100_v51, %v12110_v16 }
 0x3cb   : > { %v9102_v13 = vpop.f32.mrf.mxu1 }
 0x3cc   : > { %v6432_v41 = vadd.f32 %v6431_v54, %v6271_v47  ;;  %v9103_v28 = vadd.f32 %v9102_v13, %v9101_v63  ;;  %9292 = vmatmul.mubr.msk.bf16.gmra.mxu1 %vm472_vm0, %v6563_v31 }
 0x3cd   : > { %9295 = vmatprep.mubr.msk.bf16.mxu1 %vm472_vm0, %v6564_v23 }
 0x3ce   : > { %v6274_v57 = vadd.f32 %v9103_v28, %v12110_v16  ;;  %v6510_v38 = vmul.f32 0.1, %v6432_v41  ;;  %v12856_v28 = vld [vmem:[#allocation14_spill] sm:$0xff] }
 0x3d0   : > { %v6435_v8 = vadd.f32 %v6434_v39, %v6274_v57  ;;  %v12247_v14 = vadd.f32 %v6510_v38, %v10141_v46  ;;  %v9553_v39 = vld [vmem:[%s12781_s7 + $0x8] sm:$0xff]  }
 0x3d1   : > { %9315 = vmatprep.subr.bf16.mxu0 %v9553_v39 }
 0x3d2   : > { %v6511_v60 = vmul.f32 0.1, %v6435_v8  ;;  %12849 = vst [vmem:[#allocation27_spill] sm:$0xff] %v12247_v14  ;;  %9316 = vmatpush3.bf16.msra.mxu0 %v9553_v39  ;;  %v9554_v8 = vld [vmem:[%s12781_s7] sm:$0xff]  }
 0x3d3   : > { %9317 = vmatprep.subr.bf16.mxu0 %v9554_v8 }
 0x3d4   : > { %v12250_v11 = vadd.f32 %v6511_v60, %v12850_v15  ;;  %9296 = vmatmul.mubr.msk.bf16.gmra.mxu1 %vm472_vm0, %v6565_v10 }
 0x3d6   : > { %12851 = vst [vmem:[#allocation11_spill] sm:$0xff] %v12250_v11  ;;  %v6566_v27 = vpack.c.bf16 %v12250_v11, %v12247_v14  ;;  %9318 = vmatpush3.bf16.msra.mxu0 %v9554_v8 }
 0x3d8   : > { %9299 = vmatprep.mubr.msk.bf16.mxu1 %vm472_vm0, %v6566_v27 }
 0x3dd   : > { %v9104_v43 = vpop.f32.mrf.mxu1 }
 0x3df   : > { %v9105_v25 = vpop.f32.mrf.mxu1 }
 0x3e0   : > { %v9106_v12 = vadd.f32 %v9105_v25, %v9104_v43 }
 0x3e1   : > { %v9107_v62 = vpop.f32.mrf.mxu1 }
 0x3e2   : > { %v6279_v3 = vadd.f32 %v9106_v12, %v12110_v16 }
 0x3e3   : > { %v9108_v20 = vpop.f32.mrf.mxu1 }
 0x3e4   : > { %v6440_v48 = vadd.f32 %v9265_v33, %v6279_v3  ;;  %v9109_v46 = vadd.f32 %v9108_v20, %v9107_v62  ;;  %v6447_v33 = vpop.f32.mrf.mxu0 }
 0x3e6   : > { %v6282_v7 = vadd.f32 %v9109_v46, %v12110_v16  ;;  %v6512_v40 = vmul.f32 0.1, %v6440_v48  ;;  %v9270_v51 = vpop.f32.mrf.mxu0 }
 0x3e8   : > { %v6443_v30 = vadd.f32 %v9266_v52, %v6282_v7  ;;  %v12259_v58 = vadd.f32 %v6512_v40, %v12852_v36  ;;  %v6450_v24 = vpop.f32.mrf.mxu0  ;;  %v12860_v7 = vld [vmem:[#allocation16_spill] sm:$0xff] }
 0x3ea   : > { %v6513_v19 = vmul.f32 0.1, %v6443_v30  ;;  %12853 = vst [vmem:[#allocation12_spill] sm:$0xff] %v12259_v58  ;;  %v12862_v30 = vld [vmem:[#allocation17_spill] sm:$0xff] }
 0x3ec   : > { %v12262_v6 = vadd.f32 %v6513_v19, %v12854_v22  ;;  %v9273_v22 = vpop.f32.mrf.mxu0 }
 0x3ee   : > { %12855 = vst [vmem:[#allocation13_spill] sm:$0xff] %v12262_v6  ;;  %v6567_v18 = vpack.c.bf16 %v12262_v6, %v12259_v58 }
 0x3f0   : > { %9300 = vmatmul.mubr.msk.bf16.gmra.mxu1 %vm472_vm0, %v6567_v18 }
 0x3f5   : > { %v9110_v1 = vpop.f32.mrf.mxu1 }
 0x3f7   : > { %v9111_v21 = vpop.f32.mrf.mxu1 }
 0x3f8   : > { %v9112_v54 = vadd.f32 %v9111_v21, %v9110_v1 }
 0x3f9   : > { %v9113_v53 = vpop.f32.mrf.mxu1 }
 0x3fa   : > { %v6287_v26 = vadd.f32 %v9112_v54, %v12110_v16 }
 0x3fb   : > { %v9114_v34 = vpop.f32.mrf.mxu1 }
 0x3fc   : > { %v6448_v63 = vadd.f32 %v6447_v33, %v6287_v26  ;;  %v9115_v47 = vadd.f32 %v9114_v34, %v9113_v53 }
 0x3fe   : > { %v6290_v52 = vadd.f32 %v9115_v47, %v12110_v16  ;;  %v6514_v13 = vmul.f32 0.1, %v6448_v63 }
 0x400   : > { %v6451_v31 = vadd.f32 %v6450_v24, %v6290_v52  ;;  %v12270_v23 = vadd.f32 %v6514_v13, %v12856_v28  ;;  %v12866_v28 = vld [vmem:[#allocation19_spill] sm:$0xff] }
 0x402   : > { %v6515_v41 = vmul.f32 0.1, %v6451_v31  ;;  %12857 = vst [vmem:[#allocation14_spill] sm:$0xff] %v12270_v23  ;;  %v12864_v31 = vld [vmem:[#allocation18_spill] sm:$0xff] }
 0x404   : > { %v12273_v57 = vadd.f32 %v6515_v41, %v12858_v17 }
 0x406   : > { %12859 = vst [vmem:[#allocation15_spill] sm:$0xff] %v12273_v57  ;;  %v6568_v38 = vpack.c.bf16 %v12273_v57, %v12270_v23 }
 0x408   : > { %9303 = vmatprep.mubr.msk.bf16.mxu1 %vm472_vm0, %v6568_v38 }
 0x40d   : > { %v9116_v60 = vpop.f32.mrf.mxu1 }
 0x40f   : > { %v9117_v10 = vpop.f32.mrf.mxu1 }
 0x410   : > { %v9118_v15 = vadd.f32 %v9117_v10, %v9116_v60 }
 0x411   : > { %v9119_v27 = vpop.f32.mrf.mxu1 }
 0x412   : > { %v6295_v43 = vadd.f32 %v9118_v15, %v12110_v16 }
 0x413   : > { %v9120_v25 = vpop.f32.mrf.mxu1 }
 0x414   : > { %v6456_v12 = vadd.f32 %v9269_v37, %v6295_v43  ;;  %v9121_v62 = vadd.f32 %v9120_v25, %v9119_v27  ;;  %v6463_v37 = vpop.f32.mrf.mxu0 }
 0x416   : > { %v6298_v3 = vadd.f32 %v9121_v62, %v12110_v16  ;;  %v6516_v20 = vmul.f32 0.1, %v6456_v12  ;;  %v9274_v53 = vpop.f32.mrf.mxu0 }
 0x418   : > { %v6459_v48 = vadd.f32 %v9270_v51, %v6298_v3  ;;  %v12287_v40 = vadd.f32 %v6516_v20, %v12860_v7  ;;  %v6466_v47 = vpop.f32.mrf.mxu0  ;;  %v12870_v7 = vld [vmem:[#allocation21_spill] sm:$0xff] }
 0x41a   : > { %v6517_v46 = vmul.f32 0.1, %v6459_v48  ;;  %12861 = vst [vmem:[#allocation16_spill] sm:$0xff] %v12287_v40  ;;  %v12868_v48 = vld [vmem:[#allocation20_spill] sm:$0xff] }
 0x41c   : > { %v12290_v19 = vadd.f32 %v6517_v46, %v12862_v30 }
 0x41e   : > { %12863 = vst [vmem:[#allocation17_spill] sm:$0xff] %v12290_v19  ;;  %v6569_v36 = vpack.c.bf16 %v12290_v19, %v12287_v40 }
 0x420   : > { %9304 = vmatmul.mubr.msk.bf16.gmra.mxu1 %vm472_vm0, %v6569_v36 }
 0x425   : > { %v9122_v18 = vpop.f32.mrf.mxu1 }
 0x427   : > { %v9123_v1 = vpop.f32.mrf.mxu1 }
 0x428   : > { %v9124_v33 = vadd.f32 %v9123_v1, %v9122_v18 }
 0x429   : > { %v9125_v21 = vpop.f32.mrf.mxu1 }
 0x42a   : > { %v6303_v54 = vadd.f32 %v9124_v33, %v12110_v16 }
 0x42b   : > { %v9126_v26 = vpop.f32.mrf.mxu1 }
 0x42c   : > { %v6464_v51 = vadd.f32 %v6463_v37, %v6303_v54  ;;  %v9127_v34 = vadd.f32 %v9126_v26, %v9125_v21 }
 0x42e   : > { %v6306_v63 = vadd.f32 %v9127_v34, %v12110_v16  ;;  %v6518_v52 = vmul.f32 0.1, %v6464_v51 }
 0x430   : > { %v6467_v24 = vadd.f32 %v6466_v47, %v6306_v63  ;;  %v12298_v41 = vadd.f32 %v6518_v52, %v12864_v31 }
 0x432   : > { %v6519_v13 = vmul.f32 0.1, %v6467_v24  ;;  %12865 = vst [vmem:[#allocation18_spill] sm:$0xff] %v12298_v41 }
 0x434   : > { %v12301_v17 = vadd.f32 %v6519_v13, %v12866_v28 }
 0x436   : > { %12867 = vst [vmem:[#allocation19_spill] sm:$0xff] %v12301_v17  ;;  %v6570_v39 = vpack.c.bf16 %v12301_v17, %v12298_v41 }
 0x438   : > { %9307 = vmatprep.mubr.msk.bf16.mxu1 %vm472_vm0, %v6570_v39 }
 0x43d   : > { %v9128_v38 = vpop.f32.mrf.mxu1 }
 0x43f   : > { %v9129_v8 = vpop.f32.mrf.mxu1 }
 0x440   : > { %v9130_v60 = vadd.f32 %v9129_v8, %v9128_v38 }
 0x441   : > { %v9131_v10 = vpop.f32.mrf.mxu1 }
 0x442   : > { %v6311_v15 = vadd.f32 %v9130_v60, %v12110_v16 }
 0x443   : > { %v9132_v27 = vpop.f32.mrf.mxu1 }
 0x444   : > { %v6472_v43 = vadd.f32 %v9273_v22, %v6311_v15  ;;  %v9133_v25 = vadd.f32 %v9132_v27, %v9131_v10 }
 0x446   : > { %v6314_v12 = vadd.f32 %v9133_v25, %v12110_v16  ;;  %v6520_v62 = vmul.f32 0.1, %v6472_v43 }
 0x448   : > { %v6475_v3 = vadd.f32 %v9274_v53, %v6314_v12  ;;  %v12309_v46 = vadd.f32 %v6520_v62, %v12868_v48 }
 0x44a   : > { %v6521_v20 = vmul.f32 0.1, %v6475_v3  ;;  %12869 = vst [vmem:[#allocation20_spill] sm:$0xff] %v12309_v46  ;;  %v12872_v3 = vld [vmem:[#allocation25_spill] sm:$0xff] }
 0x44c   : > { %v12312_v30 = vadd.f32 %v6521_v20, %v12870_v7  ;;  %v12874_v7 = vld [vmem:[#allocation22_spill] sm:$0xff] }
 0x44e   : > { %12871 = vst [vmem:[#allocation21_spill] sm:$0xff] %v12312_v30  ;;  %v6571_v36 = vpack.c.bf16 %v12312_v30, %v12309_v46 }
 0x450   : > { %9308 = vmatmul.mubr.msk.bf16.gmra.mxu1 %vm472_vm0, %v6571_v36 }
 0x455   : > { %v9134_v18 = vpop.f32.mrf.mxu1 }
 0x457   : > { %v9135_v37 = vpop.f32.mrf.mxu1 }
 0x458   : > { %v9136_v53 = vadd.f32 %v9135_v37, %v9134_v18  ;;  %v12876_v18 = vld [vmem:[#allocation23_spill] sm:$0xff] }
 0x459   : > { %v9137_v22 = vpop.f32.mrf.mxu1 }
 0x45a   : > { %v6319_v52 = vadd.f32 %v9136_v53, %v12110_v16 }
 0x45b   : > { %v9138_v1 = vpop.f32.mrf.mxu1 }
 0x45c   : > { %v9139_v47 = vadd.f32 %v9138_v1, %v9137_v22  ;;  %v12878_v22 = vld [vmem:[#allocation24_spill] sm:$0xff] }
 0x45e   : > { %v6322_v60 = vadd.f32 %v9139_v47, %v12110_v16 }
 0x46c   : > { %v9140_v33 = vpop.f32.mrf.mxu1 }
 0x46e   : > { %v9141_v21 = vpop.f32.mrf.mxu1 }
 0x46f   : > { %v9142_v26 = vadd.f32 %v9141_v21, %v9140_v33 }
 0x470   : > { %v9143_v54 = vpop.f32.mrf.mxu1 }
 0x471   : > { %v6327_v24 = vadd.f32 %v9142_v26, %v12110_v16 }
 0x472   : > { %v9144_v51 = vpop.f32.mrf.mxu1 }
 0x473   : > { %v9145_v34 = vadd.f32 %v9144_v51, %v9143_v54 }
 0x474   : > { %v9277_v63 = vpop.f32.mrf.mxu1 }
 0x475   : > { %v6330_v28 = vadd.f32 %v9145_v34, %v12110_v16  ;;  %v6488_v39 = vadd.f32 %v9277_v63, %v6327_v24  ;;  %v12333_v16 = vld [vmem:[%s12780_s6] ss:$0 sm:$0xff] }
 0x476   : > { %v6479_v13 = vpop.f32.mrf.mxu1 }
 0x477   : > { %v6480_v31 = vadd.f32 %v6479_v13, %v6319_v52  ;;  %v6524_v25 = vmul.f32 0.1, %v6488_v39 }
 0x478   : > { %v9278_v38 = vpop.f32.mrf.mxu1 }
 0x479   : > { %v6491_v8 = vadd.f32 %v9278_v38, %v6330_v28  ;;  %v6522_v15 = vmul.f32 0.1, %v6480_v31  ;;  %v12336_v1 = vadd.f32 %v6524_v25, %v12878_v22 }
 0x47a   : > { %v6482_v10 = vpop.f32.mrf.mxu1 }
 0x47b   : > { %v6525_v27 = vmul.f32 0.1, %v6491_v8  ;;  %v6483_v43 = vadd.f32 %v6482_v10, %v6322_v60  ;;  %v12325_v36 = vadd.f32 %v6522_v15, %v12874_v7  ;;  %12879 = vst [vmem:[#allocation24_spill] sm:$0xff] %v12336_v1 }
 0x47c   : > { %v9285_v12 = vpop.f32.mrf.mxu1 }
 0x47d   : > { %v6523_v62 = vmul.f32 0.1, %v6483_v43  ;;  %v12322_v20 = vadd.f32 %v6525_v27, %v12872_v3  ;;  %12875 = vst [vmem:[#allocation22_spill] sm:$0xff] %v12325_v36  ;;  %v6688_v51 = vadd.f32 %v9285_v12, %v12333_v16 }
 0x47e   : > { %v6679_v48 = vpop.f32.mrf.mxu1 }
 0x47f   : > { %12873 = vst [vmem:[#allocation25_spill] sm:$0xff] %v12322_v20  ;;  %v12328_v37 = vadd.f32 %v6523_v62, %v12876_v18  ;;  %v6680_v54 = vadd.f32 %v12333_v16, %v6679_v48  ;;  %v6573_v26 = vpack.c.bf16 %v12322_v20, %v12336_v1  ;;  %v6808_v31 = vmax.f32 %v6688_v51, 0.0 }
 0x480   : > { %v9286_v33 = vpop.f32.mrf.mxu1 }
 0x481   : > { %12877 = vst [vmem:[#allocation23_spill] sm:$0xff] %v12328_v37  ;;  %v6572_v21 = vpack.c.bf16 %v12328_v37, %v12325_v36  ;;  %v6691_v53 = vadd.f32 %v9286_v33, %v12333_v16  ;;  %v6806_v24 = vmax.f32 %v6680_v54, 0.0 }
 0x482   : > { %v6682_v34 = vpop.f32.mrf.mxu1 }
 0x483   : > { %v6683_v63 = vadd.f32 %v12333_v16, %v6682_v34  ;;  %9311 = vmatprep.mubr.msk.bf16.mxu1 %vm472_vm0, %v6572_v21  ;;  %v6809_v47 = vmax.f32 %v6691_v53, 0.0 }
 0x484   : > { %v9289_v52 = vpop.f32.mrf.mxu1  ;;  %9312 = vmatmul.mubr.msk.bf16.gmra.mxu1 %vm472_vm0, %v6573_v26 }
 0x485   : > { %v6807_v13 = vmax.f32 %v6683_v63, 0.0  ;;  %v6839_v38 = vpack.c.bf16 %v6809_v47, %v6808_v31  ;;  %v6704_v15 = vadd.f32 %v9289_v52, %v12333_v16  ;;  %9359 = vmatprep.mubr.msk.f32.mxu1 %vm9629_vm7, %v12847_v45 }
 0x486   : > { %v6695_v28 = vpop.f32.mrf.mxu1 }
 0x487   : > { %v6838_v39 = vpack.c.bf16 %v6807_v13, %v6806_v24  ;;  %v6696_v60 = vadd.f32 %v12333_v16, %v6695_v28  ;;  %v6812_v48 = vmax.f32 %v6704_v15, 0.0 }
 0x488   : > { %v9290_v8 = vpop.f32.mrf.mxu1 }
 0x489   : > { %v6707_v10 = vadd.f32 %v9290_v8, %v12333_v16  ;;  %9319 = vmatprep.mubr.msk.bf16.mxu0 %vm472_vm0, %v6838_v39  ;;  %v6810_v62 = vmax.f32 %v6696_v60, 0.0 }
 0x48a   : > { %v6698_v27 = vpop.f32.mrf.mxu1  ;;  %9320 = vmatmul.mubr.msk.bf16.vlgmr.msra.gmra.mxu0 %vm472_vm0, %v6839_v38 }
 0x48b   : > { %v6699_v43 = vadd.f32 %v12333_v16, %v6698_v27  ;;  %v6813_v25 = vmax.f32 %v6707_v10, 0.0 }
 0x48c   : > { %v9293_v12 = vpop.f32.mrf.mxu1 }
 0x48d   : > { %v6811_v3 = vmax.f32 %v6699_v43, 0.0  ;;  %v6841_v22 = vpack.c.bf16 %v6813_v25, %v6812_v48  ;;  %v6720_v53 = vadd.f32 %v9293_v12, %v12333_v16 }
 0x48e   : > { %v6711_v7 = vpop.f32.mrf.mxu1 }
 0x48f   : > { %v6840_v18 = vpack.c.bf16 %v6811_v3, %v6810_v62  ;;  %v6712_v21 = vadd.f32 %v12333_v16, %v6711_v7  ;;  %v6816_v24 = vmax.f32 %v6720_v53, 0.0 }
 0x490   : > { %v9294_v33 = vpop.f32.mrf.mxu1 }
 0x491   : > { %v6723_v54 = vadd.f32 %v9294_v33, %v12333_v16  ;;  %9323 = vmatprep.mubr.msk.bf16.mxu0 %vm472_vm0, %v6840_v18  ;;  %v6814_v47 = vmax.f32 %v6712_v21, 0.0 }
 0x492   : > { %v6714_v26 = vpop.f32.mrf.mxu1  ;;  %9324 = vmatmul.mubr.msk.bf16.gmra.mxu0 %vm472_vm0, %v6841_v22 }
 0x493   : > { %v6715_v51 = vadd.f32 %v12333_v16, %v6714_v26  ;;  %v6817_v34 = vmax.f32 %v6723_v54, 0.0 }
 0x494   : > { %v9297_v63 = vpop.f32.mrf.mxu1 }
 0x495   : > { %v6815_v52 = vmax.f32 %v6715_v51, 0.0  ;;  %v6843_v28 = vpack.c.bf16 %v6817_v34, %v6816_v24  ;;  %v6736_v60 = vadd.f32 %v9297_v63, %v12333_v16 }
 0x496   : > { %v6727_v13 = vpop.f32.mrf.mxu1 }
 0x497   : > { %v6842_v31 = vpack.c.bf16 %v6815_v52, %v6814_v47  ;;  %v6728_v38 = vadd.f32 %v12333_v16, %v6727_v13  ;;  %v6820_v12 = vmax.f32 %v6736_v60, 0.0 }
 0x498   : > { %v9298_v39 = vpop.f32.mrf.mxu1 }
 0x499   : > { %v6739_v8 = vadd.f32 %v9298_v39, %v12333_v16  ;;  %9327 = vmatprep.mubr.msk.bf16.mxu0 %vm472_vm0, %v6842_v31  ;;  %v6818_v43 = vmax.f32 %v6728_v38, 0.0 }
 0x49a   : > { %v6730_v10 = vpop.f32.mrf.mxu1  ;;  %9328 = vmatmul.mubr.msk.bf16.gmra.mxu0 %vm472_vm0, %v6843_v28 }
 0x49b   : > { %v6731_v15 = vadd.f32 %v12333_v16, %v6730_v10  ;;  %v6821_v27 = vmax.f32 %v6739_v8, 0.0 }
 0x49d   : > { %v6819_v25 = vmax.f32 %v6731_v15, 0.0  ;;  %v6845_v3 = vpack.c.bf16 %v6821_v27, %v6820_v12 }
 0x49f   : > { %v6844_v62 = vpack.c.bf16 %v6819_v25, %v6818_v43 }
 0x4a1   : > { %9331 = vmatprep.mubr.msk.bf16.mxu0 %vm472_vm0, %v6844_v62 }
 0x4a2   : > { %9332 = vmatmul.mubr.msk.bf16.gmra.mxu0 %vm472_vm0, %v6845_v3 }
 0x4b0   : > { %v9301_v48 = vpop.f32.mrf.mxu1 }
 0x4b1   : > { %v6752_v21 = vadd.f32 %v9301_v48, %v12333_v16 }
 0x4b2   : > { %v6743_v7 = vpop.f32.mrf.mxu1 }
 0x4b3   : > { %v6744_v22 = vadd.f32 %v12333_v16, %v6743_v7  ;;  %v6824_v63 = vmax.f32 %v6752_v21, 0.0 }
 0x4b4   : > { %v9302_v18 = vpop.f32.mrf.mxu1 }
 0x4b5   : > { %v6755_v33 = vadd.f32 %v9302_v18, %v12333_v16  ;;  %v6822_v51 = vmax.f32 %v6744_v22, 0.0 }
 0x4b6   : > { %v6746_v54 = vpop.f32.mrf.mxu1 }
 0x4b7   : > { %v6747_v53 = vadd.f32 %v12333_v16, %v6746_v54  ;;  %v6825_v26 = vmax.f32 %v6755_v33, 0.0 }
 0x4b9   : > { %v6823_v34 = vmax.f32 %v6747_v53, 0.0  ;;  %v6847_v52 = vpack.c.bf16 %v6825_v26, %v6824_v63 }
 0x4bb   : > { %v6846_v47 = vpack.c.bf16 %v6823_v34, %v6822_v51 }
 0x4bd   : > { %9335 = vmatprep.mubr.msk.bf16.mxu0 %vm472_vm0, %v6846_v47 }
 0x4be   : > { %9336 = vmatmul.mubr.msk.bf16.gmra.mxu0 %vm472_vm0, %v6847_v52 }
 0x4e0   : > { %v9305_v24 = vpop.f32.mrf.mxu1 }
 0x4e1   : > { %v6768_v38 = vadd.f32 %v9305_v24, %v12333_v16 }
 0x4e2   : > { %v6759_v13 = vpop.f32.mrf.mxu1 }
 0x4e3   : > { %v6760_v28 = vadd.f32 %v12333_v16, %v6759_v13  ;;  %v6828_v43 = vmax.f32 %v6768_v38, 0.0 }
 0x4e4   : > { %v9306_v31 = vpop.f32.mrf.mxu1 }
 0x4e5   : > { %v6771_v39 = vadd.f32 %v9306_v31, %v12333_v16  ;;  %v6826_v15 = vmax.f32 %v6760_v28, 0.0 }
 0x4e6   : > { %v6762_v8 = vpop.f32.mrf.mxu1 }
 0x4e7   : > { %v6763_v60 = vadd.f32 %v12333_v16, %v6762_v8  ;;  %v6829_v10 = vmax.f32 %v6771_v39, 0.0 }
 0x4e9   : > { %v6827_v27 = vmax.f32 %v6763_v60, 0.0  ;;  %v6849_v12 = vpack.c.bf16 %v6829_v10, %v6828_v43 }
 0x4eb   : > { %v6848_v25 = vpack.c.bf16 %v6827_v27, %v6826_v15 }
 0x4ed   : > { %9339 = vmatprep.mubr.msk.bf16.mxu0 %vm472_vm0, %v6848_v25  ;;  %v7160_v25 = vld [vmem:[%s12783_s9 + $0x18] sm:$0xff] }
 0x4ee   : > { %9340 = vmatmul.mubr.msk.bf16.gmra.mxu0 %vm472_vm0, %v6849_v12  ;;  %v7159_v12 = vld [vmem:[%s12783_s9 + $0x10] sm:$0xff]  ;;  %9352 = vmatpush3.msra.mxu1 %v7160_v25 }
 0x4ef   : > { %9353 = vmatprep.subr.mxu1 %v12847_v45 }
 0x4f0   : > { %9354 = vmatpush3.msra.mxu1 %v7159_v12 }
 0x4f1   : > { %9355 = vmatprep.subr.mxu1 %v12847_v45 }
 0x510   : > { %v9309_v62 = vpop.f32.mrf.mxu1 }
 0x511   : > { %v6784_v22 = vadd.f32 %v9309_v62, %v12333_v16 }
 0x512   : > { %v6775_v3 = vpop.f32.mrf.mxu1 }
 0x513   : > { %v6776_v7 = vadd.f32 %v12333_v16, %v6775_v3  ;;  %v6832_v51 = vmax.f32 %v6784_v22, 0.0 }
 0x514   : > { %v9310_v48 = vpop.f32.mrf.mxu1 }
 0x515   : > { %v6787_v18 = vadd.f32 %v9310_v48, %v12333_v16  ;;  %v6830_v53 = vmax.f32 %v6776_v7, 0.0 }
 0x516   : > { %v6778_v33 = vpop.f32.mrf.mxu1 }
 0x517   : > { %v6779_v21 = vadd.f32 %v12333_v16, %v6778_v33  ;;  %v6833_v54 = vmax.f32 %v6787_v18, 0.0  ;;  %v7157_v18 = vld [vmem:[%s12783_s9] sm:$0xff] }
 0x518   : > { %v12413_v33 = vld [vmem:[%s12782_s8] ss:$0 sm:$0xff] }
 0x519   : > { %v6831_v26 = vmax.f32 %v6779_v21, 0.0  ;;  %v6851_v63 = vpack.c.bf16 %v6833_v54, %v6832_v51 }
 0x51b   : > { %v6850_v34 = vpack.c.bf16 %v6831_v26, %v6830_v53 }
 0x51d   : > { %9343 = vmatprep.mubr.msk.bf16.mxu0 %vm472_vm0, %v6850_v34 }
 0x51e   : > { %9344 = vmatmul.mubr.msk.bf16.gmra.mxu0 %vm472_vm0, %v6851_v63 }
 0x544   : > { %v9313_v47 = vpop.f32.mrf.mxu1 }
 0x545   : > { %v6800_v28 = vadd.f32 %v9313_v47, %v12333_v16 }
 0x546   : > { %v6791_v52 = vpop.f32.mrf.mxu1 }
 0x547   : > { %v6792_v13 = vadd.f32 %v12333_v16, %v6791_v52  ;;  %v6836_v15 = vmax.f32 %v6800_v28, 0.0 }
 0x548   : > { %v9314_v24 = vpop.f32.mrf.mxu1 }
 0x549   : > { %v6803_v31 = vadd.f32 %v9314_v24, %v12333_v16  ;;  %v6834_v60 = vmax.f32 %v6792_v13, 0.0 }
 0x54a   : > { %v6794_v39 = vpop.f32.mrf.mxu1  ;;  %v9321_v62 = vpop.f32.mrf.mxu0 }
 0x54b   : > { %v6795_v38 = vadd.f32 %v12333_v16, %v6794_v39  ;;  %v6837_v8 = vmax.f32 %v6803_v31, 0.0  ;;  %v7158_v16 = vld [vmem:[%s12783_s9 + $0x8] sm:$0xff]  ;;  %v12424_v34 = vadd.f32 %v9321_v62, %v12413_v33 }
 0x54c   : > { %9356 = vmatpush3.msra.mxu1 %v7158_v16  ;;  %v6959_v3 = vpop.f32.mrf.mxu0 }
 0x54d   : > { %v6835_v10 = vmax.f32 %v6795_v38, 0.0  ;;  %v6853_v43 = vpack.c.bf16 %v6837_v8, %v6836_v15  ;;  %9357 = vmatprep.subr.mxu1 %v12847_v45  ;;  %v12419_v53 = vadd.f32 %v12413_v33, %v6959_v3  ;;  %v7089_v24 = vsel %vm472_vm0, %v12424_v34, 0.0 }
 0x54e   : > { %v9322_v48 = vpop.f32.mrf.mxu0  ;;  %9358 = vmatpush3.msra.mxu1 %v7157_v18 }
 0x54f   : > { %v6852_v27 = vpack.c.bf16 %v6835_v10, %v6834_v60  ;;  %9362 = vmatprep.subr.mxu1 %v12847_v45  ;;  %v7086_v63 = vsel %vm472_vm0, %v12419_v53, 0.0  ;;  %v12431_v13 = vadd.f32 %v9322_v48, %v12413_v33 }
 0x550   : > { %v6962_v7 = vpop.f32.mrf.mxu0 }
 0x551   : > { %9347 = vmatprep.mubr.msk.bf16.mxu0 %vm472_vm0, %v6852_v27  ;;  %v12416_v54 = vadd.f32 %v12413_v33, %v6962_v7  ;;  %v7091_v39 = vsel %vm472_vm0, %v12431_v13, 0.0 }
 0x552   : > { %9348 = vmatmul.mubr.msk.bf16.gmra.mxu0 %vm472_vm0, %v6853_v43  ;;  %v9325_v22 = vpop.f32.mrf.mxu0 }
 0x553   : > { %v7087_v51 = vsel %vm472_vm0, %v12416_v54, 0.0  ;;  %v12446_v12 = vadd.f32 %v9325_v22, %v12413_v33 }
 0x554   : > { %v6975_v21 = vpop.f32.mrf.mxu0  ;;  %v7088_v47 = vadd.f32 %v7087_v51, %v7086_v63 }
 0x555   : > { %v12436_v38 = vadd.f32 %v12413_v33, %v6975_v21  ;;  %v7097_v3 = vsel %vm472_vm0, %v12446_v12, 0.0 }
 0x556   : > { %v9326_v26 = vpop.f32.mrf.mxu0  ;;  %v7090_v31 = vadd.f32 %v7089_v24, %v7088_v47 }
 0x557   : > { %v7093_v15 = vsel %vm472_vm0, %v12436_v38, 0.0  ;;  %v12451_v48 = vadd.f32 %v9326_v26, %v12413_v33 }
 0x558   : > { %v6978_v52 = vpop.f32.mrf.mxu0  ;;  %v7092_v8 = vadd.f32 %v7091_v39, %v7090_v31 }
 0x559   : > { %v12439_v10 = vadd.f32 %v12413_v33, %v6978_v52  ;;  %v7099_v21 = vsel %vm472_vm0, %v12451_v48, 0.0 }
 0x55a   : > { %v9329_v28 = vpop.f32.mrf.mxu0  ;;  %v7094_v27 = vadd.f32 %v7093_v15, %v7092_v8 }
 0x55b   : > { %v7095_v25 = vsel %vm472_vm0, %v12439_v10, 0.0  ;;  %v12466_v39 = vadd.f32 %v9329_v28, %v12413_v33 }
 0x55c   : > { %v6991_v60 = vpop.f32.mrf.mxu0  ;;  %v7096_v16 = vadd.f32 %v7095_v25, %v7094_v27 }
 0x55d   : > { %v12456_v51 = vadd.f32 %v12413_v33, %v6991_v60  ;;  %v7105_v27 = vsel %vm472_vm0, %v12466_v39, 0.0 }
 0x55e   : > { %v9330_v43 = vpop.f32.mrf.mxu0  ;;  %v7098_v7 = vadd.f32 %v7097_v3, %v7096_v16 }
 0x55f   : > { %v7101_v52 = vsel %vm472_vm0, %v12456_v51, 0.0  ;;  %v12471_v25 = vadd.f32 %v9330_v43, %v12413_v33 }
 0x560   : > { %v6994_v62 = vpop.f32.mrf.mxu0  ;;  %v7100_v63 = vadd.f32 %v7099_v21, %v7098_v7 }
 0x561   : > { %v12459_v22 = vadd.f32 %v12413_v33, %v6994_v62  ;;  %v7107_v3 = vsel %vm472_vm0, %v12471_v25, 0.0 }
 0x562   : > { %v9333_v18 = vpop.f32.mrf.mxu0  ;;  %v7102_v24 = vadd.f32 %v7101_v52, %v7100_v63 }
 0x563   : > { %v7103_v26 = vsel %vm472_vm0, %v12459_v22, 0.0 }
 0x564   : > { %v7007_v47 = vpop.f32.mrf.mxu0  ;;  %v7104_v8 = vadd.f32 %v7103_v26, %v7102_v24 }
 0x565   : > { %v12476_v7 = vadd.f32 %v12413_v33, %v7007_v47 }
 0x566   : > { %v9334_v31 = vpop.f32.mrf.mxu0  ;;  %v7106_v16 = vadd.f32 %v7105_v27, %v7104_v8  ;;  %v12486_v8 = vadd.f32 %v9333_v18, %v12413_v33 }
 0x567   : > { %v7109_v52 = vsel %vm472_vm0, %v12476_v7, 0.0 }
 0x568   : > { %v7010_v15 = vpop.f32.mrf.mxu0  ;;  %v7108_v21 = vadd.f32 %v7107_v3, %v7106_v16  ;;  %v7113_v47 = vsel %vm472_vm0, %v12486_v8, 0.0 }
 0x569   : > { %v12479_v28 = vadd.f32 %v12413_v33, %v7010_v15  ;;  %v12491_v15 = vadd.f32 %v9334_v31, %v12413_v33 }
 0x56a   : > { %v7110_v24 = vadd.f32 %v7109_v52, %v7108_v21 }
 0x56b   : > { %v7111_v43 = vsel %vm472_vm0, %v12479_v28, 0.0  ;;  %v7115_v18 = vsel %vm472_vm0, %v12491_v15, 0.0 }
 0x56c   : > { %v7112_v27 = vadd.f32 %v7111_v43, %v7110_v24 }
 0x56e   : > { %v7114_v3 = vadd.f32 %v7113_v47, %v7112_v27 }
 0x570   : > { %v7116_v43 = vadd.f32 %v7115_v18, %v7114_v3 }
 0x57e   : > { %v9337_v60 = vpop.f32.mrf.mxu0 }
 0x580   : > { %v7023_v62 = vpop.f32.mrf.mxu0 }
 0x581   : > { %v12494_v16 = vadd.f32 %v12413_v33, %v7023_v62  ;;  %v12506_v62 = vadd.f32 %v9337_v60, %v12413_v33 }
 0x582   : > { %v9338_v63 = vpop.f32.mrf.mxu0 }
 0x583   : > { %v7117_v24 = vsel %vm472_vm0, %v12494_v16, 0.0  ;;  %v12511_v30 = vadd.f32 %v9338_v63, %v12413_v33 }
 0x584   : > { %v7026_v26 = vpop.f32.mrf.mxu0  ;;  %v7118_v37 = vadd.f32 %v7117_v24, %v7116_v43 }
 0x585   : > { %v12497_v52 = vadd.f32 %v12413_v33, %v7026_v26  ;;  %v7121_v26 = vsel %vm472_vm0, %v12506_v62, 0.0  ;;  %v7123_v60 = vsel %vm472_vm0, %v12511_v30, 0.0 }
 0x587   : > { %v7119_v31 = vsel %vm472_vm0, %v12497_v52, 0.0 }
 0x588   : > { %v7120_v27 = vadd.f32 %v7119_v31, %v7118_v37 }
 0x58a   : > { %v7122_v3 = vadd.f32 %v7121_v26, %v7120_v27 }
 0x58c   : > { %v7124_v43 = vadd.f32 %v7123_v60, %v7122_v3 }
 0x5ae   : > { %v9341_v20 = vpop.f32.mrf.mxu0 }
 0x5b0   : > { %v7039_v21 = vpop.f32.mrf.mxu0 }
 0x5b1   : > { %v12514_v46 = vadd.f32 %v12413_v33, %v7039_v21  ;;  %v12526_v21 = vadd.f32 %v9341_v20, %v12413_v33 }
 0x5b2   : > { %v9342_v1 = vpop.f32.mrf.mxu0 }
 0x5b3   : > { %v7125_v37 = vsel %vm472_vm0, %v12514_v46, 0.0  ;;  %v12531_v41 = vadd.f32 %v9342_v1, %v12413_v33 }
 0x5b4   : > { %v7042_v47 = vpop.f32.mrf.mxu0  ;;  %v7126_v63 = vadd.f32 %v7125_v37, %v7124_v43 }
 0x5b5   : > { %v12517_v18 = vadd.f32 %v12413_v33, %v7042_v47  ;;  %v7129_v47 = vsel %vm472_vm0, %v12526_v21, 0.0  ;;  %v7131_v37 = vsel %vm472_vm0, %v12531_v41, 0.0 }
 0x5b7   : > { %v7127_v31 = vsel %vm472_vm0, %v12517_v18, 0.0 }
 0x5b8   : > { %v7128_v27 = vadd.f32 %v7127_v31, %v7126_v63 }
 0x5ba   : > { %v7130_v3 = vadd.f32 %v7129_v47, %v7128_v27 }
 0x5bc   : > { %v7132_v43 = vadd.f32 %v7131_v37, %v7130_v3 }
 0x5de   : > { %v9345_v36 = vpop.f32.mrf.mxu0 }
 0x5df   : > { %v12546_v1 = vadd.f32 %v9345_v36, %v12413_v33 }
 0x5e0   : > { %v7055_v24 = vpop.f32.mrf.mxu0 }
 0x5e1   : > { %v12534_v19 = vadd.f32 %v12413_v33, %v7055_v24  ;;  %v7137_v27 = vsel %vm472_vm0, %v12546_v1, 0.0 }
 0x5e2   : > { %v9346_v17 = vpop.f32.mrf.mxu0 }
 0x5e3   : > { %v7133_v20 = vsel %vm472_vm0, %v12534_v19, 0.0 }
 0x5e4   : > { %v7058_v26 = vpop.f32.mrf.mxu0  ;;  %v7134_v63 = vadd.f32 %v7133_v20, %v7132_v43 }
 0x5e5   : > { %v12537_v60 = vadd.f32 %v12413_v33, %v7058_v26  ;;  %v12551_v26 = vadd.f32 %v9346_v17, %v12413_v33 }
 0x5e7   : > { %v7135_v31 = vsel %vm472_vm0, %v12537_v60, 0.0  ;;  %v7139_v37 = vsel %vm472_vm0, %v12551_v26, 0.0 }
 0x5e8   : > { %v7136_v24 = vadd.f32 %v7135_v31, %v7134_v63 }
 0x5ea   : > { %v7138_v47 = vadd.f32 %v7137_v27, %v7136_v24 }
 0x5ec   : > { %v7140_v20 = vadd.f32 %v7139_v37, %v7138_v47 }
 0x612   : > { %v9349_v40 = vpop.f32.mrf.mxu0 }
 0x613   : > { %v12561_v31 = vadd.f32 %v9349_v40, %v12413_v33 }
 0x614   : > { %v7071_v57 = vpop.f32.mrf.mxu0 }
 0x615   : > { %v12554_v23 = vadd.f32 %v12413_v33, %v7071_v57  ;;  %v7145_v6 = vsel %vm472_vm0, %v12561_v31, 0.0 }
 0x616   : > { %v9350_v3 = vpop.f32.mrf.mxu0 }
 0x617   : > { %v7141_v36 = vsel %vm472_vm0, %v12554_v23, 0.0  ;;  %v12567_v24 = vadd.f32 %v9350_v3, %v12413_v33 }
 0x618   : > { %v7074_v43 = vpop.f32.mrf.mxu0  ;;  %v7142_v63 = vadd.f32 %v7141_v36, %v7140_v20 }
 0x619   : > { %v12564_v17 = vadd.f32 %v12413_v33, %v7074_v43  ;;  %v7147_v47 = vsel %vm472_vm0, %v12567_v24, 0.0 }
 0x61b   : > { %v7143_v57 = vsel %vm472_vm0, %v12564_v17, 0.0 }
 0x61c   : > { %v7144_v27 = vadd.f32 %v7143_v57, %v7142_v63 }
 0x61e   : > { %v7146_v58 = vadd.f32 %v7145_v6, %v7144_v27  ;;  %v7236_v6 = vld [vmem:[%s12785_s11] sm:$0x3] }
 0x620   : > { %v7148_v40 = vadd.f32 %v7147_v47, %v7146_v58  ;;  %v7161_v58 = vld [vmem:[%s12784_s10] sm:$0x1] }
 0x622   : > { %v7149_v37 = vrot.slane %v7148_v40, 4 }
 0x624   : > { %v7150_v11 = vadd.f32 %v7149_v37, %v7148_v40 }
 0x626   : > { %v7151_v43 = vrot.slane %v7150_v11, 2 }
 0x628   : > { %v7152_v14 = vadd.f32 %v7151_v43, %v7150_v11 }
 0x62a   : > { %v7153_v36 = vrot.slane %v7152_v14, 1 }
 0x62c   : > { %v7154_v20 = vadd.f32 %v7153_v36, %v7152_v14  ;;  %v7322_v36 = vlaneseq }
 0x62e   : > { %v7156_v33 = vmul.f32 0.00390625, %v7154_v20  ;;  %v7323_v20 = vshrl.u32 %v7322_v36, 7 }
 0x630   : > { %9360 = vmatmul.mubr.msk.f32.vlgmr.msra.gmra.mxu1 %vm472_vm0, %v7156_v33  ;;  %v7324_v33 = vsub.s32 0, %v7323_v20 }
 0x631   : > { %9364 = vmatprep.mubr.msk.f32.mxu1 %vm9629_vm7, %v12847_v45  ;;  %9363 = vmatpush3.msk.msra.mxu1 %vm7242_vm8, %v7236_v6  ;;  %v7237_v45 = vld [vmem:[%s12786_s12] sm:$0x1] }
 0x6f0   : > { %v7231_v3 = vpop.f32.mrf.mxu1 }
 0x6f1   : > { %v7232_v11 = vadd.f32 %v7231_v3, %v7161_v58 }
 0x6f2   : > { %v9361_v63 = vpop.f32.mrf.mxu1 }
 0x6f3   : > { %v7235_v14 = vmax.f32 %v7232_v11, 0.0 }
 0x6f5   : > { %9365 = vmatmul.mubr.msk.f32.vlgmr.msra.gmra.mxu1 %vm7238_vm9, %v7235_v14 }
 0x7b5   : > { %v7312_v57 = vpop.f32.mrf.mxu1 }
 0x7b6   : > { %v7313_v27 = vadd.f32 %v7312_v57, %v7237_v45 }
 0x7b7   : > { %v9366_v47 = vpop.f32.mrf.mxu1 }
 0x7b8   : > { %v8320_v40 = vmul.f32 -1.442695, %v7313_v27 }
 0x7ba   : > { %9555 = vpow2.f32 %v8320_v40 }
 0x7c7   : > { %v9556_v37 = vpop.eup %9555 }
 0x7c8   : > { %v7319_v43 = vadd.f32 1.0, %v9556_v37 }
 0x7ca   : > { %9557 = vrcp.f32 %v7319_v43 }
 0x7d7   : > { %v9558_v6 = vpop.eup %9557 }
 0x7d8   : > { %v7325_v58 = vrot.slane %v9558_v6, %v7324_v33 }
 0x7da   : > { %v7326_v3 = vmul.f32 %v7325_v58, %v12419_v53  ;;  %v7327_v11 = vmul.f32 %v7325_v58, %v12416_v54  ;;  %v7328_v63 = vmul.f32 %v7325_v58, %v12424_v34  ;;  %v7329_v14 = vmul.f32 %v7325_v58, %v12431_v13 }
 0x7db   : > { %v7330_v45 = vmul.f32 %v7325_v58, %v12436_v38  ;;  %v7331_v57 = vmul.f32 %v7325_v58, %v12439_v10  ;;  %v7332_v27 = vmul.f32 %v7325_v58, %v12446_v12  ;;  %v7333_v47 = vmul.f32 %v7325_v58, %v12451_v48 }
 0x7dc   : > { %v7334_v40 = vmul.f32 %v7325_v58, %v12456_v51  ;;  %v7335_v37 = vmul.f32 %v7325_v58, %v12459_v22  ;;  %v7336_v53 = vmul.f32 %v7325_v58, %v12466_v39  ;;  %v7337_v54 = vmul.f32 %v7325_v58, %v12471_v25 }
 0x7dd   : > { %v7338_v34 = vmul.f32 %v7325_v58, %v12476_v7  ;;  %v7339_v13 = vmul.f32 %v7325_v58, %v12479_v28  ;;  %v7340_v38 = vmul.f32 %v7325_v58, %v12486_v8  ;;  %v7341_v10 = vmul.f32 %v7325_v58, %v12491_v15 }
 0x7de   : > { %v7342_v12 = vmul.f32 %v7325_v58, %v12494_v16  ;;  %v7343_v48 = vmul.f32 %v7325_v58, %v12497_v52  ;;  %v7344_v51 = vmul.f32 %v7325_v58, %v12506_v62  ;;  %v7345_v22 = vmul.f32 %v7325_v58, %v12511_v30 }
 0x7df   : > { %v7346_v39 = vmul.f32 %v7325_v58, %v12514_v46  ;;  %v7347_v25 = vmul.f32 %v7325_v58, %v12517_v18  ;;  %v7348_v7 = vmul.f32 %v7325_v58, %v12526_v21  ;;  %v7349_v28 = vmul.f32 %v7325_v58, %v12531_v41 }
 0x7e0   : > { %v7350_v8 = vmul.f32 %v7325_v58, %v12534_v19  ;;  %v7351_v15 = vmul.f32 %v7325_v58, %v12537_v60  ;;  %v7352_v16 = vmul.f32 %v7325_v58, %v12546_v1  ;;  %v7353_v52 = vmul.f32 %v7325_v58, %v12551_v26 }
 0x7e1   : > { %v7354_v62 = vmul.f32 %v7325_v58, %v12554_v23  ;;  %v7355_v30 = vmul.f32 %v7325_v58, %v12564_v17  ;;  %v7356_v46 = vmul.f32 %v7325_v58, %v12561_v31  ;;  %v7358_v43 = vmul.f32 0.1, %v7326_v3 }
 0x7e2   : > { %v7359_v18 = vmul.f32 0.1, %v7327_v11  ;;  %v7360_v36 = vmul.f32 0.1, %v7328_v63  ;;  %v7357_v21 = vmul.f32 %v7325_v58, %v12567_v24  ;;  %v7361_v41 = vmul.f32 0.1, %v7329_v14 }
 0x7e3   : > { %v7362_v19 = vmul.f32 0.1, %v7330_v45  ;;  %v7363_v20 = vmul.f32 0.1, %v7331_v57  ;;  %v7364_v60 = vmul.f32 0.1, %v7332_v27  ;;  %v7390_v26 = vadd.f32 %v7358_v43, %v12146_v55 }
 0x7e4   : > { %v7365_v33 = vmul.f32 0.1, %v7333_v47  ;;  %v7366_v1 = vmul.f32 0.1, %v7334_v40  ;;  %v7367_v6 = vmul.f32 0.1, %v7335_v37  ;;  %v7391_v17 = vadd.f32 %v7359_v18, %v12138_v29 }
 0x7e5   : > { %v7368_v23 = vmul.f32 0.1, %v7336_v53  ;;  %v7369_v42 = vmul.f32 0.1, %v7337_v54  ;;  %v7370_v31 = vmul.f32 0.1, %v7338_v34  ;;  %v7392_v63 = vadd.f32 %v7360_v36, %v12174_v61 }
 0x7e6   : > { %v7371_v3 = vmul.f32 0.1, %v7339_v13  ;;  %v7372_v11 = vmul.f32 0.1, %v7340_v38  ;;  %7422 = vst.msk [vmem:[%s12628_s16] sm:$0xff] %vm472_vm0, %v7390_v26  ;;  %v7393_v14 = vadd.f32 %v7361_v41, %v12165_v32  ;;  %7423 = vst.msk [vmem:[%s12628_s16 + $0x8] sm:$0xff] %vm472_vm0, %v7391_v17  ;;  %v7394_v61 = vadd.f32 %v7362_v19, %v12180_v50 }
 0x7e7   : > { %v7373_v24 = vmul.f32 0.1, %v7341_v10  ;;  %v7374_v55 = vmul.f32 0.1, %v7342_v12  ;;  %v7375_v58 = vmul.f32 0.1, %v7343_v48  ;;  %v7395_v37 = vadd.f32 %v7363_v20, %v12171_v35 }
 0x7e8   : > { %v7376_v29 = vmul.f32 0.1, %v7344_v51  ;;  %v7377_v45 = vmul.f32 0.1, %v7345_v22  ;;  %v7378_v57 = vmul.f32 0.1, %v7346_v39  ;;  %v7396_v34 = vadd.f32 %v7364_v60, %v12203_v44 }
 0x7e9   : > { %7424 = vst.msk [vmem:[%s12628_s16 + $0x10] sm:$0xff] %vm472_vm0, %v7392_v63  ;;  %v7379_v27 = vmul.f32 0.1, %v7347_v25  ;;  %v7380_v47 = vmul.f32 0.1, %v7348_v7  ;;  %7425 = vst.msk [vmem:[%s12628_s16 + $0x18] sm:$0xff] %vm472_vm0, %v7393_v14  ;;  %v7397_v10 = vadd.f32 %v7365_v33, %v12196_v49  ;;  %v7398_v48 = vadd.f32 %v7366_v1, %v12207_v0 }
 0x7ea   : > { %v7381_v40 = vmul.f32 0.1, %v7349_v28  ;;  %v7382_v32 = vmul.f32 0.1, %v7350_v8  ;;  %v7383_v53 = vmul.f32 0.1, %v7351_v15  ;;  %v7399_v44 = vadd.f32 %v7367_v6, %v12200_v9 }
 0x7eb   : > { %v7384_v54 = vmul.f32 0.1, %v7352_v16  ;;  %7426 = vst.msk [vmem:[%s12628_s16 + $0x20] sm:$0xff] %vm472_vm0, %v7394_v61  ;;  %v7385_v50 = vmul.f32 0.1, %v7353_v52  ;;  %7427 = vst.msk [vmem:[%s12628_s16 + $0x28] sm:$0xff] %vm472_vm0, %v7395_v37  ;;  %v7400_v51 = vadd.f32 %v7368_v23, %v12224_v4  ;;  %v7401_v22 = vadd.f32 %v7369_v42, %v12218_v59 }
 0x7ec   : > { %v7386_v13 = vmul.f32 0.1, %v7354_v62  ;;  %v7387_v38 = vmul.f32 0.1, %v7355_v30  ;;  %v7388_v35 = vmul.f32 0.1, %v7356_v46  ;;  %v7402_v49 = vadd.f32 %v7370_v31, %v12228_v2 }
 0x7ed   : > { %v7389_v12 = vmul.f32 0.1, %v7357_v21  ;;  %7428 = vst.msk [vmem:[%s12628_s16 + $0x30] sm:$0xff] %vm472_vm0, %v7396_v34  ;;  %v7403_v39 = vadd.f32 %v7371_v3, %v12221_v56  ;;  %7429 = vst.msk [vmem:[%s12628_s16 + $0x38] sm:$0xff] %vm472_vm0, %v7397_v10  ;;  %v7404_v0 = vadd.f32 %v7372_v11, %v12242_v5  ;;  %v12880_v25 = vld [vmem:[#allocation26_spill] sm:$0xff]  ;;  %v12881_v7 = vld [vmem:[#allocation27_spill] sm:$0xff] }
 0x7ee   : > { %v7405_v9 = vadd.f32 %v7373_v24, %v12880_v25  ;;  %v7406_v28 = vadd.f32 %v7374_v55, %v12881_v7  ;;  %v12882_v8 = vld [vmem:[#allocation11_spill] sm:$0xff]  ;;  %7430 = vst.msk [vmem:[%s12628_s16 + $0x40] sm:$0xff] %vm472_vm0, %v7398_v48  ;;  %7431 = vst.msk [vmem:[%s12628_s16 + $0x48] sm:$0xff] %vm472_vm0, %v7399_v44  ;;  %v12883_v59 = vld [vmem:[#allocation12_spill] sm:$0xff] }
 0x7ef   : > { %v7407_v4 = vadd.f32 %v7375_v58, %v12882_v8  ;;  %v7408_v56 = vadd.f32 %v7376_v29, %v12883_v59  ;;  %v12884_v2 = vld [vmem:[#allocation13_spill] sm:$0xff]  ;;  %v12885_v5 = vld [vmem:[#allocation14_spill] sm:$0xff]  ;;  %v12886_v16 = vld [vmem:[#allocation15_spill] sm:$0xff]  ;;  %7432 = vst.msk [vmem:[%s12628_s16 + $0x50] sm:$0xff] %vm472_vm0, %v7400_v51 }
 0x7f0   : > { %v7409_v42 = vadd.f32 %v7377_v45, %v12884_v2  ;;  %v7410_v15 = vadd.f32 %v7378_v57, %v12885_v5  ;;  %v7411_v52 = vadd.f32 %v7379_v27, %v12886_v16  ;;  %7433 = vst.msk [vmem:[%s12628_s16 + $0x58] sm:$0xff] %vm472_vm0, %v7401_v22  ;;  %7434 = vst.msk [vmem:[%s12628_s16 + $0x60] sm:$0xff] %vm472_vm0, %v7402_v49  ;;  %v12887_v62 = vld [vmem:[#allocation16_spill] sm:$0xff]  ;;  %v12888_v46 = vld [vmem:[#allocation17_spill] sm:$0xff] }
 0x7f1   : > { %7435 = vst.msk [vmem:[%s12628_s16 + $0x68] sm:$0xff] %vm472_vm0, %v7403_v39  ;;  %v7412_v30 = vadd.f32 %v7380_v47, %v12887_v62  ;;  %v7413_v43 = vadd.f32 %v7381_v40, %v12888_v46  ;;  %v12889_v18 = vld [vmem:[#allocation18_spill] sm:$0xff]  ;;  %v12890_v21 = vld [vmem:[#allocation19_spill] sm:$0xff]  ;;  %7436 = vst.msk [vmem:[%s12628_s16 + $0x70] sm:$0xff] %vm472_vm0, %v7404_v0 }
 0x7f2   : > { %v7414_v36 = vadd.f32 %v7382_v32, %v12889_v18  ;;  %v7415_v41 = vadd.f32 %v7383_v53, %v12890_v21  ;;  %7437 = vst.msk [vmem:[%s12628_s16 + $0x78] sm:$0xff] %vm472_vm0, %v7405_v9  ;;  %7438 = vst.msk [vmem:[%s12628_s16 + $0x80] sm:$0xff] %vm472_vm0, %v7406_v28  ;;  %v12891_v19 = vld [vmem:[#allocation20_spill] sm:$0xff]  ;;  %v12892_v60 = vld [vmem:[#allocation21_spill] sm:$0xff] }
 0x7f3   : > { %7439 = vst.msk [vmem:[%s12628_s16 + $0x88] sm:$0xff] %vm472_vm0, %v7407_v4  ;;  %v7416_v20 = vadd.f32 %v7384_v54, %v12891_v19  ;;  %v7417_v33 = vadd.f32 %v7385_v50, %v12892_v60  ;;  %v12893_v1 = vld [vmem:[#allocation22_spill] sm:$0xff]  ;;  %v12894_v6 = vld [vmem:[#allocation23_spill] sm:$0xff]  ;;  %7440 = vst.msk [vmem:[%s12628_s16 + $0x90] sm:$0xff] %vm472_vm0, %v7408_v56 }
 0x7f4   : > { %v7418_v26 = vadd.f32 %v7386_v13, %v12893_v1  ;;  %v7419_v23 = vadd.f32 %v7387_v38, %v12894_v6  ;;  %7441 = vst.msk [vmem:[%s12628_s16 + $0x98] sm:$0xff] %vm472_vm0, %v7409_v42  ;;  %7442 = vst.msk [vmem:[%s12628_s16 + $0xa0] sm:$0xff] %vm472_vm0, %v7410_v15  ;;  %v12895_v17 = vld [vmem:[#allocation24_spill] sm:$0xff]  ;;  %v12896_v3 = vld [vmem:[#allocation25_spill] sm:$0xff] }
 0x7f5   : > { %7443 = vst.msk [vmem:[%s12628_s16 + $0xa8] sm:$0xff] %vm472_vm0, %v7411_v52  ;;  %v7420_v31 = vadd.f32 %v7388_v35, %v12895_v17  ;;  %v7421_v11 = vadd.f32 %v7389_v12, %v12896_v3  ;;  %7444 = vst.msk [vmem:[%s12628_s16 + $0xb0] sm:$0xff] %vm472_vm0, %v7412_v30 }
 0x7f6   : > { %7445 = vst.msk [vmem:[%s12628_s16 + $0xb8] sm:$0xff] %vm472_vm0, %v7413_v43  ;;  %7446 = vst.msk [vmem:[%s12628_s16 + $0xc0] sm:$0xff] %vm472_vm0, %v7414_v36 }
 0x7f7   : > { %7447 = vst.msk [vmem:[%s12628_s16 + $0xc8] sm:$0xff] %vm472_vm0, %v7415_v41  ;;  %7448 = vst.msk [vmem:[%s12628_s16 + $0xd0] sm:$0xff] %vm472_vm0, %v7416_v20 }
 0x7f8   : > { %7449 = vst.msk [vmem:[%s12628_s16 + $0xd8] sm:$0xff] %vm472_vm0, %v7417_v33  ;;  %7450 = vst.msk [vmem:[%s12628_s16 + $0xe0] sm:$0xff] %vm472_vm0, %v7418_v26 }
 0x7f9   : > { %7451 = vst.msk [vmem:[%s12628_s16 + $0xe8] sm:$0xff] %vm472_vm0, %v7419_v23  ;;  %7452 = vst.msk [vmem:[%s12628_s16 + $0xf0] sm:$0xff] %vm472_vm0, %v7420_v31 }
 0x7fa   : > { %7453 = vst.msk [vmem:[%s12628_s16 + $0xf8] sm:$0xff] %vm472_vm0, %v7421_v11 }
 0x7fb   : > { %9576 = shalt.err (!%p9573_p3)
}
 0x7fc   : > { %s9577_s24 = scalar_lea.hbm %s12706_s19, 4096  ;;  %s9581_s21 = scalar_lea.hbm %s12787_s13, 8192 }
 0x7fd   : > { %p9578_p4 = scmp.ne.s32.totalorder %s12706_s19, %s9577_s24  ;;  %p9582_p9 = scmp.lt.s32.totalorder %s12706_s19, %s12787_s13 }
 0x7fe   : > { %p9583_p10 = scmp.lt.s32.totalorder %s9581_s21, %s9577_s24 }
 0x7ff   : > { %p9579_p7 = pnand %p9578_p4, %p9741_p5 }
 0x800   : > { %p9584_p11 = por %p9583_p10, %p9582_p9 }
 0x801   : > { %p9580_p8 = pneg %p9579_p7 }
 0x803   : > { %p9585_p12 = pnand %p9584_p11, %p9580_p8 }
 0x805   : > { %9588 = shalt.err (!%p9585_p12)
}
 0x806   : > { %s9631_s27 = smov 128   ;;  %s9632_s14 = smov 8  }
 0x807   : > { %9371 = dma.vmem_to_hbm [thread:$0]  (%p9741_p5), %s12708_s23, 4096, %s12706_s19, %s12734_s20, %s9631_s27, %s9631_s27, %s9632_s14  }
 0x808 PF: > { %p9377_p13 = scmp.ge.s32.totalorder %s9623_s28, 2  ;;  %s7483_s22 = sand.u32 1, %s9611_s25  }
 0x809   : > { %s7484_s24 = scalar_lea.sflag [#allocation5], %s7483_s22 }
 0x80a   : > { %p9374_p0 = pnand %p9377_p13, %p9745_p6 }
 0x80c   : > { %p9375_p1 = pneg %p9374_p0 }
 0x80e   : > { %9606 = dma.done.wait (%p9375_p1), %s7484_s24, 4096  }
 0x80f   : > { %9608 = vsyncadd (%p9375_p1), %s7484_s24, 4294963200  ;;  %s12898_s28 = sld [smem:[#allocation8_spill]]  ;;  %s12901_s25 = smov %s9615_s26 }
 0x810   : > { %s12899_s15 = sld [smem:[#allocation7_spill]] }
 0x811   : > { %s12900_s27 = sld [smem:[#allocation9_spill]] }
 0x815   : > { %p23_p2 = scmp.ge.s32.totalorder %s12898_s28, 4  }
 0x816   : > { %s12902_s26 = smov %s12899_s15 }
 0x817   :  { %25 = sbr.rel (!%p23_p2) target bundleno = 3 (0x3), region = 110 }
 0x81c   :  { %7489 = vsyncpa [#allocation5], 1 }
 0x81d   :  { %7491 = vsyncpa [#allocation5 + $0x1], 1 }

</bundles_post_ra>
